<compile_context>
chip_gen: v5e
topology: v5e:2x2
jax: 0.10.0
libtpu: 0.0.40
codegen_flags: <defaults>
</compile_context>

<pallas_src>
import jax
import jax.numpy as jnp
import numpy as np
from jax.experimental import pallas as pl
from jax.experimental.pallas import tpu as pltpu

NEG_SLOPE = 0.01   # nn.LeakyReLU() default
BN_EPS = 1e-5      # nn.BatchNorm2d default


def _leaky(x):
    return jnp.where(x > 0, x, NEG_SLOPE * x)


def _shift_rows(v, s):
    """result[i, :] = v[i + s, :] along the flattened-row (sublane) axis.

    pltpu.roll has jnp.roll semantics, so shift = L - s gives a circular left
    shift by s.  Wrapped rows only ever land in border/garbage columns that are
    masked or cropped, so the circular wrap content is never used.
    """
    L = v.shape[0]
    s = s % L
    if s == 0:
        return v
    return pltpu.roll(v, shift=L - s, axis=0)


def mulrecep_kernel(xpad_ref, mask_ref, w1_ref, b1_ref, w3_ref, b3_ref,
                    w5_ref, b5_ref, wo_ref, bo_ref, out_ref, cat_ref):
    # xpad_ref : (1, H+4, Wp, C)  input, padded 2/2 along H and 2/(Wp-W-2) on W
    # mask_ref : (1, Wp, 1)       1.0 on valid cat columns [1, W], else 0.0
    # w1_ref   : (C, C)           1x1 conv (BN folded), bf16
    # w3_ref   : (3, 3, C, C)     3x3 conv, bf16, indexed [ky, kx]
    # w5_ref   : (5, 5, C, C)     5x5 conv, bf16
    # wo_ref   : (3, 3, 3C, C)    3x3 conv over the concat, bf16
    # b*_ref   : (1, C)           BN-folded biases, f32
    # out_ref  : (1, H, W, C)     f32
    # cat_ref  : VMEM scratch (H+2, Wp, 3C) bf16 — zero-bordered branch concat
    H, W, C = out_ref.shape[1], out_ref.shape[2], out_ref.shape[3]
    Wp = xpad_ref.shape[2]          # padded width, multiple of 8

    # Row-chunk size: keeps one f32 accumulator + one matmul partial + one bf16
    # input slab well under 64 live vregs.  Chunks are iterated with pl.loop so
    # live ranges are actually bounded (a static Python loop would not do that).
    hc = 4
    while H % hc:
        hc //= 2
    nchunks = H // hc
    R = hc * Wp                     # flattened rows of one chunk

    # convout's SAME zero padding along H: zero the cat border rows every grid
    # step (so nothing depends on scratch persistence if the batch grid is
    # split across TensorCores).  The column border is handled by mask_ref.
    zrow = jnp.zeros((1, Wp, 3 * C), cat_ref.dtype)
    cat_ref[0:1, :, :] = zrow
    cat_ref[H + 1:H + 2, :, :] = zrow

    def store_branch(r0, acc, bias_ref, c0):
        # bias + LeakyReLU in f32 (cheap on the VPU, incl. v5e), zero the
        # column border via the mask, store bf16 into this branch's channels.
        o = _leaky(acc + bias_ref[...]).reshape(hc, Wp, C) * mask_ref[...]
        cat_ref[pl.ds(r0 + 1, hc), :, c0:c0 + C] = o.astype(cat_ref.dtype)

    # ---------- Phase 1: branches 1/2/3, written eagerly into cat_ref --------
    @pl.loop(0, nchunks)
    def _phase1(ci):
        r0 = ci * hc

        def xrow(row_off):
            # Full-width row slab (hc, Wp, C): dim-0/dim-1 slices only (no
            # sublane-offset relayout); reshape is tile-aligned (Wp % 8 == 0).
            return xpad_ref[0, pl.ds(r0 + row_off, hc), :, :].reshape(R, C)

        # branch 1: 1x1 conv (input column offset +2 -> cat column offset +1).
        xr = xrow(2).astype(jnp.bfloat16)
        acc = _shift_rows(
            jnp.dot(xr, w1_ref[...], preferred_element_type=jnp.float32), 1)
        store_branch(r0, acc, b1_ref, 0)

        # branch 2: 3x3 conv.  One full-width matmul per tap; the f32 partial is
        # re-aligned with an XLU roll (shift = kx) and accumulated in registers.
        acc = jnp.zeros((R, C), jnp.float32)
        for ky in range(3):
            xr = xrow(1 + ky).astype(jnp.bfloat16)
            for kx in range(3):
                p = jnp.dot(xr, w3_ref[ky, kx],
                            preferred_element_type=jnp.float32)
                acc = acc + _shift_rows(p, kx)
        store_branch(r0, acc, b3_ref, C)

        # branch 3: 5x5 conv (shift = kx - 1).
        acc = jnp.zeros((R, C), jnp.float32)
        for ky in range(5):
            xr = xrow(ky).astype(jnp.bfloat16)
            for kx in range(5):
                p = jnp.dot(xr, w5_ref[ky, kx],
                            preferred_element_type=jnp.float32)
                acc = acc + _shift_rows(p, kx - 1)
        store_branch(r0, acc, b5_ref, 2 * C)

    # ---------- Phase 2: convout over the concat + residual ------------------
    @pl.loop(0, nchunks)
    def _phase2(ci):
        r0 = ci * hc
        acc = jnp.zeros((R, C), jnp.float32)
        for ky in range(3):
            cr = cat_ref[pl.ds(r0 + ky, hc), :, :].reshape(R, 3 * C)  # bf16
            for kx in range(3):
                p = jnp.dot(cr, wo_ref[ky, kx],
                            preferred_element_type=jnp.float32)
                acc = acc + _shift_rows(p, kx)
        h = _leaky(acc + bo_ref[...])
        # residual: x[h, w] = xpad[h+2, w+2]; re-read here instead of keeping it
        # live across the whole kernel.
        xres = xpad_ref[0, pl.ds(r0 + 2, hc), :, :].reshape(R, C)
        h = h + _shift_rows(xres, 2)
        out_ref[0, pl.ds(r0, hc), :, :] = (
            h.reshape(hc, Wp, C)[:, 0:W, :].astype(out_ref.dtype))


def mulrecep_forward(x, w1, b1, w3, b3, w5, b5, wo, bo):
    """x: (N, H, W, C) NHWC float32.  Weights HWIO f32 with BN already folded."""
    N, H, W, C = x.shape
    assert C % 128 == 0, "channel axis should fill the 128-lane vreg axis"
    assert w1.shape == (1, 1, C, C) and w3.shape == (3, 3, C, C)
    assert w5.shape == (5, 5, C, C) and wo.shape == (3, 3, 3 * C, C)

    # Pad H by 2/2 and W by 2/(enough to make the padded width a multiple of 8)
    # so every in-kernel (rows, Wp, C)->(rows*Wp, C) reshape is tile-aligned and
    # the 5x5 window never needs a sublane-offset slice.
    # TODO(synk): for non-toy image sizes fold this pad into the kernel (zero
    # halo rows in VMEM) instead of materializing a padded input copy in HBM.
    Wp = ((W + 4 + 7) // 8) * 8
    xpad = jnp.pad(x, ((0, 0), (2, 2), (2, Wp - W - 2), (0, 0)))

    # bf16 MXU operands (native MXU format on v5e/v6e/v7x); accumulation stays
    # f32 via preferred_element_type.  Taps are indexed [ky, kx] in-kernel.
    w1k = w1.reshape(C, C).astype(jnp.bfloat16)
    w3k = w3.astype(jnp.bfloat16)
    w5k = w5.astype(jnp.bfloat16)
    wok = wo.astype(jnp.bfloat16)
    b1r, b3r, b5r, bor = (b.reshape(1, C).astype(jnp.float32)
                          for b in (b1, b3, b5, bo))

    # 1.0 on the valid interior columns [1, W] of the cat buffer, 0.0 on the
    # border/garbage columns (realizes convout's SAME zero padding along W).
    colmask = np.zeros((1, Wp, 1), np.float32)
    colmask[0, 1:W + 1, 0] = 1.0
    colmask = jnp.asarray(colmask)

    grid_spec = pltpu.PrefetchScalarGridSpec(
        num_scalar_prefetch=0,
        grid=(N,),
        in_specs=[
            pl.BlockSpec((1, H + 4, Wp, C), lambda n: (n, 0, 0, 0)),
            pl.BlockSpec((1, Wp, 1), lambda n: (0, 0, 0)),
            # Grid-invariant weights/biases: constant index maps so they are
            # only fetched once.  (Single-buffering them via pl.Buffered(1)
            # would save ~2 MiB VMEM if headroom ever becomes tight.)
            pl.BlockSpec((C, C), lambda n: (0, 0)),
            pl.BlockSpec((1, C), lambda n: (0, 0)),
            pl.BlockSpec((3, 3, C, C), lambda n: (0, 0, 0, 0)),
            pl.BlockSpec((1, C), lambda n: (0, 0)),
            pl.BlockSpec((5, 5, C, C), lambda n: (0, 0, 0, 0)),
            pl.BlockSpec((1, C), lambda n: (0, 0)),
            pl.BlockSpec((3, 3, 3 * C, C), lambda n: (0, 0, 0, 0)),
            pl.BlockSpec((1, C), lambda n: (0, 0)),
        ],
        out_specs=pl.BlockSpec((1, H, W, C), lambda n: (n, 0, 0, 0)),
        scratch_shapes=[pltpu.VMEM((H + 2, Wp, 3 * C), jnp.bfloat16)],
    )

    flops = 2 * N * H * W * C * (62 * C)          # 1x1 + 3x3 + 5x5 + 3x3(3C)
    bytes_accessed = int(
        xpad.size * 4 + N * H * W * C * 4
        + (w1k.size + w3k.size + w5k.size + wok.size) * 2 + 4 * C * 4)

    # TODO(synk): for large H*W on v7x (64 MiB VMEM, 2 TensorCores) add an
    # H-strip grid axis with a 2-row input halo (BoundedSlice or manual DMA)
    # so blocks and the cat scratch stay within the scoped VMEM limit and both
    # cores get work at small N; whole-image blocks are fine at this size.
    return pl.pallas_call(
        mulrecep_kernel,
        out_shape=jax.ShapeDtypeStruct((N, H, W, C), jnp.float32),
        grid_spec=grid_spec,
        compiler_params=pltpu.CompilerParams(
            dimension_semantics=("parallel",),
            vmem_limit_bytes=16 * 1024 * 1024),
        cost_estimate=pl.CostEstimate(flops=flops, transcendentals=0,
                                      bytes_accessed=bytes_accessed),
    )(xpad, colmask, w1k, b1r, w3k, b3r, w5k, b5r, wok, bor)


def fold_bn(w, gamma, beta, mean, var, eps=BN_EPS):
    """Fold inference-mode BatchNorm into a bias-free conv: returns (w', b')."""
    scale = gamma / jnp.sqrt(var + eps)                 # (Cout,)
    return w * scale, beta - mean * scale


def conv_bn_lrelu_ref(a, w, gamma, beta, mean, var):
    dn = ('NHWC', 'HWIO', 'NHWC')
    y = jax.lax.conv_general_dilated(a, w, (1, 1), 'SAME',
                                     dimension_numbers=dn,
                                     precision=jax.lax.Precision.HIGHEST)
    y = (y - mean) * (gamma / jnp.sqrt(var + BN_EPS)) + beta
    return _leaky(y)


def ref_forward(x, p1, p3, p5, po):
    o1 = conv_bn_lrelu_ref(x, *p1)
    o2 = conv_bn_lrelu_ref(x, *p3)
    o3 = conv_bn_lrelu_ref(x, *p5)
    out = conv_bn_lrelu_ref(jnp.concatenate([o1, o2, o3], axis=-1), *po)
    return out + x


if __name__ == "__main__":
    # Small shapes consistent with the module (MulRecep default in_channels=128,
    # which keeps the channel/lane axis fully dense): batch=2, 16x16 spatial.
    N, H, W, C = 2, 16, 16, 128

    key = jax.random.PRNGKey(0)
    kx, *pkeys = jax.random.split(key, 5)
    x = jax.random.normal(kx, (N, H, W, C), dtype=jnp.float32)

    def make_conv_bn(k, kh, kw, cin, cout):
        kw_, kg, kb, km, kv = jax.random.split(k, 5)
        w = 0.05 * jax.random.normal(kw_, (kh, kw, cin, cout), dtype=jnp.float32)
        gamma = 1.0 + 0.1 * jax.random.normal(kg, (cout,), dtype=jnp.float32)
        beta = 0.1 * jax.random.normal(kb, (cout,), dtype=jnp.float32)
        mean = 0.1 * jax.random.normal(km, (cout,), dtype=jnp.float32)
        var = 0.5 + jnp.abs(jax.random.normal(kv, (cout,), dtype=jnp.float32))
        return (w, gamma, beta, mean, var)

    p1 = make_conv_bn(pkeys[0], 1, 1, C, C)
    p3 = make_conv_bn(pkeys[1], 3, 3, C, C)
    p5 = make_conv_bn(pkeys[2], 5, 5, C, C)
    po = make_conv_bn(pkeys[3], 3, 3, 3 * C, C)

    # TODO(synk): BatchNorm is applied in inference mode (running stats folded
    # into the convs); training-mode batch statistics are not computed in-kernel.
    w1, b1 = fold_bn(*p1)
    w3, b3 = fold_bn(*p3)
    w5, b5 = fold_bn(*p5)
    wo, bo = fold_bn(*po)

    out = mulrecep_forward(x, w1, b1, w3, b3, w5, b5, wo, bo)
    out = jax.block_until_ready(out)

    expected = ref_forward(x, p1, p3, p5, po)
    # Slightly more absolute headroom than the f32 version: the MXU operands
    # (and the cat scratch) are bf16 with f32 accumulation.
    np.testing.assert_allclose(np.asarray(out), np.asarray(expected),
                               rtol=2e-2, atol=6e-2)

    print("KERNEL_OK")
</pallas_src>

<mosaic_0001>
module attributes {stable_mosaic.version = 11 : i64} {
  func.func @mulrecep_kernel(%arg0: i32, %arg1: memref<1x20x24x128xf32, #tpu.memory_space<vmem>>, %arg2: memref<1x24x1xf32, #tpu.memory_space<vmem>>, %arg3: memref<128x128xbf16, #tpu.memory_space<vmem>>, %arg4: memref<1x128xf32, #tpu.memory_space<vmem>>, %arg5: memref<3x3x128x128xbf16, #tpu.memory_space<vmem>>, %arg6: memref<1x128xf32, #tpu.memory_space<vmem>>, %arg7: memref<5x5x128x128xbf16, #tpu.memory_space<vmem>>, %arg8: memref<1x128xf32, #tpu.memory_space<vmem>>, %arg9: memref<3x3x384x128xbf16, #tpu.memory_space<vmem>>, %arg10: memref<1x128xf32, #tpu.memory_space<vmem>>, %arg11: memref<1x16x16x128xf32, #tpu.memory_space<vmem>>, %arg12: memref<18x24x384xbf16, #tpu.memory_space<vmem>>) attributes {dimension_semantics = [#tpu.dimension_semantics<parallel>], iteration_bounds = array<i64: 2>, scalar_prefetch = 0 : i64, scratch_operands = 1 : i64, tpu.core_type = #tpu.core_type<tc>, window_params = [{transform_indices = @transform_0, window_bounds = array<i64: 1, 20, 24, 128>}, {pipeline_mode = #tpu.pipeline_mode<synchronous>, transform_indices = @transform_1, window_bounds = array<i64: 1, 24, 1>}, {pipeline_mode = #tpu.pipeline_mode<synchronous>, transform_indices = @transform_2, window_bounds = array<i64: 128, 128>}, {pipeline_mode = #tpu.pipeline_mode<synchronous>, transform_indices = @transform_3, window_bounds = array<i64: 1, 128>}, {pipeline_mode = #tpu.pipeline_mode<synchronous>, transform_indices = @transform_4, window_bounds = array<i64: 3, 3, 128, 128>}, {pipeline_mode = #tpu.pipeline_mode<synchronous>, transform_indices = @transform_5, window_bounds = array<i64: 1, 128>}, {pipeline_mode = #tpu.pipeline_mode<synchronous>, transform_indices = @transform_6, window_bounds = array<i64: 5, 5, 128, 128>}, {pipeline_mode = #tpu.pipeline_mode<synchronous>, transform_indices = @transform_7, window_bounds = array<i64: 1, 128>}, {pipeline_mode = #tpu.pipeline_mode<synchronous>, transform_indices = @transform_8, window_bounds = array<i64: 3, 3, 384, 128>}, {pipeline_mode = #tpu.pipeline_mode<synchronous>, transform_indices = @transform_9, window_bounds = array<i64: 1, 128>}, {transform_indices = @transform_10, window_bounds = array<i64: 1, 16, 16, 128>}]} {
    %cst = arith.constant 0.000000e+00 : bf16
    %0 = vector.broadcast %cst : bf16 to vector<1x24x384xbf16>
    %c0 = arith.constant 0 : index
    %c0_0 = arith.constant 0 : index
    %c0_1 = arith.constant 0 : index
    %1 = vector.load %arg12[%c0, %c0_0, %c0_1] : memref<18x24x384xbf16, #tpu.memory_space<vmem>>, vector<1x24x384xbf16>
    tpu.vector_store %arg12[%c0, %c0_0, %c0_1], %0 {strides = array<i32>} : memref<18x24x384xbf16, #tpu.memory_space<vmem>>, vector<1x24x384xbf16>,
    %c17 = arith.constant 17 : index
    %c0_2 = arith.constant 0 : index
    %c0_3 = arith.constant 0 : index
    %2 = vector.load %arg12[%c17, %c0_2, %c0_3] : memref<18x24x384xbf16, #tpu.memory_space<vmem>>, vector<1x24x384xbf16>
    tpu.vector_store %arg12[%c17, %c0_2, %c0_3], %0 {strides = array<i32>} : memref<18x24x384xbf16, #tpu.memory_space<vmem>>, vector<1x24x384xbf16>,
    %c0_i32 = arith.constant 0 : i32
    %c4_i32 = arith.constant 4 : i32
    %3 = arith.addi %c0_i32, %c4_i32 : i32
    %c1_i32 = arith.constant 1 : i32
    scf.for %arg13 = %c0_i32 to %3 step %c1_i32  : i32 {
      %c1_i32_9 = arith.constant 1 : i32
      %5 = arith.muli %arg13, %c1_i32_9 : i32
      %c0_i32_10 = arith.constant 0 : i32
      %6 = arith.addi %c0_i32_10, %5 : i32
      %c4_i32_11 = arith.constant 4 : i32
      %7 = arith.muli %6, %c4_i32_11 : i32
      %c2_i32 = arith.constant 2 : i32
      %8 = arith.addi %7, %c2_i32 : i32
      %c0_12 = arith.constant 0 : index
      %9 = arith.index_cast %8 : i32 to index
      %c0_13 = arith.constant 0 : index
      %c0_14 = arith.constant 0 : index
      %10 = vector.load %arg1[%c0_12, %9, %c0_13, %c0_14] : memref<1x20x24x128xf32, #tpu.memory_space<vmem>>, vector<1x4x24x128xf32>
      %11 = vector.shape_cast %10 : vector<1x4x24x128xf32> to vector<4x24x128xf32>
      %12 = vector.shape_cast %11 : vector<4x24x128xf32> to vector<96x128xf32>
      %13 = arith.truncf %12 : vector<96x128xf32> to vector<96x128xbf16>
      %c0_15 = arith.constant 0 : index
      %c0_16 = arith.constant 0 : index
      %14 = vector.load %arg3[%c0_15, %c0_16] : memref<128x128xbf16, #tpu.memory_space<vmem>>, vector<128x128xbf16>
      %cst_17 = arith.constant dense<0.000000e+00> : vector<96x128xf32>
      %15 = tpu.matmul %13, %14, %cst_17 {dimension_numbers = #tpu.dot_dimension_numbers<[1], [0], [0], [1], [0, 0, 1, 1], [], []>} : vector<96x128xbf16>, vector<128x128xbf16>, vector<96x128xf32> -> vector<96x128xf32>
      %c95_i32 = arith.constant 95 : i32
      %16 = tpu.dynamic_rotate %15 by %c95_i32 dim 0 : vector<96x128xf32>, i32 -> vector<96x128xf32>
      %c0_18 = arith.constant 0 : index
      %c0_19 = arith.constant 0 : index
      %17 = vector.load %arg4[%c0_18, %c0_19] : memref<1x128xf32, #tpu.memory_space<vmem>>, vector<1x128xf32>
      %18 = vector.broadcast %17 : vector<1x128xf32> to vector<96x128xf32>
      %19 = arith.addf %16, %18 : vector<96x128xf32>
      %cst_20 = arith.constant 0.000000e+00 : f32
      %20 = vector.broadcast %cst_20 : f32 to vector<96x128xf32>
      %21 = arith.cmpf ogt, %19, %20 : vector<96x128xf32>
      %cst_21 = arith.constant 0.00999999977 : f32
      %22 = vector.broadcast %cst_21 : f32 to vector<96x128xf32>
      %23 = arith.mulf %22, %19 : vector<96x128xf32>
      %24 = arith.select %21, %19, %23 : vector<96x128xi1>, vector<96x128xf32>
      %25 = vector.shape_cast %24 : vector<96x128xf32> to vector<4x24x128xf32>
      %c0_22 = arith.constant 0 : index
      %c0_23 = arith.constant 0 : index
      %c0_24 = arith.constant 0 : index
      %26 = vector.load %arg2[%c0_22, %c0_23, %c0_24] : memref<1x24x1xf32, #tpu.memory_space<vmem>>, vector<1x24x1xf32>
      %27 = vector.broadcast %26 : vector<1x24x1xf32> to vector<4x24x128xf32>
      %28 = arith.mulf %25, %27 : vector<4x24x128xf32>
      %29 = arith.truncf %28 : vector<4x24x128xf32> to vector<4x24x128xbf16>
      %c1_i32_25 = arith.constant 1 : i32
      %30 = arith.addi %7, %c1_i32_25 : i32
      %31 = arith.index_cast %30 : i32 to index
      %c0_26 = arith.constant 0 : index
      %c0_27 = arith.constant 0 : index
      %32 = vector.load %arg12[%31, %c0_26, %c0_27] : memref<18x24x384xbf16, #tpu.memory_space<vmem>>, vector<4x24x128xbf16>
      tpu.vector_store %arg12[%31, %c0_26, %c0_27], %29 {strides = array<i32>} : memref<18x24x384xbf16, #tpu.memory_space<vmem>>, vector<4x24x128xbf16>,
      %cst_28 = arith.constant 0.000000e+00 : f32
      %33 = vector.broadcast %cst_28 : f32 to vector<96x128xf32>
      %c1_i32_29 = arith.constant 1 : i32
      %34 = arith.addi %7, %c1_i32_29 : i32
      %c0_30 = arith.constant 0 : index
      %35 = arith.index_cast %34 : i32 to index
      %c0_31 = arith.constant 0 : index
      %c0_32 = arith.constant 0 : index
      %36 = vector.load %arg1[%c0_30, %35, %c0_31, %c0_32] : memref<1x20x24x128xf32, #tpu.memory_space<vmem>>, vector<1x4x24x128xf32>
      %37 = vector.shape_cast %36 : vector<1x4x24x128xf32> to vector<4x24x128xf32>
      %38 = vector.shape_cast %37 : vector<4x24x128xf32> to vector<96x128xf32>
      %39 = arith.truncf %38 : vector<96x128xf32> to vector<96x128xbf16>
      %c0_33 = arith.constant 0 : index
      %c0_34 = arith.constant 0 : index
      %c0_35 = arith.constant 0 : index
      %c0_36 = arith.constant 0 : index
      %40 = vector.load %arg5[%c0_33, %c0_34, %c0_35, %c0_36] : memref<3x3x128x128xbf16, #tpu.memory_space<vmem>>, vector<1x1x128x128xbf16>
      %41 = vector.shape_cast %40 : vector<1x1x128x128xbf16> to vector<128x128xbf16>
      %cst_37 = arith.constant dense<0.000000e+00> : vector<96x128xf32>
      %42 = tpu.matmul %39, %41, %cst_37 {dimension_numbers = #tpu.dot_dimension_numbers<[1], [0], [0], [1], [0, 0, 1, 1], [], []>} : vector<96x128xbf16>, vector<128x128xbf16>, vector<96x128xf32> -> vector<96x128xf32>
      %43 = arith.addf %33, %42 : vector<96x128xf32>
      %c0_38 = arith.constant 0 : index
      %c1 = arith.constant 1 : index
      %c0_39 = arith.constant 0 : index
      %c0_40 = arith.constant 0 : index
      %44 = vector.load %arg5[%c0_38, %c1, %c0_39, %c0_40] : memref<3x3x128x128xbf16, #tpu.memory_space<vmem>>, vector<1x1x128x128xbf16>
      %45 = vector.shape_cast %44 : vector<1x1x128x128xbf16> to vector<128x128xbf16>
      %cst_41 = arith.constant dense<0.000000e+00> : vector<96x128xf32>
      %46 = tpu.matmul %39, %45, %cst_41 {dimension_numbers = #tpu.dot_dimension_numbers<[1], [0], [0], [1], [0, 0, 1, 1], [], []>} : vector<96x128xbf16>, vector<128x128xbf16>, vector<96x128xf32> -> vector<96x128xf32>
      %c95_i32_42 = arith.constant 95 : i32
      %47 = tpu.dynamic_rotate %46 by %c95_i32_42 dim 0 : vector<96x128xf32>, i32 -> vector<96x128xf32>
      %48 = arith.addf %43, %47 : vector<96x128xf32>
      %c0_43 = arith.constant 0 : index
      %c2 = arith.constant 2 : index
      %c0_44 = arith.constant 0 : index
      %c0_45 = arith.constant 0 : index
      %49 = vector.load %arg5[%c0_43, %c2, %c0_44, %c0_45] : memref<3x3x128x128xbf16, #tpu.memory_space<vmem>>, vector<1x1x128x128xbf16>
      %50 = vector.shape_cast %49 : vector<1x1x128x128xbf16> to vector<128x128xbf16>
      %cst_46 = arith.constant dense<0.000000e+00> : vector<96x128xf32>
      %51 = tpu.matmul %39, %50, %cst_46 {dimension_numbers = #tpu.dot_dimension_numbers<[1], [0], [0], [1], [0, 0, 1, 1], [], []>} : vector<96x128xbf16>, vector<128x128xbf16>, vector<96x128xf32> -> vector<96x128xf32>
      %c94_i32 = arith.constant 94 : i32
      %52 = tpu.dynamic_rotate %51 by %c94_i32 dim 0 : vector<96x128xf32>, i32 -> vector<96x128xf32>
      %53 = arith.addf %48, %52 : vector<96x128xf32>
      %c2_i32_47 = arith.constant 2 : i32
      %54 = arith.addi %7, %c2_i32_47 : i32
      %c0_48 = arith.constant 0 : index
      %55 = arith.index_cast %54 : i32 to index
      %c0_49 = arith.constant 0 : index
      %c0_50 = arith.constant 0 : index
      %56 = vector.load %arg1[%c0_48, %55, %c0_49, %c0_50] : memref<1x20x24x128xf32, #tpu.memory_space<vmem>>, vector<1x4x24x128xf32>
      %57 = vector.shape_cast %56 : vector<1x4x24x128xf32> to vector<4x24x128xf32>
      %58 = vector.shape_cast %57 : vector<4x24x128xf32> to vector<96x128xf32>
      %59 = arith.truncf %58 : vector<96x128xf32> to vector<96x128xbf16>
      %c1_51 = arith.constant 1 : index
      %c0_52 = arith.constant 0 : index
      %c0_53 = arith.constant 0 : index
      %c0_54 = arith.constant 0 : index
      %60 = vector.load %arg5[%c1_51, %c0_52, %c0_53, %c0_54] : memref<3x3x128x128xbf16, #tpu.memory_space<vmem>>, vector<1x1x128x128xbf16>
      %61 = vector.shape_cast %60 : vector<1x1x128x128xbf16> to vector<128x128xbf16>
      %cst_55 = arith.constant dense<0.000000e+00> : vector<96x128xf32>
      %62 = tpu.matmul %59, %61, %cst_55 {dimension_numbers = #tpu.dot_dimension_numbers<[1], [0], [0], [1], [0, 0, 1, 1], [], []>} : vector<96x128xbf16>, vector<128x128xbf16>, vector<96x128xf32> -> vector<96x128xf32>
      %63 = arith.addf %53, %62 : vector<96x128xf32>
      %c1_56 = arith.constant 1 : index
      %c1_57 = arith.constant 1 : index
      %c0_58 = arith.constant 0 : index
      %c0_59 = arith.constant 0 : index
      %64 = vector.load %arg5[%c1_56, %c1_57, %c0_58, %c0_59] : memref<3x3x128x128xbf16, #tpu.memory_space<vmem>>, vector<1x1x128x128xbf16>
      %65 = vector.shape_cast %64 : vector<1x1x128x128xbf16> to vector<128x128xbf16>
      %cst_60 = arith.constant dense<0.000000e+00> : vector<96x128xf32>
      %66 = tpu.matmul %59, %65, %cst_60 {dimension_numbers = #tpu.dot_dimension_numbers<[1], [0], [0], [1], [0, 0, 1, 1], [], []>} : vector<96x128xbf16>, vector<128x128xbf16>, vector<96x128xf32> -> vector<96x128xf32>
      %c95_i32_61 = arith.constant 95 : i32
      %67 = tpu.dynamic_rotate %66 by %c95_i32_61 dim 0 : vector<96x128xf32>, i32 -> vector<96x128xf32>
      %68 = arith.addf %63, %67 : vector<96x128xf32>
      %c1_62 = arith.constant 1 : index
      %c2_63 = arith.constant 2 : index
      %c0_64 = arith.constant 0 : index
      %c0_65 = arith.constant 0 : index
      %69 = vector.load %arg5[%c1_62, %c2_63, %c0_64, %c0_65] : memref<3x3x128x128xbf16, #tpu.memory_space<vmem>>, vector<1x1x128x128xbf16>
      %70 = vector.shape_cast %69 : vector<1x1x128x128xbf16> to vector<128x128xbf16>
      %cst_66 = arith.constant dense<0.000000e+00> : vector<96x128xf32>
      %71 = tpu.matmul %59, %70, %cst_66 {dimension_numbers = #tpu.dot_dimension_numbers<[1], [0], [0], [1], [0, 0, 1, 1], [], []>} : vector<96x128xbf16>, vector<128x128xbf16>, vector<96x128xf32> -> vector<96x128xf32>
      %c94_i32_67 = arith.constant 94 : i32
      %72 = tpu.dynamic_rotate %71 by %c94_i32_67 dim 0 : vector<96x128xf32>, i32 -> vector<96x128xf32>
      %73 = arith.addf %68, %72 : vector<96x128xf32>
      %c3_i32 = arith.constant 3 : i32
      %74 = arith.addi %7, %c3_i32 : i32
      %c0_68 = arith.constant 0 : index
      %75 = arith.index_cast %74 : i32 to index
      %c0_69 = arith.constant 0 : index
      %c0_70 = arith.constant 0 : index
      %76 = vector.load %arg1[%c0_68, %75, %c0_69, %c0_70] : memref<1x20x24x128xf32, #tpu.memory_space<vmem>>, vector<1x4x24x128xf32>
      %77 = vector.shape_cast %76 : vector<1x4x24x128xf32> to vector<4x24x128xf32>
      %78 = vector.shape_cast %77 : vector<4x24x128xf32> to vector<96x128xf32>
      %79 = arith.truncf %78 : vector<96x128xf32> to vector<96x128xbf16>
      %c2_71 = arith.constant 2 : index
      %c0_72 = arith.constant 0 : index
      %c0_73 = arith.constant 0 : index
      %c0_74 = arith.constant 0 : index
      %80 = vector.load %arg5[%c2_71, %c0_72, %c0_73, %c0_74] : memref<3x3x128x128xbf16, #tpu.memory_space<vmem>>, vector<1x1x128x128xbf16>
      %81 = vector.shape_cast %80 : vector<1x1x128x128xbf16> to vector<128x128xbf16>
      %cst_75 = arith.constant dense<0.000000e+00> : vector<96x128xf32>
      %82 = tpu.matmul %79, %81, %cst_75 {dimension_numbers = #tpu.dot_dimension_numbers<[1], [0], [0], [1], [0, 0, 1, 1], [], []>} : vector<96x128xbf16>, vector<128x128xbf16>, vector<96x128xf32> -> vector<96x128xf32>
      %83 = arith.addf %73, %82 : vector<96x128xf32>
      %c2_76 = arith.constant 2 : index
      %c1_77 = arith.constant 1 : index
      %c0_78 = arith.constant 0 : index
      %c0_79 = arith.constant 0 : index
      %84 = vector.load %arg5[%c2_76, %c1_77, %c0_78, %c0_79] : memref<3x3x128x128xbf16, #tpu.memory_space<vmem>>, vector<1x1x128x128xbf16>
      %85 = vector.shape_cast %84 : vector<1x1x128x128xbf16> to vector<128x128xbf16>
      %cst_80 = arith.constant dense<0.000000e+00> : vector<96x128xf32>
      %86 = tpu.matmul %79, %85, %cst_80 {dimension_numbers = #tpu.dot_dimension_numbers<[1], [0], [0], [1], [0, 0, 1, 1], [], []>} : vector<96x128xbf16>, vector<128x128xbf16>, vector<96x128xf32> -> vector<96x128xf32>
      %c95_i32_81 = arith.constant 95 : i32
      %87 = tpu.dynamic_rotate %86 by %c95_i32_81 dim 0 : vector<96x128xf32>, i32 -> vector<96x128xf32>
      %88 = arith.addf %83, %87 : vector<96x128xf32>
      %c2_82 = arith.constant 2 : index
      %c2_83 = arith.constant 2 : index
      %c0_84 = arith.constant 0 : index
      %c0_85 = arith.constant 0 : index
      %89 = vector.load %arg5[%c2_82, %c2_83, %c0_84, %c0_85] : memref<3x3x128x128xbf16, #tpu.memory_space<vmem>>, vector<1x1x128x128xbf16>
      %90 = vector.shape_cast %89 : vector<1x1x128x128xbf16> to vector<128x128xbf16>
      %cst_86 = arith.constant dense<0.000000e+00> : vector<96x128xf32>
      %91 = tpu.matmul %79, %90, %cst_86 {dimension_numbers = #tpu.dot_dimension_numbers<[1], [0], [0], [1], [0, 0, 1, 1], [], []>} : vector<96x128xbf16>, vector<128x128xbf16>, vector<96x128xf32> -> vector<96x128xf32>
      %c94_i32_87 = arith.constant 94 : i32
      %92 = tpu.dynamic_rotate %91 by %c94_i32_87 dim 0 : vector<96x128xf32>, i32 -> vector<96x128xf32>
      %93 = arith.addf %88, %92 : vector<96x128xf32>
      %c0_88 = arith.constant 0 : index
      %c0_89 = arith.constant 0 : index
      %94 = vector.load %arg6[%c0_88, %c0_89] : memref<1x128xf32, #tpu.memory_space<vmem>>, vector<1x128xf32>
      %95 = vector.broadcast %94 : vector<1x128xf32> to vector<96x128xf32>
      %96 = arith.addf %93, %95 : vector<96x128xf32>
      %cst_90 = arith.constant 0.000000e+00 : f32
      %97 = vector.broadcast %cst_90 : f32 to vector<96x128xf32>
      %98 = arith.cmpf ogt, %96, %97 : vector<96x128xf32>
      %cst_91 = arith.constant 0.00999999977 : f32
      %99 = vector.broadcast %cst_91 : f32 to vector<96x128xf32>
      %100 = arith.mulf %99, %96 : vector<96x128xf32>
      %101 = arith.select %98, %96, %100 : vector<96x128xi1>, vector<96x128xf32>
      %102 = vector.shape_cast %101 : vector<96x128xf32> to vector<4x24x128xf32>
      %c0_92 = arith.constant 0 : index
      %c0_93 = arith.constant 0 : index
      %c0_94 = arith.constant 0 : index
      %103 = vector.load %arg2[%c0_92, %c0_93, %c0_94] : memref<1x24x1xf32, #tpu.memory_space<vmem>>, vector<1x24x1xf32>
      %104 = vector.broadcast %103 : vector<1x24x1xf32> to vector<4x24x128xf32>
      %105 = arith.mulf %102, %104 : vector<4x24x128xf32>
      %106 = arith.truncf %105 : vector<4x24x128xf32> to vector<4x24x128xbf16>
      %c1_i32_95 = arith.constant 1 : i32
      %107 = arith.addi %7, %c1_i32_95 : i32
      %108 = arith.index_cast %107 : i32 to index
      %c0_96 = arith.constant 0 : index
      %c128 = arith.constant 128 : index
      %109 = vector.load %arg12[%108, %c0_96, %c128] : memref<18x24x384xbf16, #tpu.memory_space<vmem>>, vector<4x24x128xbf16>
      tpu.vector_store %arg12[%108, %c0_96, %c128], %106 {strides = array<i32>} : memref<18x24x384xbf16, #tpu.memory_space<vmem>>, vector<4x24x128xbf16>,
      %cst_97 = arith.constant 0.000000e+00 : f32
      %110 = vector.broadcast %cst_97 : f32 to vector<96x128xf32>
      %c0_i32_98 = arith.constant 0 : i32
      %111 = arith.addi %7, %c0_i32_98 : i32
      %c0_99 = arith.constant 0 : index
      %112 = arith.index_cast %111 : i32 to index
      %c0_100 = arith.constant 0 : index
      %c0_101 = arith.constant 0 : index
      %113 = vector.load %arg1[%c0_99, %112, %c0_100, %c0_101] : memref<1x20x24x128xf32, #tpu.memory_space<vmem>>, vector<1x4x24x128xf32>
      %114 = vector.shape_cast %113 : vector<1x4x24x128xf32> to vector<4x24x128xf32>
      %115 = vector.shape_cast %114 : vector<4x24x128xf32> to vector<96x128xf32>
      %116 = arith.truncf %115 : vector<96x128xf32> to vector<96x128xbf16>
      %c0_102 = arith.constant 0 : index
      %c0_103 = arith.constant 0 : index
      %c0_104 = arith.constant 0 : index
      %c0_105 = arith.constant 0 : index
      %117 = vector.load %arg7[%c0_102, %c0_103, %c0_104, %c0_105] : memref<5x5x128x128xbf16, #tpu.memory_space<vmem>>, vector<1x1x128x128xbf16>
      %118 = vector.shape_cast %117 : vector<1x1x128x128xbf16> to vector<128x128xbf16>
      %cst_106 = arith.constant dense<0.000000e+00> : vector<96x128xf32>
      %119 = tpu.matmul %116, %118, %cst_106 {dimension_numbers = #tpu.dot_dimension_numbers<[1], [0], [0], [1], [0, 0, 1, 1], [], []>} : vector<96x128xbf16>, vector<128x128xbf16>, vector<96x128xf32> -> vector<96x128xf32>
      %c1_i32_107 = arith.constant 1 : i32
      %120 = tpu.dynamic_rotate %119 by %c1_i32_107 dim 0 : vector<96x128xf32>, i32 -> vector<96x128xf32>
      %121 = arith.addf %110, %120 : vector<96x128xf32>
      %c0_108 = arith.constant 0 : index
      %c1_109 = arith.constant 1 : index
      %c0_110 = arith.constant 0 : index
      %c0_111 = arith.constant 0 : index
      %122 = vector.load %arg7[%c0_108, %c1_109, %c0_110, %c0_111] : memref<5x5x128x128xbf16, #tpu.memory_space<vmem>>, vector<1x1x128x128xbf16>
      %123 = vector.shape_cast %122 : vector<1x1x128x128xbf16> to vector<128x128xbf16>
      %cst_112 = arith.constant dense<0.000000e+00> : vector<96x128xf32>
      %124 = tpu.matmul %116, %123, %cst_112 {dimension_numbers = #tpu.dot_dimension_numbers<[1], [0], [0], [1], [0, 0, 1, 1], [], []>} : vector<96x128xbf16>, vector<128x128xbf16>, vector<96x128xf32> -> vector<96x128xf32>
      %125 = arith.addf %121, %124 : vector<96x128xf32>
      %c0_113 = arith.constant 0 : index
      %c2_114 = arith.constant 2 : index
      %c0_115 = arith.constant 0 : index
      %c0_116 = arith.constant 0 : index
      %126 = vector.load %arg7[%c0_113, %c2_114, %c0_115, %c0_116] : memref<5x5x128x128xbf16, #tpu.memory_space<vmem>>, vector<1x1x128x128xbf16>
      %127 = vector.shape_cast %126 : vector<1x1x128x128xbf16> to vector<128x128xbf16>
      %cst_117 = arith.constant dense<0.000000e+00> : vector<96x128xf32>
      %128 = tpu.matmul %116, %127, %cst_117 {dimension_numbers = #tpu.dot_dimension_numbers<[1], [0], [0], [1], [0, 0, 1, 1], [], []>} : vector<96x128xbf16>, vector<128x128xbf16>, vector<96x128xf32> -> vector<96x128xf32>
      %c95_i32_118 = arith.constant 95 : i32
      %129 = tpu.dynamic_rotate %128 by %c95_i32_118 dim 0 : vector<96x128xf32>, i32 -> vector<96x128xf32>
      %130 = arith.addf %125, %129 : vector<96x128xf32>
      %c0_119 = arith.constant 0 : index
      %c3 = arith.constant 3 : index
      %c0_120 = arith.constant 0 : index
      %c0_121 = arith.constant 0 : index
      %131 = vector.load %arg7[%c0_119, %c3, %c0_120, %c0_121] : memref<5x5x128x128xbf16, #tpu.memory_space<vmem>>, vector<1x1x128x128xbf16>
      %132 = vector.shape_cast %131 : vector<1x1x128x128xbf16> to vector<128x128xbf16>
      %cst_122 = arith.constant dense<0.000000e+00> : vector<96x128xf32>
      %133 = tpu.matmul %116, %132, %cst_122 {dimension_numbers = #tpu.dot_dimension_numbers<[1], [0], [0], [1], [0, 0, 1, 1], [], []>} : vector<96x128xbf16>, vector<128x128xbf16>, vector<96x128xf32> -> vector<96x128xf32>
      %c94_i32_123 = arith.constant 94 : i32
      %134 = tpu.dynamic_rotate %133 by %c94_i32_123 dim 0 : vector<96x128xf32>, i32 -> vector<96x128xf32>
      %135 = arith.addf %130, %134 : vector<96x128xf32>
      %c0_124 = arith.constant 0 : index
      %c4 = arith.constant 4 : index
      %c0_125 = arith.constant 0 : index
      %c0_126 = arith.constant 0 : index
      %136 = vector.load %arg7[%c0_124, %c4, %c0_125, %c0_126] : memref<5x5x128x128xbf16, #tpu.memory_space<vmem>>, vector<1x1x128x128xbf16>
      %137 = vector.shape_cast %136 : vector<1x1x128x128xbf16> to vector<128x128xbf16>
      %cst_127 = arith.constant dense<0.000000e+00> : vector<96x128xf32>
      %138 = tpu.matmul %116, %137, %cst_127 {dimension_numbers = #tpu.dot_dimension_numbers<[1], [0], [0], [1], [0, 0, 1, 1], [], []>} : vector<96x128xbf16>, vector<128x128xbf16>, vector<96x128xf32> -> vector<96x128xf32>
      %c93_i32 = arith.constant 93 : i32
      %139 = tpu.dynamic_rotate %138 by %c93_i32 dim 0 : vector<96x128xf32>, i32 -> vector<96x128xf32>
      %140 = arith.addf %135, %139 : vector<96x128xf32>
      %c1_i32_128 = arith.constant 1 : i32
      %141 = arith.addi %7, %c1_i32_128 : i32
      %c0_129 = arith.constant 0 : index
      %142 = arith.index_cast %141 : i32 to index
      %c0_130 = arith.constant 0 : index
      %c0_131 = arith.constant 0 : index
      %143 = vector.load %arg1[%c0_129, %142, %c0_130, %c0_131] : memref<1x20x24x128xf32, #tpu.memory_space<vmem>>, vector<1x4x24x128xf32>
      %144 = vector.shape_cast %143 : vector<1x4x24x128xf32> to vector<4x24x128xf32>
      %145 = vector.shape_cast %144 : vector<4x24x128xf32> to vector<96x128xf32>
      %146 = arith.truncf %145 : vector<96x128xf32> to vector<96x128xbf16>
      %c1_132 = arith.constant 1 : index
      %c0_133 = arith.constant 0 : index
      %c0_134 = arith.constant 0 : index
      %c0_135 = arith.constant 0 : index
      %147 = vector.load %arg7[%c1_132, %c0_133, %c0_134, %c0_135] : memref<5x5x128x128xbf16, #tpu.memory_space<vmem>>, vector<1x1x128x128xbf16>
      %148 = vector.shape_cast %147 : vector<1x1x128x128xbf16> to vector<128x128xbf16>
      %cst_136 = arith.constant dense<0.000000e+00> : vector<96x128xf32>
      %149 = tpu.matmul %146, %148, %cst_136 {dimension_numbers = #tpu.dot_dimension_numbers<[1], [0], [0], [1], [0, 0, 1, 1], [], []>} : vector<96x128xbf16>, vector<128x128xbf16>, vector<96x128xf32> -> vector<96x128xf32>
      %c1_i32_137 = arith.constant 1 : i32
      %150 = tpu.dynamic_rotate %149 by %c1_i32_137 dim 0 : vector<96x128xf32>, i32 -> vector<96x128xf32>
      %151 = arith.addf %140, %150 : vector<96x128xf32>
      %c1_138 = arith.constant 1 : index
      %c1_139 = arith.constant 1 : index
      %c0_140 = arith.constant 0 : index
      %c0_141 = arith.constant 0 : index
      %152 = vector.load %arg7[%c1_138, %c1_139, %c0_140, %c0_141] : memref<5x5x128x128xbf16, #tpu.memory_space<vmem>>, vector<1x1x128x128xbf16>
      %153 = vector.shape_cast %152 : vector<1x1x128x128xbf16> to vector<128x128xbf16>
      %cst_142 = arith.constant dense<0.000000e+00> : vector<96x128xf32>
      %154 = tpu.matmul %146, %153, %cst_142 {dimension_numbers = #tpu.dot_dimension_numbers<[1], [0], [0], [1], [0, 0, 1, 1], [], []>} : vector<96x128xbf16>, vector<128x128xbf16>, vector<96x128xf32> -> vector<96x128xf32>
      %155 = arith.addf %151, %154 : vector<96x128xf32>
      %c1_143 = arith.constant 1 : index
      %c2_144 = arith.constant 2 : index
      %c0_145 = arith.constant 0 : index
      %c0_146 = arith.constant 0 : index
      %156 = vector.load %arg7[%c1_143, %c2_144, %c0_145, %c0_146] : memref<5x5x128x128xbf16, #tpu.memory_space<vmem>>, vector<1x1x128x128xbf16>
      %157 = vector.shape_cast %156 : vector<1x1x128x128xbf16> to vector<128x128xbf16>
      %cst_147 = arith.constant dense<0.000000e+00> : vector<96x128xf32>
      %158 = tpu.matmul %146, %157, %cst_147 {dimension_numbers = #tpu.dot_dimension_numbers<[1], [0], [0], [1], [0, 0, 1, 1], [], []>} : vector<96x128xbf16>, vector<128x128xbf16>, vector<96x128xf32> -> vector<96x128xf32>
      %c95_i32_148 = arith.constant 95 : i32
      %159 = tpu.dynamic_rotate %158 by %c95_i32_148 dim 0 : vector<96x128xf32>, i32 -> vector<96x128xf32>
      %160 = arith.addf %155, %159 : vector<96x128xf32>
      %c1_149 = arith.constant 1 : index
      %c3_150 = arith.constant 3 : index
      %c0_151 = arith.constant 0 : index
      %c0_152 = arith.constant 0 : index
      %161 = vector.load %arg7[%c1_149, %c3_150, %c0_151, %c0_152] : memref<5x5x128x128xbf16, #tpu.memory_space<vmem>>, vector<1x1x128x128xbf16>
      %162 = vector.shape_cast %161 : vector<1x1x128x128xbf16> to vector<128x128xbf16>
      %cst_153 = arith.constant dense<0.000000e+00> : vector<96x128xf32>
      %163 = tpu.matmul %146, %162, %cst_153 {dimension_numbers = #tpu.dot_dimension_numbers<[1], [0], [0], [1], [0, 0, 1, 1], [], []>} : vector<96x128xbf16>, vector<128x128xbf16>, vector<96x128xf32> -> vector<96x128xf32>
      %c94_i32_154 = arith.constant 94 : i32
      %164 = tpu.dynamic_rotate %163 by %c94_i32_154 dim 0 : vector<96x128xf32>, i32 -> vector<96x128xf32>
      %165 = arith.addf %160, %164 : vector<96x128xf32>
      %c1_155 = arith.constant 1 : index
      %c4_156 = arith.constant 4 : index
      %c0_157 = arith.constant 0 : index
      %c0_158 = arith.constant 0 : index
      %166 = vector.load %arg7[%c1_155, %c4_156, %c0_157, %c0_158] : memref<5x5x128x128xbf16, #tpu.memory_space<vmem>>, vector<1x1x128x128xbf16>
      %167 = vector.shape_cast %166 : vector<1x1x128x128xbf16> to vector<128x128xbf16>
      %cst_159 = arith.constant dense<0.000000e+00> : vector<96x128xf32>
      %168 = tpu.matmul %146, %167, %cst_159 {dimension_numbers = #tpu.dot_dimension_numbers<[1], [0], [0], [1], [0, 0, 1, 1], [], []>} : vector<96x128xbf16>, vector<128x128xbf16>, vector<96x128xf32> -> vector<96x128xf32>
      %c93_i32_160 = arith.constant 93 : i32
      %169 = tpu.dynamic_rotate %168 by %c93_i32_160 dim 0 : vector<96x128xf32>, i32 -> vector<96x128xf32>
      %170 = arith.addf %165, %169 : vector<96x128xf32>
      %c2_i32_161 = arith.constant 2 : i32
      %171 = arith.addi %7, %c2_i32_161 : i32
      %c0_162 = arith.constant 0 : index
      %172 = arith.index_cast %171 : i32 to index
      %c0_163 = arith.constant 0 : index
      %c0_164 = arith.constant 0 : index
      %173 = vector.load %arg1[%c0_162, %172, %c0_163, %c0_164] : memref<1x20x24x128xf32, #tpu.memory_space<vmem>>, vector<1x4x24x128xf32>
      %174 = vector.shape_cast %173 : vector<1x4x24x128xf32> to vector<4x24x128xf32>
      %175 = vector.shape_cast %174 : vector<4x24x128xf32> to vector<96x128xf32>
      %176 = arith.truncf %175 : vector<96x128xf32> to vector<96x128xbf16>
      %c2_165 = arith.constant 2 : index
      %c0_166 = arith.constant 0 : index
      %c0_167 = arith.constant 0 : index
      %c0_168 = arith.constant 0 : index
      %177 = vector.load %arg7[%c2_165, %c0_166, %c0_167, %c0_168] : memref<5x5x128x128xbf16, #tpu.memory_space<vmem>>, vector<1x1x128x128xbf16>
      %178 = vector.shape_cast %177 : vector<1x1x128x128xbf16> to vector<128x128xbf16>
      %cst_169 = arith.constant dense<0.000000e+00> : vector<96x128xf32>
      %179 = tpu.matmul %176, %178, %cst_169 {dimension_numbers = #tpu.dot_dimension_numbers<[1], [0], [0], [1], [0, 0, 1, 1], [], []>} : vector<96x128xbf16>, vector<128x128xbf16>, vector<96x128xf32> -> vector<96x128xf32>
      %c1_i32_170 = arith.constant 1 : i32
      %180 = tpu.dynamic_rotate %179 by %c1_i32_170 dim 0 : vector<96x128xf32>, i32 -> vector<96x128xf32>
      %181 = arith.addf %170, %180 : vector<96x128xf32>
      %c2_171 = arith.constant 2 : index
      %c1_172 = arith.constant 1 : index
      %c0_173 = arith.constant 0 : index
      %c0_174 = arith.constant 0 : index
      %182 = vector.load %arg7[%c2_171, %c1_172, %c0_173, %c0_174] : memref<5x5x128x128xbf16, #tpu.memory_space<vmem>>, vector<1x1x128x128xbf16>
      %183 = vector.shape_cast %182 : vector<1x1x128x128xbf16> to vector<128x128xbf16>
      %cst_175 = arith.constant dense<0.000000e+00> : vector<96x128xf32>
      %184 = tpu.matmul %176, %183, %cst_175 {dimension_numbers = #tpu.dot_dimension_numbers<[1], [0], [0], [1], [0, 0, 1, 1], [], []>} : vector<96x128xbf16>, vector<128x128xbf16>, vector<96x128xf32> -> vector<96x128xf32>
      %185 = arith.addf %181, %184 : vector<96x128xf32>
      %c2_176 = arith.constant 2 : index
      %c2_177 = arith.constant 2 : index
      %c0_178 = arith.constant 0 : index
      %c0_179 = arith.constant 0 : index
      %186 = vector.load %arg7[%c2_176, %c2_177, %c0_178, %c0_179] : memref<5x5x128x128xbf16, #tpu.memory_space<vmem>>, vector<1x1x128x128xbf16>
      %187 = vector.shape_cast %186 : vector<1x1x128x128xbf16> to vector<128x128xbf16>
      %cst_180 = arith.constant dense<0.000000e+00> : vector<96x128xf32>
      %188 = tpu.matmul %176, %187, %cst_180 {dimension_numbers = #tpu.dot_dimension_numbers<[1], [0], [0], [1], [0, 0, 1, 1], [], []>} : vector<96x128xbf16>, vector<128x128xbf16>, vector<96x128xf32> -> vector<96x128xf32>
      %c95_i32_181 = arith.constant 95 : i32
      %189 = tpu.dynamic_rotate %188 by %c95_i32_181 dim 0 : vector<96x128xf32>, i32 -> vector<96x128xf32>
      %190 = arith.addf %185, %189 : vector<96x128xf32>
      %c2_182 = arith.constant 2 : index
      %c3_183 = arith.constant 3 : index
      %c0_184 = arith.constant 0 : index
      %c0_185 = arith.constant 0 : index
      %191 = vector.load %arg7[%c2_182, %c3_183, %c0_184, %c0_185] : memref<5x5x128x128xbf16, #tpu.memory_space<vmem>>, vector<1x1x128x128xbf16>
      %192 = vector.shape_cast %191 : vector<1x1x128x128xbf16> to vector<128x128xbf16>
      %cst_186 = arith.constant dense<0.000000e+00> : vector<96x128xf32>
      %193 = tpu.matmul %176, %192, %cst_186 {dimension_numbers = #tpu.dot_dimension_numbers<[1], [0], [0], [1], [0, 0, 1, 1], [], []>} : vector<96x128xbf16>, vector<128x128xbf16>, vector<96x128xf32> -> vector<96x128xf32>
      %c94_i32_187 = arith.constant 94 : i32
      %194 = tpu.dynamic_rotate %193 by %c94_i32_187 dim 0 : vector<96x128xf32>, i32 -> vector<96x128xf32>
      %195 = arith.addf %190, %194 : vector<96x128xf32>
      %c2_188 = arith.constant 2 : index
      %c4_189 = arith.constant 4 : index
      %c0_190 = arith.constant 0 : index
      %c0_191 = arith.constant 0 : index
      %196 = vector.load %arg7[%c2_188, %c4_189, %c0_190, %c0_191] : memref<5x5x128x128xbf16, #tpu.memory_space<vmem>>, vector<1x1x128x128xbf16>
      %197 = vector.shape_cast %196 : vector<1x1x128x128xbf16> to vector<128x128xbf16>
      %cst_192 = arith.constant dense<0.000000e+00> : vector<96x128xf32>
      %198 = tpu.matmul %176, %197, %cst_192 {dimension_numbers = #tpu.dot_dimension_numbers<[1], [0], [0], [1], [0, 0, 1, 1], [], []>} : vector<96x128xbf16>, vector<128x128xbf16>, vector<96x128xf32> -> vector<96x128xf32>
      %c93_i32_193 = arith.constant 93 : i32
      %199 = tpu.dynamic_rotate %198 by %c93_i32_193 dim 0 : vector<96x128xf32>, i32 -> vector<96x128xf32>
      %200 = arith.addf %195, %199 : vector<96x128xf32>
      %c3_i32_194 = arith.constant 3 : i32
      %201 = arith.addi %7, %c3_i32_194 : i32
      %c0_195 = arith.constant 0 : index
      %202 = arith.index_cast %201 : i32 to index
      %c0_196 = arith.constant 0 : index
      %c0_197 = arith.constant 0 : index
      %203 = vector.load %arg1[%c0_195, %202, %c0_196, %c0_197] : memref<1x20x24x128xf32, #tpu.memory_space<vmem>>, vector<1x4x24x128xf32>
      %204 = vector.shape_cast %203 : vector<1x4x24x128xf32> to vector<4x24x128xf32>
      %205 = vector.shape_cast %204 : vector<4x24x128xf32> to vector<96x128xf32>
      %206 = arith.truncf %205 : vector<96x128xf32> to vector<96x128xbf16>
      %c3_198 = arith.constant 3 : index
      %c0_199 = arith.constant 0 : index
      %c0_200 = arith.constant 0 : index
      %c0_201 = arith.constant 0 : index
      %207 = vector.load %arg7[%c3_198, %c0_199, %c0_200, %c0_201] : memref<5x5x128x128xbf16, #tpu.memory_space<vmem>>, vector<1x1x128x128xbf16>
      %208 = vector.shape_cast %207 : vector<1x1x128x128xbf16> to vector<128x128xbf16>
      %cst_202 = arith.constant dense<0.000000e+00> : vector<96x128xf32>
      %209 = tpu.matmul %206, %208, %cst_202 {dimension_numbers = #tpu.dot_dimension_numbers<[1], [0], [0], [1], [0, 0, 1, 1], [], []>} : vector<96x128xbf16>, vector<128x128xbf16>, vector<96x128xf32> -> vector<96x128xf32>
      %c1_i32_203 = arith.constant 1 : i32
      %210 = tpu.dynamic_rotate %209 by %c1_i32_203 dim 0 : vector<96x128xf32>, i32 -> vector<96x128xf32>
      %211 = arith.addf %200, %210 : vector<96x128xf32>
      %c3_204 = arith.constant 3 : index
      %c1_205 = arith.constant 1 : index
      %c0_206 = arith.constant 0 : index
      %c0_207 = arith.constant 0 : index
      %212 = vector.load %arg7[%c3_204, %c1_205, %c0_206, %c0_207] : memref<5x5x128x128xbf16, #tpu.memory_space<vmem>>, vector<1x1x128x128xbf16>
      %213 = vector.shape_cast %212 : vector<1x1x128x128xbf16> to vector<128x128xbf16>
      %cst_208 = arith.constant dense<0.000000e+00> : vector<96x128xf32>
      %214 = tpu.matmul %206, %213, %cst_208 {dimension_numbers = #tpu.dot_dimension_numbers<[1], [0], [0], [1], [0, 0, 1, 1], [], []>} : vector<96x128xbf16>, vector<128x128xbf16>, vector<96x128xf32> -> vector<96x128xf32>
      %215 = arith.addf %211, %214 : vector<96x128xf32>
      %c3_209 = arith.constant 3 : index
      %c2_210 = arith.constant 2 : index
      %c0_211 = arith.constant 0 : index
      %c0_212 = arith.constant 0 : index
      %216 = vector.load %arg7[%c3_209, %c2_210, %c0_211, %c0_212] : memref<5x5x128x128xbf16, #tpu.memory_space<vmem>>, vector<1x1x128x128xbf16>
      %217 = vector.shape_cast %216 : vector<1x1x128x128xbf16> to vector<128x128xbf16>
      %cst_213 = arith.constant dense<0.000000e+00> : vector<96x128xf32>
      %218 = tpu.matmul %206, %217, %cst_213 {dimension_numbers = #tpu.dot_dimension_numbers<[1], [0], [0], [1], [0, 0, 1, 1], [], []>} : vector<96x128xbf16>, vector<128x128xbf16>, vector<96x128xf32> -> vector<96x128xf32>
      %c95_i32_214 = arith.constant 95 : i32
      %219 = tpu.dynamic_rotate %218 by %c95_i32_214 dim 0 : vector<96x128xf32>, i32 -> vector<96x128xf32>
      %220 = arith.addf %215, %219 : vector<96x128xf32>
      %c3_215 = arith.constant 3 : index
      %c3_216 = arith.constant 3 : index
      %c0_217 = arith.constant 0 : index
      %c0_218 = arith.constant 0 : index
      %221 = vector.load %arg7[%c3_215, %c3_216, %c0_217, %c0_218] : memref<5x5x128x128xbf16, #tpu.memory_space<vmem>>, vector<1x1x128x128xbf16>
      %222 = vector.shape_cast %221 : vector<1x1x128x128xbf16> to vector<128x128xbf16>
      %cst_219 = arith.constant dense<0.000000e+00> : vector<96x128xf32>
      %223 = tpu.matmul %206, %222, %cst_219 {dimension_numbers = #tpu.dot_dimension_numbers<[1], [0], [0], [1], [0, 0, 1, 1], [], []>} : vector<96x128xbf16>, vector<128x128xbf16>, vector<96x128xf32> -> vector<96x128xf32>
      %c94_i32_220 = arith.constant 94 : i32
      %224 = tpu.dynamic_rotate %223 by %c94_i32_220 dim 0 : vector<96x128xf32>, i32 -> vector<96x128xf32>
      %225 = arith.addf %220, %224 : vector<96x128xf32>
      %c3_221 = arith.constant 3 : index
      %c4_222 = arith.constant 4 : index
      %c0_223 = arith.constant 0 : index
      %c0_224 = arith.constant 0 : index
      %226 = vector.load %arg7[%c3_221, %c4_222, %c0_223, %c0_224] : memref<5x5x128x128xbf16, #tpu.memory_space<vmem>>, vector<1x1x128x128xbf16>
      %227 = vector.shape_cast %226 : vector<1x1x128x128xbf16> to vector<128x128xbf16>
      %cst_225 = arith.constant dense<0.000000e+00> : vector<96x128xf32>
      %228 = tpu.matmul %206, %227, %cst_225 {dimension_numbers = #tpu.dot_dimension_numbers<[1], [0], [0], [1], [0, 0, 1, 1], [], []>} : vector<96x128xbf16>, vector<128x128xbf16>, vector<96x128xf32> -> vector<96x128xf32>
      %c93_i32_226 = arith.constant 93 : i32
      %229 = tpu.dynamic_rotate %228 by %c93_i32_226 dim 0 : vector<96x128xf32>, i32 -> vector<96x128xf32>
      %230 = arith.addf %225, %229 : vector<96x128xf32>
      %c4_i32_227 = arith.constant 4 : i32
      %231 = arith.addi %7, %c4_i32_227 : i32
      %c0_228 = arith.constant 0 : index
      %232 = arith.index_cast %231 : i32 to index
      %c0_229 = arith.constant 0 : index
      %c0_230 = arith.constant 0 : index
      %233 = vector.load %arg1[%c0_228, %232, %c0_229, %c0_230] : memref<1x20x24x128xf32, #tpu.memory_space<vmem>>, vector<1x4x24x128xf32>
      %234 = vector.shape_cast %233 : vector<1x4x24x128xf32> to vector<4x24x128xf32>
      %235 = vector.shape_cast %234 : vector<4x24x128xf32> to vector<96x128xf32>
      %236 = arith.truncf %235 : vector<96x128xf32> to vector<96x128xbf16>
      %c4_231 = arith.constant 4 : index
      %c0_232 = arith.constant 0 : index
      %c0_233 = arith.constant 0 : index
      %c0_234 = arith.constant 0 : index
      %237 = vector.load %arg7[%c4_231, %c0_232, %c0_233, %c0_234] : memref<5x5x128x128xbf16, #tpu.memory_space<vmem>>, vector<1x1x128x128xbf16>
      %238 = vector.shape_cast %237 : vector<1x1x128x128xbf16> to vector<128x128xbf16>
      %cst_235 = arith.constant dense<0.000000e+00> : vector<96x128xf32>
      %239 = tpu.matmul %236, %238, %cst_235 {dimension_numbers = #tpu.dot_dimension_numbers<[1], [0], [0], [1], [0, 0, 1, 1], [], []>} : vector<96x128xbf16>, vector<128x128xbf16>, vector<96x128xf32> -> vector<96x128xf32>
      %c1_i32_236 = arith.constant 1 : i32
      %240 = tpu.dynamic_rotate %239 by %c1_i32_236 dim 0 : vector<96x128xf32>, i32 -> vector<96x128xf32>
      %241 = arith.addf %230, %240 : vector<96x128xf32>
      %c4_237 = arith.constant 4 : index
      %c1_238 = arith.constant 1 : index
      %c0_239 = arith.constant 0 : index
      %c0_240 = arith.constant 0 : index
      %242 = vector.load %arg7[%c4_237, %c1_238, %c0_239, %c0_240] : memref<5x5x128x128xbf16, #tpu.memory_space<vmem>>, vector<1x1x128x128xbf16>
      %243 = vector.shape_cast %242 : vector<1x1x128x128xbf16> to vector<128x128xbf16>
      %cst_241 = arith.constant dense<0.000000e+00> : vector<96x128xf32>
      %244 = tpu.matmul %236, %243, %cst_241 {dimension_numbers = #tpu.dot_dimension_numbers<[1], [0], [0], [1], [0, 0, 1, 1], [], []>} : vector<96x128xbf16>, vector<128x128xbf16>, vector<96x128xf32> -> vector<96x128xf32>
      %245 = arith.addf %241, %244 : vector<96x128xf32>
      %c4_242 = arith.constant 4 : index
      %c2_243 = arith.constant 2 : index
      %c0_244 = arith.constant 0 : index
      %c0_245 = arith.constant 0 : index
      %246 = vector.load %arg7[%c4_242, %c2_243, %c0_244, %c0_245] : memref<5x5x128x128xbf16, #tpu.memory_space<vmem>>, vector<1x1x128x128xbf16>
      %247 = vector.shape_cast %246 : vector<1x1x128x128xbf16> to vector<128x128xbf16>
      %cst_246 = arith.constant dense<0.000000e+00> : vector<96x128xf32>
      %248 = tpu.matmul %236, %247, %cst_246 {dimension_numbers = #tpu.dot_dimension_numbers<[1], [0], [0], [1], [0, 0, 1, 1], [], []>} : vector<96x128xbf16>, vector<128x128xbf16>, vector<96x128xf32> -> vector<96x128xf32>
      %c95_i32_247 = arith.constant 95 : i32
      %249 = tpu.dynamic_rotate %248 by %c95_i32_247 dim 0 : vector<96x128xf32>, i32 -> vector<96x128xf32>
      %250 = arith.addf %245, %249 : vector<96x128xf32>
      %c4_248 = arith.constant 4 : index
      %c3_249 = arith.constant 3 : index
      %c0_250 = arith.constant 0 : index
      %c0_251 = arith.constant 0 : index
      %251 = vector.load %arg7[%c4_248, %c3_249, %c0_250, %c0_251] : memref<5x5x128x128xbf16, #tpu.memory_space<vmem>>, vector<1x1x128x128xbf16>
      %252 = vector.shape_cast %251 : vector<1x1x128x128xbf16> to vector<128x128xbf16>
      %cst_252 = arith.constant dense<0.000000e+00> : vector<96x128xf32>
      %253 = tpu.matmul %236, %252, %cst_252 {dimension_numbers = #tpu.dot_dimension_numbers<[1], [0], [0], [1], [0, 0, 1, 1], [], []>} : vector<96x128xbf16>, vector<128x128xbf16>, vector<96x128xf32> -> vector<96x128xf32>
      %c94_i32_253 = arith.constant 94 : i32
      %254 = tpu.dynamic_rotate %253 by %c94_i32_253 dim 0 : vector<96x128xf32>, i32 -> vector<96x128xf32>
      %255 = arith.addf %250, %254 : vector<96x128xf32>
      %c4_254 = arith.constant 4 : index
      %c4_255 = arith.constant 4 : index
      %c0_256 = arith.constant 0 : index
      %c0_257 = arith.constant 0 : index
      %256 = vector.load %arg7[%c4_254, %c4_255, %c0_256, %c0_257] : memref<5x5x128x128xbf16, #tpu.memory_space<vmem>>, vector<1x1x128x128xbf16>
      %257 = vector.shape_cast %256 : vector<1x1x128x128xbf16> to vector<128x128xbf16>
      %cst_258 = arith.constant dense<0.000000e+00> : vector<96x128xf32>
      %258 = tpu.matmul %236, %257, %cst_258 {dimension_numbers = #tpu.dot_dimension_numbers<[1], [0], [0], [1], [0, 0, 1, 1], [], []>} : vector<96x128xbf16>, vector<128x128xbf16>, vector<96x128xf32> -> vector<96x128xf32>
      %c93_i32_259 = arith.constant 93 : i32
      %259 = tpu.dynamic_rotate %258 by %c93_i32_259 dim 0 : vector<96x128xf32>, i32 -> vector<96x128xf32>
      %260 = arith.addf %255, %259 : vector<96x128xf32>
      %c0_260 = arith.constant 0 : index
      %c0_261 = arith.constant 0 : index
      %261 = vector.load %arg8[%c0_260, %c0_261] : memref<1x128xf32, #tpu.memory_space<vmem>>, vector<1x128xf32>
      %262 = vector.broadcast %261 : vector<1x128xf32> to vector<96x128xf32>
      %263 = arith.addf %260, %262 : vector<96x128xf32>
      %cst_262 = arith.constant 0.000000e+00 : f32
      %264 = vector.broadcast %cst_262 : f32 to vector<96x128xf32>
      %265 = arith.cmpf ogt, %263, %264 : vector<96x128xf32>
      %cst_263 = arith.constant 0.00999999977 : f32
      %266 = vector.broadcast %cst_263 : f32 to vector<96x128xf32>
      %267 = arith.mulf %266, %263 : vector<96x128xf32>
      %268 = arith.select %265, %263, %267 : vector<96x128xi1>, vector<96x128xf32>
      %269 = vector.shape_cast %268 : vector<96x128xf32> to vector<4x24x128xf32>
      %c0_264 = arith.constant 0 : index
      %c0_265 = arith.constant 0 : index
      %c0_266 = arith.constant 0 : index
      %270 = vector.load %arg2[%c0_264, %c0_265, %c0_266] : memref<1x24x1xf32, #tpu.memory_space<vmem>>, vector<1x24x1xf32>
      %271 = vector.broadcast %270 : vector<1x24x1xf32> to vector<4x24x128xf32>
      %272 = arith.mulf %269, %271 : vector<4x24x128xf32>
      %273 = arith.truncf %272 : vector<4x24x128xf32> to vector<4x24x128xbf16>
      %c1_i32_267 = arith.constant 1 : i32
      %274 = arith.addi %7, %c1_i32_267 : i32
      %275 = arith.index_cast %274 : i32 to index
      %c0_268 = arith.constant 0 : index
      %c256 = arith.constant 256 : index
      %276 = vector.load %arg12[%275, %c0_268, %c256] : memref<18x24x384xbf16, #tpu.memory_space<vmem>>, vector<4x24x128xbf16>
      tpu.vector_store %arg12[%275, %c0_268, %c256], %273 {strides = array<i32>} : memref<18x24x384xbf16, #tpu.memory_space<vmem>>, vector<4x24x128xbf16>,
    }
    %c4_i32_4 = arith.constant 4 : i32
    %c0_i32_5 = arith.constant 0 : i32
    %c4_i32_6 = arith.constant 4 : i32
    %4 = arith.addi %c0_i32_5, %c4_i32_6 : i32
    %c1_i32_7 = arith.constant 1 : i32
    scf.for %arg13 = %c0_i32_5 to %4 step %c1_i32_7  : i32 {
      %c1_i32_9 = arith.constant 1 : i32
      %5 = arith.muli %arg13, %c1_i32_9 : i32
      %c0_i32_10 = arith.constant 0 : i32
      %6 = arith.addi %c0_i32_10, %5 : i32
      %c4_i32_11 = arith.constant 4 : i32
      %7 = arith.muli %6, %c4_i32_11 : i32
      %cst_12 = arith.constant 0.000000e+00 : f32
      %8 = vector.broadcast %cst_12 : f32 to vector<96x128xf32>
      %c0_i32_13 = arith.constant 0 : i32
      %9 = arith.addi %7, %c0_i32_13 : i32
      %10 = arith.index_cast %9 : i32 to index
      %c0_14 = arith.constant 0 : index
      %c0_15 = arith.constant 0 : index
      %11 = vector.load %arg12[%10, %c0_14, %c0_15] : memref<18x24x384xbf16, #tpu.memory_space<vmem>>, vector<4x24x384xbf16>
      %12 = vector.shape_cast %11 : vector<4x24x384xbf16> to vector<96x384xbf16>
      %c0_16 = arith.constant 0 : index
      %c0_17 = arith.constant 0 : index
      %c0_18 = arith.constant 0 : index
      %c0_19 = arith.constant 0 : index
      %13 = vector.load %arg9[%c0_16, %c0_17, %c0_18, %c0_19] : memref<3x3x384x128xbf16, #tpu.memory_space<vmem>>, vector<1x1x384x128xbf16>
      %14 = vector.shape_cast %13 : vector<1x1x384x128xbf16> to vector<384x128xbf16>
      %cst_20 = arith.constant dense<0.000000e+00> : vector<96x128xf32>
      %15 = tpu.matmul %12, %14, %cst_20 {dimension_numbers = #tpu.dot_dimension_numbers<[1], [0], [0], [1], [0, 0, 1, 1], [], []>} : vector<96x384xbf16>, vector<384x128xbf16>, vector<96x128xf32> -> vector<96x128xf32>
      %16 = arith.addf %8, %15 : vector<96x128xf32>
      %c0_21 = arith.constant 0 : index
      %c1 = arith.constant 1 : index
      %c0_22 = arith.constant 0 : index
      %c0_23 = arith.constant 0 : index
      %17 = vector.load %arg9[%c0_21, %c1, %c0_22, %c0_23] : memref<3x3x384x128xbf16, #tpu.memory_space<vmem>>, vector<1x1x384x128xbf16>
      %18 = vector.shape_cast %17 : vector<1x1x384x128xbf16> to vector<384x128xbf16>
      %cst_24 = arith.constant dense<0.000000e+00> : vector<96x128xf32>
      %19 = tpu.matmul %12, %18, %cst_24 {dimension_numbers = #tpu.dot_dimension_numbers<[1], [0], [0], [1], [0, 0, 1, 1], [], []>} : vector<96x384xbf16>, vector<384x128xbf16>, vector<96x128xf32> -> vector<96x128xf32>
      %c95_i32 = arith.constant 95 : i32
      %20 = tpu.dynamic_rotate %19 by %c95_i32 dim 0 : vector<96x128xf32>, i32 -> vector<96x128xf32>
      %21 = arith.addf %16, %20 : vector<96x128xf32>
      %c0_25 = arith.constant 0 : index
      %c2 = arith.constant 2 : index
      %c0_26 = arith.constant 0 : index
      %c0_27 = arith.constant 0 : index
      %22 = vector.load %arg9[%c0_25, %c2, %c0_26, %c0_27] : memref<3x3x384x128xbf16, #tpu.memory_space<vmem>>, vector<1x1x384x128xbf16>
      %23 = vector.shape_cast %22 : vector<1x1x384x128xbf16> to vector<384x128xbf16>
      %cst_28 = arith.constant dense<0.000000e+00> : vector<96x128xf32>
      %24 = tpu.matmul %12, %23, %cst_28 {dimension_numbers = #tpu.dot_dimension_numbers<[1], [0], [0], [1], [0, 0, 1, 1], [], []>} : vector<96x384xbf16>, vector<384x128xbf16>, vector<96x128xf32> -> vector<96x128xf32>
      %c94_i32 = arith.constant 94 : i32
      %25 = tpu.dynamic_rotate %24 by %c94_i32 dim 0 : vector<96x128xf32>, i32 -> vector<96x128xf32>
      %26 = arith.addf %21, %25 : vector<96x128xf32>
      %c1_i32_29 = arith.constant 1 : i32
      %27 = arith.addi %7, %c1_i32_29 : i32
      %28 = arith.index_cast %27 : i32 to index
      %c0_30 = arith.constant 0 : index
      %c0_31 = arith.constant 0 : index
      %29 = vector.load %arg12[%28, %c0_30, %c0_31] : memref<18x24x384xbf16, #tpu.memory_space<vmem>>, vector<4x24x384xbf16>
      %30 = vector.shape_cast %29 : vector<4x24x384xbf16> to vector<96x384xbf16>
      %c1_32 = arith.constant 1 : index
      %c0_33 = arith.constant 0 : index
      %c0_34 = arith.constant 0 : index
      %c0_35 = arith.constant 0 : index
      %31 = vector.load %arg9[%c1_32, %c0_33, %c0_34, %c0_35] : memref<3x3x384x128xbf16, #tpu.memory_space<vmem>>, vector<1x1x384x128xbf16>
      %32 = vector.shape_cast %31 : vector<1x1x384x128xbf16> to vector<384x128xbf16>
      %cst_36 = arith.constant dense<0.000000e+00> : vector<96x128xf32>
      %33 = tpu.matmul %30, %32, %cst_36 {dimension_numbers = #tpu.dot_dimension_numbers<[1], [0], [0], [1], [0, 0, 1, 1], [], []>} : vector<96x384xbf16>, vector<384x128xbf16>, vector<96x128xf32> -> vector<96x128xf32>
      %34 = arith.addf %26, %33 : vector<96x128xf32>
      %c1_37 = arith.constant 1 : index
      %c1_38 = arith.constant 1 : index
      %c0_39 = arith.constant 0 : index
      %c0_40 = arith.constant 0 : index
      %35 = vector.load %arg9[%c1_37, %c1_38, %c0_39, %c0_40] : memref<3x3x384x128xbf16, #tpu.memory_space<vmem>>, vector<1x1x384x128xbf16>
      %36 = vector.shape_cast %35 : vector<1x1x384x128xbf16> to vector<384x128xbf16>
      %cst_41 = arith.constant dense<0.000000e+00> : vector<96x128xf32>
      %37 = tpu.matmul %30, %36, %cst_41 {dimension_numbers = #tpu.dot_dimension_numbers<[1], [0], [0], [1], [0, 0, 1, 1], [], []>} : vector<96x384xbf16>, vector<384x128xbf16>, vector<96x128xf32> -> vector<96x128xf32>
      %c95_i32_42 = arith.constant 95 : i32
      %38 = tpu.dynamic_rotate %37 by %c95_i32_42 dim 0 : vector<96x128xf32>, i32 -> vector<96x128xf32>
      %39 = arith.addf %34, %38 : vector<96x128xf32>
      %c1_43 = arith.constant 1 : index
      %c2_44 = arith.constant 2 : index
      %c0_45 = arith.constant 0 : index
      %c0_46 = arith.constant 0 : index
      %40 = vector.load %arg9[%c1_43, %c2_44, %c0_45, %c0_46] : memref<3x3x384x128xbf16, #tpu.memory_space<vmem>>, vector<1x1x384x128xbf16>
      %41 = vector.shape_cast %40 : vector<1x1x384x128xbf16> to vector<384x128xbf16>
      %cst_47 = arith.constant dense<0.000000e+00> : vector<96x128xf32>
      %42 = tpu.matmul %30, %41, %cst_47 {dimension_numbers = #tpu.dot_dimension_numbers<[1], [0], [0], [1], [0, 0, 1, 1], [], []>} : vector<96x384xbf16>, vector<384x128xbf16>, vector<96x128xf32> -> vector<96x128xf32>
      %c94_i32_48 = arith.constant 94 : i32
      %43 = tpu.dynamic_rotate %42 by %c94_i32_48 dim 0 : vector<96x128xf32>, i32 -> vector<96x128xf32>
      %44 = arith.addf %39, %43 : vector<96x128xf32>
      %c2_i32 = arith.constant 2 : i32
      %45 = arith.addi %7, %c2_i32 : i32
      %46 = arith.index_cast %45 : i32 to index
      %c0_49 = arith.constant 0 : index
      %c0_50 = arith.constant 0 : index
      %47 = vector.load %arg12[%46, %c0_49, %c0_50] : memref<18x24x384xbf16, #tpu.memory_space<vmem>>, vector<4x24x384xbf16>
      %48 = vector.shape_cast %47 : vector<4x24x384xbf16> to vector<96x384xbf16>
      %c2_51 = arith.constant 2 : index
      %c0_52 = arith.constant 0 : index
      %c0_53 = arith.constant 0 : index
      %c0_54 = arith.constant 0 : index
      %49 = vector.load %arg9[%c2_51, %c0_52, %c0_53, %c0_54] : memref<3x3x384x128xbf16, #tpu.memory_space<vmem>>, vector<1x1x384x128xbf16>
      %50 = vector.shape_cast %49 : vector<1x1x384x128xbf16> to vector<384x128xbf16>
      %cst_55 = arith.constant dense<0.000000e+00> : vector<96x128xf32>
      %51 = tpu.matmul %48, %50, %cst_55 {dimension_numbers = #tpu.dot_dimension_numbers<[1], [0], [0], [1], [0, 0, 1, 1], [], []>} : vector<96x384xbf16>, vector<384x128xbf16>, vector<96x128xf32> -> vector<96x128xf32>
      %52 = arith.addf %44, %51 : vector<96x128xf32>
      %c2_56 = arith.constant 2 : index
      %c1_57 = arith.constant 1 : index
      %c0_58 = arith.constant 0 : index
      %c0_59 = arith.constant 0 : index
      %53 = vector.load %arg9[%c2_56, %c1_57, %c0_58, %c0_59] : memref<3x3x384x128xbf16, #tpu.memory_space<vmem>>, vector<1x1x384x128xbf16>
      %54 = vector.shape_cast %53 : vector<1x1x384x128xbf16> to vector<384x128xbf16>
      %cst_60 = arith.constant dense<0.000000e+00> : vector<96x128xf32>
      %55 = tpu.matmul %48, %54, %cst_60 {dimension_numbers = #tpu.dot_dimension_numbers<[1], [0], [0], [1], [0, 0, 1, 1], [], []>} : vector<96x384xbf16>, vector<384x128xbf16>, vector<96x128xf32> -> vector<96x128xf32>
      %c95_i32_61 = arith.constant 95 : i32
      %56 = tpu.dynamic_rotate %55 by %c95_i32_61 dim 0 : vector<96x128xf32>, i32 -> vector<96x128xf32>
      %57 = arith.addf %52, %56 : vector<96x128xf32>
      %c2_62 = arith.constant 2 : index
      %c2_63 = arith.constant 2 : index
      %c0_64 = arith.constant 0 : index
      %c0_65 = arith.constant 0 : index
      %58 = vector.load %arg9[%c2_62, %c2_63, %c0_64, %c0_65] : memref<3x3x384x128xbf16, #tpu.memory_space<vmem>>, vector<1x1x384x128xbf16>
      %59 = vector.shape_cast %58 : vector<1x1x384x128xbf16> to vector<384x128xbf16>
      %cst_66 = arith.constant dense<0.000000e+00> : vector<96x128xf32>
      %60 = tpu.matmul %48, %59, %cst_66 {dimension_numbers = #tpu.dot_dimension_numbers<[1], [0], [0], [1], [0, 0, 1, 1], [], []>} : vector<96x384xbf16>, vector<384x128xbf16>, vector<96x128xf32> -> vector<96x128xf32>
      %c94_i32_67 = arith.constant 94 : i32
      %61 = tpu.dynamic_rotate %60 by %c94_i32_67 dim 0 : vector<96x128xf32>, i32 -> vector<96x128xf32>
      %62 = arith.addf %57, %61 : vector<96x128xf32>
      %c0_68 = arith.constant 0 : index
      %c0_69 = arith.constant 0 : index
      %63 = vector.load %arg10[%c0_68, %c0_69] : memref<1x128xf32, #tpu.memory_space<vmem>>, vector<1x128xf32>
      %64 = vector.broadcast %63 : vector<1x128xf32> to vector<96x128xf32>
      %65 = arith.addf %62, %64 : vector<96x128xf32>
      %cst_70 = arith.constant 0.000000e+00 : f32
      %66 = vector.broadcast %cst_70 : f32 to vector<96x128xf32>
      %67 = arith.cmpf ogt, %65, %66 : vector<96x128xf32>
      %cst_71 = arith.constant 0.00999999977 : f32
      %68 = vector.broadcast %cst_71 : f32 to vector<96x128xf32>
      %69 = arith.mulf %68, %65 : vector<96x128xf32>
      %70 = arith.select %67, %65, %69 : vector<96x128xi1>, vector<96x128xf32>
      %c2_i32_72 = arith.constant 2 : i32
      %71 = arith.addi %7, %c2_i32_72 : i32
      %c0_73 = arith.constant 0 : index
      %72 = arith.index_cast %71 : i32 to index
      %c0_74 = arith.constant 0 : index
      %c0_75 = arith.constant 0 : index
      %73 = vector.load %arg1[%c0_73, %72, %c0_74, %c0_75] : memref<1x20x24x128xf32, #tpu.memory_space<vmem>>, vector<1x4x24x128xf32>
      %74 = vector.shape_cast %73 : vector<1x4x24x128xf32> to vector<4x24x128xf32>
      %75 = vector.shape_cast %74 : vector<4x24x128xf32> to vector<96x128xf32>
      %c94_i32_76 = arith.constant 94 : i32
      %76 = tpu.dynamic_rotate %75 by %c94_i32_76 dim 0 : vector<96x128xf32>, i32 -> vector<96x128xf32>
      %77 = arith.addf %70, %76 : vector<96x128xf32>
      %78 = vector.shape_cast %77 : vector<96x128xf32> to vector<4x24x128xf32>
      %79 = vector.extract_strided_slice %78 {offsets = [0, 0, 0], sizes = [4, 16, 128], strides = [1, 1, 1]} : vector<4x24x128xf32> to vector<4x16x128xf32>
      %c0_77 = arith.constant 0 : index
      %80 = arith.index_cast %7 : i32 to index
      %c0_78 = arith.constant 0 : index
      %c0_79 = arith.constant 0 : index
      %81 = vector.load %arg11[%c0_77, %80, %c0_78, %c0_79] : memref<1x16x16x128xf32, #tpu.memory_space<vmem>>, vector<1x4x16x128xf32>
      %82 = vector.shape_cast %81 : vector<1x4x16x128xf32> to vector<4x16x128xf32>
      %83 = vector.shape_cast %79 : vector<4x16x128xf32> to vector<1x4x16x128xf32>
      tpu.vector_store %arg11[%c0_77, %80, %c0_78, %c0_79], %83 {strides = array<i32>} : memref<1x16x16x128xf32, #tpu.memory_space<vmem>>, vector<1x4x16x128xf32>,
    }
    %c4_i32_8 = arith.constant 4 : i32
    return
  }
  func.func @transform_0(%arg0: i32) -> (i32, i32, i32, i32) {
    %c0_i32 = arith.constant 0 : i32
    %c0_i32_0 = arith.constant 0 : i32
    %c0_i32_1 = arith.constant 0 : i32
    %c0_i32_2 = arith.constant 0 : i32
    return %arg0, %c0_i32, %c0_i32_0, %c0_i32_1 : i32, i32, i32, i32
  }
  func.func @transform_1(%arg0: i32) -> (i32, i32, i32) {
    %c0_i32 = arith.constant 0 : i32
    %c0_i32_0 = arith.constant 0 : i32
    %c0_i32_1 = arith.constant 0 : i32
    %c0_i32_2 = arith.constant 0 : i32
    return %c0_i32, %c0_i32_0, %c0_i32_1 : i32, i32, i32
  }
  func.func @transform_2(%arg0: i32) -> (i32, i32) {
    %c0_i32 = arith.constant 0 : i32
    %c0_i32_0 = arith.constant 0 : i32
    %c0_i32_1 = arith.constant 0 : i32
    return %c0_i32, %c0_i32_0 : i32, i32
  }
  func.func @transform_3(%arg0: i32) -> (i32, i32) {
    %c0_i32 = arith.constant 0 : i32
    %c0_i32_0 = arith.constant 0 : i32
    %c0_i32_1 = arith.constant 0 : i32
    return %c0_i32, %c0_i32_0 : i32, i32
  }
  func.func @transform_4(%arg0: i32) -> (i32, i32, i32, i32) {
    %c0_i32 = arith.constant 0 : i32
    %c0_i32_0 = arith.constant 0 : i32
    %c0_i32_1 = arith.constant 0 : i32
    %c0_i32_2 = arith.constant 0 : i32
    %c0_i32_3 = arith.constant 0 : i32
    return %c0_i32, %c0_i32_0, %c0_i32_1, %c0_i32_2 : i32, i32, i32, i32
  }
  func.func @transform_5(%arg0: i32) -> (i32, i32) {
    %c0_i32 = arith.constant 0 : i32
    %c0_i32_0 = arith.constant 0 : i32
    %c0_i32_1 = arith.constant 0 : i32
    return %c0_i32, %c0_i32_0 : i32, i32
  }
  func.func @transform_6(%arg0: i32) -> (i32, i32, i32, i32) {
    %c0_i32 = arith.constant 0 : i32
    %c0_i32_0 = arith.constant 0 : i32
    %c0_i32_1 = arith.constant 0 : i32
    %c0_i32_2 = arith.constant 0 : i32
    %c0_i32_3 = arith.constant 0 : i32
    return %c0_i32, %c0_i32_0, %c0_i32_1, %c0_i32_2 : i32, i32, i32, i32
  }
  func.func @transform_7(%arg0: i32) -> (i32, i32) {
    %c0_i32 = arith.constant 0 : i32
    %c0_i32_0 = arith.constant 0 : i32
    %c0_i32_1 = arith.constant 0 : i32
    return %c0_i32, %c0_i32_0 : i32, i32
  }
  func.func @transform_8(%arg0: i32) -> (i32, i32, i32, i32) {
    %c0_i32 = arith.constant 0 : i32
    %c0_i32_0 = arith.constant 0 : i32
    %c0_i32_1 = arith.constant 0 : i32
    %c0_i32_2 = arith.constant 0 : i32
    %c0_i32_3 = arith.constant 0 : i32
    return %c0_i32, %c0_i32_0, %c0_i32_1, %c0_i32_2 : i32, i32, i32, i32
  }
  func.func @transform_9(%arg0: i32) -> (i32, i32) {
    %c0_i32 = arith.constant 0 : i32
    %c0_i32_0 = arith.constant 0 : i32
    %c0_i32_1 = arith.constant 0 : i32
    return %c0_i32, %c0_i32_0 : i32, i32
  }
  func.func @transform_10(%arg0: i32) -> (i32, i32, i32, i32) {
    %c0_i32 = arith.constant 0 : i32
    %c0_i32_0 = arith.constant 0 : i32
    %c0_i32_1 = arith.constant 0 : i32
    %c0_i32_2 = arith.constant 0 : i32
    return %arg0, %c0_i32, %c0_i32_0, %c0_i32_1 : i32, i32, i32, i32
  }
}

</mosaic_0001>

<bundles_post_ra>
// kernel: tpu_custom_call.1
= control target key start
LH: loop header
LB: loop body
LE: loop exit
PB: predicated region body
PF: predicated region fallthrough
CT: control target
= control target key end

     0   :  { %s16192_s0 = inlined_call_operand.hbm [shape: f32[2,20,24,128], index: 0, kind: input, shape index: {}]   ;;  %s16193_s1 = inlined_call_operand.vmem [shape: f32[1,24,1], index: 1, kind: input, shape index: {}]   ;;  %s16194_s2 = inlined_call_operand.hbm [shape: bf16[128,128], index: 2, kind: input, shape index: {}]   ;;  %s16195_s3 = inlined_call_operand.vmem [shape: f32[1,128], index: 3, kind: input, shape index: {}]   ;;  %s16196_s4 = inlined_call_operand.hbm [shape: bf16[3,3,128,128], index: 4, kind: input, shape index: {}]   ;;  %s16197_s5 = inlined_call_operand.vmem [shape: f32[1,128], index: 5, kind: input, shape index: {}]   ;;  %s16198_s6 = inlined_call_operand.hbm [shape: bf16[5,5,128,128], index: 6, kind: input, shape index: {}]   ;;  %s16199_s7 = inlined_call_operand.vmem [shape: f32[1,128], index: 7, kind: input, shape index: {}]   ;;  %s16200_s8 = inlined_call_operand.hbm [shape: bf16[3,3,384,128], index: 8, kind: input, shape index: {}]   ;;  %s16201_s9 = inlined_call_operand.vmem [shape: f32[1,128], index: 9, kind: input, shape index: {}]   ;;  %s16202_s10 = inlined_call_operand.hbm [shape: f32[2,16,16,128], index: 10, kind: output, shape index: {}]  }
   0x1   :  { %16204 = sst [smem:[#allocation19_spill]] %s16194_s2 }
   0x2   :  { %16205 = sst [smem:[#allocation20_spill]] %s16196_s4 }
   0x3   :  { %16206 = sst [smem:[#allocation21_spill]] %s16198_s6 }
   0x4   :  { %16207 = sst [smem:[#allocation22_spill]] %s16200_s8 }
   0x5   :  { %15 = vsyncpa [#allocation4], 0 }
   0x6   :  { %17 = vsyncpa [#allocation4 + $0x1], 0 }
   0x7   :  { %18 = vsyncpa [#allocation7], 0 }
   0x8   :  { %19 = vsyncpa [#allocation10], 0 }
   0x9   :  { %20 = vsyncpa [#allocation5], 0 }
   0xa   :  { %22 = vsyncpa [#allocation5 + $0x1], 0  ;;  %s12677_s13 = smov 0   ;;  %s12679_s14 = smov 0  }
   0xb   :  { %s12681_s15 = smov 0   ;;  %s12683_s16 = smov 0  }
   0xc LB: > { %16208 = sst [smem:[#allocation17_spill]] %s12596_s15  ;;  %s12698_s17 = sadd.s32 4294967295, %s12600_s16   ;;  %s12600_s16 = sphi %s12683_s16, %s16225_s16   ;;  %s12596_s15 = sphi %s12681_s15, %s16222_s15   ;;  %s12592_s14 = sphi %s12679_s14, %s16224_s14   ;;  %s12588_s13 = sphi %s12677_s13, %s16223_s13  }
   0xd   : > { %s9213_s18 = sadd.s32 4294967294, %s12600_s16   ;;  %p48_p0 = scmp.ne.s32.totalorder %s12592_s14, %s12588_s13 }
   0xe   : > { %p49_p1 = scmp.eq.s32.totalorder %s12698_s17, 0  ;;  %p261_p2 = scmp.eq.s32.totalorder %s12698_s17, 1 }
   0xf   : > { %p267_p3 = scmp.eq.s32.totalorder %s9213_s18, 1  ;;  %p9214_p5 = scmp.ge.s32.totalorder %s12600_s16, 1 }
  0x10   : > { %p12707_p4 = por %p49_p1, %p48_p0  ;;  %p274_p7 = scmp.lt.s32.totalorder %s12600_s16, 3 }
  0x11   : > { %p12712_p6 = por %p267_p3, %p48_p0  ;;  %s16211_s2 = sld [smem:[#allocation19_spill]] }
  0x12   : > { %p12720_p8 = pnand %p9214_p5, %p274_p7  ;;  %s12610_s25 = smov [#allocation6]  }
  0x13   : > { %s290_s26 = sshll.u32 %s12610_s25, 4  ;;  %s16214_s6 = sld [smem:[#allocation21_spill]]  ;;  %s291_s26 = int_to_ptr.vmem [resolvable:$true] %s290_s26 }
  0x14   : > { %p12270_p9 = pneg %p12720_p8  ;;  %s12611_s11 = smov 64  }
  0x15   : > { %s12612_s12 = smov 4   ;;  %s12613_s18 = smov [#allocation9]  }
  0x16   : > { %p12728_p10 = pnand %p12270_p9, %p49_p1  ;;  %s324_s21 = sshll.u32 %s12613_s18, 4  ;;  %s325_s21 = int_to_ptr.vmem [resolvable:$true] %s324_s21 }
  0x17   : > { %s288_s23 = sshll.u32 %s16211_s2, 4  ;;  %s16215_s4 = sld [smem:[#allocation20_spill]]  ;;  %s289_s23 = int_to_ptr.hbm [resolvable:$true] %s288_s23 }
  0x18   : > { %12273 = dma.hbm_to_vmem [thread:$0]  (!%p12728_p10), %s289_s23, 1024, %s291_s26, [#allocation7], %s12611_s11, %s12611_s11, %s12612_s12  }
  0x19   : > { %s322_s30 = sshll.u32 %s16214_s6, 4  ;;  %s16216_s8 = sld [smem:[#allocation22_spill]]  ;;  %s323_s30 = int_to_ptr.hbm [resolvable:$true] %s322_s30 }
  0x1a   : > { %12279 = dma.hbm_to_vmem [thread:$0]  (!%p12728_p10), %s323_s30, 25600, %s325_s21, [#allocation10], %s12611_s11, %s12611_s11, %s12612_s12  }
  0x1b   : > { %s12614_s26 = smov [#allocation8]   ;;  %s12615_s22 = smov [#allocation11]  }
  0x1c   : > { %s307_s18 = sshll.u32 %s12614_s26, 4  ;;  %s341_s25 = sshll.u32 %s12615_s22, 4  ;;  %s308_s18 = int_to_ptr.vmem [resolvable:$true] %s307_s18  ;;  %s342_s25 = int_to_ptr.vmem [resolvable:$true] %s341_s25 }
  0x1d   : > { %s305_s2 = sshll.u32 %s16215_s4, 4  ;;  %s12751_s30 = sadd.s32 1, %s12600_s16   ;;  %s306_s2 = int_to_ptr.hbm [resolvable:$true] %s305_s2 }
  0x1e   : > { %12276 = dma.hbm_to_vmem [thread:$0]  (!%p12728_p10), %s306_s2, 9216, %s308_s18, [#allocation7], %s12611_s11, %s12611_s11, %s12612_s12  }
  0x1f   : > { %s339_s23 = sshll.u32 %s16216_s8, 4  ;;  %s35_s21 = sadd.s32 1, %s12596_s15  ;;  %s340_s23 = int_to_ptr.hbm [resolvable:$true] %s339_s23 }
  0x20   : > { %12282 = dma.hbm_to_vmem [thread:$0]  (!%p12728_p10), %s340_s23, 27648, %s342_s25, [#allocation10], %s12611_s11, %s12611_s11, %s12612_s12  }
  0x21   : > { %s32_s28 = ssub.s32 %s12600_s16, %s12751_s30  ;;  %p42_p12 = scmp.ne.s32.totalorder %s12596_s15, %s12592_s14 }
  0x22   : > { %p33_p13 = scmp.eq.s32.totalorder %s32_s28, 0  ;;  %p43_p0 = scmp.eq.s32.totalorder %s12600_s16, 0 }
  0x23   : > { %p12761_p3 = por %p261_p2, %p42_p12  ;;  %p12295_p5 = scmp.lt.s32.totalorder %s12600_s16, 2 }
  0x24   : > { %s12767_s2 = scalar_select %p33_p13, %s12596_s15, %s35_s21  }
  0x25   : > { %p44_p7 = por %p43_p0, %p42_p12  ;;  %s358_s26 = sand.u32 1, %s12596_s15  }
  0x26   : > { %16218 = sst [smem:[#allocation18_spill]] %s12767_s2  ;;  %s12247_s27 = smul.u32 480, %s358_s26 }
  0x27   : > { %s12248_s11 = smul.u32 480, %s12600_s16  ;;  %p12771_p9 = pnand %p12295_p5, %p44_p7 }
  0x28   : > { %s362_s25 = scalar_lea.vmem [#allocation3], %s12247_s27  ;;  %s359_s21 = scalar_lea.sflag [#allocation4], %s358_s26 }
  0x29   : > { %s367_s22 = scalar_lea.hbm %s16192_s0, %s12248_s11  ;;  %s370_s28 = sshll.u32 %s362_s25, 4  ;;  %s371_s28 = int_to_ptr.vmem [resolvable:$true] %s370_s28 }
  0x2a   : > { %s368_s4 = sshll.u32 %s367_s22, 4  ;;  %p12492_p10 = pneg %p12771_p9  ;;  %s369_s4 = int_to_ptr.hbm [resolvable:$true] %s368_s4 }
  0x2b   : > { %s12488_s6 = sshra.s32 %s369_s4, 4  ;;  %s12495_s23 = scalar_lea.hbm %s16192_s0, 960  ;;  %s12489_s6 = int_to_ptr.hbm [resolvable:$true] %s12488_s6 }
  0x2c   : > { %s12490_s8 = scalar_lea.hbm %s12489_s6, 480  ;;  %p12496_p0 = scmp.lt.s32.totalorder %s12489_s6, %s16192_s0 }
  0x2d   : > { %p12491_p2 = scmp.ne.s32.totalorder %s12489_s6, %s12490_s8  ;;  %p12497_p5 = scmp.lt.s32.totalorder %s12495_s23, %s12490_s8 }
  0x2f   : > { %p12493_p12 = pnand %p12492_p10, %p12491_p2  ;;  %p12498_p7 = por %p12497_p5, %p12496_p0 }
  0x31   : > { %p12494_p13 = pneg %p12493_p12 }
  0x33   : > { %p12499_p11 = pnand %p12498_p7, %p12494_p13 }
  0x35   : > { %12502 = shalt.err (!%p12499_p11)
}
  0x36   : > { %s12616_s26 = smov 128   ;;  %s12617_s27 = smov 8  }
  0x37   : > { %12286 = dma.hbm_to_vmem [thread:$0]  (!%p12771_p9), %s369_s4, 7680, %s371_s28, %s359_s21, %s12616_s26, %s12616_s26, %s12617_s27  }
  0x38   : > { %382 = sbr.rel (%p12720_p8) target bundleno = 1933 (0x78d), region = 60  ;;  %s12791_s15 = sand.u32 (!%p12720_p8), 1, %s12592_s14  }
  0x39   : > { %s12249_s2 = smul.u32 (!%p12720_p8), 480, %s12791_s15  ;;  %s385_s6 = scalar_lea.sflag (!%p12720_p8), [#allocation4], %s12791_s15 }
  0x3b   : > { %s12795_s8 = scalar_lea.vmem (!%p12720_p8), [#allocation3], %s12249_s2 }
  0x3d   : > { %12571 = dma.done.wait (%p12707_p4), %s385_s6, 7680  }
  0x3e   : > { %12573 = vsyncadd (%p12707_p4), %s385_s6, 4294959616 }
  0x3f   : > { %12575 = dma.done.wait (%p49_p1), [#allocation7], 10240  }
  0x40   : > { %12577 = vsyncadd (%p49_p1), [#allocation7], 4294957056 }
  0x41   : > { %12579 = dma.done.wait (%p49_p1), [#allocation10], 53248  }
  0x42   : > { %12581 = vsyncadd (%p49_p1), [#allocation10], 4294914048  ;;  %s9226_s4 = sshll.u32 %s12791_s15, 8  ;;  %v12618_v0 = vmov 0   ;;  %s12812_s24 = smov 0  }
  0x43   : > { %447 = vst [vmem:[#allocation2] sm:$0xff] %v12618_v0  ;;  %s12810_s19 = scalar_lea.vmem [#allocation12], %s9226_s4 }
  0x44   : > { %448 = vst [vmem:[#allocation2 + $0x8] sm:$0xf] %v12618_v0 }
  0x45   : > { %449 = vst [vmem:[#allocation2 + $0xc] sm:$0xff] %v12618_v0 }
  0x46   : > { %450 = vst [vmem:[#allocation2 + $0x14] sm:$0xf] %v12618_v0 }
  0x47   : > { %451 = vst [vmem:[#allocation2 + $0x18] sm:$0xff] %v12618_v0 }
  0x48   : > { %452 = vst [vmem:[#allocation2 + $0x20] sm:$0xf] %v12618_v0 }
  0x49   : > { %454 = vst [vmem:[#allocation2 + $0x264] sm:$0xff] %v12618_v0 }
  0x4a   : > { %455 = vst [vmem:[#allocation2 + $0x26c] sm:$0xf] %v12618_v0 }
  0x4b   : > { %456 = vst [vmem:[#allocation2 + $0x270] sm:$0xff] %v12618_v0 }
  0x4c   : > { %457 = vst [vmem:[#allocation2 + $0x278] sm:$0xf] %v12618_v0 }
  0x4d   : > { %458 = vst [vmem:[#allocation2 + $0x27c] sm:$0xff] %v12618_v0 }
  0x4e   : > { %459 = vst [vmem:[#allocation2 + $0x284] sm:$0xf] %v12618_v0 }
  0x4f LB: >> { %v11653_v1 = vld [vmem:[#allocation6 + $0x38] sm:$0xff]  ;;  %v11652_v4 = vld [vmem:[#allocation6 + $0x30] sm:$0xff]  ;;  %v11651_v7 = vld [vmem:[#allocation6 + $0x28] sm:$0xff]  ;;  %s9229_s12 = smul.u32 96, %s12604_s24  ;;  %v12619_v25 = vmov 0   ;;  %s12604_s24 = sphi %s12812_s24, %s465_s24  }
  0x50   : >> { %v11669_v2 = vld [vmem:[#allocation8 + $0x78] sm:$0xff]  ;;  %552 = vmatpush.bf16.msra.mxu0 %v11653_v1  ;;  %12199 = vmatpush.bf16.msra.mxu3 %v11653_v1  ;;  %v11668_v5 = vld [vmem:[#allocation8 + $0x70] sm:$0xff]  ;;  %v11667_v8 = vld [vmem:[#allocation8 + $0x68] sm:$0xff]  ;;  %s9275_s2 = smul.u32 144, %s12604_s24  ;;  %s465_s24 = sadd.s32 1, %s12604_s24  }
  0x51   : >> { %v11661_v3 = vld [vmem:[#allocation8 + $0x38] sm:$0xff]  ;;  %829 = vmatpush.bf16.msra.mxu1 %v11669_v2  ;;  %v11660_v6 = vld [vmem:[#allocation8 + $0x30] sm:$0xff]  ;;  %v11659_v9 = vld [vmem:[#allocation8 + $0x28] sm:$0xff]  ;;  %s12819_s22 = scalar_lea.vmem %s12795_s8, %s9229_s12 [#allocation3]  ;;  %12361 = vset.pattern.permute.xlu0 %v12619_v25  ;;  %p462_p1 = scmp.ge.s32.totalorder %s465_s24, 4  }
  0x52   : >> { %940 = vmatpush.bf16.msra.mxu2 %v11661_v3  ;;  %v11650_v10 = vld [vmem:[#allocation6 + $0x20] sm:$0xff]  ;;  %v11649_v13 = vld [vmem:[#allocation6 + $0x18] sm:$0xff]  ;;  %v11648_v16 = vld [vmem:[#allocation6 + $0x10] sm:$0xff]  ;;  %12362 = vset.pattern.permute.xlu1 %v12619_v25  ;;  %s12990_s6 = scalar_lea.vmem [#allocation2], %s9275_s2  ;;  %s15126_s21 = smov (%p462_p1), 0  }
  0x53   : >> { %v11666_v11 = vld [vmem:[#allocation8 + $0x60] sm:$0xff]  ;;  %v11665_v14 = vld [vmem:[#allocation8 + $0x58] sm:$0xff]  ;;  %v11664_v17 = vld [vmem:[#allocation8 + $0x50] sm:$0xff]  ;;  %12363 = vset.pattern.permute.xlu2 %v12619_v25 }
  0x54   : >> { %553 = vmatpush.bf16.msra.mxu0 %v11652_v4  ;;  %12200 = vmatpush.bf16.msra.mxu3 %v11652_v4  ;;  %v11658_v12 = vld [vmem:[#allocation8 + $0x20] sm:$0xff]  ;;  %v11657_v15 = vld [vmem:[#allocation8 + $0x18] sm:$0xff]  ;;  %v11656_v18 = vld [vmem:[#allocation8 + $0x10] sm:$0xff] }
  0x55   : >> { %830 = vmatpush.bf16.msra.mxu1 %v11668_v5  ;;  %v11647_v19 = vld [vmem:[#allocation6 + $0x8] sm:$0xff]  ;;  %v11646_v22 = vld [vmem:[#allocation6] sm:$0xff]  ;;  %v670_v26 = vld [vmem:[%s16193_s1] sm:$0xff] }
  0x56   : >> { %941 = vmatpush.bf16.msra.mxu2 %v11660_v6  ;;  %v11663_v20 = vld [vmem:[#allocation8 + $0x48] sm:$0xff]  ;;  %v11662_v23 = vld [vmem:[#allocation8 + $0x40] sm:$0xff]  ;;  %v12828_v27 = vld [vmem:[%s12819_s22 + $0x38] sm:$0xff]  ;;  %675 = vperm.xlu0 %12361, %v670_v26  }
  0x57   : >> { %v11655_v21 = vld [vmem:[#allocation8 + $0x8] sm:$0xff]  ;;  %v12834_v29 = vld [vmem:[%s12819_s22 + $0x58] sm:$0xff]  ;;  %v11654_v30 = vld [vmem:[#allocation8] sm:$0xff] }
  0x58   : >> { %554 = vmatpush.bf16.msra.mxu0 %v11651_v7  ;;  %12201 = vmatpush.bf16.msra.mxu3 %v11651_v7  ;;  %v12822_v24 = vld [vmem:[%s12819_s22 + $0x30] sm:$0xff]  ;;  %v9290_v31 = vld [vmem:[%s12819_s22 + $0x18] sm:$0xff]  ;;  %v9291_v32 = vld [vmem:[%s12819_s22 + $0x20] sm:$0xff] }
  0x59   : >> { %831 = vmatpush.bf16.msra.mxu1 %v11667_v8  ;;  %v12831_v28 = vld [vmem:[%s12819_s22 + $0x50] sm:$0xff]  ;;  %v11701_v33 = vld [vmem:[#allocation8 + $0x178] sm:$0xff]  ;;  %v12840_v35 = vpack.c.bf16 %v12828_v27, %v12822_v24  ;;  %v12846_v37 = vpack.c.bf16 %v9291_v32, %v9290_v31  ;;  %v11684_v40 = vld [vmem:[#allocation8 + $0xf0] sm:$0xff] }
  0x5a   : >> { %942 = vmatpush.bf16.msra.mxu2 %v11659_v9  ;;  %v11685_v34 = vld [vmem:[#allocation8 + $0xf8] sm:$0xff]  ;;  %v12844_v36 = vpack.c.bf16 %v12834_v29, %v12831_v28  ;;  %v11700_v41 = vld [vmem:[#allocation8 + $0x170] sm:$0xff]  ;;  %v671_v42 = vld [vmem:[%s16193_s1 + $0x8] sm:$0xff] }
  0x5b   : >> { %v11693_v38 = vld [vmem:[#allocation8 + $0x138] sm:$0xff]  ;;  %v11692_v43 = vld [vmem:[#allocation8 + $0x130] sm:$0xff]  ;;  %v672_v45 = vld [vmem:[%s16193_s1 + $0x10] sm:$0xff] }
  0x5c   : >> { %555 = vmatpush.bf16.msra.mxu0 %v11650_v10  ;;  %12202 = vmatpush.bf16.msra.mxu3 %v11650_v10  ;;  %v11677_v39 = vld [vmem:[#allocation8 + $0xb8] sm:$0xff]  ;;  %v11676_v44 = vld [vmem:[#allocation8 + $0xb0] sm:$0xff]  ;;  %v11683_v46 = vld [vmem:[#allocation8 + $0xe8] sm:$0xff] }
  0x5d   : >> { %832 = vmatpush.bf16.msra.mxu1 %v11666_v11  ;;  %v11699_v47 = vld [vmem:[#allocation8 + $0x168] sm:$0xff]  ;;  %685 = vperm.xlu1 %12362, %v672_v45   ;;  %v11682_v50 = vld [vmem:[#allocation8 + $0xe0] sm:$0xff]  ;;  %v9232_v52 = vld [vmem:[%s12819_s22 + $0x40] sm:$0xff] }
  0x5e   : >> { %943 = vmatpush.bf16.msra.mxu2 %v11658_v12  ;;  %680 = vperm.xlu0 %12361, %v671_v42   ;;  %v11691_v48 = vld [vmem:[#allocation8 + $0x128] sm:$0xff]  ;;  %v11698_v51 = vld [vmem:[#allocation8 + $0x160] sm:$0xff]  ;;  %v12863_v54 = vld [vmem:[%s12819_s22 + $0x60] sm:$0xff] }
  0x5f   : >> { %v11675_v49 = vld [vmem:[#allocation8 + $0xa8] sm:$0xff]  ;;  %v12860_v53 = vld [vmem:[%s12819_s22 + $0x48] sm:$0xff]  ;;  %v11681_v59 = vld [vmem:[#allocation8 + $0xd8] sm:$0xff] }
  0x60   : >> { %556 = vmatpush.bf16.msra.mxu0 %v11649_v13  ;;  %12203 = vmatpush.bf16.msra.mxu3 %v11649_v13  ;;  %v12866_v55 = vld [vmem:[%s12819_s22 + $0x68] sm:$0xff]  ;;  %v12870_v60 = vpack.c.bf16 %v12860_v53, %v9232_v52  ;;  %v11673_v63 = vld [vmem:[#allocation8 + $0x98] sm:$0xff]  ;;  %v11680_v0 = vld [vmem:[#allocation8 + $0xd0] sm:$0xff]  ;;  %v12891_v13 = vpack.c.bf16 %v9232_v52, %v12828_v27 }
  0x61   : >> { %833 = vmatpush.bf16.msra.mxu1 %v11665_v14  ;;  %v9292_v56 = vld [vmem:[%s12819_s22 + $0x28] sm:$0xff]  ;;  %v12874_v61 = vpack.c.bf16 %v12866_v55, %v12863_v54  ;;  %v11697_v1 = vld [vmem:[#allocation8 + $0x158] sm:$0xff]  ;;  %v11672_v3 = vld [vmem:[#allocation8 + $0x90] sm:$0xff] }
  0x62   : >> { %944 = vmatpush.bf16.msra.mxu2 %v11657_v15  ;;  %v11674_v57 = vld [vmem:[#allocation8 + $0xa0] sm:$0xff]  ;;  %v12877_v62 = vpack.c.bf16 %v12822_v24, %v9292_v56  ;;  %v11689_v2 = vld [vmem:[#allocation8 + $0x118] sm:$0xff]  ;;  %v11679_v4 = vld [vmem:[#allocation8 + $0xc8] sm:$0xff] }
  0x63   : >> { %v11690_v58 = vld [vmem:[#allocation8 + $0x120] sm:$0xff]  ;;  %v11696_v5 = vld [vmem:[#allocation8 + $0x150] sm:$0xff]  ;;  %v11671_v6 = vld [vmem:[#allocation8 + $0x88] sm:$0xff] }
  0x64   : >> { %557 = vmatpush.bf16.msra.mxu0 %v11648_v16  ;;  %12204 = vmatpush.bf16.msra.mxu3 %v11648_v16  ;;  %v11678_v7 = vld [vmem:[#allocation8 + $0xc0] sm:$0xff]  ;;  %v11717_v8 = vld [vmem:[#allocation8 + $0x1f8] sm:$0xff]  ;;  %v9238_v9 = vld [vmem:[%s12819_s22 + $0x70] sm:$0xff] }
  0x65   : >> { %834 = vmatpush.bf16.msra.mxu1 %v11664_v17  ;;  %v12885_v10 = vld [vmem:[%s12819_s22 + $0x78] sm:$0xff]  ;;  %v11670_v11 = vld [vmem:[#allocation8 + $0x80] sm:$0xff]  ;;  %v11695_v16 = vld [vmem:[#allocation8 + $0x148] sm:$0xff] }
  0x66   : >> { %945 = vmatpush.bf16.msra.mxu2 %v11656_v18  ;;  %v12888_v12 = vpack.c.bf16 %v12885_v10, %v9238_v9  ;;  %v11688_v14 = vld [vmem:[#allocation8 + $0x110] sm:$0xff]  ;;  %v11709_v17 = vld [vmem:[#allocation8 + $0x1b8] sm:$0xff]  ;;  %v11687_v18 = vld [vmem:[#allocation8 + $0x108] sm:$0xff] }
  0x67   : >> { %v11716_v15 = vld [vmem:[#allocation8 + $0x1f0] sm:$0xff]  ;;  %v11694_v24 = vld [vmem:[#allocation8 + $0x140] sm:$0xff]  ;;  %v11725_v31 = vld [vmem:[#allocation8 + $0x238] sm:$0xff] }
  0x68   : >> { %558 = vmatpush.bf16.msra.mxu0 %v11647_v19  ;;  %12205 = vmatpush.bf16.msra.mxu3 %v11647_v19  ;;  %v11715_v19 = vld [vmem:[#allocation8 + $0x1e8] sm:$0xff]  ;;  %v11686_v25 = vld [vmem:[#allocation8 + $0x100] sm:$0xff]  ;;  %v11708_v26 = vld [vmem:[#allocation8 + $0x1b0] sm:$0xff] }
  0x69   : >> { %835 = vmatpush.bf16.msra.mxu1 %v11663_v20  ;;  %v12898_v20 = vld [vmem:[%s12819_s22 + $0x80] sm:$0xff]  ;;  %v11714_v27 = vld [vmem:[#allocation8 + $0x1e0] sm:$0xff]  ;;  %v11707_v32 = vld [vmem:[#allocation8 + $0x1a8] sm:$0xff] }
  0x6a   : >> { %946 = vmatpush.bf16.msra.mxu2 %v11655_v21  ;;  %v12901_v21 = vld [vmem:[%s12819_s22 + $0x88] sm:$0xff]  ;;  %v11711_v42 = vld [vmem:[#allocation8 + $0x1c8] sm:$0xff] }
  0x6b   : >> { %v11730_v45 = vld [vmem:[#allocation9 + $0x20] sm:$0xff] }
  0x6c   : >> { %559 = vmatpush.bf16.msra.mxu0 %v11646_v22  ;;  %12206 = vmatpush.bf16.msra.mxu3 %v11646_v22  ;;  %v12905_v22 = vpack.c.bf16 %v12901_v21, %v12898_v20 }
  0x6d   : >> { %836 = vmatpush.bf16.msra.mxu1 %v11662_v23  ;;  %v12909_v23 = vpack.c.bf16 %v12831_v28, %v12860_v53  ;;  %v12917_v28 = vpack.c.bf16 %v12863_v54, %v12834_v29  ;;  %v12924_v29 = vpack.c.bf16 %v9238_v9, %v12866_v55  ;;  %v603_v53 = vlaneseq  ;;  %v11749_v55 = vld [vmem:[#allocation9 + $0xb8] sm:$0xff] }
  0x6e   : >> { %947 = vmatpush.bf16.msra.mxu2 %v11654_v30  ;;  %v11733_v30 = vld [vmem:[#allocation9 + $0x38] sm:$0xff] }
  0x6f   : >> { %560 = vmatmul.bf16.vlgmr.msra.gmra.mxu0 %v12840_v35  ;;  %570 = vmatmul.bf16.vlgmr.msra.gmra.mxu3 %v12844_v36  ;;  %v12946_v54 = vshrl.u32 %v603_v53, 7 }
  0x70   : >> { %1203 = vmatpush.bf16.msrb.mxu0 %v11685_v34  ;;  %837 = vmatmul.bf16.vlgmr.msra.gmra.mxu1 %v12846_v37  ;;  %v11732_v34 = vld [vmem:[#allocation9 + $0x30] sm:$0xff] }
  0x71   : >> { %948 = vmatmul.bf16.vlgmr.msra.gmra.mxu2 %v12846_v37  ;;  %1319 = vmatpush.bf16.msrb.mxu1 %v11693_v38  ;;  %v11706_v38 = vld [vmem:[#allocation8 + $0x1a0] sm:$0xff]  ;;  %vm605_vm0 = vcmp.lt.s32.totalorder %v12946_v54, 7  ;;  %vm1095_vm13 = vcmp.lt.s32.totalorder %v12946_v54, 6  ;;  %vm2192_vm14 = vcmp.lt.s32.totalorder %v12946_v54, 1 }
  0x72   : >> { %1459 = vmatpush.bf16.msrb.mxu2 %v11701_v33  ;;  %1044 = vmatpush.bf16.msrb.mxu3 %v11677_v39  ;;  %v11713_v33 = vld [vmem:[#allocation8 + $0x1d8] sm:$0xff]  ;;  %v11712_v39 = vld [vmem:[#allocation8 + $0x1d0] sm:$0xff] }
  0x74   : >> { %1204 = vmatpush.bf16.msrb.mxu0 %v11684_v40  ;;  %v11731_v40 = vld [vmem:[#allocation9 + $0x28] sm:$0xff] }
  0x75   : >> { %1320 = vmatpush.bf16.msrb.mxu1 %v11692_v43  ;;  %v11710_v43 = vld [vmem:[#allocation8 + $0x1c0] sm:$0xff] }
  0x76   : >> { %1460 = vmatpush.bf16.msrb.mxu2 %v11700_v41  ;;  %1045 = vmatpush.bf16.msrb.mxu3 %v11676_v44  ;;  %v11723_v41 = vld [vmem:[#allocation8 + $0x228] sm:$0xff]  ;;  %v11705_v44 = vld [vmem:[#allocation8 + $0x198] sm:$0xff] }
  0x78   : >> { %1205 = vmatpush.bf16.msrb.mxu0 %v11683_v46  ;;  %v11722_v46 = vld [vmem:[#allocation8 + $0x220] sm:$0xff] }
  0x79   : >> { %1321 = vmatpush.bf16.msrb.mxu1 %v11691_v48  ;;  %v11729_v48 = vld [vmem:[#allocation9 + $0x18] sm:$0xff] }
  0x7a   : >> { %1461 = vmatpush.bf16.msrb.mxu2 %v11699_v47  ;;  %1046 = vmatpush.bf16.msrb.mxu3 %v11675_v49  ;;  %v11704_v47 = vld [vmem:[#allocation8 + $0x190] sm:$0xff]  ;;  %v11703_v49 = vld [vmem:[#allocation8 + $0x188] sm:$0xff] }
  0x7c   : >> { %1206 = vmatpush.bf16.msrb.mxu0 %v11682_v50  ;;  %v11721_v50 = vld [vmem:[#allocation8 + $0x218] sm:$0xff] }
  0x7d   : >> { %1322 = vmatpush.bf16.msrb.mxu1 %v11690_v58 }
  0x7e   : >> { %1462 = vmatpush.bf16.msrb.mxu2 %v11698_v51  ;;  %1047 = vmatpush.bf16.msrb.mxu3 %v11674_v57 }
  0x7f   : >> { %565 = vmatmul.bf16.gmra.mxu0 %v12870_v60  ;;  %575 = vmatmul.bf16.gmra.mxu3 %v12874_v61 }
  0x80   : >> { %1207 = vmatpush.bf16.msrb.mxu0 %v11681_v59  ;;  %842 = vmatmul.bf16.gmra.mxu1 %v12877_v62 }
  0x81   : >> { %953 = vmatmul.bf16.gmra.mxu2 %v12877_v62  ;;  %1323 = vmatpush.bf16.msrb.mxu1 %v11689_v2 }
  0x82   : >> { %1048 = vmatpush.bf16.msrb.mxu3 %v11673_v63  ;;  %1463 = vmatpush.bf16.msrb.mxu2 %v11697_v1 }
  0x84   : >> { %1208 = vmatpush.bf16.msrb.mxu0 %v11680_v0 }
  0x85   : >> { %1324 = vmatpush.bf16.msrb.mxu1 %v11688_v14 }
  0x86   : >> { %1049 = vmatpush.bf16.msrb.mxu3 %v11672_v3  ;;  %1464 = vmatpush.bf16.msrb.mxu2 %v11696_v5  ;;  %v11728_v3 = vld [vmem:[#allocation9 + $0x10] sm:$0xff] }
  0x87   : >> { %v11748_v5 = vld [vmem:[#allocation9 + $0xb0] sm:$0xff] }
  0x88   : >> { %1209 = vmatpush.bf16.msrb.mxu0 %v11679_v4  ;;  %v11720_v4 = vld [vmem:[#allocation8 + $0x210] sm:$0xff] }
  0x89   : >> { %1325 = vmatpush.bf16.msrb.mxu1 %v11687_v18 }
  0x8a   : >> { %1050 = vmatpush.bf16.msrb.mxu3 %v11671_v6  ;;  %1465 = vmatpush.bf16.msrb.mxu2 %v11695_v16 }
  0x8c   : >> { %1210 = vmatpush.bf16.msrb.mxu0 %v11678_v7 }
  0x8d   : >> { %1326 = vmatpush.bf16.msrb.mxu1 %v11686_v25 }
  0x8e   : >> { %1051 = vmatpush.bf16.msrb.mxu3 %v11670_v11  ;;  %1466 = vmatpush.bf16.msrb.mxu2 %v11694_v24 }
  0x8f   : >> { %580 = vmatmul.bf16.gmra.mxu3 %v12888_v12  ;;  %1211 = vmatmul.bf16.vlgmr.msrb.gmra.mxu0 %v12840_v35 }
  0x90   : >> { %1736 = vmatpush.bf16.msra.mxu0 %v11717_v8  ;;  %847 = vmatmul.bf16.gmra.mxu1 %v12891_v13 }
  0x91   : >> { %958 = vmatmul.bf16.gmra.mxu2 %v12891_v13  ;;  %1876 = vmatpush.bf16.msra.mxu1 %v11725_v31 }
  0x92   : >> { %1620 = vmatpush.bf16.msra.mxu3 %v11709_v17  ;;  %2141 = vmatpush.bf16.msra.mxu2 %v11733_v30 }
  0x94   : >> { %1737 = vmatpush.bf16.msra.mxu0 %v11716_v15 }
  0x96   : >> { %1621 = vmatpush.bf16.msra.mxu3 %v11708_v26  ;;  %2142 = vmatpush.bf16.msra.mxu2 %v11732_v34 }
  0x98   : >> { %1738 = vmatpush.bf16.msra.mxu0 %v11715_v19 }
  0x9a   : >> { %1622 = vmatpush.bf16.msra.mxu3 %v11707_v32  ;;  %2143 = vmatpush.bf16.msra.mxu2 %v11731_v40  ;;  %v11727_v32 = vld [vmem:[#allocation9 + $0x8] sm:$0xff] }
  0x9c   : >> { %1739 = vmatpush.bf16.msra.mxu0 %v11714_v27 }
  0x9e   : >> { %1623 = vmatpush.bf16.msra.mxu3 %v11706_v38  ;;  %2144 = vmatpush.bf16.msra.mxu2 %v11730_v45 }
  0x9f   : >> { %585 = vmatmul.bf16.gmra.mxu3 %v12905_v22  ;;  %1216 = vmatmul.bf16.gmra.mxu0 %v12870_v60 }
  0xa0   : >> { %852 = vmatmul.bf16.gmra.mxu1 %v12909_v23  ;;  %1740 = vmatpush.bf16.msra.mxu0 %v11713_v33 }
  0xa1   : >> { %963 = vmatmul.bf16.gmra.mxu2 %v12909_v23 }
  0xa2   : >> { %1624 = vmatpush.bf16.msra.mxu3 %v11705_v44  ;;  %2145 = vmatpush.bf16.msra.mxu2 %v11729_v48 }
  0xa4   : >> { %1741 = vmatpush.bf16.msra.mxu0 %v11712_v39 }
  0xa6   : >> { %1625 = vmatpush.bf16.msra.mxu3 %v11704_v47  ;;  %2146 = vmatpush.bf16.msra.mxu2 %v11728_v3 }
  0xa8   : >> { %1742 = vmatpush.bf16.msra.mxu0 %v11711_v42 }
  0xaa   : >> { %1626 = vmatpush.bf16.msra.mxu3 %v11703_v49  ;;  %2147 = vmatpush.bf16.msra.mxu2 %v11727_v32 }
  0xac   : >> { %1743 = vmatpush.bf16.msra.mxu0 %v11710_v43 }
  0xaf   : >> { %1052 = vmatmul.bf16.vlgmr.msrb.gmra.mxu3 %v12846_v37  ;;  %1221 = vmatmul.bf16.gmra.mxu0 %v12844_v36  ;;  %v11724_v37 = vld [vmem:[#allocation8 + $0x230] sm:$0xff] }
  0xb0   : >> { %857 = vmatmul.bf16.gmra.mxu1 %v12917_v28  ;;  %2398 = vmatpush.bf16.msrb.mxu0 %v11749_v55 }
  0xb1   : >> { %968 = vmatmul.bf16.gmra.mxu2 %v12917_v28  ;;  %1877 = vmatpush.bf16.msra.mxu1 %v11724_v37 }
  0xb4   : >> { %2399 = vmatpush.bf16.msrb.mxu0 %v11748_v5 }
  0xb5   : >> { %1878 = vmatpush.bf16.msra.mxu1 %v11723_v41 }
  0xb9   : >> { %1879 = vmatpush.bf16.msra.mxu1 %v11722_v46 }
  0xbd   : >> { %1880 = vmatpush.bf16.msra.mxu1 %v11721_v50 }
  0xbf   : >> { %1057 = vmatmul.bf16.gmra.mxu3 %v12877_v62  ;;  %1226 = vmatmul.bf16.gmra.mxu0 %v12874_v61 }
  0xc0   : >> { %862 = vmatmul.bf16.gmra.mxu1 %v12924_v29 }
  0xc1   : >> { %973 = vmatmul.bf16.gmra.mxu2 %v12924_v29  ;;  %1881 = vmatpush.bf16.msra.mxu1 %v11720_v4 }
  0xc8   : >> { %v12958_v1 = vpop.permute.xlu0 %675 }
  0xcf   : >> { %1062 = vmatmul.bf16.gmra.mxu3 %v12891_v13  ;;  %1231 = vmatmul.bf16.gmra.mxu0 %v12888_v12 }
  0xd0   : >> { %1327 = vmatmul.bf16.vlgmr.msrb.gmra.mxu1 %v12840_v35  ;;  %v12986_v37 = vpop.permute.xlu0 %680 }
  0xd1   : >> { %1467 = vmatmul.bf16.vlgmr.msrb.gmra.mxu2 %v12840_v35  ;;  %v11702_v35 = vld [vmem:[#allocation8 + $0x180] sm:$0xff] }
  0xd2   : >> { %1627 = vmatpush.bf16.msra.mxu3 %v11702_v35 }
  0xdf   : >> { %1067 = vmatmul.bf16.gmra.mxu3 %v12909_v23  ;;  %1236 = vmatmul.bf16.gmra.mxu0 %v12905_v22 }
  0xe0   : >> { %1332 = vmatmul.bf16.gmra.mxu1 %v12870_v60 }
  0xe1   : >> { %1472 = vmatmul.bf16.gmra.mxu2 %v12870_v60 }
  0xec   : >> { %v12938_v51 = vpop.f32.mrf.mxu0 }
  0xed   : >> { %v12940_v52 = vpop.f32.mrf.mxu1  ;;  %v591_v57 = vrot.slane %v12938_v51, 1 }
  0xee   : >> { %v868_v63 = vrot.slane %v12940_v52, 1  ;;  %v2004_v52 = vld [vmem:[%s16193_s1 + $0x8] sm:$0xff] }
  0xef   : >> { %1072 = vmatmul.bf16.gmra.mxu3 %v12917_v28  ;;  %1744 = vmatmul.bf16.vlgmr.msra.gmra.mxu0 %v12909_v23 }
  0xf0   : >> { %1337 = vmatmul.bf16.gmra.mxu1 %v12844_v36  ;;  %2013 = vperm.xlu2 %12363, %v2004_v52   ;;  %v11779_v52 = vld [vmem:[#allocation9 + $0x1a8] sm:$0xff] }
  0xf1   : >> { %1477 = vmatmul.bf16.gmra.mxu2 %v12844_v36  ;;  %v12956_v36 = vld [vmem:[%s16195_s3] ss:$0 sm:$0xff] }
  0xf2   : >> { %v12948_v56 = vpop.f32.mrf.mxu3 }
  0xf3   : >> { %v595_v8 = vrot.slane %v12948_v56, 1 }
  0xf4   : >> { %v949_v58 = vpop.f32.mrf.mxu2  ;;  %v563_v59 = vpop.f32.mrf.mxu0 }
  0xf5   : >> { %v592_v60 = vrot.slane %v563_v59, 1  ;;  %v840_v62 = vpop.f32.mrf.mxu1 }
  0xf6   : >> { %v869_v0 = vrot.slane %v840_v62, 1  ;;  %v11741_v62 = vld [vmem:[#allocation9 + $0x78] sm:$0xff] }
  0xf7   : >> { %v616_v2 = vsel %vm605_vm0, %v591_v57, %v592_v60  ;;  %2282 = vmatpush.bf16.msrb.mxu3 %v11741_v62  ;;  %v11765_v62 = vld [vmem:[#allocation9 + $0x138] sm:$0xff] }
  0xf8   : >> { %v622_v6 = vadd.f32 %v12956_v36, %v616_v2  ;;  %v890_v7 = vsel %vm605_vm0, %v868_v63, %v869_v0 }
  0xf9   : >> { %v12970_v9 = vadd.f32 %v949_v58, %v890_v7  ;;  %v13010_v7 = vpop.permute.xlu1 %685 }
  0xfa   : >> { %v573_v11 = vpop.f32.mrf.mxu3  ;;  %vm634_vm1 = vcmp.gt.f32.partialorder %v622_v6, 0.0  ;;  %v646_v13 = vmul.f32 0.01, %v622_v6 }
  0xfb   : >> { %v596_v14 = vrot.slane %v573_v11, 1 }
  0xfc   : >> { %v951_v15 = vpop.f32.mrf.mxu2  ;;  %v566_v16 = vpop.f32.mrf.mxu0  ;;  %v658_v17 = vsel %vm634_vm1, %v622_v6, %v646_v13 }
  0xfd   : >> { %v612_v18 = vsel %vm605_vm0, %v595_v8, %v596_v14  ;;  %v593_v19 = vrot.slane %v566_v16, 1  ;;  %v843_v24 = vpop.f32.mrf.mxu1  ;;  %v688_v25 = vmul.f32 %v12958_v1, %v658_v17  ;;  %v11726_v17 = vld [vmem:[#allocation9] sm:$0xff] }
  0xfe   : >> { %v626_v26 = vadd.f32 %v12956_v36, %v612_v18  ;;  %v870_v27 = vrot.slane %v843_v24, 1  ;;  %v11718_v18 = vld [vmem:[#allocation8 + $0x200] sm:$0xff]  ;;  %2148 = vmatpush.bf16.msra.mxu2 %v11726_v17 }
  0xff   : >> { %v615_v30 = vsel %vm605_vm0, %v592_v60, %v593_v19  ;;  %v700_v31 = vpack.c.bf16 %v688_v25, %v688_v25  ;;  %1077 = vmatmul.bf16.gmra.mxu3 %v12924_v29  ;;  %1749 = vmatmul.bf16.gmra.mxu0 %v12917_v28  ;;  %v11719_v60 = vld [vmem:[#allocation8 + $0x208] sm:$0xff] }
 0x100   : >> { %v623_v33 = vadd.f32 %v12956_v36, %v615_v30  ;;  %v889_v34 = vsel %vm605_vm0, %v869_v0, %v870_v27  ;;  %1342 = vmatmul.bf16.gmra.mxu1 %v12874_v61  ;;  %vm638_vm2 = vcmp.gt.f32.partialorder %v626_v26, 0.0  ;;  %v650_v38 = vmul.f32 0.01, %v626_v26  ;;  %v11747_v0 = vld [vmem:[#allocation9 + $0xa8] sm:$0xff] }
 0x101   : >> { %1482 = vmatmul.bf16.gmra.mxu2 %v12874_v61  ;;  %v12988_v39 = vadd.f32 %v951_v15, %v889_v34  ;;  %9276 = vst [vmem:[%s12990_s6 + $0x24] sm:$0xf] %v700_v31  ;;  %1882 = vmatpush.bf16.msra.mxu1 %v11719_v60 }
 0x102   : >> { %v647_v40 = vmul.f32 0.01, %v623_v33  ;;  %v576_v41 = vpop.f32.mrf.mxu3  ;;  %vm635_vm3 = vcmp.gt.f32.partialorder %v623_v33, 0.0  ;;  %v662_v42 = vsel %vm638_vm2, %v626_v26, %v650_v38  ;;  %2400 = vmatpush.bf16.msrb.mxu0 %v11747_v0  ;;  %v11757_v0 = vld [vmem:[#allocation9 + $0xf8] sm:$0xff]  ;;  %2678 = vmatpush.bf16.msrb.mxu2 %v11765_v62 }
 0x103   : >> { %v597_v43 = vrot.slane %v576_v41, 1  ;;  %v692_v61 = vmul.f32 %v12986_v37, %v662_v42  ;;  %v11740_v42 = vld [vmem:[#allocation9 + $0x70] sm:$0xff] }
 0x104   : >> { %v954_v44 = vpop.f32.mrf.mxu2  ;;  %v568_v45 = vpop.f32.mrf.mxu0  ;;  %v659_v46 = vsel %vm635_vm3, %v623_v33, %v647_v40  ;;  %2283 = vmatpush.bf16.msrb.mxu3 %v11740_v42 }
 0x105   : >> { %v611_v47 = vsel %vm605_vm0, %v596_v14, %v597_v43  ;;  %v594_v48 = vrot.slane %v568_v45, 1  ;;  %v845_v49 = vpop.f32.mrf.mxu1  ;;  %v689_v50 = vmul.f32 %v12986_v37, %v659_v46  ;;  %v704_v35 = vpack.c.bf16 %v692_v61, %v692_v61  ;;  %1883 = vmatpush.bf16.msra.mxu1 %v11718_v18 }
 0x106   : >> { %v627_v53 = vadd.f32 %v12956_v36, %v611_v47  ;;  %v871_v55 = vrot.slane %v845_v49, 1 }
 0x107   : >> { %v613_v56 = vsel %vm605_vm0, %v594_v48, %v595_v8  ;;  %v614_v58 = vsel %vm605_vm0, %v593_v19, %v594_v48  ;;  %v701_v59 = vpack.c.bf16 %v689_v50, %v689_v50  ;;  %9280 = vst [vmem:[%s12990_s6 + $0x54] sm:$0xf] %v704_v35 }
 0x108   : >> { %v651_v2 = vmul.f32 0.01, %v627_v53  ;;  %v624_v3 = vadd.f32 %v12956_v36, %v614_v58  ;;  %v625_v4 = vadd.f32 %v12956_v36, %v613_v56  ;;  %v888_v5 = vsel %vm605_vm0, %v870_v27, %v871_v55 }
 0x109   : >> { %v13007_v6 = vadd.f32 %v954_v44, %v888_v5  ;;  %9277 = vst [vmem:[%s12990_s6 + $0x30] sm:$0xf] %v701_v59  ;;  %vm639_vm4 = vcmp.gt.f32.partialorder %v627_v53, 0.0  ;;  %v11746_v44 = vld [vmem:[#allocation9 + $0xa0] sm:$0xff]  ;;  %2538 = vmatpush.bf16.msrb.mxu1 %v11757_v0 }
 0x10a   : >> { %vm637_vm5 = vcmp.gt.f32.partialorder %v625_v4, 0.0  ;;  %v649_v8 = vmul.f32 0.01, %v625_v4  ;;  %vm636_vm6 = vcmp.gt.f32.partialorder %v624_v3, 0.0  ;;  %v648_v11 = vmul.f32 0.01, %v624_v3  ;;  %v578_v13 = vpop.f32.mrf.mxu3  ;;  %2401 = vmatpush.bf16.msrb.mxu0 %v11746_v44 }
 0x10b   : >> { %v663_v14 = vsel %vm639_vm4, %v627_v53, %v651_v2  ;;  %v598_v15 = vrot.slane %v578_v13, 1 }
 0x10c   : >> { %v956_v16 = vpop.f32.mrf.mxu2  ;;  %v661_v19 = vsel %vm637_vm5, %v625_v4, %v649_v8  ;;  %v660_v24 = vsel %vm636_vm6, %v624_v3, %v648_v11  ;;  %v693_v25 = vmul.f32 %v13010_v7, %v663_v14  ;;  %v13013_v26 = vpop.f32.mrf.mxu0  ;;  %v11739_v3 = vld [vmem:[#allocation9 + $0x68] sm:$0xff]  ;;  %v11745_v4 = vld [vmem:[#allocation9 + $0x98] sm:$0xff] }
 0x10d   : >> { %v691_v27 = vmul.f32 %v12958_v1, %v661_v19  ;;  %v690_v30 = vmul.f32 %v13010_v7, %v660_v24  ;;  %v610_v31 = vsel %vm605_vm0, %v597_v43, %v598_v15  ;;  %v848_v32 = vpop.f32.mrf.mxu1  ;;  %2284 = vmatpush.bf16.msrb.mxu3 %v11739_v3 }
 0x10e   : >> { %v705_v33 = vpack.c.bf16 %v693_v25, %v693_v25  ;;  %v628_v34 = vadd.f32 %v12956_v36, %v610_v31  ;;  %v872_v38 = vrot.slane %v848_v32, 1  ;;  %2402 = vmatpush.bf16.msrb.mxu0 %v11745_v4  ;;  %v11756_v31 = vld [vmem:[#allocation9 + $0xf0] sm:$0xff]  ;;  %v11738_v32 = vld [vmem:[#allocation9 + $0x60] sm:$0xff] }
 0x10f   : >> { %v703_v40 = vpack.c.bf16 %v691_v27, %v691_v27  ;;  %v702_v41 = vpack.c.bf16 %v690_v30, %v690_v30  ;;  %1628 = vmatmul.bf16.vlgmr.msra.gmra.mxu3 %v12909_v23  ;;  %1754 = vmatmul.bf16.gmra.mxu0 %v12924_v29  ;;  %v11764_v27 = vld [vmem:[#allocation9 + $0x130] sm:$0xff] }
 0x110   : >> { %9281 = vst [vmem:[%s12990_s6 + $0x60] sm:$0xf] %v705_v33  ;;  %vm640_vm7 = vcmp.gt.f32.partialorder %v628_v34, 0.0  ;;  %v652_v43 = vmul.f32 0.01, %v628_v34  ;;  %v887_v61 = vsel %vm605_vm0, %v871_v55, %v872_v38  ;;  %1347 = vmatmul.bf16.gmra.mxu1 %v12888_v12  ;;  %2679 = vmatpush.bf16.msrb.mxu2 %v11764_v27  ;;  %v11744_v33 = vld [vmem:[#allocation9 + $0x90] sm:$0xff] }
 0x111   : >> { %1487 = vmatmul.bf16.gmra.mxu2 %v12888_v12  ;;  %9279 = vst [vmem:[%s12990_s6 + $0x48] sm:$0xf] %v703_v40  ;;  %v13028_v45 = vadd.f32 %v956_v16, %v887_v61  ;;  %2539 = vmatpush.bf16.msrb.mxu1 %v11756_v31  ;;  %v11737_v27 = vld [vmem:[#allocation9 + $0x58] sm:$0xff] }
 0x112   : >> { %9278 = vst [vmem:[%s12990_s6 + $0x3c] sm:$0xf] %v702_v41  ;;  %v664_v46 = vsel %vm640_vm7, %v628_v34, %v652_v43  ;;  %v581_v47 = vpop.f32.mrf.mxu3  ;;  %2285 = vmatpush.bf16.msrb.mxu3 %v11738_v32  ;;  %2403 = vmatpush.bf16.msrb.mxu0 %v11744_v33 }
 0x113   : >> { %v694_v48 = vmul.f32 %v12958_v1, %v664_v46  ;;  %v599_v49 = vrot.slane %v581_v47, 1 }
 0x114   : >> { %v959_v50 = vpop.f32.mrf.mxu2  ;;  %v13032_v35 = vpop.f32.mrf.mxu0 }
 0x115   : >> { %v706_v53 = vpack.c.bf16 %v694_v48, %v694_v48  ;;  %v609_v55 = vsel %vm605_vm0, %v598_v15, %v599_v49  ;;  %v850_v12 = vpop.f32.mrf.mxu1  ;;  %v13045_v15 = vpack.c.bf16 %v12898_v20, %v12885_v10 }
 0x116   : >> { %v629_v56 = vadd.f32 %v12956_v36, %v609_v55  ;;  %v873_v58 = vrot.slane %v850_v12, 1  ;;  %v2059_v12 = vld [vmem:[%s12819_s22] sm:$0xff]  ;;  %2286 = vmatpush.bf16.msrb.mxu3 %v11737_v27 }
 0x117   : >> { %9282 = vst [vmem:[%s12990_s6 + $0x6c] sm:$0xf] %v706_v53  ;;  %v11743_v53 = vld [vmem:[#allocation9 + $0x88] sm:$0xff] }
 0x118   : >> { %vm641_vm8 = vcmp.gt.f32.partialorder %v629_v56, 0.0  ;;  %v653_v59 = vmul.f32 0.01, %v629_v56  ;;  %v886_v60 = vsel %vm605_vm0, %v872_v38, %v873_v58  ;;  %2404 = vmatpush.bf16.msrb.mxu0 %v11743_v53  ;;  %v13120_v53 = vld [vmem:[%s12819_s22 + $0x18] sm:$0xff] }
 0x119   : >> { %v13040_v2 = vadd.f32 %v959_v50, %v886_v60  ;;  %v9517_v50 = vld [vmem:[%s12819_s22 + $0x90] sm:$0xff] }
 0x11a   : >> { %v665_v5 = vsel %vm641_vm8, %v629_v56, %v653_v59  ;;  %v583_v8 = vpop.f32.mrf.mxu3  ;;  %v2060_v56 = vld [vmem:[%s12819_s22 + $0x8] sm:$0xff]  ;;  %v13077_v4 = vpack.c.bf16 %v9517_v50, %v12901_v21  ;;  %v2003_v21 = vld [vmem:[%s16193_s1] sm:$0xff]  ;;  %v2061_v50 = vld [vmem:[%s12819_s22 + $0x10] sm:$0xff] }
 0x11b   : >> { %v695_v11 = vmul.f32 %v12986_v37, %v665_v5  ;;  %v600_v13 = vrot.slane %v583_v8, 1  ;;  %v13081_v8 = vpack.c.bf16 %v2060_v56, %v2059_v12  ;;  %2008 = vperm.xlu1 %12362, %v2003_v21  }
 0x11c   : >> { %v961_v14 = vpop.f32.mrf.mxu2  ;;  %v13047_v16 = vpop.f32.mrf.mxu0 }
 0x11d   : >> { %v707_v17 = vpack.c.bf16 %v695_v11, %v695_v11  ;;  %v608_v18 = vsel %vm605_vm0, %v599_v49, %v600_v13  ;;  %v853_v19 = vpop.f32.mrf.mxu1  ;;  %v11742_v11 = vld [vmem:[#allocation9 + $0x80] sm:$0xff] }
 0x11e   : >> { %v630_v24 = vadd.f32 %v12956_v36, %v608_v18  ;;  %v874_v25 = vrot.slane %v853_v19, 1  ;;  %2405 = vmatpush.bf16.msrb.mxu0 %v11742_v11 }
 0x11f   : >> { %9283 = vst [vmem:[%s12990_s6 + $0x78] sm:$0xf] %v707_v17  ;;  %1633 = vmatmul.bf16.gmra.mxu3 %v12917_v28  ;;  %1759 = vmatmul.bf16.gmra.mxu0 %v13045_v15 }
 0x120   : >> { %vm642_vm9 = vcmp.gt.f32.partialorder %v630_v24, 0.0  ;;  %v654_v10 = vmul.f32 0.01, %v630_v24  ;;  %v885_v20 = vsel %vm605_vm0, %v873_v58, %v874_v25  ;;  %1352 = vmatmul.bf16.gmra.mxu1 %v12905_v22  ;;  %v11763_v58 = vld [vmem:[#allocation9 + $0x128] sm:$0xff] }
 0x121   : >> { %1492 = vmatmul.bf16.gmra.mxu2 %v12905_v22  ;;  %v13059_v30 = vadd.f32 %v961_v14, %v885_v20 }
 0x122   : >> { %v666_v34 = vsel %vm642_vm9, %v630_v24, %v654_v10  ;;  %v586_v38 = vpop.f32.mrf.mxu3  ;;  %2680 = vmatpush.bf16.msrb.mxu2 %v11763_v58 }
 0x123   : >> { %v696_v40 = vmul.f32 %v13010_v7, %v666_v34  ;;  %v601_v41 = vrot.slane %v586_v38, 1 }
 0x124   : >> { %v964_v42 = vpop.f32.mrf.mxu2  ;;  %v13062_v44 = vpop.f32.mrf.mxu0 }
 0x125   : >> { %v708_v22 = vpack.c.bf16 %v696_v40, %v696_v40  ;;  %v607_v43 = vsel %vm605_vm0, %v600_v13, %v601_v41  ;;  %v855_v61 = vpop.f32.mrf.mxu1 }
 0x126   : >> { %v631_v46 = vadd.f32 %v12956_v36, %v607_v43  ;;  %v875_v47 = vrot.slane %v855_v61, 1  ;;  %v11762_v43 = vld [vmem:[#allocation9 + $0x120] sm:$0xff] }
 0x127   : >> { %9284 = vst [vmem:[%s12990_s6 + $0x84] sm:$0xf] %v708_v22  ;;  %v11754_v61 = vld [vmem:[#allocation9 + $0xe0] sm:$0xff]  ;;  %2681 = vmatpush.bf16.msrb.mxu2 %v11762_v43 }
 0x128   : >> { %vm643_vm10 = vcmp.gt.f32.partialorder %v631_v46, 0.0  ;;  %v655_v48 = vmul.f32 0.01, %v631_v46  ;;  %v884_v49 = vsel %vm605_vm0, %v874_v25, %v875_v47  ;;  %v11755_v25 = vld [vmem:[#allocation9 + $0xe8] sm:$0xff] }
 0x129   : >> { %v13071_v55 = vadd.f32 %v964_v42, %v884_v49  ;;  %2540 = vmatpush.bf16.msrb.mxu1 %v11755_v25 }
 0x12a   : >> { %v667_v59 = vsel %vm643_vm10, %v631_v46, %v655_v48  ;;  %v588_v60 = vpop.f32.mrf.mxu3  ;;  %v11736_v46 = vld [vmem:[#allocation9 + $0x50] sm:$0xff]  ;;  %v9519_v48 = vld [vmem:[%s12819_s22 + $0xa0] sm:$0xff] }
 0x12b   : >> { %v697_v62 = vmul.f32 %v12958_v1, %v667_v59  ;;  %v602_v0 = vrot.slane %v588_v60, 1  ;;  %2287 = vmatpush.bf16.msrb.mxu3 %v11736_v46 }
 0x12c   : >> { %v966_v3 = vpop.f32.mrf.mxu2  ;;  %v13079_v5 = vpop.f32.mrf.mxu0 }
 0x12d   : >> { %v709_v13 = vpack.c.bf16 %v697_v62, %v697_v62  ;;  %v606_v14 = vsel %vm605_vm0, %v601_v41, %v602_v0  ;;  %v617_v1 = vsel %vm605_vm0, %v602_v0, %v591_v57  ;;  %v858_v17 = vpop.f32.mrf.mxu1  ;;  %2541 = vmatpush.bf16.msrb.mxu1 %v11754_v61  ;;  %v13128_v62 = vpack.c.bf16 %v13120_v53, %v2061_v50  ;;  %v11734_v61 = vld [vmem:[#allocation9 + $0x40] sm:$0xff]  ;;  %v11780_v50 = vld [vmem:[#allocation9 + $0x1b0] sm:$0xff] }
 0x12e   : >> { %v632_v18 = vadd.f32 %v12956_v36, %v606_v14  ;;  %v633_v19 = vadd.f32 %v12956_v36, %v617_v1  ;;  %v876_v24 = vrot.slane %v858_v17, 1  ;;  %v11761_v1 = vld [vmem:[#allocation9 + $0x118] sm:$0xff] }
 0x12f   : >> { %9285 = vst [vmem:[%s12990_s6 + $0x90] sm:$0xf] %v709_v13  ;;  %1638 = vmatmul.bf16.gmra.mxu3 %v12924_v29  ;;  %1764 = vmatmul.bf16.gmra.mxu0 %v13077_v4 }
 0x130   : >> { %vm644_vm11 = vcmp.gt.f32.partialorder %v632_v18, 0.0  ;;  %vm645_vm12 = vcmp.gt.f32.partialorder %v633_v19, 0.0  ;;  %v656_v51 = vmul.f32 0.01, %v632_v18  ;;  %v657_v57 = vmul.f32 0.01, %v633_v19  ;;  %1884 = vmatmul.bf16.vlgmr.msra.gmra.mxu1 %v12909_v23  ;;  %2682 = vmatpush.bf16.msrb.mxu2 %v11761_v1 }
 0x131   : >> { %2149 = vmatmul.bf16.vlgmr.msra.gmra.mxu2 %v13081_v8  ;;  %v883_v36 = vsel %vm605_vm0, %v875_v47, %v876_v24  ;;  %v11759_v1 = vld [vmem:[#allocation9 + $0x108] sm:$0xff] }
 0x132   : >> { %v668_v10 = vsel %vm644_vm11, %v632_v18, %v656_v51  ;;  %v669_v20 = vsel %vm645_vm12, %v633_v19, %v657_v57  ;;  %v13101_v31 = vadd.f32 %v966_v3, %v883_v36  ;;  %v13103_v32 = vpop.f32.mrf.mxu3  ;;  %v11753_v57 = vld [vmem:[#allocation9 + $0xd8] sm:$0xff]  ;;  %vm2729_vm12 = vcmp.lt.s32.totalorder %v12946_v54, 5 }
 0x133   : >> { %v698_v33 = vmul.f32 %v12986_v37, %v668_v10  ;;  %v699_v23 = vmul.f32 %v13010_v7, %v669_v20  ;;  %v9518_v37 = vld [vmem:[%s12819_s22 + $0x98] sm:$0xff]  ;;  %v1083_v7 = vrot.slane %v13103_v32, 2  ;;  %v11781_v36 = vld [vmem:[#allocation9 + $0x1b8] sm:$0xff]  ;;  %2542 = vmatpush.bf16.msrb.mxu1 %v11753_v57 }
 0x134   : >> { %v969_v34 = vpop.f32.mrf.mxu2  ;;  %v13107_v38 = vpop.f32.mrf.mxu0  ;;  %v13123_v59 = vpack.c.bf16 %v9519_v48, %v9518_v37  ;;  %2977 = vmatpush.bf16.msra.mxu0 %v11781_v36  ;;  %v11760_v37 = vld [vmem:[#allocation9 + $0x110] sm:$0xff] }
 0x135   : >> { %v710_v40 = vpack.c.bf16 %v698_v33, %v698_v33  ;;  %v711_v41 = vpack.c.bf16 %v699_v23, %v699_v23  ;;  %v860_v42 = vpop.f32.mrf.mxu1  ;;  %v13159_v23 = vld [vmem:[%s12819_s22 + $0x20] sm:$0xff]  ;;  %v11752_v48 = vld [vmem:[#allocation9 + $0xd0] sm:$0xff]  ;;  %2683 = vmatpush.bf16.msrb.mxu2 %v11760_v37 }
 0x136   : >> { %v877_v22 = vrot.slane %v860_v42, 1 }
 0x137   : >> { %9286 = vst [vmem:[%s12990_s6 + $0x9c] sm:$0xf] %v710_v40  ;;  %2543 = vmatpush.bf16.msrb.mxu1 %v11752_v48 }
 0x138   : >> { %9287 = vst [vmem:[%s12990_s6 + $0xa8] sm:$0xf] %v711_v41  ;;  %v882_v47 = vsel %vm605_vm0, %v876_v24, %v877_v22  ;;  %2978 = vmatpush.bf16.msra.mxu0 %v11780_v50 }
 0x139   : >> { %v13116_v49 = vadd.f32 %v969_v34, %v882_v47  ;;  %v13162_v34 = vld [vmem:[%s12819_s22 + $0x28] sm:$0xff]  ;;  %2684 = vmatpush.bf16.msrb.mxu2 %v11759_v1 }
 0x13a   : >> { %v1055_v12 = vpop.f32.mrf.mxu3 }
 0x13b   : >> { %v1084_v58 = vrot.slane %v1055_v12, 2 }
 0x13c   : >> { %v971_v56 = vpop.f32.mrf.mxu2  ;;  %v13125_v60 = vpop.f32.mrf.mxu0  ;;  %2979 = vmatpush.bf16.msra.mxu0 %v11779_v52 }
 0x13d   : >> { %v1106_v0 = vsel %vm1095_vm13, %v1083_v7, %v1084_v58  ;;  %v863_v3 = vpop.f32.mrf.mxu1 }
 0x13e   : >> { %v1108_v11 = vadd.f32 %v1106_v0, %v12970_v9  ;;  %v878_v13 = vrot.slane %v863_v3, 1 }
 0x13f   : >> { %1643 = vmatmul.bf16.gmra.mxu3 %v13045_v15  ;;  %1769 = vmatmul.bf16.gmra.mxu0 %v13123_v59 }
 0x140   : >> { %v881_v14 = vsel %vm605_vm0, %v877_v22, %v878_v13  ;;  %1889 = vmatmul.bf16.gmra.mxu1 %v12917_v28  ;;  %v13142_v17 = vadd.f32 %v13013_v26, %v1108_v11  ;;  %v11735_v26 = vld [vmem:[#allocation9 + $0x48] sm:$0xff] }
 0x141   : >> { %2154 = vmatmul.bf16.gmra.mxu2 %v13128_v62  ;;  %v13144_v21 = vadd.f32 %v971_v56, %v881_v14  ;;  %2288 = vmatpush.bf16.msrb.mxu3 %v11735_v26 }
 0x142   : >> { %v1058_v18 = vpop.f32.mrf.mxu3 }
 0x143   : >> { %v1085_v19 = vrot.slane %v1058_v18, 2 }
 0x144   : >> { %v974_v9 = vpop.f32.mrf.mxu2  ;;  %v13146_v24 = vpop.f32.mrf.mxu0 }
 0x145   : >> { %v1105_v25 = vsel %vm1095_vm13, %v1084_v58, %v1085_v19  ;;  %v865_v28 = vpop.f32.mrf.mxu1  ;;  %2289 = vmatpush.bf16.msrb.mxu3 %v11734_v61 }
 0x146   : >> { %v1109_v27 = vadd.f32 %v1105_v25, %v12988_v39  ;;  %v879_v51 = vrot.slane %v865_v28, 1  ;;  %v13213_v25 = vld [vmem:[%s12819_s22 + $0x38] sm:$0xff] }
 0x148   : >> { %v880_v10 = vsel %vm605_vm0, %v878_v13, %v879_v51  ;;  %v13154_v20 = vadd.f32 %v13032_v35, %v1109_v27  ;;  %v891_v40 = vsel %vm605_vm0, %v879_v51, %v868_v63  ;;  %v13174_v35 = vpack.c.bf16 %v13162_v34, %v13159_v23 }
 0x149   : >> { %v13156_v33 = vadd.f32 %v974_v9, %v880_v10 }
 0x14a   : >> { %v1060_v39 = vpop.f32.mrf.mxu3 }
 0x14b   : >> { %v1086_v42 = vrot.slane %v1060_v39, 2 }
 0x14c   : >> { %v976_v41 = vpop.f32.mrf.mxu2  ;;  %v13170_v43 = vpop.f32.mrf.mxu0 }
 0x14d   : >> { %v13168_v22 = vadd.f32 %v976_v41, %v891_v40  ;;  %v1104_v46 = vsel %vm1095_vm13, %v1085_v19, %v1086_v42  ;;  %v13178_v47 = vpop.f32.mrf.mxu1  ;;  %v13210_v19 = vld [vmem:[%s12819_s22 + $0x30] sm:$0xff] }
 0x14e   : >> { %v1110_v63 = vadd.f32 %v1104_v46, %v13007_v6  ;;  %v1358_v11 = vrot.slane %v13178_v47, 1  ;;  %v13221_v10 = vpack.c.bf16 %v13213_v25, %v13210_v19 }
 0x14f   : >> { %1648 = vmatmul.bf16.gmra.mxu3 %v13077_v4  ;;  %2406 = vmatmul.bf16.vlgmr.msrb.gmra.mxu0 %v13081_v8 }
 0x150   : >> { %1894 = vmatmul.bf16.gmra.mxu1 %v12924_v29  ;;  %v13189_v12 = vadd.f32 %v13047_v16, %v1110_v63  ;;  %v2005_v16 = vld [vmem:[%s16193_s1 + $0x10] sm:$0xff] }
 0x151   : >> { %2159 = vmatmul.bf16.gmra.mxu2 %v13174_v35  ;;  %2018 = vperm.xlu2 %12363, %v2005_v16  }
 0x152   : >> { %v1063_v56 = vpop.f32.mrf.mxu3 }
 0x153   : >> { %v1087_v6 = vrot.slane %v1063_v56, 2 }
 0x154   : >> { %v13191_v58 = vpop.f32.mrf.mxu2  ;;  %v13193_v0 = vpop.f32.mrf.mxu0 }
 0x155   : >> { %v1103_v29 = vsel %vm1095_vm13, %v1086_v42, %v1087_v6  ;;  %v1330_v3 = vpop.f32.mrf.mxu1  ;;  %v1498_v57 = vrot.slane %v13191_v58, 2 }
 0x156   : >> { %v1111_v13 = vadd.f32 %v1103_v29, %v13028_v45  ;;  %v1359_v14 = vrot.slane %v1330_v3, 1 }
 0x158   : >> { %v1380_v18 = vsel %vm605_vm0, %v1358_v11, %v1359_v14  ;;  %v13207_v9 = vadd.f32 %v13062_v44, %v1111_v13  ;;  %v11758_v13 = vld [vmem:[#allocation9 + $0x100] sm:$0xff] }
 0x159   : >> { %v1382_v28 = vadd.f32 %v1380_v18, %v13142_v17  ;;  %v11751_v17 = vld [vmem:[#allocation9 + $0xc8] sm:$0xff]  ;;  %v11778_v18 = vld [vmem:[#allocation9 + $0x1a0] sm:$0xff]  ;;  %2685 = vmatpush.bf16.msrb.mxu2 %v11758_v13 }
 0x15a   : >> { %v1065_v27 = vpop.f32.mrf.mxu3  ;;  %2544 = vmatpush.bf16.msrb.mxu1 %v11751_v17  ;;  %2980 = vmatpush.bf16.msra.mxu0 %v11778_v18  ;;  %v11777_v18 = vld [vmem:[#allocation9 + $0x198] sm:$0xff] }
 0x15b   : >> { %v1088_v45 = vrot.slane %v1065_v27, 2 }
 0x15c   : >> { %v1470_v51 = vpop.f32.mrf.mxu2  ;;  %v13217_v36 = vpop.f32.mrf.mxu0 }
 0x15d   : >> { %v1499_v26 = vrot.slane %v1470_v51, 2  ;;  %v1102_v44 = vsel %vm1095_vm13, %v1087_v6, %v1088_v45  ;;  %v1333_v39 = vpop.f32.mrf.mxu1  ;;  %v13257_v51 = vld [vmem:[%s12819_s22 + $0x40] sm:$0xff] }
 0x15e   : >> { %v1112_v40 = vadd.f32 %v1102_v44, %v13040_v2  ;;  %v1360_v41 = vrot.slane %v1333_v39, 1  ;;  %v11773_v2 = vld [vmem:[#allocation9 + $0x178] sm:$0xff]  ;;  %2981 = vmatpush.bf16.msra.mxu0 %v11777_v18 }
 0x15f   : >> { %v1520_v42 = vsel %vm1095_vm13, %v1498_v57, %v1499_v26  ;;  %1653 = vmatmul.bf16.gmra.mxu3 %v13123_v59  ;;  %2411 = vmatmul.bf16.gmra.mxu0 %v13128_v62 }
 0x160   : >> { %v13232_v61 = vadd.f32 %v1520_v42, %v1382_v28  ;;  %v1379_v46 = vsel %vm605_vm0, %v1359_v14, %v1360_v41  ;;  %1899 = vmatmul.bf16.gmra.mxu1 %v13045_v15  ;;  %v13239_v63 = vadd.f32 %v13079_v5, %v1112_v40  ;;  %2837 = vmatpush.bf16.msra.mxu3 %v11773_v2  ;;  %v11750_v14 = vld [vmem:[#allocation9 + $0xc0] sm:$0xff] }
 0x161   : >> { %2164 = vmatmul.bf16.gmra.mxu2 %v13221_v10  ;;  %v1383_v37 = vadd.f32 %v1379_v46, %v13154_v20  ;;  %v11772_v20 = vld [vmem:[#allocation9 + $0x170] sm:$0xff]  ;;  %2545 = vmatpush.bf16.msrb.mxu1 %v11750_v14  ;;  %v11789_v14 = vld [vmem:[#allocation9 + $0x1f8] sm:$0xff] }
 0x162   : >> { %v1068_v48 = vpop.f32.mrf.mxu3 }
 0x163   : >> { %v1089_v50 = vrot.slane %v1068_v48, 2 }
 0x164   : >> { %v1473_v56 = vpop.f32.mrf.mxu2  ;;  %v13242_v29 = vpop.f32.mrf.mxu0  ;;  %2838 = vmatpush.bf16.msra.mxu3 %v11772_v20 }
 0x165   : >> { %v1500_v6 = vrot.slane %v1473_v56, 2  ;;  %v1101_v15 = vsel %vm1095_vm13, %v1088_v45, %v1089_v50  ;;  %v1335_v3 = vpop.f32.mrf.mxu1  ;;  %3093 = vmatpush.bf16.msra.mxu1 %v11789_v14 }
 0x166   : >> { %v1113_v5 = vadd.f32 %v1101_v15, %v13059_v30  ;;  %v1361_v16 = vrot.slane %v1335_v3, 1  ;;  %v13260_v30 = vld [vmem:[%s12819_s22 + $0x48] sm:$0xff] }
 0x167   : >> { %v1519_v1 = vsel %vm1095_vm13, %v1499_v26, %v1500_v6 }
 0x168   : >> { %v13249_v28 = vadd.f32 %v1519_v1, %v1383_v37  ;;  %v1378_v27 = vsel %vm605_vm0, %v1360_v41, %v1361_v16  ;;  %v13254_v45 = vadd.f32 %v13107_v38, %v1113_v5  ;;  %v13267_v41 = vpack.c.bf16 %v13260_v30, %v13257_v51  ;;  %v11771_v1 = vld [vmem:[#allocation9 + $0x168] sm:$0xff] }
 0x169   : >> { %v1384_v44 = vadd.f32 %v1378_v27, %v13189_v12  ;;  %2839 = vmatpush.bf16.msra.mxu3 %v11771_v1 }
 0x16a   : >> { %v1070_v26 = vpop.f32.mrf.mxu3 }
 0x16b   : >> { %v1090_v39 = vrot.slane %v1070_v26, 2 }
 0x16c   : >> { %v1475_v40 = vpop.f32.mrf.mxu2  ;;  %v13263_v42 = vpop.f32.mrf.mxu0 }
 0x16d   : >> { %v1501_v17 = vrot.slane %v1475_v40, 2  ;;  %v1100_v38 = vsel %vm1095_vm13, %v1089_v50, %v1090_v39  ;;  %v1338_v46 = vpop.f32.mrf.mxu1  ;;  %v11797_v50 = vld [vmem:[#allocation9 + $0x238] sm:$0xff] }
 0x16e   : >> { %v1114_v2 = vadd.f32 %v1100_v38, %v13071_v55  ;;  %v1362_v52 = vrot.slane %v1338_v46, 1  ;;  %3233 = vmatpush.bf16.msra.mxu2 %v11797_v50  ;;  %v11796_v50 = vld [vmem:[#allocation9 + $0x230] sm:$0xff] }
 0x16f   : >> { %v1518_v12 = vsel %vm1095_vm13, %v1500_v6, %v1501_v17  ;;  %2290 = vmatmul.bf16.vlgmr.msrb.gmra.mxu3 %v13081_v8  ;;  %2416 = vmatmul.bf16.gmra.mxu0 %v13174_v35 }
 0x170   : >> { %v13276_v37 = vadd.f32 %v1518_v12, %v1384_v44  ;;  %v1377_v48 = vsel %vm605_vm0, %v1361_v16, %v1362_v52  ;;  %1904 = vmatmul.bf16.gmra.mxu1 %v13077_v4  ;;  %v13283_v55 = vadd.f32 %v13125_v60, %v1114_v2 }
 0x171   : >> { %2169 = vmatmul.bf16.gmra.mxu2 %v13267_v41  ;;  %v1385_v56 = vadd.f32 %v1377_v48, %v13207_v9 }
 0x172   : >> { %v1073_v6 = vpop.f32.mrf.mxu3  ;;  %3234 = vmatpush.bf16.msra.mxu2 %v11796_v50 }
 0x173   : >> { %v1091_v15 = vrot.slane %v1073_v6, 2 }
 0x174   : >> { %v1478_v3 = vpop.f32.mrf.mxu2  ;;  %v13286_v13 = vpop.f32.mrf.mxu0 }
 0x175   : >> { %v1502_v5 = vrot.slane %v1478_v3, 2  ;;  %v1099_v4 = vsel %vm1095_vm13, %v1090_v39, %v1091_v15  ;;  %v1340_v16 = vpop.f32.mrf.mxu1  ;;  %v13301_v39 = vld [vmem:[%s12819_s22 + $0x50] sm:$0xff]  ;;  %v1776_v58 = vrot.slane %v13286_v13, 1  ;;  %v13447_v13 = vld [vmem:[%s16197_s5] ss:$0 sm:$0xff] }
 0x176   : >> { %v1115_v20 = vadd.f32 %v1099_v4, %v13101_v31  ;;  %v1363_v60 = vrot.slane %v1340_v16, 1  ;;  %v13304_v31 = vld [vmem:[%s12819_s22 + $0x58] sm:$0xff]  ;;  %v11770_v16 = vld [vmem:[#allocation9 + $0x160] sm:$0xff] }
 0x177   : >> { %v1517_v9 = vsel %vm1095_vm13, %v1501_v17, %v1502_v5  ;;  %v13311_v48 = vpack.c.bf16 %v13304_v31, %v13301_v39  ;;  %2840 = vmatpush.bf16.msra.mxu3 %v11770_v16 }
 0x178   : >> { %v13293_v27 = vadd.f32 %v1517_v9, %v1385_v56  ;;  %v1376_v44 = vsel %vm605_vm0, %v1362_v52, %v1363_v60  ;;  %v13298_v26 = vadd.f32 %v13146_v24, %v1115_v20 }
 0x179   : >> { %v1386_v40 = vadd.f32 %v1376_v44, %v13239_v63 }
 0x17a   : >> { %v1075_v38 = vpop.f32.mrf.mxu3 }
 0x17b   : >> { %v1092_v46 = vrot.slane %v1075_v38, 2 }
 0x17c   : >> { %v1480_v17 = vpop.f32.mrf.mxu2  ;;  %v13307_v12 = vpop.f32.mrf.mxu0 }
 0x17d   : >> { %v1503_v2 = vrot.slane %v1480_v17, 2  ;;  %v1098_v24 = vsel %vm1095_vm13, %v1091_v15, %v1092_v46  ;;  %v1343_v52 = vpop.f32.mrf.mxu1  ;;  %v11788_v15 = vld [vmem:[#allocation9 + $0x1f0] sm:$0xff]  ;;  %v11795_v17 = vld [vmem:[#allocation9 + $0x228] sm:$0xff] }
 0x17e   : >> { %v1116_v56 = vadd.f32 %v1098_v24, %v13116_v49  ;;  %v1364_v6 = vrot.slane %v1343_v52, 1  ;;  %v11776_v49 = vld [vmem:[#allocation9 + $0x190] sm:$0xff]  ;;  %3094 = vmatpush.bf16.msra.mxu1 %v11788_v15  ;;  %v11775_v24 = vld [vmem:[#allocation9 + $0x188] sm:$0xff]  ;;  %3235 = vmatpush.bf16.msra.mxu2 %v11795_v17 }
 0x17f   : >> { %v1516_v63 = vsel %vm1095_vm13, %v1502_v5, %v1503_v2  ;;  %2295 = vmatmul.bf16.gmra.mxu3 %v13128_v62  ;;  %2421 = vmatmul.bf16.gmra.mxu0 %v13221_v10 }
 0x180   : >> { %v13320_v3 = vadd.f32 %v1516_v63, %v1386_v40  ;;  %v1375_v4 = vsel %vm605_vm0, %v1363_v60, %v1364_v6  ;;  %1909 = vmatmul.bf16.gmra.mxu1 %v13123_v59  ;;  %v13327_v14 = vadd.f32 %v13170_v43, %v1116_v56  ;;  %2982 = vmatpush.bf16.msra.mxu0 %v11776_v49  ;;  %v11787_v49 = vld [vmem:[#allocation9 + $0x1e8] sm:$0xff] }
 0x181   : >> { %2174 = vmatmul.bf16.gmra.mxu2 %v13311_v48  ;;  %v1387_v5 = vadd.f32 %v1375_v4, %v13254_v45 }
 0x182   : >> { %v1078_v20 = vpop.f32.mrf.mxu3  ;;  %3095 = vmatpush.bf16.msra.mxu1 %v11787_v49 }
 0x183   : >> { %v1093_v1 = vrot.slane %v1078_v20, 2 }
 0x184   : >> { %v1483_v18 = vpop.f32.mrf.mxu2  ;;  %v13330_v9 = vpop.f32.mrf.mxu0  ;;  %2983 = vmatpush.bf16.msra.mxu0 %v11775_v24 }
 0x185   : >> { %v1504_v60 = vrot.slane %v1483_v18, 2  ;;  %v1097_v59 = vsel %vm1095_vm13, %v1092_v46, %v1093_v1  ;;  %v1345_v44 = vpop.f32.mrf.mxu1  ;;  %v11769_v18 = vld [vmem:[#allocation9 + $0x158] sm:$0xff] }
 0x186   : >> { %v1117_v40 = vadd.f32 %v1097_v59, %v13144_v21  ;;  %v1365_v43 = vrot.slane %v1345_v44, 1  ;;  %2841 = vmatpush.bf16.msra.mxu3 %v11769_v18 }
 0x187   : >> { %v1515_v38 = vsel %vm1095_vm13, %v1503_v2, %v1504_v60  ;;  %v11774_v2 = vld [vmem:[#allocation9 + $0x180] sm:$0xff] }
 0x188   : >> { %v13337_v45 = vadd.f32 %v1515_v38, %v1387_v5  ;;  %v1374_v52 = vsel %vm605_vm0, %v1364_v6, %v1365_v43  ;;  %v1251_v50 = vadd.f32 %v13193_v0, %v1117_v40  ;;  %2984 = vmatpush.bf16.msra.mxu0 %v11774_v2 }
 0x189   : >> { %v1388_v56 = vadd.f32 %v1374_v52, %v13283_v55 }
 0x18a   : >> { %v1080_v63 = vpop.f32.mrf.mxu3 }
 0x18b   : >> { %v1094_v46 = vrot.slane %v1080_v63, 2  ;;  %v11786_v63 = vld [vmem:[#allocation9 + $0x1e0] sm:$0xff] }
 0x18c   : >> { %v1485_v21 = vpop.f32.mrf.mxu2  ;;  %v13343_v15 = vpop.f32.mrf.mxu0  ;;  %3096 = vmatpush.bf16.msra.mxu1 %v11786_v63  ;;  %v11813_v63 = vld [vmem:[#allocation9 + $0x2b8] sm:$0xff] }
 0x18d   : >> { %v1505_v4 = vrot.slane %v1485_v21, 2  ;;  %v1096_v16 = vsel %vm1095_vm13, %v1093_v1, %v1094_v46  ;;  %v1107_v6 = vsel %vm1095_vm13, %v1094_v46, %v1083_v7  ;;  %v1348_v0 = vpop.f32.mrf.mxu1  ;;  %v11768_v46 = vld [vmem:[#allocation9 + $0x150] sm:$0xff]  ;;  %3531 = vmatpush.bf16.msrb.mxu0 %v11813_v63 }
 0x18e   : >> { %v1118_v55 = vadd.f32 %v1096_v16, %v13156_v33  ;;  %v1119_v5 = vadd.f32 %v1107_v6, %v13168_v22  ;;  %v1366_v20 = vrot.slane %v1348_v0, 1  ;;  %2842 = vmatpush.bf16.msra.mxu3 %v11768_v46  ;;  %v11812_v63 = vld [vmem:[#allocation9 + $0x2b0] sm:$0xff] }
 0x18f   : >> { %v1514_v59 = vsel %vm1095_vm13, %v1504_v60, %v1505_v4  ;;  %2300 = vmatmul.bf16.gmra.mxu3 %v13174_v35  ;;  %2426 = vmatmul.bf16.gmra.mxu0 %v13267_v41 }
 0x190   : >> { %v13357_v32 = vadd.f32 %v1514_v59, %v1388_v56  ;;  %v1373_v7 = vsel %vm605_vm0, %v1365_v43, %v1366_v20  ;;  %2546 = vmatmul.bf16.vlgmr.msrb.gmra.mxu1 %v13081_v8  ;;  %v1252_v33 = vadd.f32 %v13217_v36, %v1118_v55  ;;  %v1253_v22 = vadd.f32 %v13242_v29, %v1119_v5  ;;  %v11794_v43 = vld [vmem:[#allocation9 + $0x220] sm:$0xff]  ;;  %v11793_v59 = vld [vmem:[#allocation9 + $0x218] sm:$0xff] }
 0x191   : >> { %2686 = vmatmul.bf16.vlgmr.msrb.gmra.mxu2 %v13081_v8  ;;  %v1389_v1 = vadd.f32 %v1373_v7, %v13298_v26  ;;  %3532 = vmatpush.bf16.msrb.mxu0 %v11812_v63 }
 0x192   : >> { %v13366_v60 = vpop.f32.mrf.mxu3  ;;  %3236 = vmatpush.bf16.msra.mxu2 %v11794_v43 }
 0x194   : >> { %v1488_v44 = vpop.f32.mrf.mxu2  ;;  %v13368_v38 = vpop.f32.mrf.mxu0 }
 0x195   : >> { %v1506_v40 = vrot.slane %v1488_v44, 2  ;;  %v1350_v17 = vpop.f32.mrf.mxu1 }
 0x196   : >> { %v1367_v24 = vrot.slane %v1350_v17, 1  ;;  %3237 = vmatpush.bf16.msra.mxu2 %v11793_v59 }
 0x197   : >> { %v1513_v8 = vsel %vm1095_vm13, %v1505_v4, %v1506_v40 }
 0x198   : >> { %v13372_v36 = vadd.f32 %v1513_v8, %v1389_v1  ;;  %v1372_v29 = vsel %vm605_vm0, %v1366_v20, %v1367_v24  ;;  %v11785_v1 = vld [vmem:[#allocation9 + $0x1d8] sm:$0xff] }
 0x199   : >> { %v1390_v26 = vadd.f32 %v1372_v29, %v13327_v14  ;;  %3097 = vmatpush.bf16.msra.mxu1 %v11785_v1  ;;  %v1777_v1 = vrot.slane %v13307_v12, 1  ;;  %v11784_v12 = vld [vmem:[#allocation9 + $0x1d0] sm:$0xff] }
 0x19a   : >> { %v13377_v52 = vpop.f32.mrf.mxu3 }
 0x19c   : >> { %v1490_v56 = vpop.f32.mrf.mxu2  ;;  %v13379_v2 = vpop.f32.mrf.mxu0 }
 0x19d   : >> { %v1507_v21 = vrot.slane %v1490_v56, 2  ;;  %v1353_v16 = vpop.f32.mrf.mxu1  ;;  %v13409_v56 = vpack.c.bf16 %v13159_v23, %v13120_v53  ;;  %3098 = vmatpush.bf16.msra.mxu1 %v11784_v12  ;;  %v11791_v12 = vld [vmem:[#allocation9 + $0x208] sm:$0xff] }
 0x19e   : >> { %v1368_v4 = vrot.slane %v1353_v16, 1  ;;  %v11792_v16 = vld [vmem:[#allocation9 + $0x210] sm:$0xff] }
 0x19f   : >> { %v1512_v6 = vsel %vm1095_vm13, %v1506_v40, %v1507_v21  ;;  %2305 = vmatmul.bf16.gmra.mxu3 %v13221_v10  ;;  %2431 = vmatmul.bf16.gmra.mxu0 %v13311_v48 }
 0x1a0   : >> { %v13385_v14 = vadd.f32 %v1512_v6, %v1390_v26  ;;  %v1371_v0 = vsel %vm605_vm0, %v1367_v24, %v1368_v4  ;;  %2551 = vmatmul.bf16.gmra.mxu1 %v13128_v62  ;;  %3238 = vmatpush.bf16.msra.mxu2 %v11792_v16 }
 0x1a1   : >> { %2691 = vmatmul.bf16.gmra.mxu2 %v13128_v62  ;;  %v1391_v49 = vadd.f32 %v1371_v0, %v1251_v50  ;;  %v11767_v50 = vld [vmem:[#allocation9 + $0x148] sm:$0xff] }
 0x1a2   : >> { %v13391_v55 = vpop.f32.mrf.mxu3  ;;  %2843 = vmatpush.bf16.msra.mxu3 %v11767_v50 }
 0x1a4   : >> { %v1493_v5 = vpop.f32.mrf.mxu2  ;;  %v13393_v18 = vpop.f32.mrf.mxu0  ;;  %3239 = vmatpush.bf16.msra.mxu2 %v11791_v12  ;;  %v11805_v12 = vld [vmem:[#allocation9 + $0x278] sm:$0xff] }
 0x1a5   : >> { %v1508_v20 = vrot.slane %v1493_v5, 2  ;;  %v1355_v7 = vpop.f32.mrf.mxu1 }
 0x1a6   : >> { %v1369_v44 = vrot.slane %v1355_v7, 1 }
 0x1a7   : >> { %v1511_v40 = vsel %vm1095_vm13, %v1507_v21, %v1508_v20  ;;  %v11766_v21 = vld [vmem:[#allocation9 + $0x140] sm:$0xff] }
 0x1a8   : >> { %v13397_v17 = vadd.f32 %v1511_v40, %v1391_v49  ;;  %v1381_v62 = vsel %vm605_vm0, %v1369_v44, %v1358_v11  ;;  %v1370_v43 = vsel %vm605_vm0, %v1368_v4, %v1369_v44  ;;  %2844 = vmatpush.bf16.msra.mxu3 %v11766_v21  ;;  %v1775_v4 = vrot.slane %v13263_v42, 1  ;;  %v13467_v21 = vpop.permute.xlu1 %2008 }
 0x1a9   : >> { %v1392_v24 = vadd.f32 %v1370_v43, %v1252_v33  ;;  %v1393_v8 = vadd.f32 %v1381_v62, %v1253_v22  ;;  %v1660_v40 = vadd.f32 %v13377_v52, %v13249_v28  ;;  %v13461_v43 = vpack.c.bf16 %v13210_v19, %v13162_v34 }
 0x1aa   : >> { %v13405_v29 = vpop.f32.mrf.mxu3  ;;  %v1796_v52 = vsel %vm605_vm0, %v1776_v58, %v1777_v1 }
 0x1ab   : >> { %v1800_v19 = vadd.f32 %v1796_v52, %v1660_v40 }
 0x1ac   : >> { %v1495_v26 = vpop.f32.mrf.mxu2  ;;  %v13411_v47 = vpop.f32.mrf.mxu0  ;;  %3373 = vmatpush.bf16.msrb.mxu3 %v11805_v12 }
 0x1ad   : >> { %v1509_v46 = vrot.slane %v1495_v26, 2  ;;  %v13413_v11 = vpop.f32.mrf.mxu1 }
 0x1af   : >> { %v1510_v33 = vsel %vm1095_vm13, %v1508_v20, %v1509_v46  ;;  %v1521_v22 = vsel %vm1095_vm13, %v1509_v46, %v1498_v57  ;;  %2310 = vmatmul.bf16.gmra.mxu3 %v13267_v41  ;;  %2985 = vmatmul.bf16.vlgmr.msra.gmra.mxu0 %v13409_v56  ;;  %v1659_v57 = vadd.f32 %v13366_v60, %v13232_v61  ;;  %v1915_v20 = vrot.slane %v13413_v11, 2 }
 0x1b0   : >> { %v13423_v53 = vadd.f32 %v1510_v33, %v1392_v24  ;;  %2556 = vmatmul.bf16.gmra.mxu1 %v13174_v35  ;;  %v13427_v23 = vadd.f32 %v1521_v22, %v1393_v8 }
 0x1b1   : >> { %2696 = vmatmul.bf16.gmra.mxu2 %v13174_v35  ;;  %v1797_v35 = vsel %vm605_vm0, %v1775_v4, %v1776_v58 }
 0x1b2   : >> { %v13431_v6 = vpop.f32.mrf.mxu3  ;;  %v1799_v7 = vadd.f32 %v1797_v35, %v1659_v57 }
 0x1b4   : >> { %v13435_v0 = vpop.f32.mrf.mxu2  ;;  %v13437_v49 = vpop.f32.mrf.mxu0 }
 0x1b5   : >> { %v1887_v5 = vpop.f32.mrf.mxu1  ;;  %v2180_v24 = vrot.slane %v13435_v0, 7 }
 0x1b6   : >> { %v1916_v59 = vrot.slane %v1887_v5, 2  ;;  %v1778_v5 = vrot.slane %v13330_v9, 1 }
 0x1b8   : >> { %v1937_v61 = vsel %vm1095_vm13, %v1915_v20, %v1916_v59 }
 0x1b9   : >> { %v1939_v60 = vadd.f32 %v1937_v61, %v1799_v7  ;;  %v1661_v61 = vadd.f32 %v13391_v55, %v13276_v37 }
 0x1ba   : >> { %v13454_v44 = vpop.f32.mrf.mxu3 }
 0x1bb   : >> { %v1955_v62 = vadd.f32 %v13447_v13, %v1939_v60 }
 0x1bc   : >> { %v2152_v50 = vpop.f32.mrf.mxu2  ;;  %v13465_v26 = vpop.f32.mrf.mxu0 }
 0x1bd   : >> { %v2181_v8 = vrot.slane %v2152_v50, 7  ;;  %v1890_v46 = vpop.f32.mrf.mxu1  ;;  %vm1967_vm15 = vcmp.gt.f32.partialorder %v1955_v62, 0.0  ;;  %v1979_v28 = vmul.f32 0.01, %v1955_v62 }
 0x1be   : >> { %v1917_v16 = vrot.slane %v1890_v46, 2  ;;  %v1795_v46 = vsel %vm605_vm0, %v1777_v1, %v1778_v5 }
 0x1bf   : >> { %v13475_v34 = vsel %vm2192_vm14, %v2180_v24, %v2181_v8  ;;  %v1991_v33 = vsel %vm1967_vm15, %v1955_v62, %v1979_v28  ;;  %2315 = vmatmul.bf16.gmra.mxu3 %v13311_v48  ;;  %2990 = vmatmul.bf16.gmra.mxu0 %v13461_v43  ;;  %v13490_v62 = vpop.permute.xlu2 %2013  ;;  %v1801_v55 = vadd.f32 %v1795_v46, %v1661_v61  ;;  %v11790_v46 = vld [vmem:[#allocation9 + $0x200] sm:$0xff] }
 0x1c0   : >> { %v1936_v22 = vsel %vm1095_vm13, %v1916_v59, %v1917_v16  ;;  %v2021_v58 = vmul.f32 %v13467_v21, %v1991_v33  ;;  %2561 = vmatmul.bf16.gmra.mxu1 %v13221_v10  ;;  %v13512_v61 = vpack.c.bf16 %v13257_v51, %v13213_v25  ;;  %3240 = vmatpush.bf16.msra.mxu2 %v11790_v46 }
 0x1c1   : >> { %2701 = vmatmul.bf16.gmra.mxu2 %v13221_v10  ;;  %v1940_v57 = vadd.f32 %v1936_v22, %v1800_v19  ;;  %v11783_v10 = vld [vmem:[#allocation9 + $0x1c8] sm:$0xff] }
 0x1c2   : >> { %v2033_v35 = vpack.c.bf16 %v2021_v58, %v2021_v58  ;;  %v13485_v7 = vpop.f32.mrf.mxu3  ;;  %3099 = vmatpush.bf16.msra.mxu1 %v11783_v10  ;;  %v1779_v58 = vrot.slane %v13343_v15, 1  ;;  %v11811_v10 = vld [vmem:[#allocation9 + $0x2a8] sm:$0xff] }
 0x1c3   : >> { %v1956_v60 = vadd.f32 %v13447_v13, %v1940_v57  ;;  %3533 = vmatpush.bf16.msrb.mxu0 %v11811_v10 }
 0x1c4   : >> { %v2155_v40 = vpop.f32.mrf.mxu2  ;;  %9616 = vst [vmem:[%s12990_s6 + $0x28] sm:$0xf] %v2033_v35  ;;  %v13493_v50 = vpop.f32.mrf.mxu0  ;;  %v1662_v35 = vadd.f32 %v13405_v29, %v13293_v27  ;;  %v11782_v27 = vld [vmem:[#allocation9 + $0x1c0] sm:$0xff]  ;;  %v1794_v29 = vsel %vm605_vm0, %v1778_v5, %v1779_v58 }
 0x1c5   : >> { %v2182_v59 = vrot.slane %v2155_v40, 7  ;;  %v1892_v63 = vpop.f32.mrf.mxu1  ;;  %vm1968_vm1 = vcmp.gt.f32.partialorder %v1956_v60, 0.0  ;;  %v1980_v9 = vmul.f32 0.01, %v1956_v60 }
 0x1c6   : >> { %v1918_v28 = vrot.slane %v1892_v63, 2  ;;  %v1802_v51 = vadd.f32 %v1794_v29, %v1662_v35  ;;  %3100 = vmatpush.bf16.msra.mxu1 %v11782_v27  ;;  %v1663_v35 = vadd.f32 %v13431_v6, %v13320_v3 }
 0x1c7   : >> { %v13499_v37 = vsel %vm2192_vm14, %v2181_v8, %v2182_v59  ;;  %v1992_v52 = vsel %vm1968_vm1, %v1956_v60, %v1980_v9  ;;  %v13517_v63 = vpop.permute.xlu2 %2018 }
 0x1c8   : >> { %v1935_v19 = vsel %vm1095_vm13, %v1917_v16, %v1918_v28  ;;  %v2022_v33 = vmul.f32 %v13490_v62, %v1992_v52 }
 0x1c9   : >> { %v1941_v22 = vadd.f32 %v1935_v19, %v1801_v55 }
 0x1ca   : >> { %v2034_v57 = vpack.c.bf16 %v2022_v33, %v2022_v33  ;;  %v13505_v1 = vpop.f32.mrf.mxu3 }
 0x1cb   : >> { %v1957_v40 = vadd.f32 %v13447_v13, %v1941_v22 }
 0x1cc   : >> { %v2157_v8 = vpop.f32.mrf.mxu2  ;;  %9617 = vst [vmem:[%s12990_s6 + $0x34] sm:$0xf] %v2034_v57  ;;  %v13515_v60 = vpop.f32.mrf.mxu0 }
 0x1cd   : >> { %v2183_v16 = vrot.slane %v2157_v8, 7  ;;  %v1895_v15 = vpop.f32.mrf.mxu1  ;;  %vm1969_vm2 = vcmp.gt.f32.partialorder %v1957_v40, 0.0  ;;  %v1981_v9 = vmul.f32 0.01, %v1957_v40 }
 0x1ce   : >> { %v1919_v55 = vrot.slane %v1895_v15, 2  ;;  %v11810_v15 = vld [vmem:[#allocation9 + $0x2a0] sm:$0xff] }
 0x1cf   : >> { %v13523_v25 = vsel %vm2192_vm14, %v2182_v59, %v2183_v16  ;;  %v1993_v52 = vsel %vm1969_vm2, %v1957_v40, %v1981_v9  ;;  %2845 = vmatmul.bf16.vlgmr.msra.gmra.mxu3 %v13409_v56  ;;  %2995 = vmatmul.bf16.gmra.mxu0 %v13512_v61  ;;  %v1780_v59 = vrot.slane %v13368_v38, 1 }
 0x1d0   : >> { %v1934_v19 = vsel %vm1095_vm13, %v1918_v28, %v1919_v55  ;;  %v2023_v33 = vmul.f32 %v13517_v63, %v1993_v52  ;;  %2566 = vmatmul.bf16.gmra.mxu1 %v13267_v41  ;;  %v2437_v28 = vrot.slane %v13515_v60, 1  ;;  %3534 = vmatpush.bf16.msrb.mxu0 %v11810_v15 }
 0x1d1   : >> { %2706 = vmatmul.bf16.gmra.mxu2 %v13267_v41  ;;  %v1942_v5 = vadd.f32 %v1934_v19, %v1802_v51  ;;  %v11804_v41 = vld [vmem:[#allocation9 + $0x270] sm:$0xff]  ;;  %v1793_v27 = vsel %vm605_vm0, %v1779_v58, %v1780_v59 }
 0x1d2   : >> { %v2035_v22 = vpack.c.bf16 %v2023_v33, %v2023_v33  ;;  %v13533_v57 = vpop.f32.mrf.mxu3  ;;  %3374 = vmatpush.bf16.msrb.mxu3 %v11804_v41  ;;  %v1803_v6 = vadd.f32 %v1793_v27, %v1663_v35 }
 0x1d3   : >> { %v1958_v40 = vadd.f32 %v13447_v13, %v1942_v5  ;;  %v1781_v5 = vrot.slane %v13379_v2, 1 }
 0x1d4   : >> { %v2160_v8 = vpop.f32.mrf.mxu2  ;;  %9618 = vst [vmem:[%s12990_s6 + $0x40] sm:$0xf] %v2035_v22  ;;  %v2409_v10 = vpop.f32.mrf.mxu0 }
 0x1d5   : >> { %v2184_v12 = vrot.slane %v2160_v8, 7  ;;  %vm1970_vm3 = vcmp.gt.f32.partialorder %v1958_v40, 0.0  ;;  %v1982_v9 = vmul.f32 0.01, %v1958_v40  ;;  %v1897_v46 = vpop.f32.mrf.mxu1  ;;  %v2438_v38 = vrot.slane %v2409_v10, 1 }
 0x1d6   : >> { %v1920_v29 = vrot.slane %v1897_v46, 2  ;;  %v13563_v10 = vpack.c.bf16 %v13301_v39, %v13260_v30 }
 0x1d7   : >> { %v13544_v3 = vsel %vm2192_vm14, %v2183_v16, %v2184_v12  ;;  %v1994_v51 = vsel %vm1970_vm3, %v1958_v40, %v1982_v9  ;;  %v13550_v52 = vsel %vm605_vm0, %v2437_v28, %v2438_v38  ;;  %v1664_v16 = vadd.f32 %v13454_v44, %v13337_v45  ;;  %v11821_v9 = vld [vmem:[#allocation9 + $0x2f8] sm:$0xff] }
 0x1d8   : >> { %v2024_v19 = vmul.f32 %v13467_v21, %v1994_v51  ;;  %v1933_v58 = vsel %vm1095_vm13, %v1919_v55, %v1920_v29  ;;  %v11829_v55 = vld [vmem:[#allocation9 + $0x338] sm:$0xff]  ;;  %3671 = vmatpush.bf16.msrb.mxu1 %v11821_v9  ;;  %v11828_v9 = vld [vmem:[#allocation9 + $0x330] sm:$0xff] }
 0x1d9   : >> { %v1943_v33 = vadd.f32 %v1933_v58, %v1803_v6  ;;  %v1792_v6 = vsel %vm605_vm0, %v1780_v59, %v1781_v5  ;;  %3787 = vmatpush.bf16.msrb.mxu2 %v11829_v55  ;;  %v11803_v55 = vld [vmem:[#allocation9 + $0x268] sm:$0xff] }
 0x1da   : >> { %v2036_v22 = vpack.c.bf16 %v2024_v19, %v2024_v19  ;;  %v13556_v8 = vpop.f32.mrf.mxu3  ;;  %v1804_v30 = vadd.f32 %v1792_v6, %v1664_v16  ;;  %3375 = vmatpush.bf16.msrb.mxu3 %v11803_v55 }
 0x1db   : >> { %v1959_v35 = vadd.f32 %v13447_v13, %v1943_v33  ;;  %v1782_v33 = vrot.slane %v13393_v18, 1 }
 0x1dc   : >> { %v2162_v40 = vpop.f32.mrf.mxu2  ;;  %9619 = vst [vmem:[%s12990_s6 + $0x4c] sm:$0xf] %v2036_v22  ;;  %v2412_v15 = vpop.f32.mrf.mxu0 }
 0x1dd   : >> { %v2185_v41 = vrot.slane %v2162_v40, 7  ;;  %vm1971_vm4 = vcmp.gt.f32.partialorder %v1959_v35, 0.0  ;;  %v1983_v2 = vmul.f32 0.01, %v1959_v35  ;;  %v1900_v46 = vpop.f32.mrf.mxu1  ;;  %v2439_v27 = vrot.slane %v2412_v15, 1  ;;  %3788 = vmatpush.bf16.msrb.mxu2 %v11828_v9 }
 0x1de   : >> { %v1921_v45 = vrot.slane %v1900_v46, 2  ;;  %v1791_v6 = vsel %vm605_vm0, %v1781_v5, %v1782_v33 }
 0x1df   : >> { %v13570_v44 = vsel %vm2192_vm14, %v2184_v12, %v2185_v41  ;;  %v1995_v39 = vsel %vm1971_vm4, %v1959_v35, %v1983_v2  ;;  %2850 = vmatmul.bf16.gmra.mxu3 %v13461_v43  ;;  %3000 = vmatmul.bf16.gmra.mxu0 %v13563_v10  ;;  %v13576_v51 = vsel %vm605_vm0, %v2438_v38, %v2439_v27  ;;  %v11809_v12 = vld [vmem:[#allocation9 + $0x298] sm:$0xff] }
 0x1e0   : >> { %v2025_v59 = vmul.f32 %v13490_v62, %v1995_v39  ;;  %v1932_v19 = vsel %vm1095_vm13, %v1920_v29, %v1921_v45  ;;  %2571 = vmatmul.bf16.gmra.mxu1 %v13311_v48  ;;  %3535 = vmatpush.bf16.msrb.mxu0 %v11809_v12  ;;  %v1665_v38 = vadd.f32 %v13485_v7, %v13357_v32  ;;  %v13604_v12 = vld [vmem:[%s12819_s22 + $0x60] sm:$0xff] }
 0x1e1   : >> { %2711 = vmatmul.bf16.gmra.mxu2 %v13311_v48  ;;  %v1944_v58 = vadd.f32 %v1932_v19, %v1804_v30  ;;  %v11808_v48 = vld [vmem:[#allocation9 + $0x290] sm:$0xff]  ;;  %v13614_v55 = vpack.c.bf16 %v13604_v12, %v13304_v31 }
 0x1e2   : >> { %v2037_v22 = vpack.c.bf16 %v2025_v59, %v2025_v59  ;;  %v13584_v16 = vpop.f32.mrf.mxu3  ;;  %v1805_v7 = vadd.f32 %v1791_v6, %v1665_v38 }
 0x1e3   : >> { %v1960_v35 = vadd.f32 %v13447_v13, %v1944_v58  ;;  %v11807_v58 = vld [vmem:[#allocation9 + $0x288] sm:$0xff] }
 0x1e4   : >> { %v2165_v40 = vpop.f32.mrf.mxu2  ;;  %9620 = vst [vmem:[%s12990_s6 + $0x58] sm:$0xf] %v2037_v22  ;;  %v2414_v15 = vpop.f32.mrf.mxu0  ;;  %3536 = vmatpush.bf16.msrb.mxu0 %v11808_v48  ;;  %v11820_v48 = vld [vmem:[#allocation9 + $0x2f0] sm:$0xff] }
 0x1e5   : >> { %v2186_v29 = vrot.slane %v2165_v40, 7  ;;  %vm1972_vm5 = vcmp.gt.f32.partialorder %v1960_v35, 0.0  ;;  %v1984_v2 = vmul.f32 0.01, %v1960_v35  ;;  %v1902_v18 = vpop.f32.mrf.mxu1  ;;  %v2440_v46 = vrot.slane %v2414_v15, 1  ;;  %3672 = vmatpush.bf16.msrb.mxu1 %v11820_v48 }
 0x1e6   : >> { %v1922_v30 = vrot.slane %v1902_v18, 2 }
 0x1e7   : >> { %v13594_v32 = vsel %vm2192_vm14, %v2185_v41, %v2186_v29  ;;  %v1996_v39 = vsel %vm1972_vm5, %v1960_v35, %v1984_v2  ;;  %v13598_v59 = vsel %vm605_vm0, %v2439_v27, %v2440_v46  ;;  %v1783_v41 = vrot.slane %v13411_v47, 1  ;;  %v11802_v2 = vld [vmem:[#allocation9 + $0x260] sm:$0xff] }
 0x1e8   : >> { %v2026_v19 = vmul.f32 %v13517_v63, %v1996_v39  ;;  %v1931_v5 = vsel %vm1095_vm13, %v1921_v45, %v1922_v30  ;;  %v1666_v35 = vadd.f32 %v13505_v1, %v13372_v36  ;;  %3537 = vmatpush.bf16.msrb.mxu0 %v11807_v58  ;;  %3376 = vmatpush.bf16.msrb.mxu3 %v11802_v2 }
 0x1e9   : >> { %v1945_v22 = vadd.f32 %v1931_v5, %v1805_v7  ;;  %v11806_v7 = vld [vmem:[#allocation9 + $0x280] sm:$0xff]  ;;  %v1790_v36 = vsel %vm605_vm0, %v1782_v33, %v1783_v41 }
 0x1ea   : >> { %v2038_v40 = vpack.c.bf16 %v2026_v19, %v2026_v19  ;;  %v13607_v38 = vpop.f32.mrf.mxu3  ;;  %v1806_v39 = vadd.f32 %v1790_v36, %v1666_v35 }
 0x1eb   : >> { %v1961_v27 = vadd.f32 %v13447_v13, %v1945_v22  ;;  %v1784_v22 = vrot.slane %v13437_v49, 1  ;;  %v11819_v49 = vld [vmem:[#allocation9 + $0x2e8] sm:$0xff] }
 0x1ec   : >> { %v2167_v15 = vpop.f32.mrf.mxu2  ;;  %9621 = vst [vmem:[%s12990_s6 + $0x64] sm:$0xf] %v2038_v40  ;;  %v2417_v9 = vpop.f32.mrf.mxu0  ;;  %3538 = vmatpush.bf16.msrb.mxu0 %v11806_v7  ;;  %3673 = vmatpush.bf16.msrb.mxu1 %v11819_v49 }
 0x1ed   : >> { %v2187_v45 = vrot.slane %v2167_v15, 7  ;;  %vm1973_vm6 = vcmp.gt.f32.partialorder %v1961_v27, 0.0  ;;  %v1985_v47 = vmul.f32 0.01, %v1961_v27  ;;  %v1905_v18 = vpop.f32.mrf.mxu1  ;;  %v2441_v6 = vrot.slane %v2417_v9, 1 }
 0x1ee   : >> { %v1923_v1 = vrot.slane %v1905_v18, 2  ;;  %v11827_v18 = vld [vmem:[#allocation9 + $0x328] sm:$0xff]  ;;  %v1789_v7 = vsel %vm605_vm0, %v1783_v41, %v1784_v22 }
 0x1ef   : >> { %v13621_v31 = vsel %vm2192_vm14, %v2186_v29, %v2187_v45  ;;  %v1997_v19 = vsel %vm1973_vm6, %v1961_v27, %v1985_v47  ;;  %2855 = vmatmul.bf16.gmra.mxu3 %v13512_v61  ;;  %3005 = vmatmul.bf16.gmra.mxu0 %v13614_v55  ;;  %v13627_v5 = vsel %vm605_vm0, %v2440_v46, %v2441_v6 }
 0x1f0   : >> { %v2027_v33 = vmul.f32 %v13467_v21, %v1997_v19  ;;  %v1930_v58 = vsel %vm1095_vm13, %v1922_v30, %v1923_v1  ;;  %3101 = vmatmul.bf16.vlgmr.msra.gmra.mxu1 %v13409_v56  ;;  %v1667_v46 = vadd.f32 %v13533_v57, %v13385_v14  ;;  %3789 = vmatpush.bf16.msrb.mxu2 %v11827_v18 }
 0x1f1   : >> { %3241 = vmatmul.bf16.vlgmr.msra.gmra.mxu2 %v13409_v56  ;;  %v1946_v29 = vadd.f32 %v1930_v58, %v1806_v39  ;;  %v11801_v39 = vld [vmem:[#allocation9 + $0x258] sm:$0xff]  ;;  %v11826_v58 = vld [vmem:[#allocation9 + $0x320] sm:$0xff] }
 0x1f2   : >> { %v2039_v40 = vpack.c.bf16 %v2027_v33, %v2027_v33  ;;  %v13635_v35 = vpop.f32.mrf.mxu3  ;;  %v1807_v57 = vadd.f32 %v1789_v7, %v1667_v46  ;;  %3377 = vmatpush.bf16.msrb.mxu3 %v11801_v39  ;;  %v11818_v46 = vld [vmem:[#allocation9 + $0x2e0] sm:$0xff] }
 0x1f3   : >> { %v1962_v27 = vadd.f32 %v13447_v13, %v1946_v29  ;;  %3674 = vmatpush.bf16.msrb.mxu1 %v11818_v46 }
 0x1f4   : >> { %v2170_v15 = vpop.f32.mrf.mxu2  ;;  %9622 = vst [vmem:[%s12990_s6 + $0x70] sm:$0xf] %v2039_v40  ;;  %v2419_v30 = vpop.f32.mrf.mxu0  ;;  %v13655_v40 = vld [vmem:[%s12819_s22 + $0x68] sm:$0xff]  ;;  %3790 = vmatpush.bf16.msrb.mxu2 %v11826_v58 }
 0x1f5   : >> { %v2188_v9 = vrot.slane %v2170_v15, 7  ;;  %vm1974_vm7 = vcmp.gt.f32.partialorder %v1962_v27, 0.0  ;;  %v1986_v48 = vmul.f32 0.01, %v1962_v27  ;;  %v1907_v2 = vpop.f32.mrf.mxu1  ;;  %v2442_v47 = vrot.slane %v2419_v30, 1  ;;  %v13658_v15 = vld [vmem:[%s12819_s22 + $0x70] sm:$0xff] }
 0x1f6   : >> { %v1924_v36 = vrot.slane %v1907_v2, 2  ;;  %v1785_v30 = vrot.slane %v13465_v26, 1  ;;  %v13667_v7 = vpack.c.bf16 %v13658_v15, %v13655_v40 }
 0x1f7   : >> { %v13645_v14 = vsel %vm2192_vm14, %v2187_v45, %v2188_v9  ;;  %v1998_v19 = vsel %vm1974_vm7, %v1962_v27, %v1986_v48  ;;  %v13649_v33 = vsel %vm605_vm0, %v2441_v6, %v2442_v47  ;;  %v11800_v27 = vld [vmem:[#allocation9 + $0x250] sm:$0xff]  ;;  %v1668_v6 = vadd.f32 %v13556_v8, %v13397_v17 }
 0x1f8   : >> { %v2028_v29 = vmul.f32 %v13490_v62, %v1998_v19  ;;  %v1929_v41 = vsel %vm1095_vm13, %v1923_v1, %v1924_v36  ;;  %3378 = vmatpush.bf16.msrb.mxu3 %v11800_v27  ;;  %v11825_v27 = vld [vmem:[#allocation9 + $0x318] sm:$0xff] }
 0x1f9   : >> { %v1947_v45 = vadd.f32 %v1929_v41, %v1807_v57  ;;  %3791 = vmatpush.bf16.msrb.mxu2 %v11825_v27  ;;  %v11799_v27 = vld [vmem:[#allocation9 + $0x248] sm:$0xff] }
 0x1fa   : >> { %v2040_v48 = vpack.c.bf16 %v2028_v29, %v2028_v29  ;;  %v2293_v2 = vpop.f32.mrf.mxu3 }
 0x1fb   : >> { %v1963_v18 = vadd.f32 %v13447_v13, %v1947_v45  ;;  %v2322_v1 = vadd.f32 %v2293_v2, %v13475_v34  ;;  %v1788_v34 = vsel %vm605_vm0, %v1784_v22, %v1785_v30 }
 0x1fc   : >> { %v2172_v49 = vpop.f32.mrf.mxu2  ;;  %9623 = vst [vmem:[%s12990_s6 + $0x7c] sm:$0xf] %v2040_v48  ;;  %v2422_v57 = vpop.f32.mrf.mxu0  ;;  %v1808_v58 = vadd.f32 %v1788_v34, %v1668_v6  ;;  %v1786_v6 = vrot.slane %v13493_v50, 1  ;;  %3379 = vmatpush.bf16.msrb.mxu3 %v11799_v27 }
 0x1fd   : >> { %v2189_v39 = vrot.slane %v2172_v49, 7  ;;  %vm1975_vm8 = vcmp.gt.f32.partialorder %v1963_v18, 0.0  ;;  %v1987_v26 = vmul.f32 0.01, %v1963_v18  ;;  %v13671_v17 = vadd.f32 %v13576_v51, %v2322_v1  ;;  %v1910_v8 = vpop.f32.mrf.mxu1 }
 0x1fe   : >> { %v2443_v19 = vrot.slane %v2422_v57, 1  ;;  %v1925_v29 = vrot.slane %v1910_v8, 2 }
 0x1ff   : >> { %v13677_v41 = vsel %vm2192_vm14, %v2188_v9, %v2189_v39  ;;  %v1999_v45 = vsel %vm1975_vm8, %v1963_v18, %v1987_v26  ;;  %2860 = vmatmul.bf16.gmra.mxu3 %v13563_v10  ;;  %3010 = vmatmul.bf16.gmra.mxu0 %v13667_v7  ;;  %v1670_v18 = vadd.f32 %v13607_v38, %v13427_v23 }
 0x200   : >> { %v13683_v51 = vsel %vm605_vm0, %v2442_v47, %v2443_v19  ;;  %v2029_v46 = vmul.f32 %v13517_v63, %v1999_v45  ;;  %v1928_v22 = vsel %vm1095_vm13, %v1924_v36, %v1925_v29  ;;  %3106 = vmatmul.bf16.gmra.mxu1 %v13461_v43  ;;  %v1669_v47 = vadd.f32 %v13584_v16, %v13423_v53 }
 0x201   : >> { %3246 = vmatmul.bf16.gmra.mxu2 %v13461_v43  ;;  %v1948_v9 = vadd.f32 %v1928_v22, %v1808_v58  ;;  %v1787_v16 = vsel %vm605_vm0, %v1785_v30, %v1786_v6  ;;  %v11817_v30 = vld [vmem:[#allocation9 + $0x2d8] sm:$0xff] }
 0x202   : >> { %v2041_v48 = vpack.c.bf16 %v2029_v46, %v2029_v46  ;;  %v2296_v2 = vpop.f32.mrf.mxu3  ;;  %3675 = vmatpush.bf16.msrb.mxu1 %v11817_v30 }
 0x203   : >> { %v1964_v49 = vadd.f32 %v13447_v13, %v1948_v9  ;;  %v2323_v36 = vadd.f32 %v2296_v2, %v13499_v37  ;;  %v1798_v37 = vsel %vm605_vm0, %v1786_v6, %v1775_v4  ;;  %v9962_v9 = vld [vmem:[%s12819_s22 + $0x38] sm:$0xff] }
 0x204   : >> { %v13696_v1 = vpop.f32.mrf.mxu2  ;;  %9624 = vst [vmem:[%s12990_s6 + $0x88] sm:$0xf] %v2041_v48  ;;  %v2424_v26 = vpop.f32.mrf.mxu0  ;;  %v1810_v58 = vadd.f32 %v1798_v37, %v1670_v18 }
 0x205   : >> { %v2190_v57 = vrot.slane %v13696_v1, 7  ;;  %vm1976_vm9 = vcmp.gt.f32.partialorder %v1964_v49, 0.0  ;;  %v1988_v50 = vmul.f32 0.01, %v1964_v49  ;;  %v13702_v8 = vadd.f32 %v13598_v59, %v2323_v36  ;;  %v1912_v53 = vpop.f32.mrf.mxu1 }
 0x206   : >> { %v2444_v23 = vrot.slane %v2424_v26, 1  ;;  %v1926_v38 = vrot.slane %v1912_v53, 2  ;;  %v1809_v59 = vadd.f32 %v1787_v16, %v1669_v47  ;;  %v11798_v26 = vld [vmem:[#allocation9 + $0x240] sm:$0xff] }
 0x207   : >> { %v13714_v34 = vsel %vm2192_vm14, %v2189_v39, %v2190_v57  ;;  %v2000_v45 = vsel %vm1976_vm9, %v1964_v49, %v1988_v50  ;;  %v9961_v39 = vld [vmem:[%s12819_s22 + $0x30] sm:$0xff]  ;;  %3380 = vmatpush.bf16.msrb.mxu3 %v11798_v26 }
 0x208   : >> { %v13718_v46 = vsel %vm605_vm0, %v2443_v19, %v2444_v23  ;;  %v2030_v42 = vmul.f32 %v13467_v21, %v2000_v45  ;;  %v1927_v4 = vsel %vm1095_vm13, %v1925_v29, %v1926_v38  ;;  %v1938_v22 = vsel %vm1095_vm13, %v1926_v38, %v1915_v20  ;;  %v11845_v19 = vld [vmem:[#allocation9 + $0x3b8] sm:$0xff]  ;;  %v11824_v45 = vld [vmem:[#allocation9 + $0x310] sm:$0xff] }
 0x209   : >> { %v1949_v6 = vadd.f32 %v1927_v4, %v1809_v59  ;;  %v1950_v48 = vadd.f32 %v1938_v22, %v1810_v58  ;;  %v13732_v49 = vpack.c.bf16 %v9962_v9, %v9961_v39  ;;  %4067 = vmatpush.bf16.msra.mxu0 %v11845_v19  ;;  %3792 = vmatpush.bf16.msrb.mxu2 %v11824_v45  ;;  %v9963_v19 = vld [vmem:[%s12819_s22 + $0x40] sm:$0xff] }
 0x20a   : >> { %v2042_v2 = vpack.c.bf16 %v2030_v42, %v2030_v42  ;;  %v2298_v47 = vpop.f32.mrf.mxu3  ;;  %v11844_v42 = vld [vmem:[#allocation9 + $0x3b0] sm:$0xff] }
 0x20b   : >> { %v1965_v21 = vadd.f32 %v13447_v13, %v1949_v6  ;;  %v1966_v29 = vadd.f32 %v13447_v13, %v1950_v48  ;;  %v2324_v11 = vadd.f32 %v2298_v47, %v13523_v25 }
 0x20c   : >> { %v2177_v18 = vpop.f32.mrf.mxu2  ;;  %9625 = vst [vmem:[%s12990_s6 + $0x94] sm:$0xf] %v2042_v2  ;;  %v2427_v36 = vpop.f32.mrf.mxu0  ;;  %v13781_v2 = vld [vmem:[%s12819_s22 + $0x48] sm:$0xff] }
 0x20d   : >> { %v2191_v20 = vrot.slane %v2177_v18, 7  ;;  %vm1977_vm10 = vcmp.gt.f32.partialorder %v1965_v21, 0.0  ;;  %vm1978_vm11 = vcmp.gt.f32.partialorder %v1966_v29, 0.0  ;;  %v1989_v50 = vmul.f32 0.01, %v1965_v21  ;;  %v13735_v16 = vpop.f32.mrf.mxu1  ;;  %4068 = vmatpush.bf16.msra.mxu0 %v11844_v42 }
 0x20e   : >> { %v1990_v53 = vmul.f32 0.01, %v1966_v29  ;;  %v13742_v25 = vadd.f32 %v13627_v5, %v2324_v11  ;;  %v2445_v37 = vrot.slane %v2427_v36, 1  ;;  %v2577_v27 = vrot.slane %v13735_v16, 2 }
 0x20f   : >> { %v2204_v13 = vsel %vm2192_vm14, %v2191_v20, %v2180_v24  ;;  %v2001_v38 = vsel %vm1977_vm10, %v1965_v21, %v1989_v50  ;;  %2865 = vmatmul.bf16.gmra.mxu3 %v13614_v55  ;;  %3539 = vmatmul.bf16.vlgmr.msrb.gmra.mxu0 %v13732_v49  ;;  %v13786_v11 = vpack.c.bf16 %v13781_v2, %v9963_v19  ;;  %v13830_v19 = vld [vmem:[%s12819_s22 + $0x50] sm:$0xff] }
 0x210   : >> { %v2002_v59 = vsel %vm1978_vm11, %v1966_v29, %v1990_v53  ;;  %v2321_v58 = vadd.f32 %v13635_v35, %v2204_v13  ;;  %v2031_v30 = vmul.f32 %v13490_v62, %v2001_v38  ;;  %3111 = vmatmul.bf16.gmra.mxu1 %v13512_v61  ;;  %v13753_v24 = vsel %vm605_vm0, %v2444_v23, %v2445_v37  ;;  %v11816_v35 = vld [vmem:[#allocation9 + $0x2d0] sm:$0xff] }
 0x211   : >> { %v2032_v0 = vmul.f32 %v13517_v63, %v2002_v59  ;;  %3251 = vmatmul.bf16.gmra.mxu2 %v13512_v61  ;;  %v13760_v62 = vsel %vm2192_vm14, %v2190_v57, %v2191_v20  ;;  %3676 = vmatpush.bf16.msrb.mxu1 %v11816_v35 }
 0x212   : >> { %v2461_v5 = vadd.f32 %v13550_v52, %v2321_v58  ;;  %v2043_v63 = vpack.c.bf16 %v2031_v30, %v2031_v30  ;;  %v2301_v22 = vpop.f32.mrf.mxu3  ;;  %v11837_v30 = vld [vmem:[#allocation9 + $0x378] sm:$0xff] }
 0x213   : >> { %v2044_v4 = vpack.c.bf16 %v2032_v0, %v2032_v0  ;;  %v2325_v39 = vadd.f32 %v2301_v22, %v13544_v3  ;;  %v11843_v0 = vld [vmem:[#allocation9 + $0x3a8] sm:$0xff]  ;;  %3927 = vmatpush.bf16.msra.mxu3 %v11837_v30 }
 0x214   : >> { %v13763_v23 = vpop.f32.mrf.mxu2  ;;  %9626 = vst [vmem:[%s12990_s6 + $0xa0] sm:$0xf] %v2043_v63  ;;  %v2429_v52 = vpop.f32.mrf.mxu0  ;;  %4069 = vmatpush.bf16.msra.mxu0 %v11843_v0 }
 0x215   : >> { %9627 = vst [vmem:[%s12990_s6 + $0xac] sm:$0xf] %v2044_v4  ;;  %v13768_v1 = vadd.f32 %v13649_v33, %v2325_v39  ;;  %v2446_v9 = vrot.slane %v2429_v52, 1  ;;  %v2549_v57 = vpop.f32.mrf.mxu1  ;;  %v11823_v33 = vld [vmem:[#allocation9 + $0x308] sm:$0xff]  ;;  %v2717_v20 = vrot.slane %v13763_v23, 3 }
 0x216   : >> { %v2578_v6 = vrot.slane %v2549_v57, 2  ;;  %3793 = vmatpush.bf16.msrb.mxu2 %v11823_v33 }
 0x217   : >> { %v13773_v48 = vsel %vm605_vm0, %v2445_v37, %v2446_v9 }
 0x218   : >> { %v2599_v3 = vsel %vm1095_vm13, %v2577_v27, %v2578_v6 }
 0x219   : >> { %v2601_v47 = vadd.f32 %v2599_v3, %v2461_v5 }
 0x21a   : >> { %v2303_v21 = vpop.f32.mrf.mxu3 }
 0x21b   : >> { %v2326_v29 = vadd.f32 %v2303_v21, %v13570_v44  ;;  %v11814_v21 = vld [vmem:[#allocation9 + $0x2c0] sm:$0xff] }
 0x21c   : >> { %v2689_v18 = vpop.f32.mrf.mxu2  ;;  %v2432_v26 = vpop.f32.mrf.mxu0 }
 0x21d   : >> { %v2718_v36 = vrot.slane %v2689_v18, 3  ;;  %v13790_v50 = vadd.f32 %v13683_v51, %v2326_v29  ;;  %v2447_v53 = vrot.slane %v2432_v26, 1  ;;  %v2552_v13 = vpop.f32.mrf.mxu1  ;;  %v11815_v51 = vld [vmem:[#allocation9 + $0x2c8] sm:$0xff]  ;;  %v11836_v29 = vld [vmem:[#allocation9 + $0x370] sm:$0xff]  ;;  %v11842_v18 = vld [vmem:[#allocation9 + $0x3a0] sm:$0xff] }
 0x21e   : >> { %v2579_v37 = vrot.slane %v2552_v13, 2  ;;  %3677 = vmatpush.bf16.msrb.mxu1 %v11815_v51  ;;  %3928 = vmatpush.bf16.msra.mxu3 %v11836_v29 }
 0x21f   : >> { %v2740_v44 = vsel %vm2729_vm12, %v2717_v20, %v2718_v36  ;;  %2870 = vmatmul.bf16.gmra.mxu3 %v13667_v7  ;;  %3544 = vmatmul.bf16.gmra.mxu0 %v13786_v11  ;;  %v13802_v59 = vsel %vm605_vm0, %v2446_v9, %v2447_v53 }
 0x220   : >> { %v13796_v38 = vadd.f32 %v2740_v44, %v2601_v47  ;;  %v2598_v58 = vsel %vm1095_vm13, %v2578_v6, %v2579_v37  ;;  %3116 = vmatmul.bf16.gmra.mxu1 %v13563_v10  ;;  %v11822_v6 = vld [vmem:[#allocation9 + $0x300] sm:$0xff]  ;;  %v13833_v47 = vld [vmem:[%s12819_s22 + $0x58] sm:$0xff]  ;;  %4070 = vmatpush.bf16.msra.mxu0 %v11842_v18 }
 0x221   : >> { %3256 = vmatmul.bf16.gmra.mxu2 %v13563_v10  ;;  %v2602_v45 = vadd.f32 %v2598_v58, %v13671_v17 }
 0x222   : >> { %v2306_v5 = vpop.f32.mrf.mxu3  ;;  %3794 = vmatpush.bf16.msrb.mxu2 %v11822_v6  ;;  %3678 = vmatpush.bf16.msrb.mxu1 %v11814_v21  ;;  %v11841_v6 = vld [vmem:[#allocation9 + $0x398] sm:$0xff]  ;;  %v13873_v21 = vpack.c.bf16 %v13655_v40, %v13604_v12  ;;  %v11860_v12 = vld [vmem:[#allocation9 + $0x430] sm:$0xff] }
 0x223   : >> { %v2327_v35 = vadd.f32 %v2306_v5, %v13594_v32 }
 0x224   : >> { %v2692_v42 = vpop.f32.mrf.mxu2  ;;  %v2434_v4 = vpop.f32.mrf.mxu0  ;;  %4071 = vmatpush.bf16.msra.mxu0 %v11841_v6 }
 0x225   : >> { %v2719_v63 = vrot.slane %v2692_v42, 3  ;;  %v13811_v22 = vadd.f32 %v13718_v46, %v2327_v35  ;;  %v2448_v39 = vrot.slane %v2434_v4, 1  ;;  %v2554_v52 = vpop.f32.mrf.mxu1 }
 0x226   : >> { %v2580_v9 = vrot.slane %v2554_v52, 2 }
 0x227   : >> { %v2739_v17 = vsel %vm2729_vm12, %v2718_v36, %v2719_v63  ;;  %v13819_v32 = vsel %vm605_vm0, %v2447_v53, %v2448_v39  ;;  %v13825_v3 = vsel %vm605_vm0, %v2448_v39, %v2437_v28  ;;  %v13839_v28 = vpack.c.bf16 %v13833_v47, %v13830_v19 }
 0x228   : >> { %v13815_v57 = vadd.f32 %v2739_v17, %v2602_v45  ;;  %v2597_v46 = vsel %vm1095_vm13, %v2579_v37, %v2580_v9  ;;  %v11861_v45 = vld [vmem:[#allocation9 + $0x438] sm:$0xff] }
 0x229   : >> { %v2603_v33 = vadd.f32 %v2597_v46, %v13702_v8  ;;  %4365 = vmatpush.bf16.msra.mxu2 %v11861_v45 }
 0x22a   : >> { %v2308_v36 = vpop.f32.mrf.mxu3 }
 0x22b   : >> { %v2328_v60 = vadd.f32 %v2308_v36, %v13621_v31 }
 0x22c   : >> { %v2694_v26 = vpop.f32.mrf.mxu2  ;;  %v13841_v13 = vpop.f32.mrf.mxu0 }
 0x22d   : >> { %v2720_v53 = vrot.slane %v2694_v26, 3  ;;  %v13844_v8 = vadd.f32 %v13753_v24, %v2328_v60  ;;  %v2557_v44 = vpop.f32.mrf.mxu1  ;;  %4366 = vmatpush.bf16.msra.mxu2 %v11860_v12 }
 0x22e   : >> { %v2581_v51 = vrot.slane %v2557_v44, 2  ;;  %v11834_v44 = vld [vmem:[#allocation9 + $0x360] sm:$0xff] }
 0x22f   : >> { %v2738_v37 = vsel %vm2729_vm12, %v2719_v63, %v2720_v53  ;;  %3381 = vmatmul.bf16.vlgmr.msrb.gmra.mxu3 %v13409_v56  ;;  %3549 = vmatmul.bf16.gmra.mxu0 %v13839_v28 }
 0x230   : >> { %v13848_v31 = vadd.f32 %v2738_v37, %v2603_v33  ;;  %v2596_v58 = vsel %vm1095_vm13, %v2580_v9, %v2581_v51  ;;  %3121 = vmatmul.bf16.gmra.mxu1 %v13614_v55  ;;  %v11835_v9 = vld [vmem:[#allocation9 + $0x368] sm:$0xff]  ;;  %v11840_v37 = vld [vmem:[#allocation9 + $0x390] sm:$0xff] }
 0x231   : >> { %3261 = vmatmul.bf16.gmra.mxu2 %v13614_v55  ;;  %v2604_v24 = vadd.f32 %v2596_v58, %v13742_v25  ;;  %v11853_v25 = vld [vmem:[#allocation9 + $0x3f8] sm:$0xff]  ;;  %3929 = vmatpush.bf16.msra.mxu3 %v11835_v9 }
 0x232   : >> { %v2311_v30 = vpop.f32.mrf.mxu3  ;;  %4225 = vmatpush.bf16.msra.mxu1 %v11853_v25  ;;  %4072 = vmatpush.bf16.msra.mxu0 %v11840_v37  ;;  %v11839_v25 = vld [vmem:[#allocation9 + $0x388] sm:$0xff] }
 0x233   : >> { %v2329_v0 = vadd.f32 %v2311_v30, %v13645_v14 }
 0x234   : >> { %v2697_v5 = vpop.f32.mrf.mxu2  ;;  %v13858_v42 = vpop.f32.mrf.mxu0 }
 0x235   : >> { %v2721_v35 = vrot.slane %v2697_v5, 3  ;;  %v13861_v56 = vadd.f32 %v13773_v48, %v2329_v0  ;;  %v2559_v63 = vpop.f32.mrf.mxu1  ;;  %3930 = vmatpush.bf16.msra.mxu3 %v11834_v44 }
 0x236   : >> { %v2582_v39 = vrot.slane %v2559_v63, 2  ;;  %v13904_v63 = vld [vmem:[%s12819_s22 + $0x78] sm:$0xff]  ;;  %4073 = vmatpush.bf16.msra.mxu0 %v11839_v25 }
 0x237   : >> { %v2737_v4 = vsel %vm2729_vm12, %v2720_v53, %v2721_v35  ;;  %v13910_v9 = vpack.c.bf16 %v13904_v63, %v13658_v15  ;;  %v11851_v15 = vld [vmem:[#allocation9 + $0x3e8] sm:$0xff] }
 0x238   : >> { %v13865_v52 = vadd.f32 %v2737_v4, %v2604_v24  ;;  %v2595_v17 = vsel %vm1095_vm13, %v2581_v51, %v2582_v39 }
 0x239   : >> { %v2605_v14 = vadd.f32 %v2595_v17, %v13768_v1 }
 0x23a   : >> { %v2313_v46 = vpop.f32.mrf.mxu3 }
 0x23b   : >> { %v2330_v48 = vadd.f32 %v2313_v46, %v13677_v41 }
 0x23c   : >> { %v2699_v33 = vpop.f32.mrf.mxu2  ;;  %v13875_v18 = vpop.f32.mrf.mxu0 }
 0x23d   : >> { %v2722_v29 = vrot.slane %v2699_v33, 3  ;;  %v13878_v36 = vadd.f32 %v13802_v59, %v2330_v48  ;;  %v2562_v1 = vpop.f32.mrf.mxu1  ;;  %v11852_v59 = vld [vmem:[#allocation9 + $0x3f0] sm:$0xff] }
 0x23e   : >> { %v2583_v26 = vrot.slane %v2562_v1, 2  ;;  %4226 = vmatpush.bf16.msra.mxu1 %v11852_v59  ;;  %v11838_v1 = vld [vmem:[#allocation9 + $0x380] sm:$0xff] }
 0x23f   : >> { %v2736_v60 = vsel %vm2729_vm12, %v2721_v35, %v2722_v29  ;;  %3386 = vmatmul.bf16.gmra.mxu3 %v13461_v43  ;;  %3554 = vmatmul.bf16.gmra.mxu0 %v13873_v21 }
 0x240   : >> { %v13882_v53 = vadd.f32 %v2736_v60, %v2605_v14  ;;  %v2594_v40 = vsel %vm1095_vm13, %v2582_v39, %v2583_v26  ;;  %3126 = vmatmul.bf16.gmra.mxu1 %v13667_v7  ;;  %v11859_v39 = vld [vmem:[#allocation9 + $0x428] sm:$0xff]  ;;  %v11833_v60 = vld [vmem:[#allocation9 + $0x358] sm:$0xff]  ;;  %4074 = vmatpush.bf16.msra.mxu0 %v11838_v1 }
 0x241   : >> { %3266 = vmatmul.bf16.gmra.mxu2 %v13667_v7  ;;  %v2606_v41 = vadd.f32 %v2594_v40, %v13790_v50  ;;  %3931 = vmatpush.bf16.msra.mxu3 %v11833_v60 }
 0x242   : >> { %v2316_v51 = vpop.f32.mrf.mxu3  ;;  %4367 = vmatpush.bf16.msra.mxu2 %v11859_v39  ;;  %4227 = vmatpush.bf16.msra.mxu1 %v11851_v15 }
 0x243   : >> { %v2331_v43 = vadd.f32 %v2316_v51, %v13714_v34 }
 0x244   : >> { %v2702_v58 = vpop.f32.mrf.mxu2  ;;  %v13892_v45 = vpop.f32.mrf.mxu0 }
 0x245   : >> { %v2723_v24 = vrot.slane %v2702_v58, 3  ;;  %v13895_v30 = vadd.f32 %v13819_v32, %v2331_v43  ;;  %v2564_v0 = vpop.f32.mrf.mxu1  ;;  %v13937_v43 = vld [vmem:[%s12819_s22 + $0x80] sm:$0xff]  ;;  %v13940_v58 = vld [vmem:[%s12819_s22 + $0x88] sm:$0xff] }
 0x246   : >> { %v2584_v5 = vrot.slane %v2564_v0, 2  ;;  %v11850_v0 = vld [vmem:[#allocation9 + $0x3e0] sm:$0xff] }
 0x247   : >> { %v2735_v50 = vsel %vm2729_vm12, %v2722_v29, %v2723_v24  ;;  %4228 = vmatpush.bf16.msra.mxu1 %v11850_v0 }
 0x248   : >> { %v13899_v35 = vadd.f32 %v2735_v50, %v2606_v41  ;;  %v2593_v34 = vsel %vm1095_vm13, %v2583_v26, %v2584_v5  ;;  %v11832_v50 = vld [vmem:[#allocation9 + $0x350] sm:$0xff] }
 0x249   : >> { %v2607_v4 = vadd.f32 %v2593_v34, %v13811_v22  ;;  %3932 = vmatpush.bf16.msra.mxu3 %v11832_v50 }
 0x24a   : >> { %v2318_v17 = vpop.f32.mrf.mxu3 }
 0x24b   : >> { %v2332_v32 = vadd.f32 %v2318_v17, %v13760_v62  ;;  %v13948_v17 = vpack.c.bf16 %v13940_v58, %v13937_v43 }
 0x24c   : >> { %v2704_v14 = vpop.f32.mrf.mxu2  ;;  %v13912_v46 = vpop.f32.mrf.mxu0 }
 0x24d   : >> { %v2724_v6 = vrot.slane %v2704_v14, 3  ;;  %v13915_v48 = vadd.f32 %v13825_v3, %v2332_v32  ;;  %v2567_v33 = vpop.f32.mrf.mxu1 }
 0x24e   : >> { %v2585_v29 = vrot.slane %v2567_v33, 2 }
 0x24f   : >> { %v2734_v22 = vsel %vm2729_vm12, %v2723_v24, %v2724_v6  ;;  %3391 = vmatmul.bf16.gmra.mxu3 %v13512_v61  ;;  %3559 = vmatmul.bf16.gmra.mxu0 %v13910_v9  ;;  %v11858_v24 = vld [vmem:[#allocation9 + $0x420] sm:$0xff] }
 0x250   : >> { %v13919_v62 = vadd.f32 %v2734_v22, %v2607_v4  ;;  %v2592_v26 = vsel %vm1095_vm13, %v2584_v5, %v2585_v29  ;;  %3679 = vmatmul.bf16.vlgmr.msrb.gmra.mxu1 %v13732_v49  ;;  %4368 = vmatpush.bf16.msra.mxu2 %v11858_v24 }
 0x251   : >> { %3795 = vmatmul.bf16.vlgmr.msrb.gmra.mxu2 %v13732_v49  ;;  %v2608_v3 = vadd.f32 %v2592_v26, %v13844_v8 }
 0x252   : >> { %v13928_v12 = vpop.f32.mrf.mxu3 }
 0x253   : >> { %v2876_v5 = vrot.slane %v13928_v12, 7  ;;  %v11865_v12 = vld [vmem:[#allocation9 + $0x458] sm:$0xff] }
 0x254   : >> { %v2707_v61 = vpop.f32.mrf.mxu2  ;;  %v13930_v41 = vpop.f32.mrf.mxu0 }
 0x255   : >> { %v2725_v40 = vrot.slane %v2707_v61, 3  ;;  %v2569_v59 = vpop.f32.mrf.mxu1 }
 0x256   : >> { %v2586_v37 = vrot.slane %v2569_v59, 2 }
 0x257   : >> { %v2733_v44 = vsel %vm2729_vm12, %v2724_v6, %v2725_v40 }
 0x258   : >> { %v13934_v51 = vadd.f32 %v2733_v44, %v2608_v3  ;;  %v2591_v8 = vsel %vm1095_vm13, %v2585_v29, %v2586_v37 }
 0x259   : >> { %v2609_v34 = vadd.f32 %v2591_v8, %v13861_v56 }
 0x25a   : >> { %v2848_v4 = vpop.f32.mrf.mxu3 }
 0x25b   : >> { %v2877_v25 = vrot.slane %v2848_v4, 7  ;;  %v11849_v4 = vld [vmem:[#allocation9 + $0x3d8] sm:$0xff] }
 0x25c   : >> { %v2709_v39 = vpop.f32.mrf.mxu2  ;;  %v13950_v14 = vpop.f32.mrf.mxu0  ;;  %4229 = vmatpush.bf16.msra.mxu1 %v11849_v4 }
 0x25d   : >> { %v2726_v32 = vrot.slane %v2709_v39, 3  ;;  %v2898_v6 = vsel %vm2192_vm14, %v2876_v5, %v2877_v25  ;;  %v2572_v33 = vpop.f32.mrf.mxu1 }
 0x25e   : >> { %v2901_v22 = vadd.f32 %v2898_v6, %v13815_v57  ;;  %v2587_v29 = vrot.slane %v2572_v33, 2  ;;  %v11857_v57 = vld [vmem:[#allocation9 + $0x418] sm:$0xff] }
 0x25f   : >> { %v2732_v56 = vsel %vm2729_vm12, %v2725_v40, %v2726_v32  ;;  %3396 = vmatmul.bf16.gmra.mxu3 %v13563_v10  ;;  %3564 = vmatmul.bf16.gmra.mxu0 %v13948_v17 }
 0x260   : >> { %v13959_v1 = vadd.f32 %v2732_v56, %v2609_v34  ;;  %v2590_v15 = vsel %vm1095_vm13, %v2586_v37, %v2587_v29  ;;  %3684 = vmatmul.bf16.gmra.mxu1 %v13786_v11  ;;  %v13968_v60 = vadd.f32 %v13858_v42, %v2901_v22  ;;  %4369 = vmatpush.bf16.msra.mxu2 %v11857_v57 }
 0x261   : >> { %3800 = vmatmul.bf16.gmra.mxu2 %v13786_v11  ;;  %v2610_v26 = vadd.f32 %v2590_v15, %v13878_v36  ;;  %v11856_v15 = vld [vmem:[#allocation9 + $0x410] sm:$0xff] }
 0x262   : >> { %v2851_v3 = vpop.f32.mrf.mxu3 }
 0x263   : >> { %v2878_v40 = vrot.slane %v2851_v3, 7 }
 0x264   : >> { %v2712_v61 = vpop.f32.mrf.mxu2  ;;  %v13971_v59 = vpop.f32.mrf.mxu0  ;;  %4370 = vmatpush.bf16.msra.mxu2 %v11856_v15  ;;  %v11875_v15 = vld [vmem:[#allocation9 + $0x4a8] sm:$0xff] }
 0x265   : >> { %v2727_v10 = vrot.slane %v2712_v61, 3  ;;  %v2897_v44 = vsel %vm2192_vm14, %v2877_v25, %v2878_v40  ;;  %v2574_v37 = vpop.f32.mrf.mxu1 }
 0x266   : >> { %v2902_v42 = vadd.f32 %v2897_v44, %v13848_v31  ;;  %v2588_v24 = vrot.slane %v2574_v37, 2  ;;  %v11831_v31 = vld [vmem:[#allocation9 + $0x348] sm:$0xff] }
 0x267   : >> { %v2731_v8 = vsel %vm2729_vm12, %v2726_v32, %v2727_v10  ;;  %v11877_v32 = vld [vmem:[#allocation9 + $0x4b8] sm:$0xff]  ;;  %3933 = vmatpush.bf16.msra.mxu3 %v11831_v31 }
 0x268   : >> { %v13978_v0 = vadd.f32 %v2731_v8, %v2610_v26  ;;  %v13981_v36 = vadd.f32 %v13875_v18, %v2902_v42  ;;  %v2589_v50 = vsel %vm1095_vm13, %v2587_v29, %v2588_v24  ;;  %v2600_v34 = vsel %vm1095_vm13, %v2588_v24, %v2577_v27  ;;  %4621 = vmatpush.bf16.msrb.mxu0 %v11877_v32  ;;  %v11830_v26 = vld [vmem:[#allocation9 + $0x340] sm:$0xff] }
 0x269   : >> { %v2611_v39 = vadd.f32 %v2589_v50, %v13895_v30  ;;  %v2612_v25 = vadd.f32 %v2600_v34, %v13915_v48  ;;  %v11855_v34 = vld [vmem:[#allocation9 + $0x408] sm:$0xff] }
 0x26a   : >> { %v2853_v6 = vpop.f32.mrf.mxu3  ;;  %4371 = vmatpush.bf16.msra.mxu2 %v11855_v34 }
 0x26b   : >> { %v2879_v18 = vrot.slane %v2853_v6, 7  ;;  %3934 = vmatpush.bf16.msra.mxu3 %v11830_v26 }
 0x26c   : >> { %v2714_v33 = vpop.f32.mrf.mxu2  ;;  %v13991_v22 = vpop.f32.mrf.mxu0 }
 0x26d   : >> { %v2728_v56 = vrot.slane %v2714_v33, 3  ;;  %v2896_v16 = vsel %vm2192_vm14, %v2878_v40, %v2879_v18  ;;  %v13995_v27 = vpop.f32.mrf.mxu1 }
 0x26e   : >> { %v2903_v29 = vadd.f32 %v2896_v16, %v13865_v52  ;;  %v11876_v52 = vld [vmem:[#allocation9 + $0x4b0] sm:$0xff]  ;;  %v3132_v8 = vrot.slane %v13995_v27, 1  ;;  %v11847_v16 = vld [vmem:[#allocation9 + $0x3c8] sm:$0xff] }
 0x26f   : >> { %v2730_v30 = vsel %vm2729_vm12, %v2727_v10, %v2728_v56  ;;  %v2741_v48 = vsel %vm2729_vm12, %v2728_v56, %v2717_v20  ;;  %3401 = vmatmul.bf16.gmra.mxu3 %v13614_v55  ;;  %4075 = vmatmul.bf16.vlgmr.msra.gmra.mxu0 %v13732_v49  ;;  %v11848_v20 = vld [vmem:[#allocation9 + $0x3d0] sm:$0xff] }
 0x270   : >> { %v14004_v57 = vadd.f32 %v2730_v30, %v2611_v39  ;;  %v14006_v3 = vadd.f32 %v2741_v48, %v2612_v25  ;;  %3689 = vmatmul.bf16.gmra.mxu1 %v13839_v28  ;;  %v14013_v23 = vadd.f32 %v13892_v45, %v2903_v29  ;;  %4622 = vmatpush.bf16.msrb.mxu0 %v11876_v52  ;;  %v11869_v29 = vld [vmem:[#allocation9 + $0x478] sm:$0xff] }
 0x271   : >> { %3805 = vmatmul.bf16.gmra.mxu2 %v13839_v28  ;;  %4230 = vmatpush.bf16.msra.mxu1 %v11848_v20 }
 0x272   : >> { %v2856_v61 = vpop.f32.mrf.mxu3  ;;  %4481 = vmatpush.bf16.msrb.mxu3 %v11869_v29 }
 0x273   : >> { %v2880_v40 = vrot.slane %v2856_v61, 7 }
 0x274   : >> { %v14015_v10 = vpop.f32.mrf.mxu2  ;;  %v14017_v55 = vpop.f32.mrf.mxu0  ;;  %4623 = vmatpush.bf16.msrb.mxu0 %v11875_v15 }
 0x275   : >> { %v2895_v44 = vsel %vm2192_vm14, %v2879_v18, %v2880_v40  ;;  %v3104_v37 = vpop.f32.mrf.mxu1  ;;  %v3272_v31 = vrot.slane %v14015_v10, 2  ;;  %4231 = vmatpush.bf16.msra.mxu1 %v11847_v16 }
 0x276   : >> { %v2904_v45 = vadd.f32 %v2895_v44, %v13882_v53  ;;  %v3133_v42 = vrot.slane %v3104_v37, 1 }
 0x278   : >> { %v14024_v24 = vadd.f32 %v13912_v46, %v2904_v45  ;;  %v14030_v50 = vsel %vm605_vm0, %v3132_v8, %v3133_v42 }
 0x27a   : >> { %v2858_v4 = vpop.f32.mrf.mxu3 }
 0x27b   : >> { %v2881_v39 = vrot.slane %v2858_v4, 7  ;;  %v11854_v4 = vld [vmem:[#allocation9 + $0x400] sm:$0xff] }
 0x27c   : >> { %v3244_v25 = vpop.f32.mrf.mxu2  ;;  %v14033_v6 = vpop.f32.mrf.mxu0  ;;  %4372 = vmatpush.bf16.msra.mxu2 %v11854_v4 }
 0x27d   : >> { %v3273_v32 = vrot.slane %v3244_v25, 2  ;;  %v2894_v53 = vsel %vm2192_vm14, %v2880_v40, %v2881_v39  ;;  %v3107_v46 = vpop.f32.mrf.mxu1 }
 0x27e   : >> { %v2905_v33 = vadd.f32 %v2894_v53, %v13899_v35  ;;  %v3134_v56 = vrot.slane %v3107_v46, 1  ;;  %v11846_v53 = vld [vmem:[#allocation9 + $0x3c0] sm:$0xff] }
 0x27f   : >> { %v14042_v18 = vsel %vm1095_vm13, %v3272_v31, %v3273_v32  ;;  %3406 = vmatmul.bf16.gmra.mxu3 %v13667_v7  ;;  %4080 = vmatmul.bf16.gmra.mxu0 %v13786_v11  ;;  %v11874_v46 = vld [vmem:[#allocation9 + $0x4a0] sm:$0xff] }
 0x280   : >> { %v3153_v30 = vsel %vm605_vm0, %v3133_v42, %v3134_v56  ;;  %3694 = vmatmul.bf16.gmra.mxu1 %v13873_v21  ;;  %v14051_v35 = vadd.f32 %v13930_v41, %v2905_v33  ;;  %4624 = vmatpush.bf16.msrb.mxu0 %v11874_v46 }
 0x281   : >> { %3810 = vmatmul.bf16.gmra.mxu2 %v13873_v21  ;;  %v3157_v48 = vadd.f32 %v3153_v30, %v13968_v60  ;;  %4232 = vmatpush.bf16.msra.mxu1 %v11846_v53 }
 0x282   : >> { %v2861_v26 = vpop.f32.mrf.mxu3 }
 0x283   : >> { %v2882_v20 = vrot.slane %v2861_v26, 7 }
 0x284   : >> { %v3247_v7 = vpop.f32.mrf.mxu2  ;;  %v14054_v61 = vpop.f32.mrf.mxu0 }
 0x285   : >> { %v3274_v52 = vrot.slane %v3247_v7, 2  ;;  %v2893_v40 = vsel %vm2192_vm14, %v2881_v39, %v2882_v20  ;;  %v3109_v44 = vpop.f32.mrf.mxu1  ;;  %v11868_v39 = vld [vmem:[#allocation9 + $0x470] sm:$0xff]  ;;  %v11893_v7 = vld [vmem:[#allocation9 + $0x538] sm:$0xff] }
 0x286   : >> { %v2906_v41 = vadd.f32 %v2893_v40, %v13919_v62  ;;  %v3135_v37 = vrot.slane %v3109_v44, 1  ;;  %4482 = vmatpush.bf16.msrb.mxu3 %v11868_v39  ;;  %4922 = vmatpush.bf16.msrb.mxu2 %v11893_v7  ;;  %v11885_v39 = vld [vmem:[#allocation9 + $0x4f8] sm:$0xff] }
 0x287   : >> { %v3293_v60 = vsel %vm1095_vm13, %v3273_v32, %v3274_v52  ;;  %4761 = vmatpush.bf16.msrb.mxu1 %v11885_v39 }
 0x288   : >> { %v14061_v45 = vadd.f32 %v3293_v60, %v3157_v48  ;;  %v14064_v42 = vadd.f32 %v13950_v14, %v2906_v41  ;;  %v3152_v34 = vsel %vm605_vm0, %v3134_v56, %v3135_v37 }
 0x289   : >> { %v3158_v25 = vadd.f32 %v3152_v34, %v13981_v36 }
 0x28a   : >> { %v2863_v33 = vpop.f32.mrf.mxu3 }
 0x28b   : >> { %v2883_v62 = vrot.slane %v2863_v33, 7 }
 0x28c   : >> { %v3249_v16 = vpop.f32.mrf.mxu2  ;;  %v14069_v30 = vpop.f32.mrf.mxu0 }
 0x28d   : >> { %v3275_v32 = vrot.slane %v3249_v16, 2  ;;  %v2892_v14 = vsel %vm2192_vm14, %v2882_v20, %v2883_v62  ;;  %v3112_v56 = vpop.f32.mrf.mxu1  ;;  %v11867_v16 = vld [vmem:[#allocation9 + $0x468] sm:$0xff] }
 0x28e   : >> { %v2907_v48 = vadd.f32 %v2892_v14, %v13934_v51  ;;  %v3136_v29 = vrot.slane %v3112_v56, 1  ;;  %4483 = vmatpush.bf16.msrb.mxu3 %v11867_v16 }
 0x28f   : >> { %v3292_v36 = vsel %vm1095_vm13, %v3274_v52, %v3275_v32  ;;  %3935 = vmatmul.bf16.vlgmr.msra.gmra.mxu3 %v13732_v49  ;;  %4085 = vmatmul.bf16.gmra.mxu0 %v13839_v28  ;;  %v3570_v49 = vrot.slane %v14069_v30, 7 }
 0x290   : >> { %v14078_v15 = vadd.f32 %v3292_v36, %v3158_v25  ;;  %v3151_v26 = vsel %vm605_vm0, %v3135_v37, %v3136_v29  ;;  %3699 = vmatmul.bf16.gmra.mxu1 %v13910_v9  ;;  %v14085_v20 = vadd.f32 %v13971_v59, %v2907_v48 }
 0x291   : >> { %3815 = vmatmul.bf16.gmra.mxu2 %v13910_v9  ;;  %v3159_v51 = vadd.f32 %v3151_v26, %v14013_v23 }
 0x292   : >> { %v2866_v52 = vpop.f32.mrf.mxu3 }
 0x293   : >> { %v2884_v40 = vrot.slane %v2866_v52, 7 }
 0x294   : >> { %v3252_v44 = vpop.f32.mrf.mxu2  ;;  %v3542_v60 = vpop.f32.mrf.mxu0 }
 0x295   : >> { %v3276_v41 = vrot.slane %v3252_v44, 2  ;;  %v2891_v37 = vsel %vm2192_vm14, %v2883_v62, %v2884_v40  ;;  %v3114_v34 = vpop.f32.mrf.mxu1  ;;  %v3571_v4 = vrot.slane %v3542_v60, 7  ;;  %v11892_v44 = vld [vmem:[#allocation9 + $0x530] sm:$0xff] }
 0x296   : >> { %v2908_v25 = vadd.f32 %v2891_v37, %v13959_v1  ;;  %v3137_v23 = vrot.slane %v3114_v34, 1  ;;  %4923 = vmatpush.bf16.msrb.mxu2 %v11892_v44  ;;  %v11866_v34 = vld [vmem:[#allocation9 + $0x460] sm:$0xff] }
 0x297   : >> { %v3291_v59 = vsel %vm1095_vm13, %v3275_v32, %v3276_v41  ;;  %v14100_v46 = vsel %vm2192_vm14, %v3570_v49, %v3571_v4  ;;  %v11873_v32 = vld [vmem:[#allocation9 + $0x498] sm:$0xff]  ;;  %4484 = vmatpush.bf16.msrb.mxu3 %v11866_v34 }
 0x298   : >> { %v14094_v53 = vadd.f32 %v3291_v59, %v3159_v51  ;;  %v14103_v33 = vadd.f32 %v13991_v22, %v2908_v25  ;;  %v3150_v62 = vsel %vm605_vm0, %v3136_v29, %v3137_v23  ;;  %4625 = vmatpush.bf16.msrb.mxu0 %v11873_v32  ;;  %v11872_v25 = vld [vmem:[#allocation9 + $0x490] sm:$0xff] }
 0x299   : >> { %v3160_v1 = vadd.f32 %v3150_v62, %v14024_v24 }
 0x29a   : >> { %v2868_v14 = vpop.f32.mrf.mxu3 }
 0x29b   : >> { %v2885_v56 = vrot.slane %v2868_v14, 7  ;;  %4485 = vmatpush.bf16.msrb.mxu3 %v11865_v12 }
 0x29c   : >> { %v3254_v48 = vpop.f32.mrf.mxu2  ;;  %v3545_v26 = vpop.f32.mrf.mxu0  ;;  %4626 = vmatpush.bf16.msrb.mxu0 %v11872_v25 }
 0x29d   : >> { %v3277_v36 = vrot.slane %v3254_v48, 2  ;;  %v2890_v51 = vsel %vm2192_vm14, %v2884_v40, %v2885_v56  ;;  %v3117_v22 = vpop.f32.mrf.mxu1  ;;  %v3572_v7 = vrot.slane %v3545_v26, 7 }
 0x29e   : >> { %v2909_v52 = vadd.f32 %v2890_v51, %v13978_v0  ;;  %v3138_v29 = vrot.slane %v3117_v22, 1 }
 0x29f   : >> { %v3290_v24 = vsel %vm1095_vm13, %v3276_v41, %v3277_v36  ;;  %3940 = vmatmul.bf16.gmra.mxu3 %v13786_v11  ;;  %4090 = vmatmul.bf16.gmra.mxu0 %v13873_v21  ;;  %v14117_v60 = vsel %vm2192_vm14, %v3571_v4, %v3572_v7  ;;  %v11884_v41 = vld [vmem:[#allocation9 + $0x4f0] sm:$0xff] }
 0x2a0   : >> { %v14119_v37 = vadd.f32 %v3290_v24, %v3160_v1  ;;  %v3149_v40 = vsel %vm605_vm0, %v3137_v23, %v3138_v29  ;;  %3704 = vmatmul.bf16.gmra.mxu1 %v13948_v17  ;;  %v14126_v0 = vadd.f32 %v14017_v55, %v2909_v52  ;;  %v11891_v52 = vld [vmem:[#allocation9 + $0x528] sm:$0xff] }
 0x2a1   : >> { %3820 = vmatmul.bf16.gmra.mxu2 %v13948_v17  ;;  %v3161_v11 = vadd.f32 %v3149_v40, %v14051_v35  ;;  %4762 = vmatpush.bf16.msrb.mxu1 %v11884_v41 }
 0x2a2   : >> { %v2871_v4 = vpop.f32.mrf.mxu3  ;;  %4924 = vmatpush.bf16.msrb.mxu2 %v11891_v52  ;;  %v11864_v52 = vld [vmem:[#allocation9 + $0x450] sm:$0xff] }
 0x2a3   : >> { %v2886_v59 = vrot.slane %v2871_v4, 7  ;;  %4486 = vmatpush.bf16.msrb.mxu3 %v11864_v52 }
 0x2a4   : >> { %v3257_v39 = vpop.f32.mrf.mxu2  ;;  %v3547_v23 = vpop.f32.mrf.mxu0 }
 0x2a5   : >> { %v3278_v62 = vrot.slane %v3257_v39, 2  ;;  %v2889_v1 = vsel %vm2192_vm14, %v2885_v56, %v2886_v59  ;;  %v3119_v16 = vpop.f32.mrf.mxu1  ;;  %v3573_v55 = vrot.slane %v3547_v23, 7 }
 0x2a6   : >> { %v2910_v32 = vadd.f32 %v2889_v1, %v14004_v57  ;;  %v3139_v14 = vrot.slane %v3119_v16, 1  ;;  %v11871_v57 = vld [vmem:[#allocation9 + $0x488] sm:$0xff] }
 0x2a7   : >> { %v3289_v35 = vsel %vm1095_vm13, %v3277_v36, %v3278_v62  ;;  %v14138_v26 = vsel %vm2192_vm14, %v3572_v7, %v3573_v55  ;;  %4627 = vmatpush.bf16.msrb.mxu0 %v11871_v57  ;;  %v14148_v7 = vpack.c.bf16 %v13830_v19, %v13781_v2  ;;  %v11870_v2 = vld [vmem:[#allocation9 + $0x480] sm:$0xff]  ;;  %v11883_v19 = vld [vmem:[#allocation9 + $0x4e8] sm:$0xff] }
 0x2a8   : >> { %v14134_v48 = vadd.f32 %v3289_v35, %v3161_v11  ;;  %v14141_v51 = vadd.f32 %v14033_v6, %v2910_v32  ;;  %v3148_v56 = vsel %vm605_vm0, %v3138_v29, %v3139_v14  ;;  %4763 = vmatpush.bf16.msrb.mxu1 %v11883_v19 }
 0x2a9   : >> { %v3162_v22 = vadd.f32 %v3148_v56, %v14064_v42  ;;  %v11890_v56 = vld [vmem:[#allocation9 + $0x520] sm:$0xff] }
 0x2aa   : >> { %v2873_v24 = vpop.f32.mrf.mxu3  ;;  %4925 = vmatpush.bf16.msrb.mxu2 %v11890_v56 }
 0x2ab   : >> { %v2887_v44 = vrot.slane %v2873_v24, 7  ;;  %4628 = vmatpush.bf16.msrb.mxu0 %v11870_v2 }
 0x2ac   : >> { %v3259_v36 = vpop.f32.mrf.mxu2  ;;  %v3550_v11 = vpop.f32.mrf.mxu0 }
 0x2ad   : >> { %v3279_v40 = vrot.slane %v3259_v36, 2  ;;  %v2888_v6 = vsel %vm2192_vm14, %v2886_v59, %v2887_v44  ;;  %v2899_v42 = vsel %vm2192_vm14, %v2887_v44, %v2876_v5  ;;  %v3122_v29 = vpop.f32.mrf.mxu1  ;;  %v3574_v41 = vrot.slane %v3550_v11, 7  ;;  %v14194_v36 = vld [vmem:[%s12819_s22 + $0x60] sm:$0xff] }
 0x2ae   : >> { %v2900_v34 = vadd.f32 %v2899_v42, %v13796_v38  ;;  %v2911_v25 = vadd.f32 %v2888_v6, %v14006_v3  ;;  %v3140_v39 = vrot.slane %v3122_v29, 1 }
 0x2af   : >> { %v3288_v4 = vsel %vm1095_vm13, %v3278_v62, %v3279_v40  ;;  %3945 = vmatmul.bf16.gmra.mxu3 %v13839_v28  ;;  %4095 = vmatmul.bf16.gmra.mxu0 %v13910_v9  ;;  %v14164_v5 = vsel %vm2192_vm14, %v3573_v55, %v3574_v41 }
 0x2b0   : >> { %v14166_v59 = vadd.f32 %v3288_v4, %v3162_v22  ;;  %v3016_v38 = vadd.f32 %v13841_v13, %v2900_v34  ;;  %v3147_v3 = vsel %vm605_vm0, %v3139_v14, %v3140_v39  ;;  %4233 = vmatmul.bf16.vlgmr.msra.gmra.mxu1 %v14148_v7  ;;  %v14174_v28 = vadd.f32 %v14054_v61, %v2911_v25  ;;  %v11882_v22 = vld [vmem:[#allocation9 + $0x4e0] sm:$0xff] }
 0x2b1   : >> { %4373 = vmatmul.bf16.vlgmr.msra.gmra.mxu2 %v14148_v7  ;;  %v3163_v62 = vadd.f32 %v3147_v3, %v14085_v20  ;;  %4764 = vmatpush.bf16.msrb.mxu1 %v11882_v22 }
 0x2b2   : >> { %v14177_v23 = vpop.f32.mrf.mxu3  ;;  %v3156_v1 = vadd.f32 %v14030_v50, %v3016_v38  ;;  %v11889_v38 = vld [vmem:[#allocation9 + $0x518] sm:$0xff] }
 0x2b3   : >> { %v3412_v24 = vrot.slane %v14177_v23, 3  ;;  %4926 = vmatpush.bf16.msrb.mxu2 %v11889_v38 }
 0x2b4   : >> { %v3262_v13 = vpop.f32.mrf.mxu2  ;;  %v3552_v55 = vpop.f32.mrf.mxu0  ;;  %v3296_v32 = vadd.f32 %v14042_v18, %v3156_v1 }
 0x2b5   : >> { %v3280_v16 = vrot.slane %v3262_v13, 2  ;;  %v3124_v35 = vpop.f32.mrf.mxu1  ;;  %v3575_v14 = vrot.slane %v3552_v55, 7 }
 0x2b6   : >> { %v3141_v20 = vrot.slane %v3124_v35, 1 }
 0x2b7   : >> { %v3287_v61 = vsel %vm1095_vm13, %v3279_v40, %v3280_v16  ;;  %v14187_v50 = vsel %vm2192_vm14, %v3574_v41, %v3575_v14  ;;  %v14198_v41 = vpack.c.bf16 %v14194_v36, %v13833_v47 }
 0x2b8   : >> { %v14183_v57 = vadd.f32 %v3287_v61, %v3163_v62  ;;  %v3146_v18 = vsel %vm605_vm0, %v3140_v39, %v3141_v20 }
 0x2b9   : >> { %v3164_v44 = vadd.f32 %v3146_v18, %v14103_v33 }
 0x2ba   : >> { %v3384_v40 = vpop.f32.mrf.mxu3 }
 0x2bb   : >> { %v3413_v6 = vrot.slane %v3384_v40, 3 }
 0x2bc   : >> { %v3264_v11 = vpop.f32.mrf.mxu2  ;;  %v3555_v29 = vpop.f32.mrf.mxu0 }
 0x2bd   : >> { %v3281_v42 = vrot.slane %v3264_v11, 2  ;;  %v3434_v34 = vsel %vm2729_vm12, %v3412_v24, %v3413_v6  ;;  %v3127_v25 = vpop.f32.mrf.mxu1  ;;  %v3576_v4 = vrot.slane %v3555_v29, 7  ;;  %v14242_v11 = vld [vmem:[%s12819_s22 + $0x68] sm:$0xff]  ;;  %v11863_v29 = vld [vmem:[#allocation9 + $0x448] sm:$0xff] }
 0x2be   : >> { %v14206_v39 = vadd.f32 %v3434_v34, %v3296_v32  ;;  %v3142_v2 = vrot.slane %v3127_v25, 1  ;;  %v11909_v34 = vld [vmem:[#allocation9 + $0x5b8] sm:$0xff]  ;;  %4487 = vmatpush.bf16.msrb.mxu3 %v11863_v29 }
 0x2bf   : >> { %v3286_v33 = vsel %vm1095_vm13, %v3280_v16, %v3281_v42  ;;  %3950 = vmatmul.bf16.gmra.mxu3 %v13873_v21  ;;  %4100 = vmatmul.bf16.gmra.mxu0 %v13948_v17  ;;  %v14212_v47 = vsel %vm2192_vm14, %v3575_v14, %v3576_v4 }
 0x2c0   : >> { %v14214_v19 = vadd.f32 %v3286_v33, %v3164_v44  ;;  %v3145_v12 = vsel %vm605_vm0, %v3141_v20, %v3142_v2  ;;  %4238 = vmatmul.bf16.gmra.mxu1 %v14198_v41  ;;  %v11881_v20 = vld [vmem:[#allocation9 + $0x4d8] sm:$0xff]  ;;  %5178 = vmatpush.bf16.msra.mxu0 %v11909_v34 }
 0x2c1   : >> { %4378 = vmatmul.bf16.gmra.mxu2 %v14198_v41  ;;  %v3165_v3 = vadd.f32 %v3145_v12, %v14126_v0  ;;  %4765 = vmatpush.bf16.msrb.mxu1 %v11881_v20 }
 0x2c2   : >> { %v3387_v62 = vpop.f32.mrf.mxu3 }
 0x2c3   : >> { %v3414_v1 = vrot.slane %v3387_v62, 3 }
 0x2c4   : >> { %v3267_v21 = vpop.f32.mrf.mxu2  ;;  %v3557_v16 = vpop.f32.mrf.mxu0 }
 0x2c5   : >> { %v3282_v13 = vrot.slane %v3267_v21, 2  ;;  %v3433_v55 = vsel %vm2729_vm12, %v3413_v6, %v3414_v1  ;;  %v3129_v32 = vpop.f32.mrf.mxu1  ;;  %v3577_v35 = vrot.slane %v3557_v16, 7  ;;  %v14245_v6 = vld [vmem:[%s12819_s22 + $0x70] sm:$0xff]  ;;  %v11888_v21 = vld [vmem:[#allocation9 + $0x510] sm:$0xff] }
 0x2c6   : >> { %v3143_v56 = vrot.slane %v3129_v32, 1  ;;  %v3437_v61 = vadd.f32 %v3433_v55, %v14061_v45  ;;  %4927 = vmatpush.bf16.msrb.mxu2 %v11888_v21 }
 0x2c7   : >> { %v3285_v14 = vsel %vm1095_vm13, %v3281_v42, %v3282_v13  ;;  %v14230_v22 = vsel %vm2192_vm14, %v3576_v4, %v3577_v35 }
 0x2c8   : >> { %v14226_v0 = vadd.f32 %v3285_v14, %v3165_v3  ;;  %v3144_v52 = vsel %vm605_vm0, %v3142_v2, %v3143_v56  ;;  %v3155_v18 = vsel %vm605_vm0, %v3143_v56, %v3132_v8  ;;  %v3595_v44 = vadd.f32 %v14100_v46, %v3437_v61  ;;  %v11862_v3 = vld [vmem:[#allocation9 + $0x440] sm:$0xff] }
 0x2c9   : >> { %v3166_v40 = vadd.f32 %v3144_v52, %v14141_v51  ;;  %v3167_v45 = vadd.f32 %v3155_v18, %v14174_v28  ;;  %v14249_v8 = vpack.c.bf16 %v14245_v6, %v14242_v11  ;;  %4488 = vmatpush.bf16.msrb.mxu3 %v11862_v3 }
 0x2ca   : >> { %v3389_v42 = vpop.f32.mrf.mxu3 }
 0x2cb   : >> { %v3415_v4 = vrot.slane %v3389_v42, 3 }
 0x2cc   : >> { %v3269_v25 = vpop.f32.mrf.mxu2  ;;  %v3560_v33 = vpop.f32.mrf.mxu0 }
 0x2cd   : >> { %v3283_v27 = vrot.slane %v3269_v25, 2  ;;  %v3578_v46 = vrot.slane %v3560_v33, 7  ;;  %v14251_v51 = vpop.f32.mrf.mxu1  ;;  %v3432_v28 = vsel %vm2729_vm12, %v3414_v1, %v3415_v4 }
 0x2ce   : >> { %v3438_v38 = vadd.f32 %v3432_v28, %v14078_v15  ;;  %v11908_v15 = vld [vmem:[#allocation9 + $0x5b0] sm:$0xff]  ;;  %v11879_v28 = vld [vmem:[#allocation9 + $0x4c8] sm:$0xff] }
 0x2cf   : >> { %v3284_v2 = vsel %vm1095_vm13, %v3282_v13, %v3283_v27  ;;  %v3295_v12 = vsel %vm1095_vm13, %v3283_v27, %v3272_v31  ;;  %3955 = vmatmul.bf16.gmra.mxu3 %v13910_v9  ;;  %4629 = vmatmul.bf16.vlgmr.msrb.gmra.mxu0 %v14148_v7  ;;  %v14268_v1 = vsel %vm2192_vm14, %v3577_v35, %v3578_v46  ;;  %v11880_v31 = vld [vmem:[#allocation9 + $0x4d0] sm:$0xff] }
 0x2d0   : >> { %v14262_v62 = vadd.f32 %v3295_v12, %v3167_v45  ;;  %v14270_v13 = vadd.f32 %v3284_v2, %v3166_v40  ;;  %4243 = vmatmul.bf16.gmra.mxu1 %v14249_v8  ;;  %v3596_v10 = vadd.f32 %v14117_v60, %v3438_v38  ;;  %5179 = vmatpush.bf16.msra.mxu0 %v11908_v15  ;;  %v11887_v60 = vld [vmem:[#allocation9 + $0x508] sm:$0xff] }
 0x2d1   : >> { %4383 = vmatmul.bf16.gmra.mxu2 %v14249_v8  ;;  %4766 = vmatpush.bf16.msrb.mxu1 %v11880_v31 }
 0x2d2   : >> { %v3392_v9 = vpop.f32.mrf.mxu3  ;;  %4928 = vmatpush.bf16.msrb.mxu2 %v11887_v60 }
 0x2d3   : >> { %v3416_v16 = vrot.slane %v3392_v9, 3 }
 0x2d4   : >> { %v14275_v55 = vpop.f32.mrf.mxu2  ;;  %v3562_v32 = vpop.f32.mrf.mxu0 }
 0x2d5   : >> { %v3431_v35 = vsel %vm2729_vm12, %v3415_v4, %v3416_v16  ;;  %v3579_v14 = vrot.slane %v3562_v32, 7  ;;  %v3682_v56 = vpop.f32.mrf.mxu1  ;;  %v3826_v29 = vrot.slane %v14275_v55, 1  ;;  %4767 = vmatpush.bf16.msrb.mxu1 %v11879_v28 }
 0x2d6   : >> { %v3711_v61 = vadd.f32 %v3682_v56, %v3595_v44  ;;  %v3439_v20 = vadd.f32 %v3431_v35, %v14094_v53  ;;  %v14288_v44 = vpack.c.bf16 %v13937_v43, %v13904_v63  ;;  %v11901_v63 = vld [vmem:[#allocation9 + $0x578] sm:$0xff]  ;;  %v11907_v43 = vld [vmem:[#allocation9 + $0x5a8] sm:$0xff]  ;;  %v11878_v56 = vld [vmem:[#allocation9 + $0x4c0] sm:$0xff] }
 0x2d7   : >> { %v14282_v52 = vsel %vm2192_vm14, %v3578_v46, %v3579_v14  ;;  %5062 = vmatpush.bf16.msra.mxu3 %v11901_v63  ;;  %5180 = vmatpush.bf16.msra.mxu0 %v11907_v43 }
 0x2d8   : >> { %v3597_v18 = vadd.f32 %v14138_v26, %v3439_v20  ;;  %v11900_v20 = vld [vmem:[#allocation9 + $0x570] sm:$0xff] }
 0x2d9   : >> { %4768 = vmatpush.bf16.msrb.mxu1 %v11878_v56  ;;  %v14368_v56 = vld [vmem:[%s12819_s22 + $0x98] sm:$0xff] }
 0x2da   : >> { %v3394_v40 = vpop.f32.mrf.mxu3 }
 0x2db   : >> { %v3417_v45 = vrot.slane %v3394_v40, 3  ;;  %5063 = vmatpush.bf16.msra.mxu3 %v11900_v20  ;;  %v14371_v20 = vld [vmem:[%s12819_s22 + $0xa0] sm:$0xff] }
 0x2dc   : >> { %v3798_v42 = vpop.f32.mrf.mxu2  ;;  %v3565_v25 = vpop.f32.mrf.mxu0 }
 0x2dd   : >> { %v3827_v34 = vrot.slane %v3798_v42, 1  ;;  %v3580_v53 = vrot.slane %v3565_v25, 7  ;;  %v3685_v4 = vpop.f32.mrf.mxu1  ;;  %v3430_v27 = vsel %vm2729_vm12, %v3416_v16, %v3417_v45 }
 0x2de   : >> { %v3712_v33 = vadd.f32 %v3685_v4, %v3596_v10  ;;  %v3440_v46 = vadd.f32 %v3430_v27, %v14119_v37 }
 0x2df   : >> { %v3848_v26 = vsel %vm605_vm0, %v3826_v29, %v3827_v34  ;;  %3960 = vmatmul.bf16.gmra.mxu3 %v13948_v17  ;;  %4634 = vmatmul.bf16.gmra.mxu0 %v14198_v41  ;;  %v14301_v2 = vsel %vm2192_vm14, %v3579_v14, %v3580_v53  ;;  %v11886_v14 = vld [vmem:[#allocation9 + $0x500] sm:$0xff] }
 0x2e0   : >> { %4248 = vmatmul.bf16.gmra.mxu1 %v14288_v44  ;;  %v3598_v12 = vadd.f32 %v14164_v5, %v3440_v46  ;;  %4929 = vmatpush.bf16.msrb.mxu2 %v11886_v14 }
 0x2e1   : >> { %4388 = vmatmul.bf16.gmra.mxu2 %v14288_v44 }
 0x2e2   : >> { %v3397_v37 = vpop.f32.mrf.mxu3 }
 0x2e3   : >> { %v3418_v17 = vrot.slane %v3397_v37, 3 }
 0x2e4   : >> { %v3801_v38 = vpop.f32.mrf.mxu2  ;;  %v3567_v21 = vpop.f32.mrf.mxu0 }
 0x2e5   : >> { %v3828_v3 = vrot.slane %v3801_v38, 1  ;;  %v3429_v10 = vsel %vm2729_vm12, %v3417_v45, %v3418_v17  ;;  %v3581_v31 = vrot.slane %v3567_v21, 7  ;;  %v3687_v15 = vpop.f32.mrf.mxu1  ;;  %v11906_v45 = vld [vmem:[#allocation9 + $0x5a0] sm:$0xff] }
 0x2e6   : >> { %v3713_v16 = vadd.f32 %v3687_v15, %v3597_v18  ;;  %v3441_v5 = vadd.f32 %v3429_v10, %v14134_v48  ;;  %v14324_v48 = vld [vmem:[%s12819_s22 + $0x90] sm:$0xff]  ;;  %5181 = vmatpush.bf16.msra.mxu0 %v11906_v45 }
 0x2e7   : >> { %v3847_v9 = vsel %vm605_vm0, %v3827_v34, %v3828_v3  ;;  %v3593_v35 = vsel %vm2192_vm14, %v3581_v31, %v3570_v49  ;;  %v14319_v60 = vsel %vm2192_vm14, %v3580_v53, %v3581_v31 }
 0x2e8   : >> { %v14311_v32 = vadd.f32 %v3847_v9, %v3711_v61  ;;  %v3594_v40 = vadd.f32 %v3593_v35, %v14206_v39  ;;  %v3599_v18 = vadd.f32 %v14187_v50, %v3441_v5  ;;  %v14331_v39 = vpack.c.bf16 %v14324_v48, %v13940_v58  ;;  %v14364_v9 = vld [vmem:[#allocation9 + $0x5f8] sm:$0xff]  ;;  %v11899_v5 = vld [vmem:[#allocation9 + $0x568] sm:$0xff] }
 0x2e9   : >> { %v11905_v35 = vld [vmem:[#allocation9 + $0x598] sm:$0xff]  ;;  %12207 = vmatpush.bf16.msra.mxu1 %v14364_v9  ;;  %5064 = vmatpush.bf16.msra.mxu3 %v11899_v5 }
 0x2ea   : >> { %v3710_v30 = vadd.f32 %v14251_v51, %v3594_v40  ;;  %v3399_v61 = vpop.f32.mrf.mxu3  ;;  %5182 = vmatpush.bf16.msra.mxu0 %v11905_v35 }
 0x2eb   : >> { %v3419_v49 = vrot.slane %v3399_v61, 3 }
 0x2ec   : >> { %v3803_v42 = vpop.f32.mrf.mxu2  ;;  %v14327_v25 = vpop.f32.mrf.mxu0  ;;  %v14333_v50 = vadd.f32 %v3848_v26, %v3710_v30  ;;  %v14347_v26 = vld [vmem:[#allocation9 + $0x638] sm:$0xff]  ;;  %v14376_v30 = vpack.c.bf16 %v14371_v20, %v14368_v56 }
 0x2ed   : >> { %v3829_v34 = vrot.slane %v3803_v42, 1  ;;  %v3690_v53 = vpop.f32.mrf.mxu1  ;;  %v3428_v4 = vsel %vm2729_vm12, %v3418_v17, %v3419_v49  ;;  %12215 = vmatpush.bf16.msra.mxu2 %v14347_v26  ;;  %v4106_v43 = vrot.slane %v14327_v25, 3 }
 0x2ee   : >> { %v3714_v27 = vadd.f32 %v3690_v53, %v3598_v12  ;;  %v3442_v46 = vadd.f32 %v3428_v4, %v14166_v59 }
 0x2ef   : >> { %v3846_v51 = vsel %vm605_vm0, %v3828_v3, %v3829_v34  ;;  %4489 = vmatmul.bf16.vlgmr.msrb.gmra.mxu3 %v14148_v7  ;;  %4639 = vmatmul.bf16.gmra.mxu0 %v14249_v8 }
 0x2f0   : >> { %v14340_v28 = vadd.f32 %v3846_v51, %v3712_v33  ;;  %4253 = vmatmul.bf16.gmra.mxu1 %v14331_v39  ;;  %v3600_v58 = vadd.f32 %v14212_v47, %v3442_v46  ;;  %v14391_v46 = vld [vmem:[#allocation9 + $0x630] sm:$0xff] }
 0x2f1   : >> { %4393 = vmatmul.bf16.gmra.mxu2 %v14331_v39 }
 0x2f2   : >> { %v3402_v63 = vpop.f32.mrf.mxu3  ;;  %12216 = vmatpush.bf16.msra.mxu2 %v14391_v46 }
 0x2f3   : >> { %v3420_v59 = vrot.slane %v3402_v63, 3  ;;  %v14396_v63 = vld [vmem:[#allocation9 + $0x5f0] sm:$0xff] }
 0x2f4   : >> { %v3806_v33 = vpop.f32.mrf.mxu2  ;;  %v4078_v37 = vpop.f32.mrf.mxu0  ;;  %12208 = vmatpush.bf16.msra.mxu1 %v14396_v63 }
 0x2f5   : >> { %v3830_v12 = vrot.slane %v3806_v33, 1  ;;  %v3427_v17 = vsel %vm2729_vm12, %v3419_v49, %v3420_v59  ;;  %v3692_v38 = vpop.f32.mrf.mxu1  ;;  %v4107_v3 = vrot.slane %v4078_v37, 3 }
 0x2f6   : >> { %v3715_v21 = vadd.f32 %v3692_v38, %v3599_v18  ;;  %v3443_v10 = vadd.f32 %v3427_v17, %v14183_v57 }
 0x2f7   : >> { %v3845_v47 = vsel %vm605_vm0, %v3829_v34, %v3830_v12  ;;  %v14362_v15 = vsel %vm2729_vm12, %v4106_v43, %v4107_v3 }
 0x2f8   : >> { %v14356_v31 = vadd.f32 %v3845_v47, %v3713_v16  ;;  %v3601_v14 = vadd.f32 %v14230_v22, %v3443_v10 }
 0x2fa   : >> { %v3404_v57 = vpop.f32.mrf.mxu3 }
 0x2fb   : >> { %v3421_v16 = vrot.slane %v3404_v57, 3  ;;  %v14407_v57 = vld [vmem:[#allocation9 + $0x628] sm:$0xff] }
 0x2fc   : >> { %v3808_v40 = vpop.f32.mrf.mxu2  ;;  %v4081_v45 = vpop.f32.mrf.mxu0  ;;  %12217 = vmatpush.bf16.msra.mxu2 %v14407_v57 }
 0x2fd   : >> { %v3831_v18 = vrot.slane %v3808_v40, 1  ;;  %v3695_v61 = vpop.f32.mrf.mxu1  ;;  %v4108_v49 = vrot.slane %v4081_v45, 3  ;;  %v3426_v22 = vsel %vm2729_vm12, %v3420_v59, %v3421_v16  ;;  %v11903_v40 = vld [vmem:[#allocation9 + $0x588] sm:$0xff] }
 0x2fe   : >> { %v3716_v34 = vadd.f32 %v3695_v61, %v3600_v58  ;;  %v3444_v53 = vadd.f32 %v3426_v22, %v14214_v19  ;;  %v11898_v19 = vld [vmem:[#allocation9 + $0x560] sm:$0xff] }
 0x2ff   : >> { %v3844_v42 = vsel %vm605_vm0, %v3830_v12, %v3831_v18  ;;  %v14387_v51 = vsel %vm2729_vm12, %v4107_v3, %v4108_v49  ;;  %4494 = vmatmul.bf16.gmra.mxu3 %v14198_v41  ;;  %4644 = vmatmul.bf16.gmra.mxu0 %v14288_v44 }
 0x300   : >> { %v14383_v4 = vadd.f32 %v3844_v42, %v3714_v27  ;;  %4258 = vmatmul.bf16.gmra.mxu1 %v14376_v30  ;;  %v3602_v58 = vadd.f32 %v14268_v1, %v3444_v53  ;;  %v11904_v27 = vld [vmem:[#allocation9 + $0x590] sm:$0xff]  ;;  %5065 = vmatpush.bf16.msra.mxu3 %v11898_v19 }
 0x301   : >> { %4398 = vmatmul.bf16.gmra.mxu2 %v14376_v30  ;;  %5183 = vmatpush.bf16.msra.mxu0 %v11904_v27 }
 0x302   : >> { %v3407_v59 = vpop.f32.mrf.mxu3 }
 0x303   : >> { %v3422_v33 = vrot.slane %v3407_v59, 3 }
 0x304   : >> { %v3811_v12 = vpop.f32.mrf.mxu2  ;;  %v4083_v17 = vpop.f32.mrf.mxu0 }
 0x305   : >> { %v3832_v37 = vrot.slane %v3811_v12, 1  ;;  %v3425_v38 = vsel %vm2729_vm12, %v3421_v16, %v3422_v33  ;;  %v3697_v3 = vpop.f32.mrf.mxu1  ;;  %v4109_v1 = vrot.slane %v4083_v17, 3  ;;  %5184 = vmatpush.bf16.msra.mxu0 %v11903_v40 }
 0x306   : >> { %v3717_v10 = vadd.f32 %v3697_v3, %v3601_v14  ;;  %v3445_v5 = vadd.f32 %v3425_v38, %v14226_v0  ;;  %v14417_v0 = vpack.c.bf16 %v14242_v11, %v14194_v36  ;;  %v11902_v36 = vld [vmem:[#allocation9 + $0x580] sm:$0xff] }
 0x307   : >> { %v3843_v47 = vsel %vm605_vm0, %v3831_v18, %v3832_v37  ;;  %v14411_v45 = vsel %vm2729_vm12, %v4108_v49, %v4109_v1 }
 0x308   : >> { %v14405_v35 = vadd.f32 %v3843_v47, %v3715_v21  ;;  %v3603_v61 = vadd.f32 %v14282_v52, %v3445_v5  ;;  %v11896_v47 = vld [vmem:[#allocation9 + $0x550] sm:$0xff] }
 0x309   : >> { %5185 = vmatpush.bf16.msra.mxu0 %v11902_v36 }
 0x30a   : >> { %v3409_v16 = vpop.f32.mrf.mxu3 }
 0x30b   : >> { %v3423_v22 = vrot.slane %v3409_v16, 3  ;;  %v10310_v16 = vld [vmem:[%s12819_s22 + $0x78] sm:$0xff] }
 0x30c   : >> { %v3813_v18 = vpop.f32.mrf.mxu2  ;;  %v4086_v42 = vpop.f32.mrf.mxu0 }
 0x30d   : >> { %v3833_v14 = vrot.slane %v3813_v18, 1  ;;  %v3435_v21 = vsel %vm2729_vm12, %v3423_v22, %v3412_v24  ;;  %v3700_v49 = vpop.f32.mrf.mxu1  ;;  %v4110_v53 = vrot.slane %v4086_v42, 3  ;;  %v3424_v52 = vsel %vm2729_vm12, %v3422_v33, %v3423_v22  ;;  %v11915_v24 = vld [vmem:[#allocation9 + $0x5e8] sm:$0xff]  ;;  %v11897_v33 = vld [vmem:[#allocation9 + $0x558] sm:$0xff]  ;;  %5318 = vmatpush.bf16.msrb.mxu0 %v14364_v9 }
 0x30e   : >> { %v3718_v27 = vadd.f32 %v3700_v49, %v3602_v58  ;;  %v3446_v59 = vadd.f32 %v3424_v52, %v14270_v13  ;;  %v3447_v12 = vadd.f32 %v3435_v21, %v14262_v62  ;;  %12209 = vmatpush.bf16.msra.mxu1 %v11915_v24  ;;  %5066 = vmatpush.bf16.msra.mxu3 %v11897_v33 }
 0x30f   : >> { %v3842_v19 = vsel %vm605_vm0, %v3832_v37, %v3833_v14  ;;  %v14433_v23 = vsel %vm2729_vm12, %v4109_v1, %v4110_v53  ;;  %4499 = vmatmul.bf16.gmra.mxu3 %v14249_v8  ;;  %4649 = vmatmul.bf16.gmra.mxu0 %v14331_v39  ;;  %v14459_v42 = vpack.c.bf16 %v10310_v16, %v14245_v6  ;;  %v14478_v6 = vld [vmem:[#allocation9 + $0x618] sm:$0xff] }
 0x310   : >> { %v14429_v11 = vadd.f32 %v3842_v19, %v3716_v34  ;;  %4769 = vmatmul.bf16.vlgmr.msrb.gmra.mxu1 %v14148_v7  ;;  %v3604_v13 = vadd.f32 %v14301_v2, %v3446_v59  ;;  %v3605_v62 = vadd.f32 %v14319_v60, %v3447_v12  ;;  %v14446_v2 = vld [vmem:[#allocation9 + $0x620] sm:$0xff] }
 0x311   : >> { %4930 = vmatmul.bf16.vlgmr.msrb.gmra.mxu2 %v14417_v0  ;;  %v11914_v60 = vld [vmem:[#allocation9 + $0x5e0] sm:$0xff]  ;;  %5319 = vmatpush.bf16.msrb.mxu0 %v14396_v63 }
 0x312   : >> { %v14441_v34 = vpop.f32.mrf.mxu3  ;;  %12218 = vmatpush.bf16.msra.mxu2 %v14446_v2  ;;  %12210 = vmatpush.bf16.msra.mxu1 %v11914_v60 }
 0x313   : >> { %v3966_v40 = vrot.slane %v14441_v34, 2  ;;  %5067 = vmatpush.bf16.msra.mxu3 %v11896_v47 }
 0x314   : >> { %v3816_v58 = vpop.f32.mrf.mxu2  ;;  %v4088_v17 = vpop.f32.mrf.mxu0 }
 0x315   : >> { %v3834_v37 = vrot.slane %v3816_v58, 1  ;;  %v3702_v38 = vpop.f32.mrf.mxu1  ;;  %v4111_v3 = vrot.slane %v4088_v17, 3  ;;  %5320 = vmatpush.bf16.msrb.mxu0 %v11915_v24 }
 0x316   : >> { %v3719_v1 = vadd.f32 %v3702_v38, %v3603_v61  ;;  %12219 = vmatpush.bf16.msra.mxu2 %v14478_v6 }
 0x317   : >> { %v3841_v7 = vsel %vm605_vm0, %v3833_v14, %v3834_v37  ;;  %v14453_v9 = vsel %vm2729_vm12, %v4110_v53, %v4111_v3 }
 0x318   : >> { %v14448_v5 = vadd.f32 %v3841_v7, %v3717_v10  ;;  %v11895_v7 = vld [vmem:[#allocation9 + $0x548] sm:$0xff] }
 0x319   : >> { %5321 = vmatpush.bf16.msrb.mxu0 %v11914_v60  ;;  %5068 = vmatpush.bf16.msra.mxu3 %v11895_v7 }
 0x31a   : >> { %v3938_v61 = vpop.f32.mrf.mxu3 }
 0x31b   : >> { %v3967_v18 = vrot.slane %v3938_v61, 2  ;;  %v10311_v61 = vld [vmem:[%s12819_s22 + $0x80] sm:$0xff] }
 0x31c   : >> { %v3818_v22 = vpop.f32.mrf.mxu2  ;;  %v4091_v10 = vpop.f32.mrf.mxu0 }
 0x31d   : >> { %v3835_v14 = vrot.slane %v3818_v22, 1  ;;  %v3988_v63 = vsel %vm1095_vm13, %v3966_v40, %v3967_v18  ;;  %v3705_v21 = vpop.f32.mrf.mxu1  ;;  %v4112_v49 = vrot.slane %v4091_v10, 3  ;;  %v10312_v22 = vld [vmem:[%s12819_s22 + $0x88] sm:$0xff] }
 0x31e   : >> { %v3990_v52 = vadd.f32 %v3988_v63, %v14333_v50  ;;  %v3720_v19 = vadd.f32 %v3705_v21, %v3604_v13  ;;  %v14498_v63 = vpack.c.bf16 %v10312_v22, %v10311_v61 }
 0x31f   : >> { %v3840_v53 = vsel %vm605_vm0, %v3834_v37, %v3835_v14  ;;  %v14472_v12 = vsel %vm2729_vm12, %v4111_v3, %v4112_v49  ;;  %4504 = vmatmul.bf16.gmra.mxu3 %v14288_v44  ;;  %4654 = vmatmul.bf16.gmra.mxu0 %v14376_v30  ;;  %v11913_v3 = vld [vmem:[#allocation9 + $0x5d8] sm:$0xff] }
 0x320   : >> { %v14468_v59 = vadd.f32 %v3840_v53, %v3718_v27  ;;  %4774 = vmatmul.bf16.gmra.mxu1 %v14198_v41  ;;  %v14481_v36 = vadd.f32 %v14362_v15, %v3990_v52  ;;  %5322 = vmatpush.bf16.msrb.mxu0 %v11913_v3  ;;  %v14504_v53 = vld [vmem:[#allocation9 + $0x610] sm:$0xff] }
 0x321   : >> { %4935 = vmatmul.bf16.gmra.mxu2 %v14459_v42  ;;  %12211 = vmatpush.bf16.msra.mxu1 %v11913_v3  ;;  %v14533_v3 = vld [vmem:[#allocation9 + $0x608] sm:$0xff] }
 0x322   : >> { %v3941_v50 = vpop.f32.mrf.mxu3  ;;  %12220 = vmatpush.bf16.msra.mxu2 %v14504_v53 }
 0x323   : >> { %v3968_v24 = vrot.slane %v3941_v50, 2 }
 0x324   : >> { %v3821_v27 = vpop.f32.mrf.mxu2  ;;  %v4093_v13 = vpop.f32.mrf.mxu0 }
 0x325   : >> { %v3836_v33 = vrot.slane %v3821_v27, 1  ;;  %v3987_v41 = vsel %vm1095_vm13, %v3967_v18, %v3968_v24  ;;  %v3707_v58 = vpop.f32.mrf.mxu1  ;;  %v4113_v37 = vrot.slane %v4093_v13, 3  ;;  %v11894_v27 = vld [vmem:[#allocation9 + $0x540] sm:$0xff] }
 0x326   : >> { %v3991_v15 = vadd.f32 %v3987_v41, %v14311_v32  ;;  %v3721_v38 = vadd.f32 %v3707_v58, %v3605_v62  ;;  %5069 = vmatpush.bf16.msra.mxu3 %v11894_v27  ;;  %12221 = vmatpush.bf16.msra.mxu2 %v14533_v3 }
 0x327   : >> { %v3839_v17 = vsel %vm605_vm0, %v3835_v14, %v3836_v33  ;;  %v14493_v47 = vsel %vm2729_vm12, %v4112_v49, %v4113_v37 }
 0x328   : >> { %v14489_v60 = vadd.f32 %v3839_v17, %v3719_v1  ;;  %v4131_v16 = vadd.f32 %v14387_v51, %v3991_v15 }
 0x32a   : >> { %v3943_v18 = vpop.f32.mrf.mxu3 }
 0x32b   : >> { %v3969_v10 = vrot.slane %v3943_v18, 2 }
 0x32c   : >> { %v3823_v14 = vpop.f32.mrf.mxu2  ;;  %v4096_v62 = vpop.f32.mrf.mxu0 }
 0x32d   : >> { %v3837_v32 = vrot.slane %v3823_v14, 1  ;;  %v3986_v1 = vsel %vm1095_vm13, %v3968_v24, %v3969_v10  ;;  %v4114_v21 = vrot.slane %v4096_v62, 3  ;;  %v14502_v49 = vpop.f32.mrf.mxu1 }
 0x32e   : >> { %v3992_v50 = vadd.f32 %v3986_v1, %v14340_v28  ;;  %v4264_v15 = vrot.slane %v14502_v49, 7  ;;  %v14549_v1 = vpack.c.bf16 %v14368_v56, %v14324_v48 }
 0x32f   : >> { %v3838_v51 = vsel %vm605_vm0, %v3836_v33, %v3837_v32  ;;  %v3849_v52 = vsel %vm605_vm0, %v3837_v32, %v3826_v29  ;;  %v14519_v24 = vsel %vm2729_vm12, %v4113_v37, %v4114_v21  ;;  %4509 = vmatmul.bf16.gmra.mxu3 %v14331_v39  ;;  %5186 = vmatmul.bf16.vlgmr.msra.gmra.mxu0 %v14417_v0  ;;  %v11912_v29 = vld [vmem:[#allocation9 + $0x5d0] sm:$0xff] }
 0x330   : >> { %v14513_v13 = vadd.f32 %v3838_v51, %v3720_v19  ;;  %v14515_v41 = vadd.f32 %v3849_v52, %v3721_v38  ;;  %4779 = vmatmul.bf16.gmra.mxu1 %v14249_v8  ;;  %v4132_v55 = vadd.f32 %v14411_v45, %v3992_v50  ;;  %5323 = vmatpush.bf16.msrb.mxu0 %v11912_v29  ;;  %v11911_v50 = vld [vmem:[#allocation9 + $0x5c8] sm:$0xff] }
 0x331   : >> { %4940 = vmatmul.bf16.gmra.mxu2 %v14498_v63  ;;  %12212 = vmatpush.bf16.msra.mxu1 %v11912_v29 }
 0x332   : >> { %v3946_v28 = vpop.f32.mrf.mxu3 }
 0x333   : >> { %v3970_v19 = vrot.slane %v3946_v28, 2 }
 0x334   : >> { %v14527_v33 = vpop.f32.mrf.mxu2  ;;  %v4098_v58 = vpop.f32.mrf.mxu0  ;;  %5324 = vmatpush.bf16.msrb.mxu0 %v11911_v50 }
 0x335   : >> { %v3985_v37 = vsel %vm1095_vm13, %v3969_v10, %v3970_v19  ;;  %v4115_v17 = vrot.slane %v4098_v58, 3  ;;  %v4236_v8 = vpop.f32.mrf.mxu1  ;;  %12213 = vmatpush.bf16.msra.mxu1 %v11911_v50 }
 0x336   : >> { %v3993_v45 = vadd.f32 %v3985_v37, %v14356_v31  ;;  %v4265_v38 = vrot.slane %v4236_v8, 7 }
 0x337   : >> { %v14537_v7 = vsel %vm2729_vm12, %v4114_v21, %v4115_v17 }
 0x338   : >> { %v4286_v61 = vsel %vm2192_vm14, %v4264_v15, %v4265_v38  ;;  %v4133_v22 = vadd.f32 %v14433_v23, %v3993_v45 }
 0x339   : >> { %v4289_v18 = vadd.f32 %v4286_v61, %v4131_v16  ;;  %v14570_v61 = vld [vmem:[#allocation9 + $0x600] sm:$0xff] }
 0x33a   : >> { %v3948_v14 = vpop.f32.mrf.mxu3  ;;  %12222 = vmatpush.bf16.msra.mxu2 %v14570_v61 }
 0x33b   : >> { %v3971_v10 = vrot.slane %v3948_v14, 2 }
 0x33c   : >> { %v4376_v31 = vpop.f32.mrf.mxu2  ;;  %v4101_v62 = vpop.f32.mrf.mxu0 }
 0x33d   : >> { %v14545_v32 = vadd.f32 %v4376_v31, %v4289_v18  ;;  %v3984_v21 = vsel %vm1095_vm13, %v3970_v19, %v3971_v10  ;;  %v4116_v51 = vrot.slane %v4101_v62, 3  ;;  %v4239_v52 = vpop.f32.mrf.mxu1  ;;  %v10316_v31 = vld [vmem:[%s12819_s22 + $0xa8] sm:$0xff] }
 0x33e   : >> { %v4266_v23 = vrot.slane %v4239_v52, 7  ;;  %v3994_v16 = vadd.f32 %v3984_v21, %v14383_v4  ;;  %v14593_v52 = vpack.c.bf16 %v10316_v31, %v14371_v20 }
 0x33f   : >> { %v14556_v27 = vsel %vm2729_vm12, %v4115_v17, %v4116_v51  ;;  %4514 = vmatmul.bf16.gmra.mxu3 %v14376_v30  ;;  %5191 = vmatmul.bf16.gmra.mxu0 %v14459_v42 }
 0x340   : >> { %4784 = vmatmul.bf16.gmra.mxu1 %v14288_v44  ;;  %v4285_v48 = vsel %vm2192_vm14, %v4265_v38, %v4266_v23  ;;  %v4134_v56 = vadd.f32 %v14453_v9, %v3994_v16  ;;  %v11910_v9 = vld [vmem:[#allocation9 + $0x5c0] sm:$0xff] }
 0x341   : >> { %4945 = vmatmul.bf16.gmra.mxu2 %v14549_v1  ;;  %v4290_v29 = vadd.f32 %v4285_v48, %v4132_v55  ;;  %12214 = vmatpush.bf16.msra.mxu1 %v11910_v9 }
 0x342   : >> { %v3951_v4 = vpop.f32.mrf.mxu3  ;;  %5325 = vmatpush.bf16.msrb.mxu0 %v11910_v9 }
 0x343   : >> { %v3972_v28 = vrot.slane %v3951_v4, 2 }
 0x344   : >> { %v4379_v19 = vpop.f32.mrf.mxu2  ;;  %v4103_v37 = vpop.f32.mrf.mxu0 }
 0x345   : >> { %v14565_v58 = vadd.f32 %v4379_v19, %v4290_v29  ;;  %v3983_v44 = vsel %vm1095_vm13, %v3971_v10, %v3972_v28  ;;  %v4117_v17 = vrot.slane %v4103_v37, 3  ;;  %v4241_v8 = vpop.f32.mrf.mxu1 }
 0x346   : >> { %v3995_v45 = vadd.f32 %v3983_v44, %v14405_v35  ;;  %v4267_v38 = vrot.slane %v4241_v8, 7  ;;  %5458 = vmatpush.bf16.msra.mxu0 %v14347_v26 }
 0x347   : >> { %v14574_v55 = vsel %vm2729_vm12, %v4116_v51, %v4117_v17  ;;  %v14580_v18 = vsel %vm2729_vm12, %v4117_v17, %v4106_v43 }
 0x348   : >> { %v4284_v14 = vsel %vm2192_vm14, %v4266_v23, %v4267_v38  ;;  %v4135_v10 = vadd.f32 %v14472_v12, %v3995_v45  ;;  %v10317_v45 = vld [vmem:[%s12819_s22 + $0xb0] sm:$0xff] }
 0x349   : >> { %v4291_v35 = vadd.f32 %v4284_v14, %v4133_v22 }
 0x34a   : >> { %v3953_v62 = vpop.f32.mrf.mxu3  ;;  %5459 = vmatpush.bf16.msra.mxu0 %v14391_v46 }
 0x34b   : >> { %v3973_v21 = vrot.slane %v3953_v62, 2 }
 0x34c   : >> { %v4381_v25 = vpop.f32.mrf.mxu2  ;;  %v14590_v43 = vpop.f32.mrf.mxu0 }
 0x34d   : >> { %v14588_v51 = vadd.f32 %v4381_v25, %v4291_v35  ;;  %v3982_v12 = vsel %vm1095_vm13, %v3972_v28, %v3973_v21  ;;  %v4244_v50 = vpop.f32.mrf.mxu1  ;;  %v4660_v46 = vrot.slane %v14590_v43, 2 }
 0x34e   : >> { %v4268_v22 = vrot.slane %v4244_v50, 7  ;;  %v3996_v23 = vadd.f32 %v3982_v12, %v14429_v11  ;;  %5460 = vmatpush.bf16.msra.mxu0 %v14407_v57 }
 0x34f   : >> { %5070 = vmatmul.bf16.vlgmr.msra.gmra.mxu3 %v14417_v0  ;;  %5196 = vmatmul.bf16.gmra.mxu0 %v14498_v63 }
 0x350   : >> { %4789 = vmatmul.bf16.gmra.mxu1 %v14331_v39  ;;  %v4283_v26 = vsel %vm2192_vm14, %v4267_v38, %v4268_v22  ;;  %v4136_v20 = vadd.f32 %v14493_v47, %v3996_v23  ;;  %v10318_v38 = vld [vmem:[%s12819_s22 + $0xb8] sm:$0xff] }
 0x351   : >> { %4950 = vmatmul.bf16.gmra.mxu2 %v14593_v52  ;;  %v4292_v16 = vadd.f32 %v4283_v26, %v4134_v56  ;;  %v14628_v31 = vpack.c.bf16 %v10318_v38, %v10317_v45 }
 0x352   : >> { %v3956_v48 = vpop.f32.mrf.mxu3  ;;  %5461 = vmatpush.bf16.msra.mxu0 %v14446_v2 }
 0x353   : >> { %v3974_v11 = vrot.slane %v3956_v48, 2 }
 0x354   : >> { %v4384_v29 = vpop.f32.mrf.mxu2  ;;  %v4632_v39 = vpop.f32.mrf.mxu0 }
 0x355   : >> { %v14608_v4 = vadd.f32 %v4384_v29, %v4292_v16  ;;  %v3981_v28 = vsel %vm1095_vm13, %v3973_v21, %v3974_v11  ;;  %v4246_v19 = vpop.f32.mrf.mxu1  ;;  %v4661_v37 = vrot.slane %v4632_v39, 2 }
 0x356   : >> { %v3997_v47 = vadd.f32 %v3981_v28, %v14448_v5  ;;  %v4269_v56 = vrot.slane %v4246_v19, 7  ;;  %5462 = vmatpush.bf16.msra.mxu0 %v14478_v6 }
 0x357   : >> { %v14618_v57 = vsel %vm1095_vm13, %v4660_v46, %v4661_v37 }
 0x358   : >> { %v4282_v44 = vsel %vm2192_vm14, %v4268_v22, %v4269_v56  ;;  %v4137_v17 = vadd.f32 %v14519_v24, %v3997_v47 }
 0x359   : >> { %v4293_v8 = vadd.f32 %v4282_v44, %v4135_v10 }
 0x35a   : >> { %v3958_v9 = vpop.f32.mrf.mxu3  ;;  %5463 = vmatpush.bf16.msra.mxu0 %v14504_v53 }
 0x35b   : >> { %v3975_v5 = vrot.slane %v3958_v9, 2 }
 0x35c   : >> { %v4386_v14 = vpop.f32.mrf.mxu2  ;;  %v4635_v35 = vpop.f32.mrf.mxu0 }
 0x35d   : >> { %v14626_v2 = vadd.f32 %v4386_v14, %v4293_v8  ;;  %v3980_v62 = vsel %vm1095_vm13, %v3974_v11, %v3975_v5  ;;  %v4249_v21 = vpop.f32.mrf.mxu1  ;;  %v4662_v25 = vrot.slane %v4635_v35, 2 }
 0x35e   : >> { %v4270_v12 = vrot.slane %v4249_v21, 7  ;;  %v3998_v24 = vadd.f32 %v3980_v62, %v14468_v59  ;;  %5464 = vmatpush.bf16.msra.mxu0 %v14533_v3 }
 0x35f   : >> { %v14636_v6 = vsel %vm1095_vm13, %v4661_v37, %v4662_v25  ;;  %5075 = vmatmul.bf16.gmra.mxu3 %v14459_v42  ;;  %5201 = vmatmul.bf16.gmra.mxu0 %v14549_v1 }
 0x360   : >> { %4794 = vmatmul.bf16.gmra.mxu1 %v14376_v30  ;;  %v4281_v10 = vsel %vm2192_vm14, %v4269_v56, %v4270_v12  ;;  %v4138_v50 = vadd.f32 %v14537_v7, %v3998_v24 }
 0x361   : >> { %4955 = vmatmul.bf16.gmra.mxu2 %v14628_v31  ;;  %v4294_v59 = vadd.f32 %v4281_v10, %v4136_v20  ;;  %v5585_v10 = vld [vmem:[%s16193_s1] sm:$0xff] }
 0x362   : >> { %v3961_v22 = vpop.f32.mrf.mxu3  ;;  %5465 = vmatpush.bf16.msra.mxu0 %v14570_v61  ;;  %5590 = vperm.xlu0 %12361, %v5585_v10  }
 0x363   : >> { %v3976_v53 = vrot.slane %v3961_v22, 2 }
 0x364   : >> { %v4389_v23 = vpop.f32.mrf.mxu2  ;;  %v4637_v16 = vpop.f32.mrf.mxu0 }
 0x365   : >> { %v14646_v26 = vadd.f32 %v4389_v23, %v4294_v59  ;;  %v3979_v48 = vsel %vm1095_vm13, %v3975_v5, %v3976_v53  ;;  %v4251_v30 = vpop.f32.mrf.mxu1  ;;  %v4663_v11 = vrot.slane %v4637_v16, 2 }
 0x366   : >> { %v3999_v29 = vadd.f32 %v3979_v48, %v14489_v60  ;;  %v4271_v39 = vrot.slane %v4251_v30, 7 }
 0x367   : >> { %v14654_v7 = vsel %vm1095_vm13, %v4662_v25, %v4663_v11 }
 0x368   : >> { %v4280_v3 = vsel %vm2192_vm14, %v4270_v12, %v4271_v39  ;;  %v4139_v20 = vadd.f32 %v14556_v27, %v3999_v29 }
 0x369   : >> { %v4295_v28 = vadd.f32 %v4280_v3, %v4137_v17  ;;  %v5586_v3 = vld [vmem:[%s16193_s1 + $0x8] sm:$0xff] }
 0x36a   : >> { %v3963_v19 = vpop.f32.mrf.mxu3  ;;  %5595 = vperm.xlu1 %12362, %v5586_v3  }
 0x36b   : >> { %v3977_v37 = vrot.slane %v3963_v19, 2 }
 0x36c   : >> { %v4391_v47 = vpop.f32.mrf.mxu2  ;;  %v4640_v44 = vpop.f32.mrf.mxu0 }
 0x36d   : >> { %v14659_v56 = vadd.f32 %v4391_v47, %v4295_v28  ;;  %v3978_v60 = vsel %vm1095_vm13, %v3976_v53, %v3977_v37  ;;  %v3989_v61 = vsel %vm1095_vm13, %v3977_v37, %v3966_v40  ;;  %v4254_v8 = vpop.f32.mrf.mxu1  ;;  %v4664_v45 = vrot.slane %v4640_v44, 2 }
 0x36e   : >> { %v4272_v38 = vrot.slane %v4254_v8, 7  ;;  %v4000_v27 = vadd.f32 %v3978_v60, %v14513_v13  ;;  %v4001_v17 = vadd.f32 %v3989_v61, %v14515_v41 }
 0x36f   : >> { %v14671_v9 = vsel %vm1095_vm13, %v4663_v11, %v4664_v45  ;;  %5080 = vmatmul.bf16.gmra.mxu3 %v14498_v63  ;;  %5206 = vmatmul.bf16.gmra.mxu0 %v14593_v52 }
 0x370   : >> { %5331 = vmatmul.bf16.vlgmr.msra.gmra.mxu1 %v14459_v42  ;;  %v4279_v34 = vsel %vm2192_vm14, %v4271_v39, %v4272_v38  ;;  %v4140_v40 = vadd.f32 %v14574_v55, %v4000_v27  ;;  %v4141_v13 = vadd.f32 %v14580_v18, %v4001_v17 }
 0x371   : >> { %5471 = vmatmul.bf16.vlgmr.msra.gmra.mxu2 %v14459_v42  ;;  %v4296_v41 = vadd.f32 %v4279_v34, %v4138_v50  ;;  %v5587_v34 = vld [vmem:[%s16193_s1 + $0x10] sm:$0xff] }
 0x372   : >> { %v14681_v5 = vpop.f32.mrf.mxu3  ;;  %5600 = vperm.xlu2 %12363, %v5587_v34  }
 0x373   : >> { %v4520_v55 = vrot.slane %v14681_v5, 1 }
 0x374   : >> { %v4394_v14 = vpop.f32.mrf.mxu2  ;;  %v4642_v62 = vpop.f32.mrf.mxu0 }
 0x375   : >> { %v14683_v35 = vadd.f32 %v4394_v14, %v4296_v41  ;;  %v4256_v21 = vpop.f32.mrf.mxu1  ;;  %v4665_v25 = vrot.slane %v4642_v62, 2 }
 0x376   : >> { %v4273_v12 = vrot.slane %v4256_v21, 7 }
 0x377   : >> { %v14687_v42 = vsel %vm1095_vm13, %v4664_v45, %v4665_v25 }
 0x378   : >> { %v4278_v24 = vsel %vm2192_vm14, %v4272_v38, %v4273_v12 }
 0x379   : >> { %v4297_v18 = vadd.f32 %v4278_v24, %v4139_v20 }
 0x37a   : >> { %v4492_v50 = vpop.f32.mrf.mxu3 }
 0x37b   : >> { %v4521_v22 = vrot.slane %v4492_v50, 1 }
 0x37c   : >> { %v4396_v59 = vpop.f32.mrf.mxu2  ;;  %v4645_v23 = vpop.f32.mrf.mxu0 }
 0x37d   : >> { %v14695_v53 = vadd.f32 %v4396_v59, %v4297_v18  ;;  %v4542_v16 = vsel %vm605_vm0, %v4520_v55, %v4521_v22  ;;  %v4259_v48 = vpop.f32.mrf.mxu1  ;;  %v4666_v30 = vrot.slane %v4645_v23, 2 }
 0x37e   : >> { %v4274_v11 = vrot.slane %v4259_v48, 7 }
 0x37f   : >> { %v14703_v29 = vsel %vm1095_vm13, %v4665_v25, %v4666_v30  ;;  %5085 = vmatmul.bf16.gmra.mxu3 %v14549_v1  ;;  %5211 = vmatmul.bf16.gmra.mxu0 %v14628_v31 }
 0x380   : >> { %5336 = vmatmul.bf16.gmra.mxu1 %v14498_v63  ;;  %v4277_v39 = vsel %vm2192_vm14, %v4273_v12, %v4274_v11 }
 0x381   : >> { %5476 = vmatmul.bf16.gmra.mxu2 %v14498_v63  ;;  %v4298_v20 = vadd.f32 %v4277_v39, %v4140_v40 }
 0x382   : >> { %v4495_v28 = vpop.f32.mrf.mxu3 }
 0x383   : >> { %v4522_v37 = vrot.slane %v4495_v28, 1 }
 0x384   : >> { %v4399_v19 = vpop.f32.mrf.mxu2  ;;  %v4647_v44 = vpop.f32.mrf.mxu0 }
 0x385   : >> { %v14714_v47 = vadd.f32 %v4399_v19, %v4298_v20  ;;  %v4541_v60 = vsel %vm605_vm0, %v4521_v22, %v4522_v37  ;;  %v4261_v61 = vpop.f32.mrf.mxu1  ;;  %v4667_v63 = vrot.slane %v4647_v44, 2 }
 0x386   : >> { %v4545_v8 = vadd.f32 %v4541_v60, %v14545_v32  ;;  %v4275_v45 = vrot.slane %v4261_v61, 7 }
 0x387   : >> { %v14721_v38 = vsel %vm1095_vm13, %v4666_v30, %v4667_v63 }
 0x388   : >> { %v4287_v27 = vsel %vm2192_vm14, %v4275_v45, %v4264_v15  ;;  %v4276_v17 = vsel %vm2192_vm14, %v4274_v11, %v4275_v45  ;;  %v4685_v40 = vadd.f32 %v14636_v6, %v4545_v8 }
 0x389   : >> { %v4288_v32 = vadd.f32 %v4287_v27, %v14481_v36  ;;  %v4299_v41 = vadd.f32 %v4276_v17, %v4141_v13 }
 0x38a   : >> { %v4497_v14 = vpop.f32.mrf.mxu3 }
 0x38b   : >> { %v4404_v62 = vadd.f32 %v14527_v33, %v4288_v32  ;;  %v4523_v21 = vrot.slane %v4497_v14, 1 }
 0x38c   : >> { %v4401_v49 = vpop.f32.mrf.mxu2  ;;  %v4650_v15 = vpop.f32.mrf.mxu0 }
 0x38d   : >> { %v14735_v25 = vadd.f32 %v4401_v49, %v4299_v41  ;;  %v4540_v12 = vsel %vm605_vm0, %v4522_v37, %v4523_v21  ;;  %v4668_v24 = vrot.slane %v4650_v15, 2  ;;  %v14739_v18 = vpop.f32.mrf.mxu1  ;;  %v4544_v10 = vadd.f32 %v4542_v16, %v4404_v62 }
 0x38e   : >> { %v4546_v6 = vadd.f32 %v4540_v12, %v14565_v58  ;;  %v4800_v30 = vrot.slane %v14739_v18, 3 }
 0x38f   : >> { %v14744_v36 = vsel %vm1095_vm13, %v4667_v63, %v4668_v24  ;;  %5090 = vmatmul.bf16.gmra.mxu3 %v14593_v52  ;;  %5326 = vmatmul.bf16.vlgmr.msrb.gmra.mxu0 %v14417_v0  ;;  %v4684_v33 = vadd.f32 %v14618_v57, %v4544_v10 }
 0x390   : >> { %5341 = vmatmul.bf16.gmra.mxu1 %v14549_v1  ;;  %v4686_v13 = vadd.f32 %v14654_v7, %v4546_v6 }
 0x391   : >> { %5481 = vmatmul.bf16.gmra.mxu2 %v14549_v1 }
 0x392   : >> { %v4500_v50 = vpop.f32.mrf.mxu3 }
 0x393   : >> { %v4524_v59 = vrot.slane %v4500_v50, 1 }
 0x394   : >> { %v14752_v22 = vpop.f32.mrf.mxu2  ;;  %v4652_v58 = vpop.f32.mrf.mxu0 }
 0x395   : >> { %v4539_v23 = vsel %vm605_vm0, %v4523_v21, %v4524_v59  ;;  %v4669_v16 = vrot.slane %v4652_v58, 2  ;;  %v4772_v48 = vpop.f32.mrf.mxu1  ;;  %v4961_v37 = vrot.slane %v14752_v22, 7 }
 0x396   : >> { %v4547_v57 = vadd.f32 %v4539_v23, %v14588_v51  ;;  %v4801_v11 = vrot.slane %v4772_v48, 3 }
 0x397   : >> { %v14760_v1 = vsel %vm1095_vm13, %v4668_v24, %v4669_v16 }
 0x398   : >> { %v4822_v7 = vsel %vm2729_vm12, %v4800_v30, %v4801_v11  ;;  %v4687_v39 = vadd.f32 %v14671_v9, %v4547_v57 }
 0x399   : >> { %v14767_v3 = vadd.f32 %v4822_v7, %v4684_v33 }
 0x39a   : >> { %v4502_v20 = vpop.f32.mrf.mxu3 }
 0x39b   : >> { %v4525_v28 = vrot.slane %v4502_v20, 1 }
 0x39c   : >> { %v4933_v19 = vpop.f32.mrf.mxu2  ;;  %v4655_v44 = vpop.f32.mrf.mxu0 }
 0x39d   : >> { %v4962_v51 = vrot.slane %v4933_v19, 7  ;;  %v4538_v60 = vsel %vm605_vm0, %v4524_v59, %v4525_v28  ;;  %v4670_v61 = vrot.slane %v4655_v44, 2  ;;  %v4775_v63 = vpop.f32.mrf.mxu1 }
 0x39e   : >> { %v4548_v8 = vadd.f32 %v4538_v60, %v14608_v4  ;;  %v4802_v45 = vrot.slane %v4775_v63, 3 }
 0x39f   : >> { %v4983_v9 = vsel %vm2192_vm14, %v4961_v37, %v4962_v51  ;;  %v14779_v27 = vsel %vm1095_vm13, %v4669_v16, %v4670_v61  ;;  %5095 = vmatmul.bf16.gmra.mxu3 %v14628_v31  ;;  %5466 = vmatmul.bf16.vlgmr.msra.gmra.mxu0 %v14417_v0 }
 0x3a0   : >> { %v4821_v17 = vsel %vm2729_vm12, %v4801_v11, %v4802_v45  ;;  %5346 = vmatmul.bf16.gmra.mxu1 %v14593_v52  ;;  %v4688_v4 = vadd.f32 %v14687_v42, %v4548_v8 }
 0x3a1   : >> { %5486 = vmatmul.bf16.gmra.mxu2 %v14593_v52  ;;  %v4825_v34 = vadd.f32 %v4821_v17, %v4685_v40 }
 0x3a2   : >> { %v4505_v32 = vpop.f32.mrf.mxu3 }
 0x3a3   : >> { %v4526_v41 = vrot.slane %v4505_v32, 1  ;;  %v14788_v62 = vadd.f32 %v4983_v9, %v4825_v34 }
 0x3a4   : >> { %v4936_v14 = vpop.f32.mrf.mxu2  ;;  %v4657_v21 = vpop.f32.mrf.mxu0 }
 0x3a5   : >> { %v4963_v49 = vrot.slane %v4936_v14, 7  ;;  %v4537_v0 = vsel %vm605_vm0, %v4525_v28, %v4526_v41  ;;  %v4671_v15 = vrot.slane %v4657_v21, 2  ;;  %v4777_v12 = vpop.f32.mrf.mxu1 }
 0x3a6   : >> { %v4549_v24 = vadd.f32 %v4537_v0, %v14626_v2  ;;  %v4803_v10 = vrot.slane %v4777_v12, 3 }
 0x3a7   : >> { %v4982_v52 = vsel %vm2192_vm14, %v4962_v51, %v4963_v49  ;;  %v14797_v42 = vsel %vm1095_vm13, %v4670_v61, %v4671_v15  ;;  %v14803_v40 = vsel %vm1095_vm13, %v4671_v15, %v4660_v46 }
 0x3a8   : >> { %v4820_v6 = vsel %vm2729_vm12, %v4802_v45, %v4803_v10  ;;  %v4689_v33 = vadd.f32 %v14703_v29, %v4549_v24 }
 0x3a9   : >> { %v4826_v2 = vadd.f32 %v4820_v6, %v4686_v13 }
 0x3aa   : >> { %v4507_v50 = vpop.f32.mrf.mxu3 }
 0x3ab   : >> { %v4527_v59 = vrot.slane %v4507_v50, 1  ;;  %v14808_v23 = vadd.f32 %v4982_v52, %v4826_v2 }
 0x3ac   : >> { %v4938_v58 = vpop.f32.mrf.mxu2  ;;  %v14810_v48 = vpop.f32.mrf.mxu0 }
 0x3ad   : >> { %v4964_v16 = vrot.slane %v4938_v58, 7  ;;  %v4536_v43 = vsel %vm605_vm0, %v4526_v41, %v4527_v59  ;;  %v4780_v57 = vpop.f32.mrf.mxu1  ;;  %v5217_v19 = vrot.slane %v14810_v48, 1 }
 0x3ae   : >> { %v4550_v46 = vadd.f32 %v4536_v43, %v14646_v26  ;;  %v4804_v11 = vrot.slane %v4780_v57, 3 }
 0x3af   : >> { %v4981_v7 = vsel %vm2192_vm14, %v4963_v49, %v4964_v16 }
 0x3b0   : >> { %v4819_v29 = vsel %vm2729_vm12, %v4803_v10, %v4804_v11  ;;  %5351 = vmatmul.bf16.gmra.mxu1 %v14628_v31  ;;  %v4690_v13 = vadd.f32 %v14721_v38, %v4550_v46 }
 0x3b1   : >> { %5491 = vmatmul.bf16.gmra.mxu2 %v14628_v31  ;;  %v4827_v20 = vadd.f32 %v4819_v29, %v4687_v39 }
 0x3b2   : >> { %v4510_v28 = vpop.f32.mrf.mxu3 }
 0x3b3   : >> { %v4528_v51 = vrot.slane %v4510_v28, 1  ;;  %v14823_v26 = vadd.f32 %v4981_v7, %v4827_v20 }
 0x3b4   : >> { %v4941_v44 = vpop.f32.mrf.mxu2  ;;  %v14825_v61 = vpop.f32.mrf.mxu0 }
 0x3b5   : >> { %v4965_v60 = vrot.slane %v4941_v44, 7  ;;  %v4535_v63 = vsel %vm605_vm0, %v4527_v59, %v4528_v51  ;;  %v4782_v8 = vpop.f32.mrf.mxu1  ;;  %v5218_v45 = vrot.slane %v14825_v61, 1 }
 0x3b6   : >> { %v4551_v31 = vadd.f32 %v4535_v63, %v14659_v56  ;;  %v4805_v38 = vrot.slane %v4782_v8, 3 }
 0x3b7   : >> { %v4980_v39 = vsel %vm2192_vm14, %v4964_v16, %v4965_v60  ;;  %v14839_v9 = vsel %vm605_vm0, %v5217_v19, %v5218_v45 }
 0x3b8   : >> { %v4818_v17 = vsel %vm2729_vm12, %v4804_v11, %v4805_v38  ;;  %v4691_v34 = vadd.f32 %v14744_v36, %v4551_v31 }
 0x3b9   : >> { %v4828_v32 = vadd.f32 %v4818_v17, %v4688_v4 }
 0x3ba   : >> { %v4512_v41 = vpop.f32.mrf.mxu3 }
 0x3bb   : >> { %v4529_v56 = vrot.slane %v4512_v41, 1  ;;  %v14844_v49 = vadd.f32 %v4980_v39, %v4828_v32 }
 0x3bc   : >> { %v4943_v14 = vpop.f32.mrf.mxu2  ;;  %v14846_v0 = vpop.f32.mrf.mxu0 }
 0x3bd   : >> { %v4966_v21 = vrot.slane %v4943_v14, 7  ;;  %v4534_v15 = vsel %vm605_vm0, %v4528_v51, %v4529_v56  ;;  %v4785_v12 = vpop.f32.mrf.mxu1 }
 0x3be   : >> { %v4552_v24 = vadd.f32 %v4534_v15, %v14683_v35  ;;  %v4806_v10 = vrot.slane %v4785_v12, 3 }
 0x3bf   : >> { %v4979_v52 = vsel %vm2192_vm14, %v4965_v60, %v4966_v21 }
 0x3c0   : >> { %v4817_v36 = vsel %vm2729_vm12, %v4805_v38, %v4806_v10  ;;  %v4692_v4 = vadd.f32 %v14760_v1, %v4552_v24  ;;  %v5219_v24 = vrot.slane %v14846_v0, 1 }
 0x3c1   : >> { %v4829_v6 = vadd.f32 %v4817_v36, %v4689_v33 }
 0x3c2   : >> { %v4515_v2 = vpop.f32.mrf.mxu3 }
 0x3c3   : >> { %v4530_v50 = vrot.slane %v4515_v2, 1  ;;  %v14856_v58 = vadd.f32 %v4979_v52, %v4829_v6  ;;  %v5238_v2 = vsel %vm605_vm0, %v5218_v45, %v5219_v24 }
 0x3c4   : >> { %v4946_v59 = vpop.f32.mrf.mxu2  ;;  %v14858_v43 = vpop.f32.mrf.mxu0 }
 0x3c5   : >> { %v4967_v16 = vrot.slane %v4946_v59, 7  ;;  %v4533_v35 = vsel %vm605_vm0, %v4529_v56, %v4530_v50  ;;  %v4787_v57 = vpop.f32.mrf.mxu1 }
 0x3c6   : >> { %v4553_v46 = vadd.f32 %v4533_v35, %v14695_v53  ;;  %v4807_v11 = vrot.slane %v4787_v57, 3 }
 0x3c7   : >> { %v4978_v7 = vsel %vm2192_vm14, %v4966_v21, %v4967_v16 }
 0x3c8   : >> { %v4816_v1 = vsel %vm2729_vm12, %v4806_v10, %v4807_v11  ;;  %v4693_v33 = vadd.f32 %v14779_v27, %v4553_v46 }
 0x3c9   : >> { %v4830_v29 = vadd.f32 %v4816_v1, %v4690_v13 }
 0x3ca   : >> { %v4517_v20 = vpop.f32.mrf.mxu3 }
 0x3cb   : >> { %v4531_v28 = vrot.slane %v4517_v20, 1  ;;  %v14868_v44 = vadd.f32 %v4978_v7, %v4830_v29 }
 0x3cc   : >> { %v4948_v51 = vpop.f32.mrf.mxu2  ;;  %v14870_v63 = vpop.f32.mrf.mxu0 }
 0x3cd   : >> { %v4968_v60 = vrot.slane %v4948_v51, 7  ;;  %v4532_v53 = vsel %vm605_vm0, %v4530_v50, %v4531_v28  ;;  %v4543_v8 = vsel %vm605_vm0, %v4531_v28, %v4520_v55  ;;  %v4790_v31 = vpop.f32.mrf.mxu1 }
 0x3ce   : >> { %v4554_v27 = vadd.f32 %v4532_v53, %v14714_v47  ;;  %v4555_v13 = vadd.f32 %v4543_v8, %v14735_v25  ;;  %v4808_v38 = vrot.slane %v4790_v31, 3 }
 0x3cf   : >> { %v4977_v39 = vsel %vm2192_vm14, %v4967_v16, %v4968_v60 }
 0x3d0   : >> { %v4815_v17 = vsel %vm2729_vm12, %v4807_v11, %v4808_v38  ;;  %v4694_v32 = vadd.f32 %v14797_v42, %v4554_v27  ;;  %v4695_v41 = vadd.f32 %v14803_v40, %v4555_v13 }
 0x3d1   : >> { %v4831_v5 = vadd.f32 %v4815_v17, %v4691_v34 }
 0x3d2   : >> { %v5071_v56 = vpop.f32.mrf.mxu3 }
 0x3d3   : >> { %v14886_v55 = vadd.f32 %v4977_v39, %v4831_v5 }
 0x3d4   : >> { %v4951_v14 = vpop.f32.mrf.mxu2  ;;  %v14888_v47 = vpop.f32.mrf.mxu0 }
 0x3d5   : >> { %v4969_v21 = vrot.slane %v4951_v14, 7  ;;  %v4792_v25 = vpop.f32.mrf.mxu1 }
 0x3d6   : >> { %v4809_v15 = vrot.slane %v4792_v25, 3 }
 0x3d7   : >> { %v4976_v12 = vsel %vm2192_vm14, %v4968_v60, %v4969_v21 }
 0x3d8   : >> { %v4814_v42 = vsel %vm2729_vm12, %v4808_v38, %v4809_v15 }
 0x3d9   : >> { %v4832_v10 = vadd.f32 %v4814_v42, %v4692_v4 }
 0x3da   : >> { %v5073_v40 = vpop.f32.mrf.mxu3 }
 0x3db   : >> { %v5102_v52 = vadd.f32 %v5073_v40, %v14788_v62  ;;  %v14896_v36 = vadd.f32 %v4976_v12, %v4832_v10 }
 0x3dc   : >> { %v4953_v34 = vpop.f32.mrf.mxu2  ;;  %v14902_v50 = vpop.f32.mrf.mxu0 }
 0x3dd   : >> { %v4970_v6 = vrot.slane %v4953_v34, 7  ;;  %v14904_v59 = vadd.f32 %v5238_v2, %v5102_v52  ;;  %v4795_v0 = vpop.f32.mrf.mxu1  ;;  %v5221_v52 = vrot.slane %v14870_v63, 1 }
 0x3de   : >> { %v4810_v16 = vrot.slane %v4795_v0, 3 }
 0x3df   : >> { %v4975_v4 = vsel %vm2192_vm14, %v4969_v21, %v4970_v6  ;;  %v5220_v21 = vrot.slane %v14858_v43, 1 }
 0x3e0   : >> { %v4813_v62 = vsel %vm2729_vm12, %v4809_v15, %v4810_v16 }
 0x3e1   : >> { %v4833_v35 = vadd.f32 %v4813_v62, %v4693_v33  ;;  %v5236_v62 = vsel %vm605_vm0, %v5220_v21, %v5221_v52 }
 0x3e2   : >> { %v5076_v57 = vpop.f32.mrf.mxu3 }
 0x3e3   : >> { %v14910_v11 = vadd.f32 %v4975_v4, %v4833_v35  ;;  %v5103_v25 = vadd.f32 %v5076_v57, %v14808_v23  ;;  %v14959_v23 = vld [vmem:[%s16199_s7] ss:$0 sm:$0xff] }
 0x3e4   : >> { %v4956_v46 = vpop.f32.mrf.mxu2  ;;  %v14912_v7 = vpop.f32.mrf.mxu0 }
 0x3e5   : >> { %v4971_v61 = vrot.slane %v4956_v46, 7  ;;  %v4797_v45 = vpop.f32.mrf.mxu1 }
 0x3e6   : >> { %v4811_v1 = vrot.slane %v4797_v45, 3 }
 0x3e7   : >> { %v4974_v29 = vsel %vm2192_vm14, %v4970_v6, %v4971_v61 }
 0x3e8   : >> { %v4812_v20 = vsel %vm2729_vm12, %v4810_v16, %v4811_v1  ;;  %v4823_v33 = vsel %vm2729_vm12, %v4811_v1, %v4800_v30 }
 0x3e9   : >> { %v4834_v28 = vadd.f32 %v4812_v20, %v4694_v32  ;;  %v4835_v51 = vadd.f32 %v4823_v33, %v4695_v41 }
 0x3ea   : >> { %v5078_v60 = vpop.f32.mrf.mxu3 }
 0x3eb   : >> { %v14922_v8 = vadd.f32 %v4974_v29, %v4834_v28  ;;  %v5104_v0 = vadd.f32 %v5078_v60, %v14823_v26  ;;  %v5222_v28 = vrot.slane %v14888_v47, 1 }
 0x3ec   : >> { %v4958_v53 = vpop.f32.mrf.mxu2  ;;  %v14924_v27 = vpop.f32.mrf.mxu0 }
 0x3ed   : >> { %v4972_v31 = vrot.slane %v4958_v53, 7  ;;  %v14926_v13 = vpop.f32.mrf.mxu1  ;;  %v5244_v46 = vadd.f32 %v5236_v62, %v5104_v0 }
 0x3ee   : >> { %v5359_v15 = vrot.slane %v14926_v13, 2 }
 0x3ef   : >> { %v4984_v38 = vsel %vm2192_vm14, %v4972_v31, %v4961_v37  ;;  %v4973_v18 = vsel %vm2192_vm14, %v4971_v61, %v4972_v31  ;;  %v14972_v61 = vpop.permute.xlu2 %5600 }
 0x3f0   : >> { %v4985_v30 = vadd.f32 %v4984_v38, %v14767_v3  ;;  %v14935_v39 = vadd.f32 %v4973_v18, %v4835_v51  ;;  %v5237_v3 = vsel %vm605_vm0, %v5219_v24, %v5220_v21 }
 0x3f1   : >> { %v5243_v12 = vadd.f32 %v5237_v3, %v5103_v25  ;;  %v14987_v25 = vpop.permute.xlu0 %5590 }
 0x3f2   : >> { %v5101_v17 = vadd.f32 %v5071_v56, %v4985_v30  ;;  %v5081_v32 = vpop.f32.mrf.mxu3 }
 0x3f3   : >> { %v5105_v31 = vadd.f32 %v5081_v32, %v14844_v49 }
 0x3f4   : >> { %v14937_v41 = vpop.f32.mrf.mxu2  ;;  %v14940_v5 = vadd.f32 %v14839_v9, %v5101_v17  ;;  %v14942_v14 = vpop.f32.mrf.mxu0  ;;  %v5235_v17 = vsel %vm605_vm0, %v5221_v52, %v5222_v28 }
 0x3f5   : >> { %v5334_v22 = vpop.f32.mrf.mxu1  ;;  %v5499_v10 = vrot.slane %v14937_v41, 3  ;;  %v5245_v21 = vadd.f32 %v5235_v17, %v5105_v31 }
 0x3f6   : >> { %v5360_v37 = vrot.slane %v5334_v22, 2 }
 0x3f8   : >> { %v5377_v56 = vsel %vm1095_vm13, %v5359_v15, %v5360_v37 }
 0x3f9   : >> { %v5383_v34 = vadd.f32 %v5377_v56, %v5243_v12 }
 0x3fa   : >> { %v5083_v9 = vpop.f32.mrf.mxu3 }
 0x3fc   : >> { %v5474_v42 = vpop.f32.mrf.mxu2  ;;  %v14954_v43 = vpop.f32.mrf.mxu0 }
 0x3fd   : >> { %v5500_v40 = vrot.slane %v5474_v42, 3  ;;  %v5337_v24 = vpop.f32.mrf.mxu1 }
 0x3fe   : >> { %v5361_v2 = vrot.slane %v5337_v24, 2 }
 0x3ff   : >> { %v5517_v6 = vsel %vm2729_vm12, %v5499_v10, %v5500_v40 }
 0x400   : >> { %v5523_v16 = vadd.f32 %v5517_v6, %v5383_v34  ;;  %v5376_v35 = vsel %vm1095_vm13, %v5360_v37, %v5361_v2  ;;  %v5106_v6 = vadd.f32 %v5083_v9, %v14856_v58 }
 0x401   : >> { %v5384_v26 = vadd.f32 %v5376_v35, %v5244_v46 }
 0x402   : >> { %v5539_v4 = vadd.f32 %v14959_v23, %v5523_v16  ;;  %v5086_v57 = vpop.f32.mrf.mxu3 }
 0x404   : >> { %v5477_v63 = vpop.f32.mrf.mxu2  ;;  %vm5551_vm14 = vcmp.gt.f32.partialorder %v5539_v4, 0.0  ;;  %v5563_v45 = vmul.f32 0.01, %v5539_v4  ;;  %v14974_v29 = vpop.f32.mrf.mxu0 }
 0x405   : >> { %v5501_v1 = vrot.slane %v5477_v63, 3  ;;  %v5339_v33 = vpop.f32.mrf.mxu1  ;;  %v15004_v63 = vpop.permute.xlu1 %5595 }
 0x406   : >> { %v5575_v20 = vsel %vm5551_vm14, %v5539_v4, %v5563_v45  ;;  %v5362_v53 = vrot.slane %v5339_v33, 2  ;;  %v5224_v33 = vrot.slane %v14912_v7, 1 }
 0x407   : >> { %v5516_v51 = vsel %vm2729_vm12, %v5500_v40, %v5501_v1  ;;  %v5605_v60 = vmul.f32 %v14972_v61, %v5575_v20  ;;  %v5223_v40 = vrot.slane %v14902_v50, 1 }
 0x408   : >> { %v5524_v38 = vadd.f32 %v5516_v51, %v5384_v26  ;;  %v5375_v22 = vsel %vm1095_vm13, %v5361_v2, %v5362_v53 }
 0x409   : >> { %v5617_v18 = vpack.c.bf16 %v5605_v60, %v5605_v60  ;;  %v5385_v56 = vadd.f32 %v5375_v22, %v5245_v21  ;;  %v5234_v4 = vsel %vm605_vm0, %v5222_v28, %v5223_v40 }
 0x40a   : >> { %v5540_v30 = vadd.f32 %v14959_v23, %v5524_v38  ;;  %v5088_v47 = vpop.f32.mrf.mxu3  ;;  %v5246_v35 = vadd.f32 %v5234_v4, %v5106_v6 }
 0x40b   : >> { %10481 = vst [vmem:[%s12990_s6 + $0x44] sm:$0xf] %v5617_v18 }
 0x40c   : >> { %v5479_v37 = vpop.f32.mrf.mxu2  ;;  %vm5552_vm15 = vcmp.gt.f32.partialorder %v5540_v30, 0.0  ;;  %v5564_v3 = vmul.f32 0.01, %v5540_v30  ;;  %v14989_v32 = vpop.f32.mrf.mxu0 }
 0x40d   : >> { %v5502_v49 = vrot.slane %v5479_v37, 3  ;;  %v5342_v42 = vpop.f32.mrf.mxu1 }
 0x40e   : >> { %v5576_v12 = vsel %vm5552_vm15, %v5540_v30, %v5564_v3  ;;  %v5363_v52 = vrot.slane %v5342_v42, 2  ;;  %v5233_v30 = vsel %vm605_vm0, %v5223_v40, %v5224_v33  ;;  %v5225_v3 = vrot.slane %v14924_v27, 1 }
 0x40f   : >> { %v5515_v34 = vsel %vm2729_vm12, %v5501_v1, %v5502_v49  ;;  %v5606_v24 = vmul.f32 %v14987_v25, %v5576_v12 }
 0x410   : >> { %v5525_v2 = vadd.f32 %v5515_v34, %v5385_v56  ;;  %v5374_v62 = vsel %vm1095_vm13, %v5362_v53, %v5363_v52  ;;  %v5107_v53 = vadd.f32 %v5086_v57, %v14868_v44  ;;  %v5357_v56 = vrot.slane %v14989_v32, 2 }
 0x411   : >> { %v5618_v0 = vpack.c.bf16 %v5606_v24, %v5606_v24  ;;  %v5386_v1 = vadd.f32 %v5374_v62, %v5246_v35 }
 0x412   : >> { %v5541_v16 = vadd.f32 %v14959_v23, %v5525_v2  ;;  %v15002_v50 = vpop.f32.mrf.mxu3  ;;  %v5247_v22 = vadd.f32 %v5233_v30, %v5107_v53 }
 0x413   : >> { %10482 = vst [vmem:[%s12990_s6 + $0x50] sm:$0xf] %v5618_v0  ;;  %v5232_v0 = vsel %vm605_vm0, %v5224_v33, %v5225_v3 }
 0x414   : >> { %v5482_v46 = vpop.f32.mrf.mxu2  ;;  %vm5553_vm1 = vcmp.gt.f32.partialorder %v5541_v16, 0.0  ;;  %v5565_v58 = vmul.f32 0.01, %v5541_v16  ;;  %v5329_v45 = vpop.f32.mrf.mxu0 }
 0x415   : >> { %v5503_v9 = vrot.slane %v5482_v46, 3  ;;  %v5344_v20 = vpop.f32.mrf.mxu1  ;;  %v5358_v24 = vrot.slane %v5329_v45, 2  ;;  %v5226_v45 = vrot.slane %v14942_v14, 1  ;;  %v5109_v14 = vadd.f32 %v15002_v50, %v14896_v36 }
 0x416   : >> { %v5577_v26 = vsel %vm5553_vm1, %v5541_v16, %v5565_v58  ;;  %v5364_v60 = vrot.slane %v5344_v20, 2 }
 0x417   : >> { %v5514_v28 = vsel %vm2729_vm12, %v5502_v49, %v5503_v9  ;;  %v5607_v51 = vmul.f32 %v15004_v63, %v5577_v26  ;;  %v5108_v49 = vadd.f32 %v5088_v47, %v14886_v55  ;;  %v5379_v47 = vsel %vm1095_vm13, %v5357_v56, %v5358_v24 }
 0x418   : >> { %v5526_v31 = vadd.f32 %v5514_v28, %v5386_v1  ;;  %v5373_v17 = vsel %vm1095_vm13, %v5363_v52, %v5364_v60  ;;  %v5378_v35 = vsel %vm1095_vm13, %v5358_v24, %v5359_v15  ;;  %v5228_v1 = vrot.slane %v14974_v29, 1 }
 0x419   : >> { %v5619_v38 = vpack.c.bf16 %v5607_v51, %v5607_v51  ;;  %v5387_v42 = vadd.f32 %v5373_v17, %v5247_v22  ;;  %v5248_v55 = vadd.f32 %v5232_v0, %v5108_v49  ;;  %v5381_v33 = vadd.f32 %v5379_v47, %v14940_v5 }
 0x41a   : >> { %v5542_v18 = vadd.f32 %v14959_v23, %v5526_v31  ;;  %v15017_v7 = vpop.f32.mrf.mxu3  ;;  %v5382_v15 = vadd.f32 %v5378_v35, %v14904_v59 }
 0x41b   : >> { %10483 = vst [vmem:[%s12990_s6 + $0x5c] sm:$0xf] %v5619_v38 }
 0x41c   : >> { %vm5554_vm2 = vcmp.gt.f32.partialorder %v5542_v18, 0.0  ;;  %v5566_v21 = vmul.f32 0.01, %v5542_v18  ;;  %v5484_v37 = vpop.f32.mrf.mxu2  ;;  %v15020_v57 = vpop.f32.mrf.mxu0 }
 0x41d   : >> { %v5504_v44 = vrot.slane %v5484_v37, 3  ;;  %v5347_v40 = vpop.f32.mrf.mxu1  ;;  %v5497_v58 = vrot.slane %v15020_v57, 3  ;;  %v5231_v37 = vsel %vm605_vm0, %v5225_v3, %v5226_v45 }
 0x41e   : >> { %v5578_v12 = vsel %vm5554_vm2, %v5542_v18, %v5566_v21  ;;  %v5365_v6 = vrot.slane %v5347_v40, 2  ;;  %v5227_v21 = vrot.slane %v14954_v43, 1  ;;  %v5240_v43 = vsel %vm605_vm0, %v5228_v1, %v5217_v19 }
 0x41f   : >> { %v5608_v34 = vmul.f32 %v14972_v61, %v5578_v12  ;;  %v5513_v52 = vsel %vm2729_vm12, %v5503_v9, %v5504_v44  ;;  %v5249_v49 = vadd.f32 %v5231_v37, %v5109_v14 }
 0x420   : >> { %v5527_v2 = vadd.f32 %v5513_v52, %v5387_v42  ;;  %v5372_v4 = vsel %vm1095_vm13, %v5364_v60, %v5365_v6 }
 0x421   : >> { %v5620_v27 = vpack.c.bf16 %v5608_v34, %v5608_v34  ;;  %v5388_v51 = vadd.f32 %v5372_v4, %v5248_v55 }
 0x422   : >> { %v5543_v16 = vadd.f32 %v14959_v23, %v5527_v2  ;;  %v15037_v62 = vpop.f32.mrf.mxu3 }
 0x423   : >> { %10484 = vst [vmem:[%s12990_s6 + $0x68] sm:$0xf] %v5620_v27  ;;  %v5111_v14 = vadd.f32 %v15037_v62, %v14922_v8 }
 0x424   : >> { %vm5555_vm3 = vcmp.gt.f32.partialorder %v5543_v16, 0.0  ;;  %v5567_v46 = vmul.f32 0.01, %v5543_v16  ;;  %v5487_v9 = vpop.f32.mrf.mxu2  ;;  %v5469_v20 = vpop.f32.mrf.mxu0 }
 0x425   : >> { %v5505_v26 = vrot.slane %v5487_v9, 3  ;;  %v5349_v60 = vpop.f32.mrf.mxu1  ;;  %v5498_v13 = vrot.slane %v5469_v20, 3 }
 0x426   : >> { %v5579_v28 = vsel %vm5555_vm3, %v5543_v16, %v5567_v46  ;;  %v5366_v38 = vrot.slane %v5349_v60, 2 }
 0x427   : >> { %v5609_v53 = vmul.f32 %v14987_v25, %v5579_v28  ;;  %v5512_v31 = vsel %vm2729_vm12, %v5504_v44, %v5505_v26  ;;  %v5518_v5 = vsel %vm2729_vm12, %v5498_v13, %v5499_v10  ;;  %v5519_v59 = vsel %vm2729_vm12, %v5497_v58, %v5498_v13 }
 0x428   : >> { %v5528_v18 = vadd.f32 %v5512_v31, %v5388_v51  ;;  %v5521_v17 = vadd.f32 %v5519_v59, %v5381_v33  ;;  %v5522_v22 = vadd.f32 %v5518_v5, %v5382_v15  ;;  %v5371_v41 = vsel %vm1095_vm13, %v5365_v6, %v5366_v38 }
 0x429   : >> { %v5621_v30 = vpack.c.bf16 %v5609_v53, %v5609_v53  ;;  %v5389_v52 = vadd.f32 %v5371_v41, %v5249_v49  ;;  %v5230_v33 = vsel %vm605_vm0, %v5226_v45, %v5227_v21 }
 0x42a   : >> { %v5544_v36 = vadd.f32 %v14959_v23, %v5528_v18  ;;  %v5537_v10 = vadd.f32 %v14959_v23, %v5521_v17  ;;  %v5538_v50 = vadd.f32 %v14959_v23, %v5522_v22  ;;  %v5098_v44 = vpop.f32.mrf.mxu3 }
 0x42b   : >> { %10485 = vst [vmem:[%s12990_s6 + $0x74] sm:$0xf] %v5621_v30  ;;  %v5112_v12 = vadd.f32 %v5098_v44, %v14935_v39  ;;  %v5110_v39 = vadd.f32 %v15017_v7, %v14910_v11  ;;  %v5229_v30 = vsel %vm605_vm0, %v5227_v21, %v5228_v1 }
 0x42c   : >> { %vm5556_vm4 = vcmp.gt.f32.partialorder %v5544_v36, 0.0  ;;  %v5568_v3 = vmul.f32 0.01, %v5544_v36  ;;  %v5489_v42 = vpop.f32.mrf.mxu2  ;;  %vm5549_vm5 = vcmp.gt.f32.partialorder %v5537_v10, 0.0  ;;  %vm5550_vm6 = vcmp.gt.f32.partialorder %v5538_v50, 0.0 }
 0x42d   : >> { %v5561_v40 = vmul.f32 0.01, %v5537_v10  ;;  %v5562_v34 = vmul.f32 0.01, %v5538_v50  ;;  %v5252_v6 = vadd.f32 %v5240_v43, %v5112_v12  ;;  %v5506_v48 = vrot.slane %v5489_v42, 3  ;;  %v5352_v2 = vpop.f32.mrf.mxu1 }
 0x42e   : >> { %v5580_v24 = vsel %vm5556_vm4, %v5544_v36, %v5568_v3  ;;  %v5367_v16 = vrot.slane %v5352_v2, 2  ;;  %v5250_v7 = vadd.f32 %v5230_v33, %v5110_v39  ;;  %v5251_v8 = vadd.f32 %v5229_v30, %v5111_v14 }
 0x42f   : >> { %v5610_v27 = vmul.f32 %v15004_v63, %v5580_v24  ;;  %v5573_v0 = vsel %vm5549_vm5, %v5537_v10, %v5561_v40  ;;  %v5574_v19 = vsel %vm5550_vm6, %v5538_v50, %v5562_v34  ;;  %v5511_v4 = vsel %vm2729_vm12, %v5505_v26, %v5506_v48 }
 0x430   : >> { %v5603_v55 = vmul.f32 %v14987_v25, %v5573_v0  ;;  %v5604_v47 = vmul.f32 %v15004_v63, %v5574_v19  ;;  %v5529_v46 = vadd.f32 %v5511_v4, %v5389_v52  ;;  %v5370_v11 = vsel %vm1095_vm13, %v5366_v38, %v5367_v16 }
 0x431   : >> { %v5622_v35 = vpack.c.bf16 %v5610_v27, %v5610_v27  ;;  %v5390_v13 = vadd.f32 %v5370_v11, %v5250_v7 }
 0x432   : >> { %v5615_v9 = vpack.c.bf16 %v5603_v55, %v5603_v55  ;;  %v5616_v20 = vpack.c.bf16 %v5604_v47, %v5604_v47  ;;  %v5545_v28 = vadd.f32 %v14959_v23, %v5529_v46 }
 0x433   : >> { %10486 = vst [vmem:[%s12990_s6 + $0x80] sm:$0xf] %v5622_v35 }
 0x434   : >> { %10479 = vst [vmem:[%s12990_s6 + $0x2c] sm:$0xf] %v5615_v9  ;;  %v5492_v51 = vpop.f32.mrf.mxu2  ;;  %vm5557_vm7 = vcmp.gt.f32.partialorder %v5545_v28, 0.0  ;;  %v5569_v60 = vmul.f32 0.01, %v5545_v28 }
 0x435   : >> { %10480 = vst [vmem:[%s12990_s6 + $0x38] sm:$0xf] %v5616_v20  ;;  %v5507_v26 = vrot.slane %v5492_v51, 3  ;;  %v5354_v15 = vpop.f32.mrf.mxu1 }
 0x436   : >> { %v5581_v53 = vsel %vm5557_vm7, %v5545_v28, %v5569_v60  ;;  %v5368_v31 = vrot.slane %v5354_v15, 2 }
 0x437   : >> { %v5510_v45 = vsel %vm2729_vm12, %v5506_v48, %v5507_v26  ;;  %v5611_v38 = vmul.f32 %v14972_v61, %v5581_v53 }
 0x438   : >> { %v5530_v18 = vadd.f32 %v5510_v45, %v5390_v13  ;;  %v5369_v17 = vsel %vm1095_vm13, %v5367_v16, %v5368_v31  ;;  %v5380_v22 = vsel %vm1095_vm13, %v5368_v31, %v5357_v56 }
 0x439   : >> { %v5623_v5 = vpack.c.bf16 %v5611_v38, %v5611_v38  ;;  %v5391_v29 = vadd.f32 %v5369_v17, %v5251_v8  ;;  %v5392_v10 = vadd.f32 %v5380_v22, %v5252_v6 }
 0x43a   : >> { %v5546_v59 = vadd.f32 %v14959_v23, %v5530_v18 }
 0x43b   : >> { %10487 = vst [vmem:[%s12990_s6 + $0x8c] sm:$0xf] %v5623_v5 }
 0x43c   : >> { %vm5558_vm8 = vcmp.gt.f32.partialorder %v5546_v59, 0.0  ;;  %v5570_v62 = vmul.f32 0.01, %v5546_v59  ;;  %v5494_v37 = vpop.f32.mrf.mxu2 }
 0x43d   : >> { %v5508_v36 = vrot.slane %v5494_v37, 3 }
 0x43e   : >> { %v5582_v41 = vsel %vm5558_vm8, %v5546_v59, %v5570_v62 }
 0x43f   : >> { %v5612_v1 = vmul.f32 %v14987_v25, %v5582_v41  ;;  %v5509_v21 = vsel %vm2729_vm12, %v5507_v26, %v5508_v36  ;;  %v5520_v32 = vsel %vm2729_vm12, %v5508_v36, %v5497_v58 }
 0x440   : >> { %v5531_v56 = vadd.f32 %v5509_v21, %v5391_v29  ;;  %v5532_v50 = vadd.f32 %v5520_v32, %v5392_v10 }
 0x441   : >> { %v5624_v44 = vpack.c.bf16 %v5612_v1, %v5612_v1 }
 0x442   : >> { %v5547_v43 = vadd.f32 %v14959_v23, %v5531_v56  ;;  %v5548_v49 = vadd.f32 %v14959_v23, %v5532_v50 }
 0x443   : >> { %10488 = vst [vmem:[%s12990_s6 + $0x98] sm:$0xf] %v5624_v44 }
 0x444   : >> { %vm5559_vm9 = vcmp.gt.f32.partialorder %v5547_v43, 0.0  ;;  %vm5560_vm10 = vcmp.gt.f32.partialorder %v5548_v49, 0.0  ;;  %v5571_v25 = vmul.f32 0.01, %v5547_v43  ;;  %v5572_v3 = vmul.f32 0.01, %v5548_v49 }
 0x446   : >> { %v5583_v12 = vsel %vm5559_vm9, %v5547_v43, %v5571_v25  ;;  %v5584_v42 = vsel %vm5560_vm10, %v5548_v49, %v5572_v3 }
 0x447   : >> { %v5613_v57 = vmul.f32 %v15004_v63, %v5583_v12  ;;  %v5614_v58 = vmul.f32 %v14972_v61, %v5584_v42 }
 0x448   : > { %464 = sbr.rel (!%p462_p1) target bundleno = 79 (0x4f), region = 187 }
 0x449   : >> { %v5625_v40 = vpack.c.bf16 %v5613_v57, %v5613_v57  ;;  %v5626_v34 = vpack.c.bf16 %v5614_v58, %v5614_v58 }
 0x44b   : >> { %10489 = vst [vmem:[%s12990_s6 + $0xa4] sm:$0xf] %v5625_v40 }
 0x44c   : >> { %10490 = vst [vmem:[%s12990_s6 + $0xb0] sm:$0xf] %v5626_v34 }
 0x44d LB: >> { %v11976_v23 = vld [vmem:[#allocation11 + $0xf8] sm:$0xff]  ;;  %v11975_v24 = vld [vmem:[#allocation11 + $0xf0] sm:$0xff]  ;;  %v11974_v48 = vld [vmem:[#allocation11 + $0xe8] sm:$0xff]  ;;  %s11926_s24 = smul.u32 144, %s12608_s21  ;;  %s12197_s26 = sshll.u32 %s12608_s21, 6  ;;  %s12608_s21 = sphi %s15126_s21, %s5644_s21  }
 0x44e   : >> { %v11984_v63 = vld [vmem:[#allocation11 + $0x138] sm:$0xff]  ;;  %6010 = vmatpush.bf16.msra.mxu0 %v11976_v23  ;;  %12223 = vmatpush.bf16.msra.mxu3 %v11976_v23  ;;  %v11983_v52 = vld [vmem:[#allocation11 + $0x130] sm:$0xff]  ;;  %v11982_v2 = vld [vmem:[#allocation11 + $0x128] sm:$0xff]  ;;  %s11627_s23 = smul.u32 96, %s12608_s21  ;;  %s16072_s27 = scalar_lea.vmem %s12810_s19, %s12197_s26 [#allocation12] }
 0x44f   : >> { %v11992_v61 = vld [vmem:[#allocation11 + $0x178] sm:$0xff]  ;;  %6049 = vmatpush.bf16.msra.mxu1 %v11984_v63  ;;  %v11991_v6 = vld [vmem:[#allocation11 + $0x170] sm:$0xff]  ;;  %v11990_v27 = vld [vmem:[#allocation11 + $0x168] sm:$0xff]  ;;  %s15132_s6 = scalar_lea.vmem [#allocation2], %s11926_s24  ;;  %s5644_s21 = sadd.s32 1, %s12608_s21  }
 0x450   : >> { %6088 = vmatpush.bf16.msra.mxu2 %v11992_v61  ;;  %v11973_v0 = vld [vmem:[#allocation11 + $0xe0] sm:$0xff]  ;;  %v11972_v39 = vld [vmem:[#allocation11 + $0xd8] sm:$0xff]  ;;  %v11971_v4 = vld [vmem:[#allocation11 + $0xd0] sm:$0xff]  ;;  %s16050_s18 = scalar_lea.vmem %s12795_s8, %s11627_s23 [#allocation3]  ;;  %p5641_p4 = scmp.ge.s32.totalorder %s5644_s21, 4  }
 0x451   : >> { %v11981_v19 = vld [vmem:[#allocation11 + $0x120] sm:$0xff]  ;;  %v11980_v55 = vld [vmem:[#allocation11 + $0x118] sm:$0xff]  ;;  %v11979_v35 = vld [vmem:[#allocation11 + $0x110] sm:$0xff]  ;;  %s12198_s2 = sshll.u32 (%p5641_p4), %s12698_s17, 8  ;;  %s9051_s28 = sshll.u32 (%p5641_p4), %s12810_s19, 4  ;;  %s9052_s28 = int_to_ptr.vmem [resolvable:$true] %s9051_s28 }
 0x452   : >> { %6011 = vmatpush.bf16.msra.mxu0 %v11975_v24  ;;  %12224 = vmatpush.bf16.msra.mxu3 %v11975_v24  ;;  %v11989_v16 = vld [vmem:[#allocation11 + $0x160] sm:$0xff]  ;;  %v11988_v47 = vld [vmem:[#allocation11 + $0x158] sm:$0xff]  ;;  %v11987_v46 = vld [vmem:[#allocation11 + $0x150] sm:$0xff]  ;;  %s9050_s25 = scalar_lea.hbm (%p5641_p4), %s16202_s10, %s12198_s2  ;;  %s12538_s17 = scalar_lea.hbm (%p5641_p4), %s16202_s10, 512 }
 0x453   : >> { %6050 = vmatpush.bf16.msra.mxu1 %v11983_v52  ;;  %v11970_v9 = vld [vmem:[#allocation11 + $0xc8] sm:$0xff]  ;;  %v11969_v28 = vld [vmem:[#allocation11 + $0xc0] sm:$0xff]  ;;  %v10496_v51 = vld [vmem:[%s15132_s6] sm:$0xf]  ;;  %s9053_s24 = sshll.u32 (%p5641_p4), %s9050_s25, 4  ;;  %s9054_s24 = int_to_ptr.hbm [resolvable:$true] %s9053_s24 }
 0x454   : >> { %6089 = vmatpush.bf16.msra.mxu2 %v11991_v6  ;;  %v11978_v20 = vld [vmem:[#allocation11 + $0x108] sm:$0xff]  ;;  %v11977_v11 = vld [vmem:[#allocation11 + $0x100] sm:$0xff]  ;;  %v11934_v13 = vld [vmem:[%s15132_s6 + $0x38] sm:$0xf0]  ;;  %s12532_s23 = sshra.s32 (%p5641_p4), %s9054_s24, 4  ;;  %s12533_s23 = int_to_ptr.hbm [resolvable:$true] %s12532_s23 }
 0x455   : >> { %v11986_v33 = vld [vmem:[#allocation11 + $0x148] sm:$0xff]  ;;  %v11985_v7 = vld [vmem:[#allocation11 + $0x140] sm:$0xff]  ;;  %v11927_v15 = vld [vmem:[%s15132_s6 + $0x4] sm:$0xf]  ;;  %p12539_p2 = scmp.lt.s32.totalorder (%p5641_p4), %s12533_s23, %s16202_s10 }
 0x456   : >> { %6012 = vmatpush.bf16.msra.mxu0 %v11974_v48  ;;  %12225 = vmatpush.bf16.msra.mxu3 %v11974_v48  ;;  %v11928_v60 = vld [vmem:[%s15132_s6 + $0x8] sm:$0xf0]  ;;  %v10520_v26 = vld [vmem:[%s15132_s6 + $0x30] sm:$0xf]  ;;  %v10504_v45 = vld [vmem:[%s15132_s6 + $0x8] sm:$0xf] }
 0x457   : >> { %6051 = vmatpush.bf16.msra.mxu1 %v11982_v2  ;;  %v10498_v53 = vld [vmem:[%s15132_s6 + $0xc] sm:$0xf0]  ;;  %v11929_v31 = vld [vmem:[%s15132_s6 + $0x10] sm:$0xf0]  ;;  %v12000_v14 = vld [vmem:[#allocation11 + $0x1b8] sm:$0xff]  ;;  %v15142_v18 = vor.u32 %v11928_v60, %v10496_v51  ;;  %v15144_v5 = vor.u32 %v11934_v13, %v10520_v26 }
 0x458   : >> { %6090 = vmatpush.bf16.msra.mxu2 %v11990_v27  ;;  %v11960_v38 = vld [vmem:[#allocation11 + $0x78] sm:$0xff]  ;;  %v15146_v59 = vor.u32 %v11927_v15, %v10498_v53  ;;  %v15148_v30 = vor.u32 %v11929_v31, %v10504_v45  ;;  %v11959_v8 = vld [vmem:[#allocation11 + $0x70] sm:$0xff]  ;;  %v11958_v41 = vld [vmem:[#allocation11 + $0x68] sm:$0xff] }
 0x459   : >> { %v11968_v17 = vld [vmem:[#allocation11 + $0xb8] sm:$0xff]  ;;  %v11999_v62 = vld [vmem:[#allocation11 + $0x1b0] sm:$0xff]  ;;  %v11998_v29 = vld [vmem:[#allocation11 + $0x1a8] sm:$0xff] }
 0x45a   : >> { %6013 = vmatpush.bf16.msra.mxu0 %v11973_v0  ;;  %12226 = vmatpush.bf16.msra.mxu3 %v11973_v0  ;;  %v11952_v22 = vld [vmem:[#allocation11 + $0x38] sm:$0xff]  ;;  %v11967_v37 = vld [vmem:[#allocation11 + $0xb0] sm:$0xff]  ;;  %v11966_v10 = vld [vmem:[#allocation11 + $0xa8] sm:$0xff] }
 0x45b   : >> { %6052 = vmatpush.bf16.msra.mxu1 %v11981_v19  ;;  %v11951_v36 = vld [vmem:[#allocation11 + $0x30] sm:$0xff]  ;;  %v11950_v1 = vld [vmem:[#allocation11 + $0x28] sm:$0xff]  ;;  %v11957_v21 = vld [vmem:[#allocation11 + $0x60] sm:$0xff] }
 0x45c   : >> { %6091 = vmatpush.bf16.msra.mxu2 %v11989_v16  ;;  %v10508_v32 = vld [vmem:[%s15132_s6 + $0x18] sm:$0xf]  ;;  %v11997_v56 = vld [vmem:[#allocation11 + $0x1a0] sm:$0xff]  ;;  %v11931_v50 = vld [vmem:[%s15132_s6 + $0x20] sm:$0xf0] }
 0x45d   : >> { %v10532_v44 = vld [vmem:[%s15132_s6 + $0x48] sm:$0xf]  ;;  %v11937_v43 = vld [vmem:[%s15132_s6 + $0x50] sm:$0xf0]  ;;  %v11930_v49 = vld [vmem:[%s15132_s6 + $0x1c] sm:$0xf]  ;;  %v15162_v40 = vor.u32 %v11931_v50, %v10508_v32 }
 0x45e   : >> { %6014 = vmatpush.bf16.msra.mxu0 %v11972_v39  ;;  %12227 = vmatpush.bf16.msra.mxu3 %v11972_v39  ;;  %v10510_v25 = vld [vmem:[%s15132_s6 + $0x24] sm:$0xf0]  ;;  %v10516_v3 = vld [vmem:[%s15132_s6 + $0x20] sm:$0xf]  ;;  %v11932_v12 = vld [vmem:[%s15132_s6 + $0x28] sm:$0xf0]  ;;  %v15164_v34 = vor.u32 %v11937_v43, %v10532_v44 }
 0x45f   : >> { %6053 = vmatpush.bf16.msra.mxu1 %v11980_v55  ;;  %v11949_v42 = vld [vmem:[#allocation11 + $0x20] sm:$0xff]  ;;  %v11956_v58 = vld [vmem:[#allocation11 + $0x58] sm:$0xff]  ;;  %v15166_v23 = vor.u32 %v11930_v49, %v10510_v25  ;;  %v15168_v63 = vor.u32 %v11932_v12, %v10516_v3  ;;  %v11955_v24 = vld [vmem:[#allocation11 + $0x50] sm:$0xff] }
 0x460   : >> { %6092 = vmatpush.bf16.msra.mxu2 %v11988_v47  ;;  %v11965_v57 = vld [vmem:[#allocation11 + $0xa0] sm:$0xff]  ;;  %v11948_v61 = vld [vmem:[#allocation11 + $0x18] sm:$0xff]  ;;  %v11947_v48 = vld [vmem:[#allocation11 + $0x10] sm:$0xff] }
 0x461   : >> { %v11996_v52 = vld [vmem:[#allocation11 + $0x198] sm:$0xff]  ;;  %v11954_v2 = vld [vmem:[#allocation11 + $0x48] sm:$0xff]  ;;  %v11995_v27 = vld [vmem:[#allocation11 + $0x190] sm:$0xff] }
 0x462   : >> { %6015 = vmatpush.bf16.msra.mxu0 %v11971_v4  ;;  %12228 = vmatpush.bf16.msra.mxu3 %v11971_v4  ;;  %v11964_v6 = vld [vmem:[#allocation11 + $0x98] sm:$0xff]  ;;  %v11946_v0 = vld [vmem:[#allocation11 + $0x8] sm:$0xff]  ;;  %v11953_v19 = vld [vmem:[#allocation11 + $0x40] sm:$0xff] }
 0x463   : >> { %6054 = vmatpush.bf16.msra.mxu1 %v11979_v35  ;;  %v10544_v16 = vld [vmem:[%s15132_s6 + $0x60] sm:$0xf]  ;;  %v11940_v55 = vld [vmem:[%s15132_s6 + $0x68] sm:$0xf0]  ;;  %v11933_v47 = vld [vmem:[%s15132_s6 + $0x34] sm:$0xf] }
 0x464   : >> { %6093 = vmatpush.bf16.msra.mxu2 %v11987_v46  ;;  %v12016_v39 = vld [vmem:[#allocation11 + $0x238] sm:$0xff]  ;;  %v10528_v35 = vld [vmem:[%s15132_s6 + $0x38] sm:$0xf]  ;;  %v11994_v51 = vld [vmem:[#allocation11 + $0x188] sm:$0xff] }
 0x465   : >> { %v10522_v4 = vld [vmem:[%s15132_s6 + $0x3c] sm:$0xf0]  ;;  %v11935_v46 = vld [vmem:[%s15132_s6 + $0x40] sm:$0xf0]  ;;  %v11962_v26 = vld [vmem:[#allocation11 + $0x88] sm:$0xff] }
 0x466   : >> { %6016 = vmatpush.bf16.msra.mxu0 %v11970_v9  ;;  %12229 = vmatpush.bf16.msra.mxu3 %v11970_v9  ;;  %v11945_v9 = vld [vmem:[#allocation11] sm:$0xff]  ;;  %v12008_v60 = vld [vmem:[#allocation11 + $0x1f8] sm:$0xff]  ;;  %v12014_v13 = vld [vmem:[#allocation11 + $0x228] sm:$0xff] }
 0x467   : >> { %6055 = vmatpush.bf16.msra.mxu1 %v11978_v20  ;;  %v15180_v20 = vor.u32 %v11940_v55, %v10544_v16  ;;  %v10556_v15 = vld [vmem:[%s15132_s6 + $0x78] sm:$0xf]  ;;  %v11943_v53 = vld [vmem:[%s15132_s6 + $0x80] sm:$0xf0]  ;;  %v11936_v45 = vld [vmem:[%s15132_s6 + $0x4c] sm:$0xf] }
 0x468   : >> { %6094 = vmatpush.bf16.msra.mxu2 %v11986_v33  ;;  %v15182_v33 = vor.u32 %v11933_v47, %v10522_v4  ;;  %v10534_v31 = vld [vmem:[%s15132_s6 + $0x54] sm:$0xf0]  ;;  %v12050_v50 = vld [vmem:[#allocation11 + $0x2b8] sm:$0xff]  ;;  %v12006_v43 = vld [vmem:[#allocation11 + $0x1e8] sm:$0xff] }
 0x469   : >> { %v12042_v44 = vld [vmem:[#allocation11 + $0x278] sm:$0xff]  ;;  %v12049_v25 = vld [vmem:[#allocation11 + $0x2b0] sm:$0xff]  ;;  %v10558_v12 = vld [vmem:[%s15132_s6 + $0x84] sm:$0xf0] }
 0x46a   : >> { %6017 = vmatpush.bf16.msra.mxu0 %v11969_v28  ;;  %12230 = vmatpush.bf16.msra.mxu3 %v11969_v28  ;;  %v15184_v28 = vor.u32 %v11935_v46, %v10528_v35  ;;  %v12012_v49 = vld [vmem:[#allocation11 + $0x218] sm:$0xff]  ;;  %v11942_v3 = vld [vmem:[%s15132_s6 + $0x7c] sm:$0xf]  ;;  %v12047_v16 = vld [vmem:[#allocation11 + $0x2a0] sm:$0xff] }
 0x46b   : >> { %6056 = vmatpush.bf16.msra.mxu1 %v11977_v11  ;;  %v11963_v11 = vld [vmem:[#allocation11 + $0x90] sm:$0xff]  ;;  %v12046_v47 = vld [vmem:[#allocation11 + $0x298] sm:$0xff]  ;;  %v12002_v35 = vld [vmem:[#allocation11 + $0x1c8] sm:$0xff] }
 0x46c   : >> { %6095 = vmatpush.bf16.msra.mxu2 %v11985_v7  ;;  %v12015_v7 = vld [vmem:[#allocation11 + $0x230] sm:$0xff]  ;;  %v12038_v4 = vld [vmem:[#allocation11 + $0x258] sm:$0xff]  ;;  %v12001_v46 = vld [vmem:[#allocation11 + $0x1c0] sm:$0xff] }
 0x46d   : >> { %6018 = vmatmul.bf16.vlgmr.msra.gmra.mxu0 %v15142_v18  ;;  %6028 = vmatmul.bf16.vlgmr.msra.gmra.mxu3 %v15144_v5  ;;  %v12003_v55 = vld [vmem:[#allocation11 + $0x1d0] sm:$0xff] }
 0x46e   : >> { %6329 = vmatpush.bf16.msrb.mxu0 %v11960_v38  ;;  %6057 = vmatmul.bf16.vlgmr.msra.gmra.mxu1 %v15146_v59  ;;  %v11938_v38 = vld [vmem:[%s15132_s6 + $0x58] sm:$0xf0] }
 0x46f   : >> { %6096 = vmatmul.bf16.vlgmr.msra.gmra.mxu2 %v15148_v30  ;;  %6364 = vmatpush.bf16.msrb.mxu1 %v11968_v17  ;;  %v15196_v17 = vor.u32 %v11943_v53, %v10556_v15 }
 0x470   : >> { %6592 = vmatpush.bf16.msrb.mxu2 %v12000_v14  ;;  %6294 = vmatpush.bf16.msrb.mxu3 %v11952_v22  ;;  %v10540_v14 = vld [vmem:[%s15132_s6 + $0x50] sm:$0xf]  ;;  %v15198_v22 = vor.u32 %v11936_v45, %v10534_v31 }
 0x472   : >> { %6330 = vmatpush.bf16.msrb.mxu0 %v11959_v8  ;;  %v15200_v8 = vor.u32 %v11938_v38, %v10540_v14  ;;  %v12044_v14 = vld [vmem:[#allocation11 + $0x288] sm:$0xff] }
 0x473   : >> { %6365 = vmatpush.bf16.msrb.mxu1 %v11967_v37  ;;  %v11961_v37 = vld [vmem:[#allocation11 + $0x80] sm:$0xff] }
 0x474   : >> { %6593 = vmatpush.bf16.msrb.mxu2 %v11999_v62  ;;  %6295 = vmatpush.bf16.msrb.mxu3 %v11951_v36  ;;  %v11993_v62 = vld [vmem:[#allocation11 + $0x180] sm:$0xff]  ;;  %v12007_v36 = vld [vmem:[#allocation11 + $0x1f0] sm:$0xff] }
 0x476   : >> { %6331 = vmatpush.bf16.msrb.mxu0 %v11958_v41  ;;  %v12013_v41 = vld [vmem:[#allocation11 + $0x220] sm:$0xff] }
 0x477   : >> { %6366 = vmatpush.bf16.msrb.mxu1 %v11966_v10  ;;  %v10546_v10 = vld [vmem:[%s15132_s6 + $0x6c] sm:$0xf0] }
 0x478   : >> { %6594 = vmatpush.bf16.msrb.mxu2 %v11998_v29  ;;  %6296 = vmatpush.bf16.msrb.mxu3 %v11950_v1  ;;  %v11939_v29 = vld [vmem:[%s15132_s6 + $0x64] sm:$0xf]  ;;  %v10552_v1 = vld [vmem:[%s15132_s6 + $0x68] sm:$0xf] }
 0x479   : >> { %v15210_v32 = vor.u32 %v11939_v29, %v10546_v10  ;;  %v12036_v10 = vld [vmem:[#allocation11 + $0x248] sm:$0xff] }
 0x47a   : >> { %6332 = vmatpush.bf16.msrb.mxu0 %v11957_v21  ;;  %v11941_v21 = vld [vmem:[%s15132_s6 + $0x70] sm:$0xf0] }
 0x47b   : >> { %6367 = vmatpush.bf16.msrb.mxu1 %v11965_v57  ;;  %v11944_v57 = vld [vmem:[%s15132_s6 + $0x88] sm:$0xf0] }
 0x47c   : >> { %6595 = vmatpush.bf16.msrb.mxu2 %v11997_v56  ;;  %6297 = vmatpush.bf16.msrb.mxu3 %v11949_v42  ;;  %v15212_v56 = vor.u32 %v11941_v21, %v10552_v1  ;;  %v10564_v42 = vld [vmem:[%s15132_s6 + $0x80] sm:$0xf]  ;;  %v12064_v21 = vld [vmem:[#allocation11 + $0x328] sm:$0xff] }
 0x47d   : >> { %6023 = vmatmul.bf16.gmra.mxu0 %v15162_v40  ;;  %6033 = vmatmul.bf16.gmra.mxu3 %v15164_v34  ;;  %v12058_v1 = vld [vmem:[#allocation11 + $0x2f8] sm:$0xff] }
 0x47e   : >> { %6333 = vmatpush.bf16.msrb.mxu0 %v11956_v58  ;;  %6062 = vmatmul.bf16.gmra.mxu1 %v15166_v23  ;;  %v15222_v58 = vor.u32 %v11942_v3, %v10558_v12 }
 0x47f   : >> { %6101 = vmatmul.bf16.gmra.mxu2 %v15168_v63  ;;  %6368 = vmatpush.bf16.msrb.mxu1 %v11964_v6  ;;  %v12011_v6 = vld [vmem:[#allocation11 + $0x210] sm:$0xff] }
 0x480   : >> { %6298 = vmatpush.bf16.msrb.mxu3 %v11948_v61  ;;  %6596 = vmatpush.bf16.msrb.mxu2 %v11996_v52  ;;  %v15224_v61 = vor.u32 %v11944_v57, %v10564_v42  ;;  %v12005_v52 = vld [vmem:[#allocation11 + $0x1e0] sm:$0xff] }
 0x481   : >> { %v12043_v57 = vld [vmem:[#allocation11 + $0x280] sm:$0xff] }
 0x482   : >> { %6334 = vmatpush.bf16.msrb.mxu0 %v11955_v24  ;;  %v12041_v24 = vld [vmem:[#allocation11 + $0x270] sm:$0xff] }
 0x483   : >> { %6369 = vmatpush.bf16.msrb.mxu1 %v11963_v11 }
 0x484   : >> { %6299 = vmatpush.bf16.msrb.mxu3 %v11947_v48  ;;  %6597 = vmatpush.bf16.msrb.mxu2 %v11995_v27  ;;  %v12048_v48 = vld [vmem:[#allocation11 + $0x2a8] sm:$0xff] }
 0x485   : >> { %v12010_v27 = vld [vmem:[#allocation11 + $0x208] sm:$0xff] }
 0x486   : >> { %6335 = vmatpush.bf16.msrb.mxu0 %v11954_v2  ;;  %v12040_v2 = vld [vmem:[#allocation11 + $0x268] sm:$0xff] }
 0x487   : >> { %6370 = vmatpush.bf16.msrb.mxu1 %v11962_v26 }
 0x488   : >> { %6300 = vmatpush.bf16.msrb.mxu3 %v11946_v0  ;;  %6598 = vmatpush.bf16.msrb.mxu2 %v11994_v51  ;;  %v12009_v0 = vld [vmem:[#allocation11 + $0x200] sm:$0xff]  ;;  %v12045_v51 = vld [vmem:[#allocation11 + $0x290] sm:$0xff] }
 0x48a   : >> { %6336 = vmatpush.bf16.msrb.mxu0 %v11953_v19  ;;  %v12004_v19 = vld [vmem:[#allocation11 + $0x1d8] sm:$0xff] }
 0x48b   : >> { %6371 = vmatpush.bf16.msrb.mxu1 %v11961_v37 }
 0x48c   : >> { %6301 = vmatpush.bf16.msrb.mxu3 %v11945_v9  ;;  %6599 = vmatpush.bf16.msrb.mxu2 %v11993_v62 }
 0x48d   : >> { %6038 = vmatmul.bf16.gmra.mxu3 %v15180_v20  ;;  %6337 = vmatmul.bf16.vlgmr.msrb.gmra.mxu0 %v15146_v59 }
 0x48e   : >> { %6670 = vmatpush.bf16.msra.mxu0 %v12016_v39  ;;  %6067 = vmatmul.bf16.gmra.mxu1 %v15182_v33  ;;  %v12039_v39 = vld [vmem:[#allocation11 + $0x260] sm:$0xff] }
 0x48f   : >> { %6106 = vmatmul.bf16.gmra.mxu2 %v15184_v28  ;;  %7055 = vmatpush.bf16.msra.mxu1 %v12042_v44 }
 0x490   : >> { %6631 = vmatpush.bf16.msra.mxu3 %v12008_v60  ;;  %7090 = vmatpush.bf16.msra.mxu2 %v12050_v50  ;;  %v12065_v60 = vld [vmem:[#allocation11 + $0x330] sm:$0xff] }
 0x492   : >> { %6671 = vmatpush.bf16.msra.mxu0 %v12015_v7 }
 0x493   : >> { %7056 = vmatpush.bf16.msra.mxu1 %v12041_v24  ;;  %v12057_v24 = vld [vmem:[#allocation11 + $0x2f0] sm:$0xff] }
 0x494   : >> { %6632 = vmatpush.bf16.msra.mxu3 %v12007_v36  ;;  %7091 = vmatpush.bf16.msra.mxu2 %v12049_v25 }
 0x496   : >> { %6672 = vmatpush.bf16.msra.mxu0 %v12014_v13 }
 0x497   : >> { %7057 = vmatpush.bf16.msra.mxu1 %v12040_v2 }
 0x498   : >> { %6633 = vmatpush.bf16.msra.mxu3 %v12006_v43  ;;  %7092 = vmatpush.bf16.msra.mxu2 %v12048_v48 }
 0x49a   : >> { %6673 = vmatpush.bf16.msra.mxu0 %v12013_v41 }
 0x49b   : >> { %7058 = vmatpush.bf16.msra.mxu1 %v12039_v39 }
 0x49c   : >> { %6634 = vmatpush.bf16.msra.mxu3 %v12005_v52  ;;  %7093 = vmatpush.bf16.msra.mxu2 %v12047_v16  ;;  %v12063_v52 = vld [vmem:[#allocation11 + $0x320] sm:$0xff]  ;;  %v12082_v16 = vld [vmem:[#allocation11 + $0x3b8] sm:$0xff] }
 0x49d   : >> { %6043 = vmatmul.bf16.gmra.mxu3 %v15196_v17  ;;  %6342 = vmatmul.bf16.gmra.mxu0 %v15166_v23 }
 0x49e   : >> { %6072 = vmatmul.bf16.gmra.mxu1 %v15198_v22  ;;  %6674 = vmatpush.bf16.msra.mxu0 %v12012_v49 }
 0x49f   : >> { %6111 = vmatmul.bf16.gmra.mxu2 %v15200_v8  ;;  %7059 = vmatpush.bf16.msra.mxu1 %v12038_v4 }
 0x4a0   : >> { %6635 = vmatpush.bf16.msra.mxu3 %v12004_v19  ;;  %7094 = vmatpush.bf16.msra.mxu2 %v12046_v47 }
 0x4a2   : >> { %6675 = vmatpush.bf16.msra.mxu0 %v12011_v6 }
 0x4a4   : >> { %6636 = vmatpush.bf16.msra.mxu3 %v12003_v55  ;;  %7095 = vmatpush.bf16.msra.mxu2 %v12045_v51 }
 0x4a6   : >> { %6676 = vmatpush.bf16.msra.mxu0 %v12010_v27 }
 0x4a8   : >> { %6637 = vmatpush.bf16.msra.mxu3 %v12002_v35  ;;  %7096 = vmatpush.bf16.msra.mxu2 %v12044_v14  ;;  %v12061_v14 = vld [vmem:[#allocation11 + $0x310] sm:$0xff] }
 0x4aa   : >> { %6677 = vmatpush.bf16.msra.mxu0 %v12009_v0 }
 0x4ac   : >> { %6638 = vmatpush.bf16.msra.mxu3 %v12001_v46  ;;  %7097 = vmatpush.bf16.msra.mxu2 %v12043_v57 }
 0x4ad   : >> { %6302 = vmatmul.bf16.vlgmr.msrb.gmra.mxu3 %v15142_v18  ;;  %6346 = vmatmul.bf16.gmra.mxu0 %v15182_v33 }
 0x4ae   : >> { %6077 = vmatmul.bf16.gmra.mxu1 %v15210_v32 }
 0x4af   : >> { %6116 = vmatmul.bf16.gmra.mxu2 %v15212_v56 }
 0x4b0   : >> { %7125 = vmatpush.bf16.msrb.mxu3 %v12058_v1  ;;  %v10884_v1 = vld [vmem:[%s15132_s6 + $0x30] sm:$0xf0] }
 0x4b4   : >> { %7126 = vmatpush.bf16.msrb.mxu3 %v12057_v24 }
 0x4bd   : >> { %6307 = vmatmul.bf16.gmra.mxu3 %v15162_v40  ;;  %6350 = vmatmul.bf16.gmra.mxu0 %v15198_v22 }
 0x4be   : >> { %6082 = vmatmul.bf16.gmra.mxu1 %v15222_v58 }
 0x4bf   : >> { %6121 = vmatmul.bf16.gmra.mxu2 %v15224_v61 }
 0x4cd   : >> { %6311 = vmatmul.bf16.gmra.mxu3 %v15144_v5  ;;  %6355 = vmatmul.bf16.gmra.mxu0 %v15210_v32 }
 0x4ce   : >> { %6372 = vmatmul.bf16.vlgmr.msrb.gmra.mxu1 %v15148_v30 }
 0x4cf   : >> { %6600 = vmatmul.bf16.vlgmr.msrb.gmra.mxu2 %v15142_v18  ;;  %v12066_v18 = vld [vmem:[#allocation11 + $0x338] sm:$0xff] }
 0x4d0   : >> { %7361 = vmatpush.bf16.msrb.mxu0 %v12066_v18  ;;  %7439 = vmatpush.bf16.msrb.mxu2 %v12082_v16 }
 0x4d4   : >> { %7362 = vmatpush.bf16.msrb.mxu0 %v12065_v60 }
 0x4d8   : >> { %7363 = vmatpush.bf16.msrb.mxu0 %v12064_v21 }
 0x4dc   : >> { %7364 = vmatpush.bf16.msrb.mxu0 %v12063_v52  ;;  %v12072_v52 = vld [vmem:[#allocation11 + $0x368] sm:$0xff] }
 0x4dd   : >> { %6315 = vmatmul.bf16.gmra.mxu3 %v15164_v34  ;;  %6359 = vmatmul.bf16.gmra.mxu0 %v15222_v58 }
 0x4de   : >> { %6377 = vmatmul.bf16.gmra.mxu1 %v15168_v63 }
 0x4df   : >> { %6605 = vmatmul.bf16.gmra.mxu2 %v15162_v40  ;;  %v12037_v40 = vld [vmem:[#allocation11 + $0x250] sm:$0xff] }
 0x4e0   : >> { %7060 = vmatpush.bf16.msra.mxu1 %v12037_v40 }
 0x4e4   : >> { %7061 = vmatpush.bf16.msra.mxu1 %v12036_v10  ;;  %v12017_v10 = vld [vmem:[%s15132_s6 + $0x28] sm:$0xf] }
 0x4ea   : >> { %v6019_v9 = vpop.f32.mrf.mxu0 }
 0x4eb   : >> { %v6058_v11 = vpop.f32.mrf.mxu1 }
 0x4ec   : >> { %v6059_v7 = vadd.f32 %v6058_v11, %v6019_v9  ;;  %v12074_v11 = vld [vmem:[#allocation11 + $0x378] sm:$0xff] }
 0x4ed   : >> { %6320 = vmatmul.bf16.gmra.mxu3 %v15180_v20  ;;  %6678 = vmatmul.bf16.vlgmr.msra.gmra.mxu0 %v15148_v30 }
 0x4ee   : >> { %6381 = vmatmul.bf16.gmra.mxu1 %v15184_v28 }
 0x4ef   : >> { %6610 = vmatmul.bf16.gmra.mxu2 %v15144_v5 }
 0x4f0   : >> { %v6029_v26 = vpop.f32.mrf.mxu3 }
 0x4f2   : >> { %v6097_v13 = vpop.f32.mrf.mxu2  ;;  %v6021_v53 = vpop.f32.mrf.mxu0 }
 0x4f3   : >> { %v6098_v15 = vadd.f32 %v6097_v13, %v6059_v7  ;;  %v6060_v45 = vpop.f32.mrf.mxu1  ;;  %v12056_v7 = vld [vmem:[#allocation11 + $0x2e8] sm:$0xff] }
 0x4f4   : >> { %v6061_v31 = vadd.f32 %v6060_v45, %v6021_v53  ;;  %7127 = vmatpush.bf16.msrb.mxu3 %v12056_v7  ;;  %v12081_v53 = vld [vmem:[#allocation11 + $0x3b0] sm:$0xff]  ;;  %v12020_v7 = vld [vmem:[%s15132_s6 + $0x40] sm:$0xf] }
 0x4f5   : >> { %v6127_v41 = vrot.slane %v6098_v15, 1  ;;  %v12073_v45 = vld [vmem:[#allocation11 + $0x370] sm:$0xff]  ;;  %7440 = vmatpush.bf16.msrb.mxu2 %v12081_v53 }
 0x4f8   : >> { %v6031_v38 = vpop.f32.mrf.mxu3 }
 0x4fa   : >> { %v6099_v62 = vpop.f32.mrf.mxu2  ;;  %v6024_v37 = vpop.f32.mrf.mxu0 }
 0x4fb   : >> { %v6100_v30 = vadd.f32 %v6099_v62, %v6061_v31  ;;  %v6063_v36 = vpop.f32.mrf.mxu1  ;;  %v12055_v31 = vld [vmem:[#allocation11 + $0x2e0] sm:$0xff] }
 0x4fc   : >> { %v6064_v29 = vadd.f32 %v6063_v36, %v6024_v37  ;;  %7128 = vmatpush.bf16.msrb.mxu3 %v12055_v31  ;;  %v12080_v36 = vld [vmem:[#allocation11 + $0x3a8] sm:$0xff] }
 0x4fd   : >> { %v6128_v5 = vrot.slane %v6100_v30, 1  ;;  %6324 = vmatmul.bf16.gmra.mxu3 %v15196_v17  ;;  %6683 = vmatmul.bf16.gmra.mxu0 %v15168_v63  ;;  %v12035_v63 = vld [vmem:[#allocation11 + $0x240] sm:$0xff] }
 0x4fe   : >> { %6385 = vmatmul.bf16.gmra.mxu1 %v15200_v8  ;;  %7441 = vmatpush.bf16.msrb.mxu2 %v12080_v36  ;;  %v12098_v36 = vld [vmem:[#allocation11 + $0x438] sm:$0xff] }
 0x4ff   : >> { %6615 = vmatmul.bf16.gmra.mxu2 %v15164_v34  ;;  %v15248_v50 = vsel %vm605_vm0, %v6127_v41, %v6128_v5  ;;  %7062 = vmatpush.bf16.msra.mxu1 %v12035_v63  ;;  %v12060_v41 = vld [vmem:[#allocation11 + $0x308] sm:$0xff] }
 0x500   : >> { %v6034_v44 = vpop.f32.mrf.mxu3 }
 0x502   : >> { %v6102_v43 = vpop.f32.mrf.mxu2  ;;  %v6026_v25 = vpop.f32.mrf.mxu0 }
 0x503   : >> { %v6103_v49 = vadd.f32 %v6102_v43, %v6064_v29  ;;  %v6065_v3 = vpop.f32.mrf.mxu1  ;;  %7400 = vmatpush.bf16.msrb.mxu1 %v12074_v11  ;;  %v12018_v29 = vld [vmem:[%s15132_s6 + $0x2c] sm:$0xf0]  ;;  %v12059_v43 = vld [vmem:[#allocation11 + $0x300] sm:$0xff] }
 0x504   : >> { %v6066_v42 = vadd.f32 %v6065_v3, %v6026_v25  ;;  %v12021_v11 = vld [vmem:[%s15132_s6 + $0x44] sm:$0xf0] }
 0x505   : >> { %v6129_v12 = vrot.slane %v6103_v49, 1 }
 0x507   : >> { %v15252_v34 = vsel %vm605_vm0, %v6128_v5, %v6129_v12  ;;  %7401 = vmatpush.bf16.msrb.mxu1 %v12073_v45  ;;  %v10882_v5 = vld [vmem:[%s15132_s6 + $0x24] sm:$0xf]  ;;  %v15290_v12 = vor.u32 %v12017_v10, %v10884_v1  ;;  %v12023_v10 = vld [vmem:[%s15132_s6 + $0x58] sm:$0xf] }
 0x508   : >> { %v6036_v6 = vpop.f32.mrf.mxu3  ;;  %v15288_v3 = vor.u32 %v12018_v29, %v10882_v5  ;;  %v12024_v29 = vld [vmem:[%s15132_s6 + $0x5c] sm:$0xf0]  ;;  %v10908_v1 = vld [vmem:[%s15132_s6 + $0x60] sm:$0xf0] }
 0x50a   : >> { %v6104_v48 = vpop.f32.mrf.mxu2  ;;  %v15254_v27 = vpop.f32.mrf.mxu0 }
 0x50b   : >> { %v6105_v2 = vadd.f32 %v6104_v48, %v6066_v42  ;;  %v6068_v0 = vpop.f32.mrf.mxu1  ;;  %7402 = vmatpush.bf16.msrb.mxu1 %v12072_v52  ;;  %v15338_v52 = vor.u32 %v12023_v10, %v10908_v1  ;;  %v10932_v10 = vld [vmem:[%s15132_s6 + $0x90] sm:$0xf0] }
 0x50c   : >> { %v6069_v19 = vadd.f32 %v6068_v0, %v6029_v26 }
 0x50d   : >> { %6639 = vmatmul.bf16.vlgmr.msra.gmra.mxu3 %v15146_v59  ;;  %6688 = vmatmul.bf16.gmra.mxu0 %v15184_v28  ;;  %v6130_v18 = vrot.slane %v6105_v2, 1  ;;  %v12062_v59 = vld [vmem:[#allocation11 + $0x318] sm:$0xff] }
 0x50e   : >> { %6390 = vmatmul.bf16.gmra.mxu1 %v15212_v56  ;;  %7365 = vmatpush.bf16.msrb.mxu0 %v12062_v59  ;;  %v10896_v59 = vld [vmem:[%s15132_s6 + $0x48] sm:$0xf0] }
 0x50f   : >> { %6620 = vmatmul.bf16.gmra.mxu2 %v15180_v20 }
 0x510   : >> { %v6039_v39 = vpop.f32.mrf.mxu3 }
 0x512   : >> { %v6107_v55 = vpop.f32.mrf.mxu2  ;;  %v15260_v4 = vpop.f32.mrf.mxu0  ;;  %7366 = vmatpush.bf16.msrb.mxu0 %v12061_v14 }
 0x513   : >> { %v6108_v47 = vadd.f32 %v6107_v55, %v6069_v19  ;;  %v6070_v35 = vpop.f32.mrf.mxu1 }
 0x514   : >> { %v6071_v9 = vadd.f32 %v6070_v35, %v6031_v38 }
 0x515   : >> { %v6131_v46 = vrot.slane %v6108_v47, 1 }
 0x516   : >> { %7367 = vmatpush.bf16.msrb.mxu0 %v12060_v41  ;;  %v10906_v41 = vld [vmem:[%s15132_s6 + $0x54] sm:$0xf] }
 0x517   : >> { %v15264_v28 = vsel %vm605_vm0, %v6130_v18, %v6131_v46  ;;  %v12071_v18 = vld [vmem:[#allocation11 + $0x360] sm:$0xff] }
 0x518   : >> { %v15266_v20 = vpop.f32.mrf.mxu3  ;;  %7403 = vmatpush.bf16.msrb.mxu1 %v12071_v18 }
 0x51a   : >> { %v6109_v51 = vpop.f32.mrf.mxu2  ;;  %v6343_v60 = vpop.f32.mrf.mxu0  ;;  %7368 = vmatpush.bf16.msrb.mxu0 %v12059_v43 }
 0x51b   : >> { %v6110_v40 = vadd.f32 %v6109_v51, %v6071_v9  ;;  %v6073_v26 = vpop.f32.mrf.mxu1  ;;  %v10894_v9 = vld [vmem:[%s15132_s6 + $0x3c] sm:$0xf] }
 0x51c   : >> { %v6074_v15 = vadd.f32 %v6073_v26, %v6034_v44 }
 0x51d   : >> { %v6132_v13 = vrot.slane %v6110_v40, 1  ;;  %6644 = vmatmul.bf16.gmra.mxu3 %v15166_v23  ;;  %6693 = vmatmul.bf16.gmra.mxu0 %v15200_v8 }
 0x51e   : >> { %6394 = vmatmul.bf16.gmra.mxu1 %v15224_v61  ;;  %7738 = vmatpush.bf16.msra.mxu0 %v12098_v36  ;;  %v10890_v36 = vld [vmem:[%s15132_s6 + $0x2c] sm:$0xf] }
 0x51f   : >> { %6625 = vmatmul.bf16.gmra.mxu2 %v15196_v17  ;;  %v15274_v38 = vsel %vm605_vm0, %v6131_v46, %v6132_v13  ;;  %v12053_v46 = vld [vmem:[#allocation11 + $0x2d0] sm:$0xff]  ;;  %v15316_v13 = vor.u32 %v12020_v7, %v10896_v59 }
 0x520   : >> { %v15276_v62 = vpop.f32.mrf.mxu3  ;;  %v10920_v7 = vld [vmem:[%s15132_s6 + $0x78] sm:$0xf0] }
 0x522   : >> { %v6112_v23 = vpop.f32.mrf.mxu2  ;;  %v15278_v17 = vpop.f32.mrf.mxu0 }
 0x523   : >> { %v6113_v8 = vadd.f32 %v6112_v23, %v6074_v15  ;;  %v6075_v30 = vpop.f32.mrf.mxu1  ;;  %v12070_v23 = vld [vmem:[#allocation11 + $0x358] sm:$0xff] }
 0x524   : >> { %v6076_v37 = vadd.f32 %v6075_v30, %v6036_v6  ;;  %v12054_v6 = vld [vmem:[#allocation11 + $0x2d8] sm:$0xff]  ;;  %7404 = vmatpush.bf16.msrb.mxu1 %v12070_v23 }
 0x525   : >> { %v6133_v57 = vrot.slane %v6113_v8, 1  ;;  %7129 = vmatpush.bf16.msrb.mxu3 %v12054_v6 }
 0x528   : >> { %v15284_v21 = vpop.f32.mrf.mxu3 }
 0x529   : >> { %7130 = vmatpush.bf16.msrb.mxu3 %v12053_v46  ;;  %v10918_v46 = vld [vmem:[%s15132_s6 + $0x6c] sm:$0xf] }
 0x52a   : >> { %v6114_v44 = vpop.f32.mrf.mxu2  ;;  %v15286_v25 = vpop.f32.mrf.mxu0 }
 0x52b   : >> { %v6115_v49 = vadd.f32 %v6114_v44, %v6076_v37  ;;  %v6078_v42 = vpop.f32.mrf.mxu1  ;;  %v12052_v37 = vld [vmem:[#allocation11 + $0x2c8] sm:$0xff] }
 0x52c   : >> { %v6079_v24 = vadd.f32 %v6078_v42, %v6039_v39  ;;  %v12077_v42 = vld [vmem:[#allocation11 + $0x390] sm:$0xff] }
 0x52d   : >> { %v6134_v63 = vrot.slane %v6115_v49, 1  ;;  %6649 = vmatmul.bf16.gmra.mxu3 %v15182_v33  ;;  %6698 = vmatmul.bf16.gmra.mxu0 %v15212_v56  ;;  %v12079_v33 = vld [vmem:[#allocation11 + $0x3a0] sm:$0xff] }
 0x52e   : >> { %7063 = vmatmul.bf16.vlgmr.msra.gmra.mxu1 %v15288_v3  ;;  %7442 = vmatpush.bf16.msrb.mxu2 %v12079_v33  ;;  %v12097_v33 = vld [vmem:[#allocation11 + $0x430] sm:$0xff] }
 0x52f   : >> { %7098 = vmatmul.bf16.vlgmr.msra.gmra.mxu2 %v15290_v12  ;;  %v15298_v48 = vsel %vm605_vm0, %v6133_v57, %v6134_v63  ;;  %7131 = vmatpush.bf16.msrb.mxu3 %v12052_v37  ;;  %v12051_v57 = vld [vmem:[#allocation11 + $0x2c0] sm:$0xff]  ;;  %v10930_v37 = vld [vmem:[%s15132_s6 + $0x84] sm:$0xf] }
 0x530   : >> { %v6303_v2 = vpop.f32.mrf.mxu3  ;;  %7739 = vmatpush.bf16.msra.mxu0 %v12097_v33  ;;  %v12106_v33 = vld [vmem:[#allocation11 + $0x478] sm:$0xff] }
 0x531   : >> { %v6304_v19 = vadd.f32 %v6303_v2, %v15248_v50 }
 0x532   : >> { %v6117_v0 = vpop.f32.mrf.mxu2  ;;  %v6349_v16 = vpop.f32.mrf.mxu0 }
 0x533   : >> { %v6118_v56 = vadd.f32 %v6117_v0, %v6079_v24  ;;  %v6080_v39 = vpop.f32.mrf.mxu1  ;;  %v6339_v55 = vadd.f32 %v15254_v27, %v6304_v19  ;;  %v15336_v24 = vor.u32 %v12024_v29, %v10906_v41  ;;  %7132 = vmatpush.bf16.msrb.mxu3 %v12051_v57  ;;  %v12019_v41 = vld [vmem:[%s15132_s6 + $0x34] sm:$0xf0]  ;;  %v12029_v29 = vld [vmem:[%s15132_s6 + $0x88] sm:$0xf] }
 0x534   : >> { %v6081_v35 = vadd.f32 %v6080_v39, %v15266_v20  ;;  %v15314_v20 = vor.u32 %v12021_v11, %v10894_v9  ;;  %v12027_v9 = vld [vmem:[%s15132_s6 + $0x74] sm:$0xf0]  ;;  %v12026_v11 = vld [vmem:[%s15132_s6 + $0x70] sm:$0xf]  ;;  %v15396_v57 = vor.u32 %v12029_v29, %v10932_v10  ;;  %v10914_v10 = vld [vmem:[%s15132_s6 + $0x5c] sm:$0xf] }
 0x535   : >> { %v6135_v47 = vrot.slane %v6118_v56, 1  ;;  %v12092_v29 = vld [vmem:[#allocation11 + $0x408] sm:$0xff] }
 0x537   : >> { %v15306_v50 = vsel %vm605_vm0, %v6134_v63, %v6135_v47 }
 0x538   : >> { %v6305_v51 = vpop.f32.mrf.mxu3 }
 0x539   : >> { %v6306_v27 = vadd.f32 %v6305_v51, %v15252_v34  ;;  %v12078_v34 = vld [vmem:[#allocation11 + $0x398] sm:$0xff] }
 0x53a   : >> { %v6119_v40 = vpop.f32.mrf.mxu2  ;;  %v15312_v26 = vpop.f32.mrf.mxu0  ;;  %7443 = vmatpush.bf16.msrb.mxu2 %v12078_v34 }
 0x53b   : >> { %v6120_v60 = vadd.f32 %v6119_v40, %v6081_v35  ;;  %v6083_v15 = vpop.f32.mrf.mxu1  ;;  %v6341_v53 = vadd.f32 %v15260_v4, %v6306_v27  ;;  %v12076_v35 = vld [vmem:[#allocation11 + $0x388] sm:$0xff]  ;;  %v15367_v27 = vor.u32 %v12027_v9, %v10918_v46  ;;  %v12033_v46 = vld [vmem:[%s15132_s6 + $0xa4] sm:$0xf0]  ;;  %v12032_v9 = vld [vmem:[%s15132_s6 + $0xa0] sm:$0xf] }
 0x53c   : >> { %v6084_v45 = vadd.f32 %v6083_v15, %v15276_v62  ;;  %v12068_v40 = vld [vmem:[#allocation11 + $0x348] sm:$0xff] }
 0x53d   : >> { %6654 = vmatmul.bf16.gmra.mxu3 %v15198_v22  ;;  %6703 = vmatmul.bf16.gmra.mxu0 %v15224_v61  ;;  %v6136_v22 = vrot.slane %v6120_v60, 1  ;;  %v15369_v60 = vor.u32 %v12026_v11, %v10920_v7  ;;  %v10944_v11 = vld [vmem:[%s15132_s6 + $0xa8] sm:$0xf0] }
 0x53e   : >> { %7068 = vmatmul.bf16.gmra.mxu1 %v15314_v20  ;;  %7444 = vmatpush.bf16.msrb.mxu2 %v12077_v42 }
 0x53f   : >> { %7103 = vmatmul.bf16.gmra.mxu2 %v15316_v13 }
 0x540   : >> { %v6308_v31 = vpop.f32.mrf.mxu3 }
 0x542   : >> { %v6122_v14 = vpop.f32.mrf.mxu2  ;;  %v15324_v8 = vpop.f32.mrf.mxu0  ;;  %7445 = vmatpush.bf16.msrb.mxu2 %v12076_v35  ;;  %v12022_v35 = vld [vmem:[%s15132_s6 + $0x4c] sm:$0xf0] }
 0x543   : >> { %v6123_v4 = vadd.f32 %v6122_v14, %v6084_v45  ;;  %v6085_v62 = vpop.f32.mrf.mxu1  ;;  %v12075_v14 = vld [vmem:[#allocation11 + $0x380] sm:$0xff] }
 0x544   : >> { %v6086_v30 = vadd.f32 %v6085_v62, %v15284_v21 }
 0x545   : >> { %v6137_v61 = vrot.slane %v6123_v4, 1 }
 0x546   : >> { %7446 = vmatpush.bf16.msrb.mxu2 %v12075_v14 }
 0x547   : >> { %v15330_v5 = vsel %vm605_vm0, %v6136_v22, %v6137_v61  ;;  %v12067_v22 = vld [vmem:[#allocation11 + $0x340] sm:$0xff] }
 0x548   : >> { %v6309_v44 = vpop.f32.mrf.mxu3 }
 0x549   : >> { %v6310_v49 = vadd.f32 %v6309_v44, %v15264_v28  ;;  %v12069_v28 = vld [vmem:[#allocation11 + $0x350] sm:$0xff] }
 0x54a   : >> { %v6124_v43 = vpop.f32.mrf.mxu2  ;;  %v6356_v21 = vpop.f32.mrf.mxu0  ;;  %7405 = vmatpush.bf16.msrb.mxu1 %v12069_v28 }
 0x54b   : >> { %v6125_v63 = vadd.f32 %v6124_v43, %v6086_v30  ;;  %v6373_v6 = vpop.f32.mrf.mxu1  ;;  %v6345_v2 = vadd.f32 %v15278_v17, %v6310_v49  ;;  %v12095_v30 = vld [vmem:[#allocation11 + $0x420] sm:$0xff] }
 0x54c   : >> { %v15341_v19 = vadd.f32 %v6373_v6, %v6339_v55 }
 0x54d   : >> { %v6138_v0 = vrot.slane %v6125_v63, 1  ;;  %6659 = vmatmul.bf16.gmra.mxu3 %v15210_v32  ;;  %7369 = vmatmul.bf16.vlgmr.msrb.gmra.mxu0 %v15288_v3 }
 0x54e   : >> { %7072 = vmatmul.bf16.gmra.mxu1 %v15336_v24 }
 0x54f   : >> { %7107 = vmatmul.bf16.gmra.mxu2 %v15338_v52  ;;  %v15349_v17 = vsel %vm605_vm0, %v6137_v61, %v6138_v0  ;;  %7406 = vmatpush.bf16.msrb.mxu1 %v12068_v40  ;;  %v12089_v61 = vld [vmem:[#allocation11 + $0x3f0] sm:$0xff] }
 0x550   : >> { %v6312_v56 = vpop.f32.mrf.mxu3 }
 0x551   : >> { %v6313_v32 = vadd.f32 %v6312_v56, %v15274_v38  ;;  %v12088_v56 = vld [vmem:[#allocation11 + $0x3e8] sm:$0xff] }
 0x552   : >> { %v15352_v16 = vpop.f32.mrf.mxu2  ;;  %v15354_v39 = vpop.f32.mrf.mxu0 }
 0x553   : >> { %v6375_v55 = vpop.f32.mrf.mxu1  ;;  %v6348_v47 = vadd.f32 %v15286_v25, %v6313_v32  ;;  %v12090_v25 = vld [vmem:[#allocation11 + $0x3f8] sm:$0xff]  ;;  %7407 = vmatpush.bf16.msrb.mxu1 %v12067_v22  ;;  %v12087_v22 = vld [vmem:[#allocation11 + $0x3e0] sm:$0xff] }
 0x554   : >> { %v15357_v18 = vadd.f32 %v6375_v55, %v6341_v53  ;;  %v12096_v53 = vld [vmem:[#allocation11 + $0x428] sm:$0xff]  ;;  %7699 = vmatpush.bf16.msra.mxu3 %v12090_v25  ;;  %v12094_v32 = vld [vmem:[#allocation11 + $0x418] sm:$0xff]  ;;  %v10942_v55 = vld [vmem:[%s15132_s6 + $0x9c] sm:$0xf] }
 0x555   : >> { %7740 = vmatpush.bf16.msra.mxu0 %v12096_v53  ;;  %v15422_v53 = vor.u32 %v12033_v46, %v10942_v55 }
 0x557   : >> { %7777 = vmatpush.bf16.msra.mxu1 %v12106_v33 }
 0x558   : >> { %v6314_v59 = vpop.f32.mrf.mxu3  ;;  %7700 = vmatpush.bf16.msra.mxu3 %v12089_v61  ;;  %v12093_v61 = vld [vmem:[#allocation11 + $0x410] sm:$0xff] }
 0x559   : >> { %7741 = vmatpush.bf16.msra.mxu0 %v12095_v30 }
 0x55a   : >> { %v15363_v51 = vpop.f32.mrf.mxu2  ;;  %v15365_v38 = vpop.f32.mrf.mxu0 }
 0x55b   : >> { %v6378_v15 = vpop.f32.mrf.mxu1 }
 0x55c   : >> { %7701 = vmatpush.bf16.msra.mxu3 %v12088_v56 }
 0x55d   : >> { %6664 = vmatmul.bf16.gmra.mxu3 %v15222_v58  ;;  %7374 = vmatmul.bf16.gmra.mxu0 %v15314_v20 }
 0x55e   : >> { %7076 = vmatmul.bf16.gmra.mxu1 %v15367_v27  ;;  %7742 = vmatpush.bf16.msra.mxu0 %v12094_v32 }
 0x55f   : >> { %7111 = vmatmul.bf16.gmra.mxu2 %v15369_v60 }
 0x560   : >> { %v6316_v45 = vpop.f32.mrf.mxu3  ;;  %7702 = vmatpush.bf16.msra.mxu3 %v12087_v22 }
 0x561   : >> { %v6317_v34 = vadd.f32 %v6316_v45, %v15298_v48  ;;  %v12030_v48 = vld [vmem:[%s15132_s6 + $0x8c] sm:$0xf0]  ;;  %v15424_v45 = vor.u32 %v12032_v9, %v10944_v11  ;;  %v10926_v11 = vld [vmem:[%s15132_s6 + $0x74] sm:$0xf] }
 0x562   : >> { %v15376_v31 = vpop.f32.mrf.mxu2  ;;  %v6362_v58 = vpop.f32.mrf.mxu0  ;;  %v15394_v42 = vor.u32 %v12030_v48, %v10930_v37  ;;  %7743 = vmatpush.bf16.msra.mxu0 %v12093_v61 }
 0x563   : >> { %v6379_v23 = vpop.f32.mrf.mxu1  ;;  %v6352_v4 = vadd.f32 %v15312_v26, %v6317_v34  ;;  %v15390_v26 = vor.u32 %v12019_v41, %v10890_v36 }
 0x564   : >> { %v15379_v62 = vadd.f32 %v6379_v23, %v6345_v2  ;;  %v12105_v23 = vld [vmem:[#allocation11 + $0x470] sm:$0xff] }
 0x565   : >> { %7778 = vmatpush.bf16.msra.mxu1 %v12105_v23 }
 0x566   : >> { %7744 = vmatpush.bf16.msra.mxu0 %v12092_v29 }
 0x568   : >> { %v6318_v1 = vpop.f32.mrf.mxu3 }
 0x569   : >> { %v6319_v44 = vadd.f32 %v6318_v1, %v15306_v50  ;;  %v12132_v50 = vld [vmem:[#allocation11 + $0x4b8] sm:$0xff]  ;;  %v12025_v1 = vld [vmem:[%s15132_s6 + $0x64] sm:$0xf0] }
 0x56a   : >> { %v15388_v43 = vpop.f32.mrf.mxu2  ;;  %v15392_v49 = vpop.f32.mrf.mxu0  ;;  %8161 = vmatpush.bf16.msra.mxu2 %v12132_v50 }
 0x56b   : >> { %v6382_v63 = vpop.f32.mrf.mxu1  ;;  %v6354_v21 = vadd.f32 %v15324_v8, %v6319_v44  ;;  %v12130_v44 = vld [vmem:[#allocation11 + $0x4a8] sm:$0xff] }
 0x56c   : >> { %v15399_v6 = vadd.f32 %v6382_v63, %v6348_v47  ;;  %v10902_v47 = vld [vmem:[%s15132_s6 + $0x44] sm:$0xf] }
 0x56d   : >> { %7133 = vmatmul.bf16.vlgmr.msrb.gmra.mxu3 %v15390_v26  ;;  %7379 = vmatmul.bf16.gmra.mxu0 %v15336_v24  ;;  %v15418_v15 = vor.u32 %v12022_v35, %v10902_v47 }
 0x56e   : >> { %7081 = vmatmul.bf16.gmra.mxu1 %v15394_v42 }
 0x56f   : >> { %7116 = vmatmul.bf16.gmra.mxu2 %v15396_v57 }
 0x570   : >> { %v6321_v2 = vpop.f32.mrf.mxu3 }
 0x571   : >> { %v15445_v2 = vor.u32 %v12025_v1, %v10914_v10 }
 0x572   : >> { %v15405_v0 = vpop.f32.mrf.mxu2  ;;  %v15407_v8 = vpop.f32.mrf.mxu0 }
 0x573   : >> { %v6384_v28 = vpop.f32.mrf.mxu1 }
 0x578   : >> { %v6322_v7 = vpop.f32.mrf.mxu3 }
 0x579   : >> { %v6323_v59 = vadd.f32 %v6322_v7, %v15330_v5  ;;  %v12131_v5 = vld [vmem:[#allocation11 + $0x4b0] sm:$0xff]  ;;  %v12028_v7 = vld [vmem:[%s15132_s6 + $0x7c] sm:$0xf0] }
 0x57a   : >> { %v15416_v40 = vpop.f32.mrf.mxu2  ;;  %v15420_v25 = vpop.f32.mrf.mxu0  ;;  %8162 = vmatpush.bf16.msra.mxu2 %v12131_v5  ;;  %v12085_v5 = vld [vmem:[#allocation11 + $0x3d0] sm:$0xff] }
 0x57b   : >> { %v6386_v34 = vpop.f32.mrf.mxu1  ;;  %v6358_v14 = vadd.f32 %v15354_v39, %v6323_v59  ;;  %v12129_v59 = vld [vmem:[#allocation11 + $0x4a0] sm:$0xff] }
 0x57c   : >> { %v15427_v58 = vadd.f32 %v6386_v34, %v6352_v4  ;;  %v12103_v34 = vld [vmem:[#allocation11 + $0x460] sm:$0xff] }
 0x57d   : >> { %7138 = vmatmul.bf16.gmra.mxu3 %v15418_v15  ;;  %7384 = vmatmul.bf16.gmra.mxu0 %v15367_v27 }
 0x57e   : >> { %7085 = vmatmul.bf16.gmra.mxu1 %v15422_v53  ;;  %8163 = vmatpush.bf16.msra.mxu2 %v12130_v44 }
 0x57f   : >> { %7120 = vmatmul.bf16.gmra.mxu2 %v15424_v45 }
 0x580   : >> { %v6325_v30 = vpop.f32.mrf.mxu3 }
 0x581   : >> { %v6326_v39 = vadd.f32 %v6325_v30, %v15349_v17  ;;  %v12091_v17 = vld [vmem:[#allocation11 + $0x400] sm:$0xff]  ;;  %v15466_v30 = vor.u32 %v12028_v7, %v10926_v11 }
 0x582   : >> { %v15434_v4 = vpop.f32.mrf.mxu2  ;;  %v15436_v37 = vpop.f32.mrf.mxu0  ;;  %7745 = vmatpush.bf16.msra.mxu0 %v12091_v17  ;;  %8164 = vmatpush.bf16.msra.mxu2 %v12129_v59 }
 0x583   : >> { %v6388_v36 = vpop.f32.mrf.mxu1  ;;  %v6361_v41 = vadd.f32 %v15365_v38, %v6326_v39  ;;  %v12104_v38 = vld [vmem:[#allocation11 + $0x468] sm:$0xff] }
 0x584   : >> { %v15439_v48 = vadd.f32 %v6388_v36, %v6354_v21  ;;  %v12086_v21 = vld [vmem:[#allocation11 + $0x3d8] sm:$0xff]  ;;  %7779 = vmatpush.bf16.msra.mxu1 %v12104_v38 }
 0x585   : >> { %7703 = vmatpush.bf16.msra.mxu3 %v12086_v21  ;;  %v12102_v21 = vld [vmem:[#allocation11 + $0x458] sm:$0xff] }
 0x588   : >> { %v6327_v63 = vpop.f32.mrf.mxu3  ;;  %7780 = vmatpush.bf16.msra.mxu1 %v12103_v34  ;;  %v12083_v34 = vld [vmem:[#allocation11 + $0x3c0] sm:$0xff] }
 0x589   : >> { %7704 = vmatpush.bf16.msra.mxu3 %v12085_v5 }
 0x58a   : >> { %v15443_v50 = vpop.f32.mrf.mxu2  ;;  %v15447_v28 = vpop.f32.mrf.mxu0 }
 0x58b   : >> { %v6391_v33 = vpop.f32.mrf.mxu1 }
 0x58c   : >> { %7781 = vmatpush.bf16.msra.mxu1 %v12102_v21  ;;  %v12126_v21 = vld [vmem:[#allocation11 + $0x488] sm:$0xff] }
 0x58d   : >> { %7142 = vmatmul.bf16.gmra.mxu3 %v15445_v2  ;;  %7389 = vmatmul.bf16.gmra.mxu0 %v15394_v42 }
 0x58e   : >> { %7408 = vmatmul.bf16.vlgmr.msrb.gmra.mxu1 %v15290_v12 }
 0x58f   : >> { %7447 = vmatmul.bf16.vlgmr.msrb.gmra.mxu2 %v15390_v26 }
 0x590   : >> { %v6640_v56 = vpop.f32.mrf.mxu3 }
 0x591   : >> { %v6641_v55 = vadd.f32 %v6640_v56, %v15352_v16  ;;  %v12084_v56 = vld [vmem:[#allocation11 + $0x3c8] sm:$0xff] }
 0x592   : >> { %v15453_v32 = vpop.f32.mrf.mxu2  ;;  %v15456_v47 = vpop.f32.mrf.mxu0  ;;  %7705 = vmatpush.bf16.msra.mxu3 %v12084_v56 }
 0x593   : >> { %v6680_v35 = vadd.f32 %v15392_v49, %v6641_v55  ;;  %v6392_v46 = vpop.f32.mrf.mxu1  ;;  %v12148_v55 = vld [vmem:[#allocation11 + $0x538] sm:$0xff] }
 0x594   : >> { %v15459_v9 = vadd.f32 %v6392_v46, %v6358_v14  ;;  %v12031_v46 = vld [vmem:[%s15132_s6 + $0x94] sm:$0xf0]  ;;  %8231 = vmatpush.bf16.msrb.mxu0 %v12148_v55 }
 0x595   : >> { %v6709_v36 = vrot.slane %v6680_v35, 2  ;;  %v10938_v35 = vld [vmem:[%s15132_s6 + $0x8c] sm:$0xf] }
 0x596   : >> { %v15498_v59 = vor.u32 %v12031_v46, %v10938_v35  ;;  %7706 = vmatpush.bf16.msra.mxu3 %v12083_v34 }
 0x598   : >> { %v6642_v23 = vpop.f32.mrf.mxu3 }
 0x599   : >> { %v6643_v61 = vadd.f32 %v6642_v23, %v15363_v51  ;;  %v12128_v51 = vld [vmem:[#allocation11 + $0x498] sm:$0xff] }
 0x59a   : >> { %v15463_v22 = vpop.f32.mrf.mxu2  ;;  %v15468_v16 = vpop.f32.mrf.mxu0  ;;  %8165 = vmatpush.bf16.msra.mxu2 %v12128_v51 }
 0x59b   : >> { %v6682_v49 = vadd.f32 %v15407_v8, %v6643_v61  ;;  %v6395_v14 = vpop.f32.mrf.mxu1 }
 0x59c   : >> { %v15471_v39 = vadd.f32 %v6395_v14, %v6361_v41 }
 0x59d   : >> { %v6710_v29 = vrot.slane %v6682_v49, 2  ;;  %7146 = vmatmul.bf16.gmra.mxu3 %v15466_v30  ;;  %7394 = vmatmul.bf16.gmra.mxu0 %v15422_v53  ;;  %v12127_v49 = vld [vmem:[#allocation11 + $0x490] sm:$0xff] }
 0x59e   : >> { %7413 = vmatmul.bf16.gmra.mxu1 %v15316_v13  ;;  %8166 = vmatpush.bf16.msra.mxu2 %v12127_v49 }
 0x59f   : >> { %7452 = vmatmul.bf16.gmra.mxu2 %v15418_v15  ;;  %v6729_v10 = vsel %vm1095_vm13, %v6709_v36, %v6710_v29 }
 0x5a0   : >> { %v6645_v8 = vpop.f32.mrf.mxu3  ;;  %v15480_v41 = vadd.f32 %v6729_v10, %v15341_v19 }
 0x5a1   : >> { %v6646_v44 = vadd.f32 %v6645_v8, %v15376_v31 }
 0x5a2   : >> { %v15482_v1 = vpop.f32.mrf.mxu2  ;;  %v15485_v63 = vpop.f32.mrf.mxu0  ;;  %8167 = vmatpush.bf16.msra.mxu2 %v12126_v21 }
 0x5a3   : >> { %v6685_v17 = vadd.f32 %v15420_v25, %v6646_v44  ;;  %v6397_v33 = vpop.f32.mrf.mxu1 }
 0x5a4   : >> { %v12034_v33 = vld [vmem:[%s15132_s6 + $0xac] sm:$0xf0] }
 0x5a5   : >> { %v6711_v38 = vrot.slane %v6685_v17, 2  ;;  %v10950_v17 = vld [vmem:[%s15132_s6 + $0xa4] sm:$0xf] }
 0x5a6   : >> { %v15521_v46 = vor.u32 %v12034_v33, %v10950_v17  ;;  %v12145_v17 = vld [vmem:[#allocation11 + $0x520] sm:$0xff] }
 0x5a7   : >> { %v6728_v11 = vsel %vm1095_vm13, %v6710_v29, %v6711_v38 }
 0x5a8   : >> { %v6647_v19 = vpop.f32.mrf.mxu3  ;;  %v15493_v31 = vadd.f32 %v6728_v11, %v15357_v18  ;;  %v12101_v18 = vld [vmem:[#allocation11 + $0x450] sm:$0xff] }
 0x5a9   : >> { %v6648_v25 = vadd.f32 %v6647_v19, %v15388_v43  ;;  %v12147_v43 = vld [vmem:[#allocation11 + $0x530] sm:$0xff]  ;;  %7782 = vmatpush.bf16.msra.mxu1 %v12101_v18 }
 0x5aa   : >> { %v15495_v7 = vpop.f32.mrf.mxu2  ;;  %v15500_v5 = vpop.f32.mrf.mxu0  ;;  %8232 = vmatpush.bf16.msrb.mxu0 %v12147_v43 }
 0x5ab   : >> { %v6687_v23 = vadd.f32 %v15436_v37, %v6648_v25  ;;  %v7064_v61 = vpop.f32.mrf.mxu1 }
 0x5ad   : >> { %7151 = vmatmul.bf16.gmra.mxu3 %v15498_v59  ;;  %7746 = vmatmul.bf16.vlgmr.msra.gmra.mxu0 %v15290_v12  ;;  %v6712_v8 = vrot.slane %v6687_v23, 2  ;;  %v12140_v23 = vld [vmem:[#allocation11 + $0x4f8] sm:$0xff] }
 0x5ae   : >> { %7418 = vmatmul.bf16.gmra.mxu1 %v15338_v52  ;;  %8196 = vmatpush.bf16.msrb.mxu3 %v12140_v23  ;;  %v12156_v23 = vld [vmem:[#allocation11 + $0x578] sm:$0xff] }
 0x5af   : >> { %7457 = vmatmul.bf16.gmra.mxu2 %v15445_v2 }
 0x5b0   : >> { %v6650_v14 = vpop.f32.mrf.mxu3 }
 0x5b1   : >> { %v6651_v37 = vadd.f32 %v6650_v14, %v15405_v0 }
 0x5b2   : >> { %v7099_v36 = vpop.f32.mrf.mxu2  ;;  %v15510_v51 = vpop.f32.mrf.mxu0 }
 0x5b3   : >> { %v15508_v29 = vadd.f32 %v7099_v36, %v7064_v61  ;;  %v6690_v12 = vadd.f32 %v15447_v28, %v6651_v37  ;;  %v7066_v10 = vpop.f32.mrf.mxu1  ;;  %v12146_v61 = vld [vmem:[#allocation11 + $0x528] sm:$0xff]  ;;  %v12125_v36 = vld [vmem:[#allocation11 + $0x480] sm:$0xff] }
 0x5b4   : >> { %8233 = vmatpush.bf16.msrb.mxu0 %v12146_v61  ;;  %8168 = vmatpush.bf16.msra.mxu2 %v12125_v36  ;;  %v12138_v61 = vld [vmem:[#allocation11 + $0x4e8] sm:$0xff] }
 0x5b5   : >> { %v6713_v44 = vrot.slane %v6690_v12, 2  ;;  %v12099_v12 = vld [vmem:[#allocation11 + $0x440] sm:$0xff] }
 0x5b7   : >> { %v6727_v38 = vsel %vm1095_vm13, %v6712_v8, %v6713_v44 }
 0x5b8   : >> { %v6652_v56 = vpop.f32.mrf.mxu3  ;;  %v15518_v55 = vadd.f32 %v6727_v38, %v15379_v62  ;;  %v12100_v62 = vld [vmem:[#allocation11 + $0x448] sm:$0xff]  ;;  %8234 = vmatpush.bf16.msrb.mxu0 %v12145_v17 }
 0x5b9   : >> { %v6653_v0 = vadd.f32 %v6652_v56, %v15416_v40  ;;  %7783 = vmatpush.bf16.msra.mxu1 %v12100_v62 }
 0x5ba   : >> { %v7101_v35 = vpop.f32.mrf.mxu2  ;;  %v15525_v11 = vpop.f32.mrf.mxu0 }
 0x5bb   : >> { %v15523_v28 = vadd.f32 %v7101_v35, %v7066_v10  ;;  %v6692_v19 = vadd.f32 %v15456_v47, %v6653_v0  ;;  %v7069_v25 = vpop.f32.mrf.mxu1  ;;  %v12139_v10 = vld [vmem:[#allocation11 + $0x4f0] sm:$0xff] }
 0x5bc   : >> { %8197 = vmatpush.bf16.msrb.mxu3 %v12139_v10  ;;  %v12155_v10 = vld [vmem:[#allocation11 + $0x570] sm:$0xff] }
 0x5bd   : >> { %v6714_v34 = vrot.slane %v6692_v19, 2  ;;  %7155 = vmatmul.bf16.gmra.mxu3 %v15521_v46  ;;  %7751 = vmatmul.bf16.gmra.mxu0 %v15316_v13 }
 0x5be   : >> { %7423 = vmatmul.bf16.gmra.mxu1 %v15369_v60 }
 0x5bf   : >> { %7462 = vmatmul.bf16.gmra.mxu2 %v15466_v30  ;;  %v6726_v40 = vsel %vm1095_vm13, %v6713_v44, %v6714_v34  ;;  %7784 = vmatpush.bf16.msra.mxu1 %v12099_v12  ;;  %v12163_v12 = vld [vmem:[#allocation11 + $0x5b0] sm:$0xff] }
 0x5c0   : >> { %v6655_v49 = vpop.f32.mrf.mxu3  ;;  %v15535_v47 = vadd.f32 %v6726_v40, %v15399_v6  ;;  %v12144_v40 = vld [vmem:[#allocation11 + $0x518] sm:$0xff]  ;;  %8198 = vmatpush.bf16.msrb.mxu3 %v12138_v61 }
 0x5c1   : >> { %v6656_v18 = vadd.f32 %v6655_v49, %v15434_v4  ;;  %8235 = vmatpush.bf16.msrb.mxu0 %v12144_v40 }
 0x5c2   : >> { %v7104_v13 = vpop.f32.mrf.mxu2  ;;  %v15538_v43 = vpop.f32.mrf.mxu0 }
 0x5c3   : >> { %v6695_v14 = vadd.f32 %v15468_v16, %v6656_v18  ;;  %v7070_v37 = vpop.f32.mrf.mxu1  ;;  %8467 = vmatpush.bf16.msrb.mxu1 %v12156_v23 }
 0x5c5   : >> { %v6715_v21 = vrot.slane %v6695_v14, 2 }
 0x5c7   : >> { %8468 = vmatpush.bf16.msrb.mxu1 %v12155_v10  ;;  %v12135_v10 = vld [vmem:[#allocation11 + $0x4d0] sm:$0xff] }
 0x5c8   : >> { %v6657_v8 = vpop.f32.mrf.mxu3 }
 0x5c9   : >> { %v6658_v44 = vadd.f32 %v6657_v8, %v15443_v50  ;;  %v12164_v50 = vld [vmem:[#allocation11 + $0x5b8] sm:$0xff]  ;;  %v12143_v8 = vld [vmem:[#allocation11 + $0x510] sm:$0xff] }
 0x5ca   : >> { %v7105_v33 = vpop.f32.mrf.mxu2  ;;  %v15544_v38 = vpop.f32.mrf.mxu0  ;;  %8506 = vmatpush.bf16.msrb.mxu2 %v12164_v50  ;;  %8236 = vmatpush.bf16.msrb.mxu0 %v12143_v8  ;;  %v12111_v8 = vld [vmem:[%s15132_s6 + $0x68] sm:$0xf0] }
 0x5cb   : >> { %v15542_v6 = vadd.f32 %v7105_v33, %v7070_v37  ;;  %v6697_v4 = vadd.f32 %v15485_v63, %v6658_v44  ;;  %v7073_v16 = vpop.f32.mrf.mxu1 }
 0x5cd   : >> { %v6716_v56 = vrot.slane %v6697_v4, 2  ;;  %7707 = vmatmul.bf16.vlgmr.msra.gmra.mxu3 %v15288_v3  ;;  %7756 = vmatmul.bf16.gmra.mxu0 %v15338_v52  ;;  %v12162_v4 = vld [vmem:[#allocation11 + $0x5a8] sm:$0xff] }
 0x5ce   : >> { %7428 = vmatmul.bf16.gmra.mxu1 %v15396_v57  ;;  %8507 = vmatpush.bf16.msrb.mxu2 %v12163_v12  ;;  %v12153_v12 = vld [vmem:[#allocation11 + $0x560] sm:$0xff] }
 0x5cf   : >> { %7467 = vmatmul.bf16.gmra.mxu2 %v15498_v59  ;;  %v6725_v0 = vsel %vm1095_vm13, %v6715_v21, %v6716_v56 }
 0x5d0   : >> { %v6660_v35 = vpop.f32.mrf.mxu3  ;;  %v15554_v19 = vadd.f32 %v6725_v0, %v15427_v58  ;;  %v11268_v0 = vld [vmem:[%s15132_s6 + $0x48] sm:$0xf] }
 0x5d1   : >> { %v6661_v63 = vadd.f32 %v6660_v35, %v15453_v32 }
 0x5d2   : >> { %v7108_v25 = vpop.f32.mrf.mxu2  ;;  %v15559_v3 = vpop.f32.mrf.mxu0  ;;  %8508 = vmatpush.bf16.msrb.mxu2 %v12162_v4 }
 0x5d3   : >> { %v15557_v34 = vadd.f32 %v7108_v25, %v7073_v16  ;;  %v6700_v52 = vadd.f32 %v15500_v5, %v6661_v63  ;;  %v7075_v62 = vpop.f32.mrf.mxu1  ;;  %v12142_v16 = vld [vmem:[#allocation11 + $0x508] sm:$0xff] }
 0x5d4   : >> { %8237 = vmatpush.bf16.msrb.mxu0 %v12142_v16 }
 0x5d5   : >> { %v6717_v49 = vrot.slane %v6700_v52, 2 }
 0x5d7   : >> { %v6724_v58 = vsel %vm1095_vm13, %v6716_v56, %v6717_v49 }
 0x5d8   : >> { %v6662_v18 = vpop.f32.mrf.mxu3  ;;  %v15565_v32 = vadd.f32 %v6724_v58, %v15439_v48  ;;  %v12137_v48 = vld [vmem:[#allocation11 + $0x4e0] sm:$0xff]  ;;  %v12154_v58 = vld [vmem:[#allocation11 + $0x568] sm:$0xff] }
 0x5d9   : >> { %v6663_v13 = vadd.f32 %v6662_v18, %v15463_v22  ;;  %8199 = vmatpush.bf16.msrb.mxu3 %v12137_v48  ;;  %v12136_v18 = vld [vmem:[#allocation11 + $0x4d8] sm:$0xff]  ;;  %8469 = vmatpush.bf16.msrb.mxu1 %v12154_v58 }
 0x5da   : >> { %v7110_v14 = vpop.f32.mrf.mxu2  ;;  %v15568_v37 = vpop.f32.mrf.mxu0  ;;  %v11280_v48 = vld [vmem:[%s15132_s6 + $0x60] sm:$0xf] }
 0x5db   : >> { %v6702_v5 = vadd.f32 %v15510_v51, %v6663_v13  ;;  %v7077_v36 = vpop.f32.mrf.mxu1 }
 0x5dd   : >> { %7712 = vmatmul.bf16.gmra.mxu3 %v15314_v20  ;;  %7761 = vmatmul.bf16.gmra.mxu0 %v15369_v60  ;;  %v6718_v21 = vrot.slane %v6702_v5, 2 }
 0x5de   : >> { %7433 = vmatmul.bf16.gmra.mxu1 %v15424_v45  ;;  %8200 = vmatpush.bf16.msrb.mxu3 %v12136_v18 }
 0x5df   : >> { %7472 = vmatmul.bf16.gmra.mxu2 %v15521_v46  ;;  %8470 = vmatpush.bf16.msrb.mxu1 %v12153_v12 }
 0x5e0   : >> { %v6665_v22 = vpop.f32.mrf.mxu3 }
 0x5e1   : >> { %v6666_v51 = vadd.f32 %v6665_v22, %v15482_v1  ;;  %v12108_v1 = vld [vmem:[%s15132_s6 + $0x50] sm:$0xf0] }
 0x5e2   : >> { %v7112_v17 = vpop.f32.mrf.mxu2  ;;  %v15578_v60 = vpop.f32.mrf.mxu0  ;;  %v15593_v61 = vor.u32 %v12108_v1, %v11268_v0  ;;  %8201 = vmatpush.bf16.msrb.mxu3 %v12135_v10  ;;  %v11292_v0 = vld [vmem:[%s15132_s6 + $0x78] sm:$0xf]  ;;  %v11276_v1 = vld [vmem:[%s15132_s6 + $0x50] sm:$0xf] }
 0x5e3   : >> { %v15576_v20 = vadd.f32 %v7112_v17, %v7077_v36  ;;  %v6705_v44 = vadd.f32 %v15525_v11, %v6666_v51  ;;  %v7079_v33 = vpop.f32.mrf.mxu1  ;;  %v12141_v11 = vld [vmem:[#allocation11 + $0x500] sm:$0xff] }
 0x5e4   : >> { %8238 = vmatpush.bf16.msrb.mxu0 %v12141_v11  ;;  %v12161_v36 = vld [vmem:[#allocation11 + $0x5a0] sm:$0xff] }
 0x5e5   : >> { %v6719_v56 = vrot.slane %v6705_v44, 2  ;;  %8509 = vmatpush.bf16.msrb.mxu2 %v12161_v36 }
 0x5e7   : >> { %v6723_v50 = vsel %vm1095_vm13, %v6718_v21, %v6719_v56 }
 0x5e8   : >> { %v6667_v35 = vpop.f32.mrf.mxu3  ;;  %v15586_v63 = vadd.f32 %v6723_v50, %v15459_v9  ;;  %v12134_v50 = vld [vmem:[#allocation11 + $0x4c8] sm:$0xff] }
 0x5e9   : >> { %v6668_v25 = vadd.f32 %v6667_v35, %v15495_v7  ;;  %v12109_v35 = vld [vmem:[%s15132_s6 + $0x58] sm:$0xf0]  ;;  %8202 = vmatpush.bf16.msrb.mxu3 %v12134_v50 }
 0x5ea   : >> { %v7114_v52 = vpop.f32.mrf.mxu2  ;;  %v15591_v23 = vpop.f32.mrf.mxu0 }
 0x5eb   : >> { %v15589_v62 = vadd.f32 %v7114_v52, %v7079_v33  ;;  %v6707_v40 = vadd.f32 %v15538_v43, %v6668_v25  ;;  %v7082_v49 = vpop.f32.mrf.mxu1  ;;  %v12152_v25 = vld [vmem:[#allocation11 + $0x558] sm:$0xff] }
 0x5ec   : >> { %8471 = vmatpush.bf16.msrb.mxu1 %v12152_v25  ;;  %v12133_v49 = vld [vmem:[#allocation11 + $0x4c0] sm:$0xff]  ;;  %v12172_v25 = vld [vmem:[#allocation11 + $0x5f8] sm:$0xff] }
 0x5ed   : >> { %v6720_v13 = vrot.slane %v6707_v40, 2  ;;  %7717 = vmatmul.bf16.gmra.mxu3 %v15336_v24  ;;  %7766 = vmatmul.bf16.gmra.mxu0 %v15396_v57  ;;  %v15636_v40 = vor.u32 %v12109_v35, %v11276_v1 }
 0x5ee   : >> { %7785 = vmatmul.bf16.vlgmr.msra.gmra.mxu1 %v15390_v26  ;;  %8203 = vmatpush.bf16.msrb.mxu3 %v12133_v49 }
 0x5ef   : >> { %8169 = vmatmul.bf16.vlgmr.msra.gmra.mxu2 %v15593_v61  ;;  %v6722_v9 = vsel %vm1095_vm13, %v6719_v56, %v6720_v13 }
 0x5f0   : >> { %v7134_v7 = vpop.f32.mrf.mxu3  ;;  %v15603_v43 = vadd.f32 %v6722_v9, %v15471_v39 }
 0x5f1   : >> { %v7135_v24 = vadd.f32 %v7134_v7, %v15508_v29 }
 0x5f2   : >> { %v7117_v14 = vpop.f32.mrf.mxu2  ;;  %v15606_v5 = vpop.f32.mrf.mxu0  ;;  %8545 = vmatpush.bf16.msra.mxu3 %v12172_v25 }
 0x5f3   : >> { %v15609_v26 = vadd.f32 %v7135_v24, %v15480_v41  ;;  %v7083_v57 = vpop.f32.mrf.mxu1  ;;  %v15618_v41 = vor.u32 %v12111_v8, %v11280_v48  ;;  %v12159_v14 = vld [vmem:[#allocation11 + $0x590] sm:$0xff]  ;;  %v11288_v48 = vld [vmem:[%s15132_s6 + $0x68] sm:$0xf]  ;;  %v12112_v8 = vld [vmem:[%s15132_s6 + $0x70] sm:$0xf0] }
 0x5f8   : >> { %v7136_v22 = vpop.f32.mrf.mxu3 }
 0x5f9   : >> { %v7137_v51 = vadd.f32 %v7136_v22, %v15523_v28  ;;  %v12160_v28 = vld [vmem:[#allocation11 + $0x598] sm:$0xff]  ;;  %v11304_v22 = vld [vmem:[%s15132_s6 + $0x90] sm:$0xf] }
 0x5fa   : >> { %v7118_v39 = vpop.f32.mrf.mxu2  ;;  %v15616_v29 = vpop.f32.mrf.mxu0  ;;  %8510 = vmatpush.bf16.msrb.mxu2 %v12160_v28 }
 0x5fb   : >> { %v15614_v17 = vadd.f32 %v7118_v39, %v7083_v57  ;;  %v15621_v44 = vadd.f32 %v7137_v51, %v15493_v31  ;;  %v7086_v33 = vpop.f32.mrf.mxu1  ;;  %v12117_v39 = vld [vmem:[%s15132_s6 + $0x98] sm:$0xf0]  ;;  %v12158_v51 = vld [vmem:[#allocation11 + $0x588] sm:$0xff] }
 0x5fd   : >> { %7722 = vmatmul.bf16.gmra.mxu3 %v15367_v27  ;;  %7771 = vmatmul.bf16.gmra.mxu0 %v15424_v45  ;;  %v12114_v27 = vld [vmem:[%s15132_s6 + $0x80] sm:$0xf0] }
 0x5fe   : >> { %7790 = vmatmul.bf16.gmra.mxu1 %v15418_v15  ;;  %v12180_v45 = vld [vmem:[#allocation11 + $0x638] sm:$0xff]  ;;  %v15640_v18 = vor.u32 %v12114_v27, %v11292_v0  ;;  %8511 = vmatpush.bf16.msrb.mxu2 %v12159_v14  ;;  %v12150_v27 = vld [vmem:[#allocation11 + $0x548] sm:$0xff]  ;;  %v12171_v14 = vld [vmem:[#allocation11 + $0x5f0] sm:$0xff] }
 0x5ff   : >> { %8174 = vmatmul.bf16.gmra.mxu2 %v15618_v41  ;;  %8805 = vmatpush.bf16.msra.mxu0 %v12180_v45  ;;  %v12178_v45 = vld [vmem:[#allocation11 + $0x628] sm:$0xff] }
 0x600   : >> { %v7139_v4 = vpop.f32.mrf.mxu3  ;;  %8546 = vmatpush.bf16.msra.mxu3 %v12171_v14 }
 0x601   : >> { %v15661_v4 = vor.u32 %v12112_v8, %v11288_v48 }
 0x602   : >> { %v7121_v16 = vpop.f32.mrf.mxu2  ;;  %v15629_v56 = vpop.f32.mrf.mxu0  ;;  %8512 = vmatpush.bf16.msrb.mxu2 %v12158_v51 }
 0x603   : >> { %v15627_v21 = vadd.f32 %v7121_v16, %v7086_v33  ;;  %v7088_v31 = vpop.f32.mrf.mxu1 }
 0x604   : >> { %v15665_v31 = vor.u32 %v12117_v39, %v11304_v22 }
 0x608   : >> { %v7140_v15 = vpop.f32.mrf.mxu3 }
 0x609   : >> { %v7141_v11 = vadd.f32 %v7140_v15, %v15542_v6  ;;  %v12151_v6 = vld [vmem:[#allocation11 + $0x550] sm:$0xff] }
 0x60a   : >> { %v7123_v52 = vpop.f32.mrf.mxu2  ;;  %v15638_v58 = vpop.f32.mrf.mxu0  ;;  %8472 = vmatpush.bf16.msrb.mxu1 %v12151_v6  ;;  %v12107_v6 = vld [vmem:[%s15132_s6 + $0x4c] sm:$0xf] }
 0x60b   : >> { %v15643_v13 = vadd.f32 %v7141_v11, %v15518_v55  ;;  %v7409_v9 = vpop.f32.mrf.mxu1  ;;  %v12179_v55 = vld [vmem:[#allocation11 + $0x630] sm:$0xff] }
 0x60c   : >> { %v7410_v7 = vadd.f32 %v7409_v9, %v15544_v38  ;;  %8806 = vmatpush.bf16.msra.mxu0 %v12179_v55  ;;  %v12177_v55 = vld [vmem:[#allocation11 + $0x620] sm:$0xff] }
 0x60d   : >> { %7727 = vmatmul.bf16.gmra.mxu3 %v15394_v42  ;;  %8239 = vmatmul.bf16.vlgmr.msrb.gmra.mxu0 %v15636_v40 }
 0x60e   : >> { %7795 = vmatmul.bf16.gmra.mxu1 %v15445_v2 }
 0x60f   : >> { %8178 = vmatmul.bf16.gmra.mxu2 %v15640_v18  ;;  %8473 = vmatpush.bf16.msrb.mxu1 %v12150_v27 }
 0x610   : >> { %v7143_v24 = vpop.f32.mrf.mxu3  ;;  %8807 = vmatpush.bf16.msra.mxu0 %v12178_v45  ;;  %v12123_v45 = vld [vmem:[%s15132_s6 + $0xc8] sm:$0xf0] }
 0x611   : >> { %v7144_v38 = vadd.f32 %v7143_v24, %v15557_v34 }
 0x612   : >> { %v7448_v57 = vpop.f32.mrf.mxu2  ;;  %v15651_v36 = vpop.f32.mrf.mxu0 }
 0x613   : >> { %v7449_v42 = vadd.f32 %v7448_v57, %v7410_v7  ;;  %v15654_v12 = vadd.f32 %v7144_v38, %v15535_v47  ;;  %v7411_v2 = vpop.f32.mrf.mxu1  ;;  %v12149_v7 = vld [vmem:[#allocation11 + $0x540] sm:$0xff]  ;;  %v11270_v38 = vld [vmem:[%s15132_s6 + $0x54] sm:$0xf0]  ;;  %v11300_v57 = vld [vmem:[%s15132_s6 + $0x80] sm:$0xf] }
 0x614   : >> { %v7412_v10 = vadd.f32 %v7411_v2, %v15559_v3  ;;  %8474 = vmatpush.bf16.msrb.mxu1 %v12149_v7  ;;  %v11316_v2 = vld [vmem:[%s15132_s6 + $0xa8] sm:$0xf]  ;;  %8808 = vmatpush.bf16.msra.mxu0 %v12177_v55  ;;  %v15696_v22 = vor.u32 %v12107_v6, %v11270_v38  ;;  %v12176_v7 = vld [vmem:[#allocation11 + $0x618] sm:$0xff] }
 0x615   : >> { %v7478_v50 = vrot.slane %v7449_v42, 1  ;;  %v12115_v42 = vld [vmem:[%s15132_s6 + $0x88] sm:$0xf0] }
 0x616   : >> { %v15698_v39 = vor.u32 %v12115_v42, %v11300_v57 }
 0x618   : >> { %v7145_v33 = vpop.f32.mrf.mxu3  ;;  %8809 = vmatpush.bf16.msra.mxu0 %v12176_v7 }
 0x61a   : >> { %v7450_v28 = vpop.f32.mrf.mxu2  ;;  %v15663_v16 = vpop.f32.mrf.mxu0 }
 0x61b   : >> { %v7451_v34 = vadd.f32 %v7450_v28, %v7412_v10  ;;  %v7414_v47 = vpop.f32.mrf.mxu1  ;;  %v12120_v10 = vld [vmem:[%s15132_s6 + $0xb0] sm:$0xf0] }
 0x61c   : >> { %v7415_v3 = vadd.f32 %v7414_v47, %v15568_v37  ;;  %v15702_v28 = vor.u32 %v12120_v10, %v11316_v2 }
 0x61d   : >> { %v7479_v0 = vrot.slane %v7451_v34, 1  ;;  %7732 = vmatmul.bf16.gmra.mxu3 %v15422_v53  ;;  %8244 = vmatmul.bf16.gmra.mxu0 %v15661_v4 }
 0x61e   : >> { %7800 = vmatmul.bf16.gmra.mxu1 %v15466_v30 }
 0x61f   : >> { %v7497_v1 = vsel %vm605_vm0, %v7478_v50, %v7479_v0  ;;  %8182 = vmatmul.bf16.gmra.mxu2 %v15665_v31 }
 0x620   : >> { %v15675_v35 = vadd.f32 %v7497_v1, %v15609_v26  ;;  %v7147_v15 = vpop.f32.mrf.mxu3 }
 0x621   : >> { %v7148_v37 = vadd.f32 %v7147_v15, %v15576_v20  ;;  %v12157_v20 = vld [vmem:[#allocation11 + $0x580] sm:$0xff]  ;;  %v12110_v15 = vld [vmem:[%s15132_s6 + $0x64] sm:$0xf] }
 0x622   : >> { %v7453_v53 = vpop.f32.mrf.mxu2  ;;  %v15678_v30 = vpop.f32.mrf.mxu0  ;;  %8513 = vmatpush.bf16.msrb.mxu2 %v12157_v20  ;;  %v12170_v20 = vld [vmem:[#allocation11 + $0x5e8] sm:$0xff] }
 0x623   : >> { %v7454_v52 = vadd.f32 %v7453_v53, %v7415_v3  ;;  %v15681_v26 = vadd.f32 %v7148_v37, %v15554_v19  ;;  %v7416_v11 = vpop.f32.mrf.mxu1  ;;  %v11282_v53 = vld [vmem:[%s15132_s6 + $0x6c] sm:$0xf0]  ;;  %8547 = vmatpush.bf16.msra.mxu3 %v12170_v20 }
 0x624   : >> { %v7417_v9 = vadd.f32 %v7416_v11, %v15578_v60  ;;  %v12118_v11 = vld [vmem:[%s15132_s6 + $0xa0] sm:$0xf0] }
 0x625   : >> { %v7480_v49 = vrot.slane %v7454_v52, 1  ;;  %v11312_v52 = vld [vmem:[%s15132_s6 + $0x98] sm:$0xf] }
 0x627   : >> { %v7496_v24 = vsel %vm605_vm0, %v7479_v0, %v7480_v49 }
 0x628   : >> { %v15691_v19 = vadd.f32 %v7496_v24, %v15621_v44  ;;  %v7149_v60 = vpop.f32.mrf.mxu3  ;;  %v15732_v24 = vor.u32 %v12118_v11, %v11312_v52 }
 0x629   : >> { %v7150_v48 = vadd.f32 %v7149_v60, %v15589_v62  ;;  %v15712_v62 = vld [vmem:[#allocation11 + $0x6b8] sm:$0xff]  ;;  %v15742_v60 = vld [vmem:[#allocation11 + $0x6b0] sm:$0xff] }
 0x62a   : >> { %v7455_v8 = vpop.f32.mrf.mxu2  ;;  %v15700_v33 = vpop.f32.mrf.mxu0  ;;  %12239 = vmatpush.bf16.msra.mxu2 %v15712_v62 }
 0x62b   : >> { %v7456_v51 = vadd.f32 %v7455_v8, %v7417_v9  ;;  %v15705_v44 = vadd.f32 %v7150_v48, %v15565_v32  ;;  %v7419_v34 = vpop.f32.mrf.mxu1  ;;  %v12188_v9 = vld [vmem:[#allocation11 + $0x678] sm:$0xff]  ;;  %v12187_v8 = vld [vmem:[#allocation11 + $0x670] sm:$0xff] }
 0x62c   : >> { %v7420_v47 = vadd.f32 %v7419_v34, %v15591_v23  ;;  %12231 = vmatpush.bf16.msra.mxu1 %v12188_v9 }
 0x62d   : >> { %8204 = vmatmul.bf16.vlgmr.msrb.gmra.mxu3 %v15696_v22  ;;  %8248 = vmatmul.bf16.gmra.mxu0 %v15698_v39  ;;  %v7481_v1 = vrot.slane %v7456_v51, 1  ;;  %v12175_v51 = vld [vmem:[#allocation11 + $0x610] sm:$0xff] }
 0x62e   : >> { %7805 = vmatmul.bf16.gmra.mxu1 %v15498_v59  ;;  %v11328_v59 = vld [vmem:[%s15132_s6 + $0xc0] sm:$0xf]  ;;  %12240 = vmatpush.bf16.msra.mxu2 %v15742_v60 }
 0x62f   : >> { %8187 = vmatmul.bf16.gmra.mxu2 %v15702_v28  ;;  %v15736_v42 = vor.u32 %v12123_v45, %v11328_v59  ;;  %8810 = vmatpush.bf16.msra.mxu0 %v12175_v51  ;;  %v11324_v59 = vld [vmem:[%s15132_s6 + $0xb0] sm:$0xf]  ;;  %v12121_v45 = vld [vmem:[%s15132_s6 + $0xb8] sm:$0xf0] }
 0x630   : >> { %v7152_v32 = vpop.f32.mrf.mxu3  ;;  %12232 = vmatpush.bf16.msra.mxu1 %v12187_v8  ;;  %v15769_v52 = vor.u32 %v12121_v45, %v11324_v59 }
 0x632   : >> { %v7458_v50 = vpop.f32.mrf.mxu2  ;;  %v15715_v0 = vpop.f32.mrf.mxu0 }
 0x633   : >> { %v7459_v23 = vadd.f32 %v7458_v50, %v7420_v47  ;;  %v7421_v3 = vpop.f32.mrf.mxu1 }
 0x634   : >> { %v7422_v25 = vadd.f32 %v7421_v3, %v15606_v5  ;;  %v15730_v5 = vor.u32 %v12110_v15, %v11282_v53  ;;  %v15765_v15 = vld [vmem:[#allocation11 + $0x6a8] sm:$0xff] }
 0x635   : >> { %v7482_v27 = vrot.slane %v7459_v23, 1  ;;  %12241 = vmatpush.bf16.msra.mxu2 %v15765_v15 }
 0x637   : >> { %v7495_v37 = vsel %vm605_vm0, %v7481_v1, %v7482_v27  ;;  %v12113_v1 = vld [vmem:[%s15132_s6 + $0x7c] sm:$0xf] }
 0x638   : >> { %v15727_v49 = vadd.f32 %v7495_v37, %v15643_v13  ;;  %v7153_v14 = vpop.f32.mrf.mxu3 }
 0x639   : >> { %v7154_v6 = vadd.f32 %v7153_v14, %v15614_v17 }
 0x63a   : >> { %v7460_v55 = vpop.f32.mrf.mxu2  ;;  %v15734_v57 = vpop.f32.mrf.mxu0 }
 0x63b   : >> { %v7461_v38 = vadd.f32 %v7460_v55, %v7422_v25  ;;  %v15739_v13 = vadd.f32 %v7154_v6, %v15586_v63  ;;  %v7424_v2 = vpop.f32.mrf.mxu1  ;;  %v12169_v63 = vld [vmem:[#allocation11 + $0x5e0] sm:$0xff] }
 0x63c   : >> { %v7425_v17 = vadd.f32 %v7424_v2, %v15616_v29  ;;  %8548 = vmatpush.bf16.msra.mxu3 %v12169_v63  ;;  %v11294_v25 = vld [vmem:[%s15132_s6 + $0x84] sm:$0xf0]  ;;  %v12186_v2 = vld [vmem:[#allocation11 + $0x668] sm:$0xff] }
 0x63d   : >> { %v7483_v10 = vrot.slane %v7461_v38, 1  ;;  %8209 = vmatmul.bf16.gmra.mxu3 %v15730_v5  ;;  %8252 = vmatmul.bf16.gmra.mxu0 %v15732_v24  ;;  %v15767_v53 = vor.u32 %v12113_v1, %v11294_v25 }
 0x63e   : >> { %7810 = vmatmul.bf16.gmra.mxu1 %v15521_v46 }
 0x63f   : >> { %v7494_v48 = vsel %vm605_vm0, %v7482_v27, %v7483_v10  ;;  %8191 = vmatmul.bf16.gmra.mxu2 %v15736_v42  ;;  %v12174_v27 = vld [vmem:[#allocation11 + $0x608] sm:$0xff]  ;;  %v12168_v10 = vld [vmem:[#allocation11 + $0x5d8] sm:$0xff]  ;;  %12233 = vmatpush.bf16.msra.mxu1 %v12186_v2 }
 0x640   : >> { %v15751_v29 = vadd.f32 %v7494_v48, %v15654_v12  ;;  %v7156_v34 = vpop.f32.mrf.mxu3  ;;  %8811 = vmatpush.bf16.msra.mxu0 %v12174_v27  ;;  %8549 = vmatpush.bf16.msra.mxu3 %v12168_v10  ;;  %v15787_v48 = vld [vmem:[#allocation11 + $0x6a0] sm:$0xff] }
 0x641   : >> { %v7157_v47 = vadd.f32 %v7156_v34, %v15627_v21  ;;  %12242 = vmatpush.bf16.msra.mxu2 %v15787_v48 }
 0x642   : >> { %v7463_v46 = vpop.f32.mrf.mxu2  ;;  %v15755_v50 = vpop.f32.mrf.mxu0 }
 0x643   : >> { %v7464_v32 = vadd.f32 %v7463_v46, %v7425_v17  ;;  %v15758_v23 = vadd.f32 %v7157_v47, %v15603_v43  ;;  %v7426_v3 = vpop.f32.mrf.mxu1  ;;  %v12173_v43 = vld [vmem:[#allocation11 + $0x600] sm:$0xff] }
 0x644   : >> { %v7427_v12 = vadd.f32 %v7426_v3, %v15629_v56  ;;  %8812 = vmatpush.bf16.msra.mxu0 %v12173_v43  ;;  %v12124_v3 = vld [vmem:[%s15132_s6 + $0xd0] sm:$0xf0] }
 0x645   : >> { %v7484_v7 = vrot.slane %v7464_v32, 1  ;;  %v11336_v32 = vld [vmem:[%s15132_s6 + $0xc8] sm:$0xf] }
 0x646   : >> { %v15807_v45 = vor.u32 %v12124_v3, %v11336_v32  ;;  %v15833_v3 = vld [vmem:[#allocation11 + $0x690] sm:$0xff] }
 0x648   : >> { %v7158_v21 = vpop.f32.mrf.mxu3  ;;  %8844 = vmatpush.bf16.msrb.mxu0 %v12188_v9 }
 0x649   : >> { %v12167_v21 = vld [vmem:[#allocation11 + $0x5d0] sm:$0xff] }
 0x64a   : >> { %v7465_v37 = vpop.f32.mrf.mxu2  ;;  %v15772_v20 = vpop.f32.mrf.mxu0  ;;  %8550 = vmatpush.bf16.msra.mxu3 %v12167_v21 }
 0x64b   : >> { %v7466_v11 = vadd.f32 %v7465_v37, %v7427_v12  ;;  %v7429_v56 = vpop.f32.mrf.mxu1 }
 0x64c   : >> { %v7430_v6 = vadd.f32 %v7429_v56, %v15638_v58  ;;  %8845 = vmatpush.bf16.msrb.mxu0 %v12187_v8  ;;  %v12116_v8 = vld [vmem:[%s15132_s6 + $0x94] sm:$0xf] }
 0x64d   : >> { %v7485_v14 = vrot.slane %v7466_v11, 1  ;;  %8213 = vmatmul.bf16.gmra.mxu3 %v15767_v53  ;;  %8257 = vmatmul.bf16.gmra.mxu0 %v15769_v52 }
 0x64e   : >> { %8475 = vmatmul.bf16.vlgmr.msrb.gmra.mxu1 %v15593_v61 }
 0x64f   : >> { %v7493_v55 = vsel %vm605_vm0, %v7484_v7, %v7485_v14  ;;  %8514 = vmatmul.bf16.vlgmr.msrb.gmra.mxu2 %v15696_v22 }
 0x650   : >> { %v15782_v38 = vadd.f32 %v7493_v55, %v15681_v26  ;;  %v7708_v17 = vpop.f32.mrf.mxu3  ;;  %8846 = vmatpush.bf16.msrb.mxu0 %v12186_v2 }
 0x651   : >> { %v15785_v9 = vadd.f32 %v15700_v33, %v7708_v17  ;;  %v11306_v33 = vld [vmem:[%s15132_s6 + $0x9c] sm:$0xf0] }
 0x652   : >> { %v7468_v58 = vpop.f32.mrf.mxu2  ;;  %v15789_v51 = vpop.f32.mrf.mxu0  ;;  %v15805_v59 = vor.u32 %v12116_v8, %v11306_v33 }
 0x653   : >> { %v7469_v63 = vadd.f32 %v7468_v58, %v7430_v6  ;;  %v7431_v26 = vpop.f32.mrf.mxu1  ;;  %v12184_v6 = vld [vmem:[#allocation11 + $0x658] sm:$0xff] }
 0x654   : >> { %v7432_v47 = vadd.f32 %v7431_v26, %v15651_v36  ;;  %v12185_v36 = vld [vmem:[#allocation11 + $0x660] sm:$0xff] }
 0x655   : >> { %v7486_v34 = vrot.slane %v7469_v63, 1  ;;  %12234 = vmatpush.bf16.msra.mxu1 %v12185_v36  ;;  %8847 = vmatpush.bf16.msrb.mxu0 %v12185_v36  ;;  %v12166_v63 = vld [vmem:[#allocation11 + $0x5c8] sm:$0xff] }
 0x656   : >> { %8551 = vmatpush.bf16.msra.mxu3 %v12166_v63 }
 0x657   : >> { %v7492_v46 = vsel %vm605_vm0, %v7485_v14, %v7486_v34  ;;  %v15817_v14 = vld [vmem:[#allocation11 + $0x698] sm:$0xff]  ;;  %v11318_v34 = vld [vmem:[%s15132_s6 + $0xb4] sm:$0xf0] }
 0x658   : >> { %v15800_v12 = vadd.f32 %v7492_v46, %v15705_v44  ;;  %v7710_v1 = vpop.f32.mrf.mxu3  ;;  %12243 = vmatpush.bf16.msra.mxu2 %v15817_v14 }
 0x659   : >> { %v15803_v25 = vadd.f32 %v15715_v0, %v7710_v1  ;;  %12235 = vmatpush.bf16.msra.mxu1 %v12184_v6  ;;  %8848 = vmatpush.bf16.msrb.mxu0 %v12184_v6 }
 0x65a   : >> { %v7470_v27 = vpop.f32.mrf.mxu2  ;;  %v15809_v43 = vpop.f32.mrf.mxu0 }
 0x65b   : >> { %v7471_v37 = vadd.f32 %v7470_v27, %v7432_v47  ;;  %v7434_v11 = vpop.f32.mrf.mxu1 }
 0x65c   : >> { %v7435_v44 = vadd.f32 %v7434_v11, %v15663_v16  ;;  %12244 = vmatpush.bf16.msra.mxu2 %v15833_v3 }
 0x65d   : >> { %8217 = vmatmul.bf16.gmra.mxu3 %v15805_v59  ;;  %8261 = vmatmul.bf16.gmra.mxu0 %v15807_v45  ;;  %v7487_v10 = vrot.slane %v7471_v37, 1 }
 0x65e   : >> { %8480 = vmatmul.bf16.gmra.mxu1 %v15618_v41 }
 0x65f   : >> { %8519 = vmatmul.bf16.gmra.mxu2 %v15730_v5 }
 0x660   : >> { %v7713_v0 = vpop.f32.mrf.mxu3 }
 0x661   : >> { %v7753_v7 = vadd.f32 %v15734_v57, %v7713_v0  ;;  %v12119_v57 = vld [vmem:[%s15132_s6 + $0xac] sm:$0xf]  ;;  %v12183_v0 = vld [vmem:[#allocation11 + $0x650] sm:$0xff] }
 0x662   : >> { %v7473_v56 = vpop.f32.mrf.mxu2  ;;  %v15819_v16 = vpop.f32.mrf.mxu0  ;;  %v15831_v32 = vor.u32 %v12119_v57, %v11318_v34  ;;  %12236 = vmatpush.bf16.msra.mxu1 %v12183_v0  ;;  %8849 = vmatpush.bf16.msrb.mxu0 %v12183_v0  ;;  %v15866_v34 = vld [vmem:[#allocation11 + $0x688] sm:$0xff] }
 0x663   : >> { %v7474_v55 = vadd.f32 %v7473_v56, %v7435_v44  ;;  %v7436_v2 = vpop.f32.mrf.mxu1  ;;  %12245 = vmatpush.bf16.msra.mxu2 %v15866_v34 }
 0x664   : >> { %v7437_v58 = vadd.f32 %v7436_v2, %v15678_v30  ;;  %v12165_v30 = vld [vmem:[#allocation11 + $0x5c0] sm:$0xff] }
 0x665   : >> { %v7488_v17 = vrot.slane %v7474_v55, 1  ;;  %8552 = vmatpush.bf16.msra.mxu3 %v12165_v30 }
 0x667   : >> { %v7491_v26 = vsel %vm605_vm0, %v7487_v10, %v7488_v17  ;;  %v12122_v10 = vld [vmem:[%s15132_s6 + $0xc4] sm:$0xf] }
 0x668   : >> { %v15828_v47 = vadd.f32 %v7491_v26, %v15739_v13  ;;  %v7715_v8 = vpop.f32.mrf.mxu3 }
 0x669   : >> { %v7755_v33 = vadd.f32 %v15755_v50, %v7715_v8 }
 0x66a   : >> { %v7475_v46 = vpop.f32.mrf.mxu2  ;;  %v15835_v27 = vpop.f32.mrf.mxu0 }
 0x66b   : >> { %v7476_v1 = vadd.f32 %v7475_v46, %v7437_v58  ;;  %v7786_v36 = vpop.f32.mrf.mxu1 }
 0x66c   : >> { %v7787_v13 = vadd.f32 %v7786_v36, %v15785_v9 }
 0x66d   : >> { %v7489_v21 = vrot.slane %v7476_v1, 1  ;;  %8222 = vmatmul.bf16.gmra.mxu3 %v15831_v32  ;;  %8813 = vmatmul.bf16.vlgmr.msra.gmra.mxu0 %v15593_v61 }
 0x66e   : >> { %8485 = vmatmul.bf16.gmra.mxu1 %v15640_v18  ;;  %v7816_v55 = vrot.slane %v7787_v13, 2  ;;  %v12189_v13 = vld [vmem:[#allocation11 + $0x680] sm:$0xff] }
 0x66f   : >> { %v7490_v50 = vsel %vm605_vm0, %v7488_v17, %v7489_v21  ;;  %8524 = vmatmul.bf16.gmra.mxu2 %v15767_v53  ;;  %v11330_v17 = vld [vmem:[%s15132_s6 + $0xcc] sm:$0xf0]  ;;  %s9039_s6 = scalar_lea.sflag (%p5641_p4), [#allocation5], %s12791_s15 }
 0x670   : >> { %v15846_v37 = vadd.f32 %v7490_v50, %v15758_v23  ;;  %v7718_v11 = vpop.f32.mrf.mxu3  ;;  %v15864_v57 = vor.u32 %v12122_v10, %v11330_v17  ;;  %12246 = vmatpush.bf16.msra.mxu2 %v12189_v13 }
 0x671   : >> { %v7758_v44 = vadd.f32 %v15772_v20, %v7718_v11 }
 0x672   : >> { %v15849_v9 = vpop.f32.mrf.mxu2  ;;  %v15851_v56 = vpop.f32.mrf.mxu0 }
 0x673   : >> { %v7788_v61 = vpop.f32.mrf.mxu1 }
 0x674   : >> { %v7789_v6 = vadd.f32 %v7788_v61, %v15803_v25  ;;  %v12182_v25 = vld [vmem:[#allocation11 + $0x648] sm:$0xff] }
 0x675   : >> { %12237 = vmatpush.bf16.msra.mxu1 %v12182_v25  ;;  %8850 = vmatpush.bf16.msrb.mxu0 %v12182_v25 }
 0x676   : >> { %v7817_v2 = vrot.slane %v7789_v6, 2 }
 0x678   : >> { %v7835_v23 = vsel %vm1095_vm13, %v7816_v55, %v7817_v2  ;;  %v7720_v58 = vpop.f32.mrf.mxu3  ;;  %v12181_v55 = vld [vmem:[#allocation11 + $0x640] sm:$0xff] }
 0x679   : >> { %v15859_v20 = vadd.f32 %v7835_v23, %v15675_v35  ;;  %v7760_v63 = vadd.f32 %v15789_v51, %v7720_v58  ;;  %12238 = vmatpush.bf16.msra.mxu1 %v12181_v55  ;;  %8851 = vmatpush.bf16.msrb.mxu0 %v12181_v55 }
 0x67a   : >> { %v15862_v26 = vpop.f32.mrf.mxu2  ;;  %v15868_v8 = vpop.f32.mrf.mxu0 }
 0x67b   : >> { %v7791_v46 = vpop.f32.mrf.mxu1 }
 0x67c   : >> { %v7792_v30 = vadd.f32 %v7791_v46, %v7753_v7 }
 0x67d   : >> { %8226 = vmatmul.bf16.gmra.mxu3 %v15864_v57  ;;  %8818 = vmatmul.bf16.gmra.mxu0 %v15618_v41 }
 0x67e   : >> { %v7818_v35 = vrot.slane %v7792_v30, 2  ;;  %8490 = vmatmul.bf16.gmra.mxu1 %v15665_v31  ;;  %8883 = vmatpush.bf16.msra.mxu0 %v15712_v62 }
 0x67f   : >> { %8529 = vmatmul.bf16.gmra.mxu2 %v15805_v59 }
 0x680   : >> { %v7834_v51 = vsel %vm1095_vm13, %v7817_v2, %v7818_v35  ;;  %v7723_v1 = vpop.f32.mrf.mxu3 }
 0x681   : >> { %v15878_v36 = vadd.f32 %v7834_v51, %v15691_v19  ;;  %v7763_v21 = vadd.f32 %v15809_v43, %v7723_v1 }
 0x682   : >> { %v8175_v7 = vpop.f32.mrf.mxu2  ;;  %v7774_v50 = vpop.f32.mrf.mxu0  ;;  %8884 = vmatpush.bf16.msra.mxu0 %v15742_v60 }
 0x683   : >> { %v7793_v11 = vpop.f32.mrf.mxu1 }
 0x684   : >> { %v7794_v41 = vadd.f32 %v7793_v11, %v7755_v33 }
 0x686   : >> { %v7819_v43 = vrot.slane %v7794_v41, 2  ;;  %8885 = vmatpush.bf16.msra.mxu0 %v15765_v15 }
 0x688   : >> { %v7725_v0 = vpop.f32.mrf.mxu3 }
 0x689   : >> { %v7765_v61 = vadd.f32 %v15819_v16, %v7725_v0 }
 0x68a   : >> { %v15882_v6 = vpop.f32.mrf.mxu2  ;;  %v15884_v10 = vpop.f32.mrf.mxu0  ;;  %8886 = vmatpush.bf16.msra.mxu0 %v15787_v48 }
 0x68b   : >> { %v7796_v2 = vpop.f32.mrf.mxu1 }
 0x68c   : >> { %v7797_v19 = vadd.f32 %v7796_v2, %v7758_v44 }
 0x68d   : >> { %8553 = vmatmul.bf16.vlgmr.msra.gmra.mxu3 %v15636_v40  ;;  %8823 = vmatmul.bf16.gmra.mxu0 %v15640_v18 }
 0x68e   : >> { %v7820_v33 = vrot.slane %v7797_v19, 2  ;;  %8495 = vmatmul.bf16.gmra.mxu1 %v15702_v28  ;;  %8887 = vmatpush.bf16.msra.mxu0 %v15817_v14 }
 0x68f   : >> { %8534 = vmatmul.bf16.gmra.mxu2 %v15831_v32 }
 0x690   : >> { %v7833_v16 = vsel %vm1095_vm13, %v7819_v43, %v7820_v33  ;;  %v7728_v17 = vpop.f32.mrf.mxu3 }
 0x691   : >> { %v15895_v44 = vadd.f32 %v7833_v16, %v15727_v49  ;;  %v7768_v62 = vadd.f32 %v15835_v27, %v7728_v17 }
 0x692   : >> { %v15898_v23 = vpop.f32.mrf.mxu2  ;;  %v8242_v18 = vpop.f32.mrf.mxu0  ;;  %8888 = vmatpush.bf16.msra.mxu0 %v15833_v3 }
 0x693   : >> { %v7798_v58 = vpop.f32.mrf.mxu1 }
 0x694   : >> { %v7799_v25 = vadd.f32 %v7798_v58, %v7760_v63 }
 0x696   : >> { %v7821_v46 = vrot.slane %v7799_v25, 2  ;;  %8889 = vmatpush.bf16.msra.mxu0 %v15866_v34 }
 0x698   : >> { %v7832_v30 = vsel %vm1095_vm13, %v7820_v33, %v7821_v46  ;;  %v7730_v35 = vpop.f32.mrf.mxu3 }
 0x699   : >> { %v15905_v60 = vadd.f32 %v7832_v30, %v15751_v29  ;;  %v7770_v49 = vadd.f32 %v15851_v56, %v7730_v35 }
 0x69a   : >> { %v8181_v27 = vpop.f32.mrf.mxu2  ;;  %v8245_v51 = vpop.f32.mrf.mxu0  ;;  %8890 = vmatpush.bf16.msra.mxu0 %v12189_v13 }
 0x69b   : >> { %v7801_v1 = vpop.f32.mrf.mxu1 }
 0x69c   : >> { %v7802_v7 = vadd.f32 %v7801_v1, %v7763_v21 }
 0x69d   : >> { %8558 = vmatmul.bf16.gmra.mxu3 %v15661_v4  ;;  %8828 = vmatmul.bf16.gmra.mxu0 %v15665_v31 }
 0x69e   : >> { %8500 = vmatmul.bf16.gmra.mxu1 %v15736_v42  ;;  %v7822_v14 = vrot.slane %v7802_v7, 2 }
 0x69f   : >> { %8539 = vmatmul.bf16.gmra.mxu2 %v15864_v57 }
 0x6a0   : >> { %v7733_v15 = vpop.f32.mrf.mxu3 }
 0x6a1   : >> { %v7773_v29 = vadd.f32 %v15868_v8, %v7733_v15 }
 0x6a2   : >> { %v15915_v48 = vpop.f32.mrf.mxu2  ;;  %v8246_v56 = vpop.f32.mrf.mxu0 }
 0x6a3   : >> { %v7803_v63 = vpop.f32.mrf.mxu1 }
 0x6a4   : >> { %v7804_v21 = vadd.f32 %v7803_v63, %v7765_v61 }
 0x6a6   : >> { %v7823_v11 = vrot.slane %v7804_v21, 2 }
 0x6a8   : >> { %v7831_v31 = vsel %vm1095_vm13, %v7822_v14, %v7823_v11  ;;  %v7735_v41 = vpop.f32.mrf.mxu3 }
 0x6a9   : >> { %v15921_v0 = vadd.f32 %v7831_v31, %v15782_v38  ;;  %v7775_v3 = vadd.f32 %v7774_v50, %v7735_v41 }
 0x6aa   : >> { %v15923_v55 = vpop.f32.mrf.mxu2  ;;  %v8249_v8 = vpop.f32.mrf.mxu0 }
 0x6ab   : >> { %v7806_v2 = vpop.f32.mrf.mxu1 }
 0x6ac   : >> { %v7807_v19 = vadd.f32 %v7806_v2, %v7768_v62 }
 0x6ad   : >> { %8563 = vmatmul.bf16.gmra.mxu3 %v15698_v39  ;;  %8833 = vmatmul.bf16.gmra.mxu0 %v15702_v28 }
 0x6ae   : >> { %v7824_v34 = vrot.slane %v7807_v19, 2  ;;  %8857 = vmatmul.bf16.vlgmr.msra.gmra.mxu1 %v15730_v5 }
 0x6af   : >> { %8896 = vmatmul.bf16.vlgmr.msra.gmra.mxu2 %v15661_v4 }
 0x6b0   : >> { %v7830_v13 = vsel %vm1095_vm13, %v7823_v11, %v7824_v34  ;;  %v8205_v38 = vpop.f32.mrf.mxu3 }
 0x6b1   : >> { %v15932_v50 = vadd.f32 %v7830_v13, %v15800_v12  ;;  %v8206_v43 = vadd.f32 %v8205_v38, %v15849_v9 }
 0x6b2   : >> { %v8188_v61 = vpop.f32.mrf.mxu2  ;;  %v8251_v33 = vpop.f32.mrf.mxu0 }
 0x6b3   : >> { %v8241_v16 = vadd.f32 %v15884_v10, %v8206_v43  ;;  %v7808_v17 = vpop.f32.mrf.mxu1 }
 0x6b4   : >> { %v7809_v28 = vadd.f32 %v7808_v17, %v7770_v49 }
 0x6b5   : >> { %v15937_v62 = vadd.f32 %v8241_v16, %v15859_v20 }
 0x6b6   : >> { %v7825_v9 = vrot.slane %v7809_v28, 2 }
 0x6b8   : >> { %v8207_v5 = vpop.f32.mrf.mxu3 }
 0x6b9   : >> { %v8208_v58 = vadd.f32 %v8207_v5, %v15862_v26 }
 0x6ba   : >> { %v15939_v4 = vpop.f32.mrf.mxu2  ;;  %v8253_v25 = vpop.f32.mrf.mxu0 }
 0x6bb   : >> { %v8243_v46 = vadd.f32 %v8242_v18, %v8208_v58  ;;  %v7811_v12 = vpop.f32.mrf.mxu1 }
 0x6bc   : >> { %v7812_v30 = vadd.f32 %v7811_v12, %v7773_v29 }
 0x6bd   : >> { %v15943_v35 = vadd.f32 %v8243_v46, %v15878_v36  ;;  %8568 = vmatmul.bf16.gmra.mxu3 %v15732_v24  ;;  %8838 = vmatmul.bf16.gmra.mxu0 %v15736_v42 }
 0x6be   : >> { %v7826_v10 = vrot.slane %v7812_v30, 2  ;;  %8862 = vmatmul.bf16.gmra.mxu1 %v15767_v53 }
 0x6bf   : >> { %8901 = vmatmul.bf16.gmra.mxu2 %v15698_v39 }
 0x6c0   : >> { %v7829_v20 = vsel %vm1095_vm13, %v7825_v9, %v7826_v10  ;;  %v8210_v26 = vpop.f32.mrf.mxu3 }
 0x6c1   : >> { %v15952_v18 = vadd.f32 %v7829_v20, %v15828_v47 }
 0x6c2   : >> { %v15954_v49 = vpop.f32.mrf.mxu2  ;;  %v8255_v36 = vpop.f32.mrf.mxu0 }
 0x6c3   : >> { %v7813_v27 = vpop.f32.mrf.mxu1 }
 0x6c4   : >> { %v7814_v51 = vadd.f32 %v7813_v27, %v7775_v3 }
 0x6c6   : >> { %v7827_v1 = vrot.slane %v7814_v51, 2 }
 0x6c8   : >> { %v7828_v42 = vsel %vm1095_vm13, %v7826_v10, %v7827_v1  ;;  %v8211_v7 = vpop.f32.mrf.mxu3 }
 0x6c9   : >> { %v15959_v53 = vadd.f32 %v7828_v42, %v15846_v37  ;;  %v8212_v15 = vadd.f32 %v8211_v7, %v15882_v6 }
 0x6ca   : >> { %v8194_v39 = vpop.f32.mrf.mxu2  ;;  %v8258_v29 = vpop.f32.mrf.mxu0 }
 0x6cb   : >> { %v8247_v63 = vadd.f32 %v8246_v56, %v8212_v15  ;;  %v8476_v47 = vpop.f32.mrf.mxu1 }
 0x6cd   : >> { %v15963_v21 = vadd.f32 %v8247_v63, %v15895_v44  ;;  %8573 = vmatmul.bf16.gmra.mxu3 %v15769_v52  ;;  %8852 = vmatmul.bf16.vlgmr.msrb.gmra.mxu0 %v15696_v22 }
 0x6ce   : >> { %8867 = vmatmul.bf16.gmra.mxu1 %v15805_v59 }
 0x6cf   : >> { %8906 = vmatmul.bf16.gmra.mxu2 %v15732_v24 }
 0x6d0   : >> { %v8214_v14 = vpop.f32.mrf.mxu3 }
 0x6d1   : >> { %v8215_v37 = vadd.f32 %v8214_v14, %v15898_v23 }
 0x6d2   : >> { %v8515_v11 = vpop.f32.mrf.mxu2  ;;  %v8259_v6 = vpop.f32.mrf.mxu0 }
 0x6d3   : >> { %v8516_v31 = vadd.f32 %v8515_v11, %v8476_v47  ;;  %v8250_v41 = vadd.f32 %v8249_v8, %v8215_v37  ;;  %v8478_v56 = vpop.f32.mrf.mxu1 }
 0x6d5   : >> { %v15971_v3 = vadd.f32 %v8250_v41, %v15905_v60 }
 0x6d8   : >> { %v8216_v44 = vpop.f32.mrf.mxu3 }
 0x6da   : >> { %v8517_v2 = vpop.f32.mrf.mxu2  ;;  %v8262_v34 = vpop.f32.mrf.mxu0 }
 0x6db   : >> { %v8518_v19 = vadd.f32 %v8517_v2, %v8478_v56  ;;  %v8481_v22 = vpop.f32.mrf.mxu1 }
 0x6dd   : >> { %8578 = vmatmul.bf16.gmra.mxu3 %v15807_v45  ;;  %8891 = vmatmul.bf16.vlgmr.msra.gmra.mxu0 %v15636_v40 }
 0x6de   : >> { %8872 = vmatmul.bf16.gmra.mxu1 %v15831_v32 }
 0x6df   : >> { %8911 = vmatmul.bf16.gmra.mxu2 %v15769_v52 }
 0x6e0   : >> { %v8218_v24 = vpop.f32.mrf.mxu3 }
 0x6e1   : >> { %v8219_v59 = vadd.f32 %v8218_v24, %v15915_v48 }
 0x6e2   : >> { %v8520_v23 = vpop.f32.mrf.mxu2  ;;  %v8264_v60 = vpop.f32.mrf.mxu0 }
 0x6e3   : >> { %v8521_v8 = vadd.f32 %v8520_v23, %v8481_v22  ;;  %v8254_v13 = vadd.f32 %v8253_v25, %v8219_v59  ;;  %v8483_v38 = vpop.f32.mrf.mxu1 }
 0x6e5   : >> { %v15979_v61 = vadd.f32 %v8254_v13, %v15921_v0 }
 0x6e8   : >> { %v8220_v43 = vpop.f32.mrf.mxu3 }
 0x6e9   : >> { %v8221_v33 = vadd.f32 %v8220_v43, %v15923_v55 }
 0x6ea   : >> { %v8522_v16 = vpop.f32.mrf.mxu2  ;;  %v15984_v32 = vpop.f32.mrf.mxu0 }
 0x6eb   : >> { %v15982_v40 = vadd.f32 %v8522_v16, %v8483_v38  ;;  %v8256_v52 = vadd.f32 %v8255_v36, %v8221_v33  ;;  %v8486_v17 = vpop.f32.mrf.mxu1 }
 0x6ed   : >> { %v15987_v48 = vadd.f32 %v8256_v52, %v15932_v50 }
 0x6ee   : >> { %8877 = vmatmul.bf16.gmra.mxu1 %v15864_v57 }
 0x6ef   : >> { %8916 = vmatmul.bf16.gmra.mxu2 %v15807_v45 }
 0x6f0   : >> { %v8223_v28 = vpop.f32.mrf.mxu3 }
 0x6f2   : >> { %v8525_v0 = vpop.f32.mrf.mxu2  ;;  %v15991_v58 = vpop.f32.mrf.mxu0 }
 0x6f3   : >> { %v8526_v5 = vadd.f32 %v8525_v0, %v8486_v17  ;;  %v8488_v55 = vpop.f32.mrf.mxu1 }
 0x6f8   : >> { %v8224_v25 = vpop.f32.mrf.mxu3 }
 0x6f9   : >> { %v8225_v46 = vadd.f32 %v8224_v25, %v15939_v4 }
 0x6fa   : >> { %v8527_v12 = vpop.f32.mrf.mxu2  ;;  %v15994_v9 = vpop.f32.mrf.mxu0 }
 0x6fb   : >> { %v8528_v30 = vadd.f32 %v8527_v12, %v8488_v55  ;;  %v8260_v10 = vadd.f32 %v8259_v6, %v8225_v46  ;;  %v8491_v50 = vpop.f32.mrf.mxu1 }
 0x6fd   : >> { %v15997_v20 = vadd.f32 %v8260_v10, %v15952_v18 }
 0x700   : >> { %v8227_v57 = vpop.f32.mrf.mxu3 }
 0x701   : >> { %v8228_v45 = vadd.f32 %v8227_v57, %v15954_v49 }
 0x702   : >> { %v8530_v26 = vpop.f32.mrf.mxu2  ;;  %v8821_v27 = vpop.f32.mrf.mxu0 }
 0x703   : >> { %v16000_v36 = vadd.f32 %v8530_v26, %v8491_v50  ;;  %v8263_v51 = vadd.f32 %v8262_v34, %v8228_v45  ;;  %v8493_v1 = vpop.f32.mrf.mxu1 }
 0x705   : >> { %v16003_v4 = vadd.f32 %v8263_v51, %v15959_v53 }
 0x708   : >> { %v8229_v42 = vpop.f32.mrf.mxu3 }
 0x70a   : >> { %v8532_v7 = vpop.f32.mrf.mxu2  ;;  %v8824_v15 = vpop.f32.mrf.mxu0 }
 0x70b   : >> { %v16005_v39 = vadd.f32 %v8532_v7, %v8493_v1  ;;  %v8496_v29 = vpop.f32.mrf.mxu1 }
 0x710   : >> { %v8554_v18 = vpop.f32.mrf.mxu3 }
 0x711   : >> { %v8555_v47 = vadd.f32 %v8554_v18, %v8516_v31 }
 0x712   : >> { %v8535_v63 = vpop.f32.mrf.mxu2  ;;  %v16009_v49 = vpop.f32.mrf.mxu0 }
 0x713   : >> { %v16007_v14 = vadd.f32 %v8535_v63, %v8496_v29  ;;  %v8498_v37 = vpop.f32.mrf.mxu1  ;;  %v8584_v44 = vrot.slane %v8555_v47, 1 }
 0x718   : >> { %v8556_v11 = vpop.f32.mrf.mxu3 }
 0x719   : >> { %v8557_v41 = vadd.f32 %v8556_v11, %v8518_v19  ;;  %v11631_v11 = vld [vmem:[%s16050_s18 + $0x48] sm:$0xff] }
 0x71a   : >> { %v8537_v6 = vpop.f32.mrf.mxu2  ;;  %v16013_v53 = vpop.f32.mrf.mxu0 }
 0x71b   : >> { %v16011_v56 = vadd.f32 %v8537_v6, %v8498_v37  ;;  %v8585_v2 = vrot.slane %v8557_v41, 1  ;;  %v8501_v34 = vpop.f32.mrf.mxu1  ;;  %v11632_v6 = vld [vmem:[%s16050_s18 + $0x50] sm:$0xff] }
 0x71d   : >> { %v8603_v22 = vsel %vm605_vm0, %v8584_v44, %v8585_v2 }
 0x71e   : >> { %v16018_v31 = vadd.f32 %v8603_v22, %v15937_v62 }
 0x720   : >> { %v8559_v24 = vpop.f32.mrf.mxu3 }
 0x721   : >> { %v8560_v23 = vadd.f32 %v8559_v24, %v8521_v8 }
 0x722   : >> { %v8540_v59 = vpop.f32.mrf.mxu2  ;;  %v16022_v13 = vpop.f32.mrf.mxu0 }
 0x723   : >> { %v16020_v60 = vadd.f32 %v8540_v59, %v8501_v34  ;;  %v8586_v19 = vrot.slane %v8560_v23, 1  ;;  %v8503_v38 = vpop.f32.mrf.mxu1  ;;  %v9004_v34 = vrot.slane %v11632_v6, 2 }
 0x725   : >> { %v8602_v43 = vsel %vm605_vm0, %v8585_v2, %v8586_v19 }
 0x726   : >> { %v16027_v33 = vadd.f32 %v8602_v43, %v15943_v35 }
 0x728   : >> { %v8561_v16 = vpop.f32.mrf.mxu3 }
 0x729   : >> { %v8562_v8 = vadd.f32 %v8561_v16, %v15982_v40 }
 0x72a   : >> { %v8542_v52 = vpop.f32.mrf.mxu2  ;;  %v16031_v62 = vpop.f32.mrf.mxu0 }
 0x72b   : >> { %v16029_v17 = vadd.f32 %v8542_v52, %v8503_v38  ;;  %v16033_v28 = vpop.f32.mrf.mxu1  ;;  %v8587_v12 = vrot.slane %v8562_v8, 1 }
 0x730   : >> { %v8564_v0 = vpop.f32.mrf.mxu3 }
 0x731   : >> { %v8565_v55 = vadd.f32 %v8564_v0, %v8526_v5 }
 0x732   : >> { %v16036_v25 = vpop.f32.mrf.mxu2  ;;  %v16038_v46 = vpop.f32.mrf.mxu0 }
 0x733   : >> { %v8588_v35 = vrot.slane %v8565_v55, 1  ;;  %v8860_v10 = vpop.f32.mrf.mxu1 }
 0x734   : >> { %v8861_v7 = vadd.f32 %v8860_v10, %v8821_v27 }
 0x735   : >> { %v8601_v50 = vsel %vm605_vm0, %v8587_v12, %v8588_v35 }
 0x736   : >> { %v8606_v57 = vadd.f32 %v8601_v50, %v15963_v21 }
 0x738   : >> { %v8566_v45 = vpop.f32.mrf.mxu3 }
 0x739   : >> { %v8567_v26 = vadd.f32 %v8566_v45, %v8528_v30 }
 0x73a   : >> { %v8899_v51 = vpop.f32.mrf.mxu2  ;;  %v16043_v40 = vpop.f32.mrf.mxu0 }
 0x73b   : >> { %v8589_v1 = vrot.slane %v8567_v26, 1  ;;  %v8863_v5 = vpop.f32.mrf.mxu1  ;;  %v8900_v18 = vadd.f32 %v8899_v51, %v8861_v7 }
 0x73c   : >> { %v8864_v63 = vadd.f32 %v8863_v5, %v8824_v15  ;;  %v9003_v15 = vrot.slane %v11631_v11, 2 }
 0x73d   : >> { %v8600_v42 = vsel %vm605_vm0, %v8588_v35, %v8589_v1  ;;  %v8925_v44 = vrot.slane %v8900_v18, 2 }
 0x73e   : >> { %v8607_v29 = vadd.f32 %v8600_v42, %v15971_v3  ;;  %v16059_v3 = vld [vmem:[%s16201_s9] ss:$0 sm:$0xff]  ;;  %v9017_v16 = vsel %vm1095_vm13, %v9003_v15, %v9004_v34 }
 0x740   : >> { %v8569_v47 = vpop.f32.mrf.mxu3 }
 0x741   : >> { %v8570_v22 = vadd.f32 %v8569_v47, %v16000_v36 }
 0x742   : >> { %v8902_v21 = vpop.f32.mrf.mxu2  ;;  %v16052_v37 = vpop.f32.mrf.mxu0 }
 0x743   : >> { %v8903_v30 = vadd.f32 %v8902_v21, %v8864_v63  ;;  %v8865_v41 = vpop.f32.mrf.mxu1  ;;  %v8590_v0 = vrot.slane %v8570_v22, 1  ;;  %v11634_v22 = vld [vmem:[%s16050_s18 + $0x60] sm:$0xff] }
 0x744   : >> { %v8866_v59 = vadd.f32 %v8865_v41, %v16009_v49  ;;  %v11633_v49 = vld [vmem:[%s16050_s18 + $0x58] sm:$0xff] }
 0x745   : >> { %v8926_v2 = vrot.slane %v8903_v30, 2  ;;  %v9005_v51 = vrot.slane %v11633_v49, 2  ;;  %v11636_v49 = vld [vmem:[%s16050_s18 + $0x70] sm:$0xff] }
 0x747   : >> { %v8939_v27 = vsel %vm1095_vm13, %v8925_v44, %v8926_v2 }
 0x748   : >> { %v8944_v24 = vadd.f32 %v8939_v27, %v8606_v57  ;;  %v8571_v23 = vpop.f32.mrf.mxu3 }
 0x749   : >> { %v8572_v38 = vadd.f32 %v8571_v23, %v16005_v39 }
 0x74a   : >> { %v8956_v19 = vadd.f32 %v16059_v3, %v8944_v24  ;;  %v8904_v43 = vpop.f32.mrf.mxu2  ;;  %v8853_v8 = vpop.f32.mrf.mxu0  ;;  %v11635_v24 = vld [vmem:[%s16050_s18 + $0x68] sm:$0xff] }
 0x74b   : >> { %v8905_v52 = vadd.f32 %v8904_v43, %v8866_v59  ;;  %v8591_v55 = vrot.slane %v8572_v38, 1  ;;  %v8868_v12 = vpop.f32.mrf.mxu1  ;;  %v8859_v38 = vadd.f32 %v16033_v28, %v15994_v9  ;;  %v9007_v43 = vrot.slane %v11635_v24, 2 }
 0x74c   : >> { %vm8964_vm11 = vcmp.gt.f32.partialorder %v8956_v19, 0.0  ;;  %v8972_v36 = vmul.f32 0.01, %v8956_v19  ;;  %v8869_v6 = vadd.f32 %v8868_v12, %v16013_v53 }
 0x74d   : >> { %v8927_v35 = vrot.slane %v8905_v52, 2  ;;  %v8599_v39 = vsel %vm605_vm0, %v8590_v0, %v8591_v55  ;;  %v8898_v0 = vadd.f32 %v16036_v25, %v8859_v38 }
 0x74e   : >> { %v8980_v10 = vsel %vm8964_vm11, %v8956_v19, %v8972_v36  ;;  %v8608_v57 = vadd.f32 %v8599_v39, %v15979_v61  ;;  %v9016_v61 = vsel %vm1095_vm13, %v9004_v34, %v9005_v51 }
 0x74f   : >> { %v9022_v50 = vadd.f32 %v9017_v16, %v8980_v10  ;;  %v8938_v45 = vsel %vm1095_vm13, %v8926_v2, %v8927_v35  ;;  %v8854_v16 = vadd.f32 %v8853_v8, %v15984_v32  ;;  %v11628_v10 = vld [vmem:[%s16050_s18 + $0x30] sm:$0xff] }
 0x750   : >> { %v8945_v26 = vadd.f32 %v8938_v45, %v8607_v29  ;;  %v8574_v1 = vpop.f32.mrf.mxu3  ;;  %v11629_v45 = vld [vmem:[%s16050_s18 + $0x38] sm:$0xff] }
 0x751   : >> { %9032 = vst [vmem:[%s16072_s27 + $0x10] sm:$0xff] %v9022_v50  ;;  %v8575_v42 = vadd.f32 %v8574_v1, %v16007_v14  ;;  %v11630_v1 = vld [vmem:[%s16050_s18 + $0x40] sm:$0xff] }
 0x752   : >> { %v8957_v5 = vadd.f32 %v16059_v3, %v8945_v26  ;;  %v8907_v7 = vpop.f32.mrf.mxu2  ;;  %v8855_v18 = vpop.f32.mrf.mxu0  ;;  %v8924_v26 = vrot.slane %v8898_v0, 2 }
 0x753   : >> { %v8592_v47 = vrot.slane %v8575_v42, 1  ;;  %v8870_v21 = vpop.f32.mrf.mxu1  ;;  %v8908_v41 = vadd.f32 %v8907_v7, %v8869_v6  ;;  %v8856_v12 = vadd.f32 %v8855_v18, %v15991_v58 }
 0x754   : >> { %vm8965_vm12 = vcmp.gt.f32.partialorder %v8957_v5, 0.0  ;;  %v8973_v63 = vmul.f32 0.01, %v8957_v5  ;;  %v8871_v44 = vadd.f32 %v8870_v21, %v16022_v13  ;;  %v9006_v13 = vrot.slane %v11634_v22, 2 }
 0x755   : >> { %v8598_v30 = vsel %vm605_vm0, %v8591_v55, %v8592_v47  ;;  %v8928_v23 = vrot.slane %v8908_v41, 2  ;;  %v9002_v41 = vrot.slane %v11630_v1, 2 }
 0x756   : >> { %v8981_v29 = vsel %vm8965_vm12, %v8957_v5, %v8973_v63  ;;  %v8609_v14 = vadd.f32 %v8598_v30, %v15987_v48  ;;  %v9015_v32 = vsel %vm1095_vm13, %v9006_v13, %v9007_v43  ;;  %v9000_v5 = vrot.slane %v11628_v10, 2  ;;  %v11638_v10 = vld [vmem:[%s16050_s18 + $0x80] sm:$0xff] }
 0x757   : >> { %v9023_v11 = vadd.f32 %v9016_v61, %v8981_v29  ;;  %v9001_v29 = vrot.slane %v11629_v45, 2 }
 0x758   : >> { %v8576_v2 = vpop.f32.mrf.mxu3 }
 0x759   : >> { %9033 = vst [vmem:[%s16072_s27 + $0x18] sm:$0xff] %v9023_v11  ;;  %v8577_v48 = vadd.f32 %v8576_v2, %v16011_v56 }
 0x75a   : >> { %v8909_v27 = vpop.f32.mrf.mxu2  ;;  %v8892_v34 = vpop.f32.mrf.mxu0 }
 0x75b   : >> { %v8910_v15 = vadd.f32 %v8909_v27, %v8871_v44  ;;  %v8873_v59 = vpop.f32.mrf.mxu1  ;;  %v8893_v28 = vadd.f32 %v8892_v34, %v8854_v16  ;;  %v8593_v39 = vrot.slane %v8577_v48, 1 }
 0x75c   : >> { %v8874_v36 = vadd.f32 %v8873_v59, %v16031_v62  ;;  %v9019_v59 = vsel %vm1095_vm13, %v9000_v5, %v9001_v29 }
 0x75d   : >> { %v8929_v19 = vrot.slane %v8910_v15, 2  ;;  %v8922_v7 = vrot.slane %v8893_v28, 2 }
 0x75f   : >> { %v8937_v53 = vsel %vm1095_vm13, %v8928_v23, %v8929_v19 }
 0x760   : >> { %v8946_v52 = vadd.f32 %v8937_v53, %v8608_v57  ;;  %v8579_v55 = vpop.f32.mrf.mxu3 }
 0x761   : >> { %v8580_v56 = vadd.f32 %v8579_v55, %v16020_v60  ;;  %v9008_v60 = vrot.slane %v11636_v49, 2  ;;  %v11637_v49 = vld [vmem:[%s16050_s18 + $0x78] sm:$0xff] }
 0x762   : >> { %v8958_v9 = vadd.f32 %v16059_v3, %v8946_v52  ;;  %v8912_v35 = vpop.f32.mrf.mxu2  ;;  %v8894_v8 = vpop.f32.mrf.mxu0 }
 0x763   : >> { %v8913_v25 = vadd.f32 %v8912_v35, %v8874_v36  ;;  %v8594_v50 = vrot.slane %v8580_v56, 1  ;;  %v8875_v58 = vpop.f32.mrf.mxu1  ;;  %v8895_v57 = vadd.f32 %v8894_v8, %v8856_v12  ;;  %v9010_v8 = vrot.slane %v11638_v10, 2 }
 0x764   : >> { %vm8966_vm14 = vcmp.gt.f32.partialorder %v8958_v9, 0.0  ;;  %v8974_v62 = vmul.f32 0.01, %v8958_v9  ;;  %v8876_v53 = vadd.f32 %v8875_v58, %v16038_v46 }
 0x765   : >> { %v8930_v51 = vrot.slane %v8913_v25, 2  ;;  %v8597_v18 = vsel %vm605_vm0, %v8593_v39, %v8594_v50  ;;  %v8923_v63 = vrot.slane %v8895_v57, 2  ;;  %v9009_v25 = vrot.slane %v11637_v49, 2 }
 0x766   : >> { %v8982_v42 = vsel %vm8966_vm14, %v8958_v9, %v8974_v62  ;;  %v8610_v47 = vadd.f32 %v8597_v18, %v15997_v20 }
 0x767   : >> { %v9024_v61 = vadd.f32 %v9015_v32, %v8982_v42  ;;  %v8936_v21 = vsel %vm1095_vm13, %v8929_v19, %v8930_v51  ;;  %v8940_v11 = vsel %vm1095_vm13, %v8923_v63, %v8924_v26  ;;  %v8941_v6 = vsel %vm1095_vm13, %v8922_v7, %v8923_v63  ;;  %v11639_v51 = vld [vmem:[%s16050_s18 + $0x88] sm:$0xff]  ;;  %s12534_s18 = scalar_lea.hbm (%p5641_p4), %s12533_s23, 256 }
 0x768   : >> { %v8947_v30 = vadd.f32 %v8936_v21, %v8609_v14  ;;  %v8942_v44 = vadd.f32 %v8941_v6, %v16018_v31  ;;  %v8943_v2 = vadd.f32 %v8940_v11, %v16027_v33  ;;  %v8581_v27 = vpop.f32.mrf.mxu3  ;;  %v9014_v14 = vsel %vm1095_vm13, %v9007_v43, %v9008_v60  ;;  %p12535_p8 = scmp.ne.s32.totalorder (%p5641_p4), %s12533_s23, %s12534_s18  ;;  %p12540_p10 = scmp.lt.s32.totalorder (%p5641_p4), %s12538_s17, %s12534_s18 }
 0x769   : >> { %9034 = vst [vmem:[%s16072_s27 + $0x20] sm:$0xff] %v9024_v61  ;;  %v8582_v15 = vadd.f32 %v8581_v27, %v16029_v17  ;;  %v9018_v33 = vsel %vm1095_vm13, %v9001_v29, %v9002_v41  ;;  %v9013_v45 = vsel %vm1095_vm13, %v9009_v25, %v9010_v8  ;;  %v9011_v7 = vrot.slane %v11639_v51, 2 }
 0x76a   : >> { %v8959_v20 = vadd.f32 %v16059_v3, %v8947_v30  ;;  %v8914_v34 = vpop.f32.mrf.mxu2  ;;  %v8954_v22 = vadd.f32 %v16059_v3, %v8942_v44  ;;  %v8955_v24 = vadd.f32 %v16059_v3, %v8943_v2  ;;  %p12536_p11 = pnand (%p5641_p4), %p12535_p8, %p12761_p3  ;;  %p12541_p12 = por (%p5641_p4), %p12540_p10, %p12539_p2 }
 0x76b   : >> { %v8595_v23 = vrot.slane %v8582_v15, 1  ;;  %v8878_v19 = vpop.f32.mrf.mxu1  ;;  %v8915_v12 = vadd.f32 %v8914_v34, %v8876_v53  ;;  %v9012_v63 = vsel %vm1095_vm13, %v9010_v8, %v9011_v7 }
 0x76c   : >> { %vm8967_vm15 = vcmp.gt.f32.partialorder %v8959_v20, 0.0  ;;  %v8975_v31 = vmul.f32 0.01, %v8959_v20  ;;  %vm8962_vm1 = vcmp.gt.f32.partialorder %v8954_v22, 0.0  ;;  %vm8963_vm2 = vcmp.gt.f32.partialorder %v8955_v24, 0.0  ;;  %p12537_p9 = pneg (%p5641_p4), %p12536_p11 }
 0x76d   : >> { %v8970_v17 = vmul.f32 0.01, %v8954_v22  ;;  %v8971_v38 = vmul.f32 0.01, %v8955_v24  ;;  %v8596_v13 = vsel %vm605_vm0, %v8594_v50, %v8595_v23  ;;  %v8879_v9 = vadd.f32 %v8878_v19, %v16043_v40 }
 0x76e   : >> { %v8983_v48 = vsel %vm8967_vm15, %v8959_v20, %v8975_v31  ;;  %v8611_v0 = vadd.f32 %v8596_v13, %v16003_v4  ;;  %v8931_v56 = vrot.slane %v8915_v12, 2  ;;  %p12542_p13 = pnand (%p5641_p4), %p12541_p12, %p12537_p9 }
 0x76f   : >> { %v9025_v43 = vadd.f32 %v9014_v14, %v8983_v48  ;;  %v8978_v16 = vsel %vm8962_vm1, %v8954_v22, %v8970_v17  ;;  %v8979_v52 = vsel %vm8963_vm2, %v8955_v24, %v8971_v38 }
 0x770   : >> { %v9020_v36 = vadd.f32 %v9019_v59, %v8978_v16  ;;  %v9021_v55 = vadd.f32 %v9018_v33, %v8979_v52 }
 0x771   : >> { %9035 = vst [vmem:[%s16072_s27 + $0x28] sm:$0xff] %v9025_v43 }
 0x772   : >> { %9030 = vst [vmem:[%s16072_s27] sm:$0xff] %v9020_v36  ;;  %v8917_v28 = vpop.f32.mrf.mxu2 }
 0x773   : >> { %9031 = vst [vmem:[%s16072_s27 + $0x8] sm:$0xff] %v9021_v55  ;;  %v8918_v46 = vadd.f32 %v8917_v28, %v8879_v9  ;;  %v8880_v39 = vpop.f32.mrf.mxu1 }
 0x774   : >> { %v8881_v62 = vadd.f32 %v8880_v39, %v16052_v37 }
 0x775   : >> { %v8932_v35 = vrot.slane %v8918_v46, 2 }
 0x777   : >> { %v8935_v32 = vsel %vm1095_vm13, %v8931_v56, %v8932_v35 }
 0x778   : >> { %v8948_v4 = vadd.f32 %v8935_v32, %v8610_v47 }
 0x77a   : >> { %v8960_v40 = vadd.f32 %v16059_v3, %v8948_v4  ;;  %v8919_v50 = vpop.f32.mrf.mxu2 }
 0x77b   : >> { %v8920_v58 = vadd.f32 %v8919_v50, %v8881_v62 }
 0x77c   : >> { %vm8968_vm3 = vcmp.gt.f32.partialorder %v8960_v40, 0.0  ;;  %v8976_v57 = vmul.f32 0.01, %v8960_v40 }
 0x77d   : >> { %v8933_v26 = vrot.slane %v8920_v58, 2 }
 0x77e   : >> { %v8984_v60 = vsel %vm8968_vm3, %v8960_v40, %v8976_v57 }
 0x77f   : >> { %v9026_v1 = vadd.f32 %v9013_v45, %v8984_v60  ;;  %v8934_v5 = vsel %vm1095_vm13, %v8932_v35, %v8933_v26 }
 0x780   : >> { %v8949_v42 = vadd.f32 %v8934_v5, %v8611_v0 }
 0x781   : >> { %9036 = vst [vmem:[%s16072_s27 + $0x30] sm:$0xff] %v9026_v1 }
 0x782   : >> { %v8961_v37 = vadd.f32 %v16059_v3, %v8949_v42 }
 0x784   : >> { %vm8969_vm4 = vcmp.gt.f32.partialorder %v8961_v37, 0.0  ;;  %v8977_v18 = vmul.f32 0.01, %v8961_v37 }
 0x785   : > { %5643 = sbr.rel (!%p5641_p4) target bundleno = 1101 (0x44d), region = 198 }
 0x786   : >> { %v8985_v61 = vsel %vm8969_vm4, %v8961_v37, %v8977_v18 }
 0x787   : >> { %v9027_v47 = vadd.f32 %v9012_v63, %v8985_v61 }
 0x789   : >> { %9037 = vst [vmem:[%s16072_s27 + $0x38] sm:$0xff] %v9027_v47 }
 0x78a   : > { %12545 = shalt.err (!%p12542_p13)
}
 0x78b   : > { %s12620_s15 = smov 128   ;;  %s12621_s19 = smov 8  }
 0x78c   : > { %12268 = dma.vmem_to_hbm [thread:$0]  (%p12761_p3), %s9052_s28, 4096, %s9054_s24, %s9039_s6, %s12620_s15, %s12620_s15, %s12621_s19  }
 0x78d PF: > { %s9068_s26 = sand.u32 1, %s12588_s13   ;;  %p16220_p0 = scmp.ge.s32.totalorder %s12600_s16, 2 }
 0x78e   : > { %s9069_s27 = scalar_lea.sflag [#allocation5], %s9068_s26 }
 0x78f   : > { %p12288_p5 = pnand %p16220_p0, %p12712_p6 }
 0x791   : > { %p12289_p7 = pneg %p12288_p5 }
 0x793   : > { %12583 = dma.done.wait (%p12289_p7), %s9069_s27, 4096  }
 0x794   : > { %12585 = vsyncadd (%p12289_p7), %s9069_s27, 4294963200  ;;  %s16221_s2 = sld [smem:[#allocation17_spill]]  ;;  %p25_p1 = scmp.ge.s32.totalorder %s12751_s30, 4  }
 0x795   : > { %s16222_s15 = sld [smem:[#allocation18_spill]]  ;;  %s16223_s13 = smov %s12592_s14 }
 0x796   : > { %s16225_s16 = smov %s12751_s30  ;;  %27 = sbr.rel (!%p25_p1) target bundleno = 12 (0xc), region = 209 }
 0x79a   : > { %s16224_s14 = smov %s16221_s2 }
 0x79b   :  { %9075 = vsyncpa [#allocation4], 1 }
 0x79c   :  { %9077 = vsyncpa [#allocation4 + $0x1], 1 }
 0x79d   :  { %9078 = vsyncpa [#allocation7], 1 }
 0x79e   :  { %9079 = vsyncpa [#allocation10], 1 }
 0x79f   :  { %9080 = vsyncpa [#allocation5], 1 }
 0x7a0   :  { %9082 = vsyncpa [#allocation5 + $0x1], 1 }

</bundles_post_ra>
